<compile_context>
chip_gen: v6e
topology: v6e:2x2x1
jax: 0.10.0
libtpu: 0.0.40
codegen_flags: <defaults>
</compile_context>

<pallas_src>
import functools

import jax
import jax.numpy as jnp
from jax.experimental import pallas as pl
from jax.experimental.pallas import tpu as pltpu


# Order in which parameter refs are passed to the kernel (after the input X).
_PARAM_ORDER = (
    'w11', 'b11', 's11', 'h11',
    'w12', 'b12', 's12', 'h12',
    'w13', 'b13', 's13', 'h13',
    'w14', 'b14', 's14', 'h14',
    'w15', 'b15',
    'wm1', 'bm1', 'wm2', 'bm2',
    'w21', 'b21', 's21', 'h21',
    'w22', 'b22', 's22', 'h22',
    'w23', 'b23', 's23', 'h23',
    'w24', 'b24',
    'w25', 'b25',
    'wfc', 'bfc',
)


def _dbma_kernel(x_ref, *refs, P1, P2):
    """One batch element per grid step; all intermediates stay in VMEM."""
    out_ref = refs[-1]
    p = dict(zip(_PARAM_ORDER, refs[:-1]))

    f32 = jnp.float32
    xs = x_ref[0]                          # (PP, S) f32, PP = P1*P2 pixels
    PP, S = xs.shape
    L1 = (S - 7) // 2 + 1                  # spectral length after conv11

    def matmul(a, w_ref, b_ref):
        w = w_ref[...]
        y = jnp.dot(a.astype(w.dtype), w, preferred_element_type=f32)
        return y + b_ref[...]

    def bn_relu(t, s, h):
        # eval-mode BatchNorm folded to a per-channel affine, then ReLU.
        return jnp.maximum(t * p[s][...] + p[h][...], 0.0)

    def spec_conv(t, wname, bname):
        # 1x1x7 conv along the spectral axis, zero padding 3, stride 1.
        # t: (L1*PP, Cin), rows ordered l-major / pixel-minor.
        cin = t.shape[-1]
        z = jnp.zeros((3 * PP, cin), f32)
        tp = jnp.concatenate([z, t, z], axis=0)            # ((L1+6)*PP, Cin)
        cols = jnp.concatenate(
            [tp[dk * PP:(dk + L1) * PP, :] for dk in range(7)], axis=-1)
        return matmul(cols, p[wname], p[bname])            # (L1*PP, Nout)

    def spat_conv(t, wname, bname):
        # 3x3x1 conv over the patch, zero padding 1, stride 1.
        # t: (PP, Cin), rows ordered row-major over the (P1, P2) patch.
        cin = t.shape[-1]
        t3 = t.reshape(P1, P2, cin)
        zr = jnp.zeros((1, P2, cin), f32)
        t3 = jnp.concatenate([zr, t3, zr], axis=0)         # (P1+2, P2, Cin)
        zc = jnp.zeros((P1 + 2, 1, cin), f32)
        t3 = jnp.concatenate([zc, t3, zc], axis=1)         # (P1+2, P2+2, Cin)
        cols = jnp.concatenate(
            [t3[dh:dh + P1, dw:dw + P2, :]
             for dh in range(3) for dw in range(3)], axis=-1)   # (P1,P2,9*Cin)
        return matmul(cols.reshape(PP, 9 * cin), p[wname], p[bname])

    # ---------------- branch 1: spectral dense block ----------------
    # conv11: kernel (1,1,7), stride (1,1,2), valid.
    a11 = jnp.concatenate([xs[:, 2 * l:2 * l + 7] for l in range(L1)], axis=0)
    x11 = matmul(a11, p['w11'], p['b11'])                  # (L1*PP, 24)

    x12 = spec_conv(bn_relu(x11, 's11', 'h11'), 'w12', 'b12')
    c = jnp.concatenate([x11, x12], axis=-1)
    x13 = spec_conv(bn_relu(c, 's12', 'h12'), 'w13', 'b13')
    c = jnp.concatenate([x11, x12, x13], axis=-1)
    x14 = spec_conv(bn_relu(c, 's13', 'h13'), 'w14', 'b14')
    c = jnp.concatenate([x11, x12, x13, x14], axis=-1)     # (L1*PP, 96)
    t14 = bn_relu(c, 's14', 'h14')

    # conv15: spectral kernel spans all of L1 -> spectral axis collapses to 1.
    a15 = jnp.concatenate([t14[l * PP:(l + 1) * PP, :] for l in range(L1)],
                          axis=-1)                         # (PP, L1*96)
    x16 = matmul(a15, p['w15'], p['b15'])                  # (PP, 60)

    # channel attention: gate = sigmoid(2 * shared_mlp(avg_pool(x16))).
    avg = jnp.mean(x16, axis=0, keepdims=True)             # (1, 60)
    hid = jnp.dot(avg, p['wm1'][...], preferred_element_type=f32) + p['bm1'][...]
    mlp = jnp.dot(hid, p['wm2'][...], preferred_element_type=f32) + p['bm2'][...]
    gate1 = jax.nn.sigmoid(2.0 * mlp)                      # (1, 60)
    x1 = jnp.mean(x16 * gate1, axis=0, keepdims=True)      # (1, 60)

    # ---------------- branch 2: spatial dense block ----------------
    x21 = matmul(xs, p['w21'], p['b21'])                   # (PP, 24)
    x22 = spat_conv(bn_relu(x21, 's21', 'h21'), 'w22', 'b22')
    c = jnp.concatenate([x21, x22], axis=-1)
    x23 = spat_conv(bn_relu(c, 's22', 'h22'), 'w23', 'b23')
    c = jnp.concatenate([x21, x22, x23], axis=-1)
    x24 = spat_conv(bn_relu(c, 's23', 'h23'), 'w24', 'b24')
    x25 = jnp.concatenate([x21, x22, x23, x24], axis=-1)   # (PP, 60)

    # spatial attention: channel max/mean -> 3x3x2 conv (as an 18-col GEMM).
    mx = jnp.max(x25, axis=-1, keepdims=True)              # (PP, 1)
    av = jnp.mean(x25, axis=-1, keepdims=True)             # (PP, 1)
    mxav = jnp.concatenate([mx, av], axis=-1)              # (PP, 2)
    gate2 = jax.nn.sigmoid(spat_conv(mxav, 'w25', 'b25'))  # (PP, 1)
    x2 = jnp.mean(gate2 * x25, axis=0, keepdims=True)      # (1, 60)

    # ---------------- classifier ----------------
    xpre = jnp.concatenate([x1, x2], axis=-1)              # (1, 120)
    logits = (jnp.dot(xpre, p['wfc'][...], preferred_element_type=f32)
              + p['bfc'][...])                             # (1, classes)
    out_ref[...] = logits[None]                            # (1, 1, classes)


# ---------------------------------------------------------------------------
# Wrapper: one pallas_call for the whole network.
# ---------------------------------------------------------------------------
def dbma_forward(X, params):
    B, P1, P2, S = X.shape
    L1 = (S - 7) // 2 + 1
    k3d = (S - 6) // 2
    assert L1 - k3d + 1 == 1, "band must make conv15 collapse the spectral axis"

    classes = params['wfc'].shape[-1]
    plist = [params[k] for k in _PARAM_ORDER]
    xflat = X.reshape(B, P1 * P2, S)

    def _full(a):
        nd = a.ndim
        return pl.BlockSpec(a.shape, lambda b, _nd=nd: (0,) * _nd)

    out = pl.pallas_call(
        functools.partial(_dbma_kernel, P1=P1, P2=P2),
        out_shape=jax.ShapeDtypeStruct((B, 1, classes), jnp.float32),
        grid_spec=pltpu.PrefetchScalarGridSpec(
            num_scalar_prefetch=0,
            grid=(B,),
            in_specs=[pl.BlockSpec((1, P1 * P2, S), lambda b: (b, 0, 0))]
                     + [_full(a) for a in plist],
            out_specs=pl.BlockSpec((1, 1, classes), lambda b: (b, 0, 0)),
        ),
        compiler_params=pltpu.CompilerParams(
            dimension_semantics=("parallel",)),
    )(xflat, *plist)
    return out[:, 0, :]


# ---------------------------------------------------------------------------
# Parameters (deterministic synthetic init; matches DBMA_network shapes).
# Dense-block conv weights are stored bf16 (MXU operands); biases / BN / MLP /
# classifier stay f32.
# ---------------------------------------------------------------------------
def init_params(key, band, classes):
    L1 = (band - 7) // 2 + 1
    keys = iter(jax.random.split(key, 64))
    bf16 = jnp.bfloat16

    def w(shape, dtype=jnp.float32):
        fan_in = shape[0]
        v = jax.random.normal(next(keys), shape, jnp.float32) / jnp.sqrt(
            jnp.asarray(fan_in, jnp.float32))
        return v.astype(dtype)

    def b(n):
        return 0.01 * jax.random.normal(next(keys), (1, n), jnp.float32)

    def bn(c):
        gamma = 1.0 + 0.1 * jax.random.normal(next(keys), (c,), jnp.float32)
        beta = 0.1 * jax.random.normal(next(keys), (c,), jnp.float32)
        mean = 0.1 * jax.random.normal(next(keys), (c,), jnp.float32)
        var = 1.0 + jax.random.uniform(next(keys), (c,), jnp.float32)
        scale = gamma / jnp.sqrt(var + 1e-3)
        shift = beta - mean * scale
        return scale.reshape(1, c), shift.reshape(1, c)

    p = {}
    # branch 1 (spectral)
    p['w11'], p['b11'] = w((7 * 1, 24)), b(24)              # K=7: keep f32
    p['s11'], p['h11'] = bn(24)
    p['w12'], p['b12'] = w((7 * 24, 24), bf16), b(24)
    p['s12'], p['h12'] = bn(48)
    p['w13'], p['b13'] = w((7 * 48, 24), bf16), b(24)
    p['s13'], p['h13'] = bn(72)
    p['w14'], p['b14'] = w((7 * 72, 24), bf16), b(24)
    p['s14'], p['h14'] = bn(96)
    p['w15'], p['b15'] = w((L1 * 96, 60), bf16), b(60)
    p['wm1'], p['bm1'] = w((60, 30)), b(30)
    p['wm2'], p['bm2'] = w((30, 60)), b(60)
    # branch 2 (spatial)
    p['w21'], p['b21'] = w((band, 24), bf16), b(24)
    p['s21'], p['h21'] = bn(24)
    p['w22'], p['b22'] = w((9 * 24, 12), bf16), b(12)
    p['s22'], p['h22'] = bn(36)
    p['w23'], p['b23'] = w((9 * 36, 12), bf16), b(12)
    p['s23'], p['h23'] = bn(48)
    p['w24'], p['b24'] = w((9 * 48, 12), bf16), b(12)
    p['w25'], p['b25'] = w((18, 1)), b(1)                   # 3x3x2 conv + bias
    # classifier
    p['wfc'], p['bfc'] = w((120, classes)), b(classes)
    return p


if __name__ == "__main__":
    B, P, band, classes = 2, 8, 16, 9      # even band -> conv15 output length 1
    key = jax.random.PRNGKey(0)
    kx, kp = jax.random.split(key)
    X = jax.random.normal(kx, (B, P, P, band), jnp.float32)
    params = init_params(kp, band, classes)

    out = jax.jit(dbma_forward)(X, params)
    out = jax.block_until_ready(out)
    assert out.shape == (B, classes)
    assert bool(jnp.all(jnp.isfinite(out)))
    print("KERNEL_OK")
</pallas_src>

<mosaic_0001>
module attributes {stable_mosaic.version = 11 : i64} {
  func.func @_dbma_kernel(%arg0: i32, %arg1: memref<1x64x16xf32, #tpu.memory_space<vmem>>, %arg2: memref<7x24xf32, #tpu.memory_space<vmem>>, %arg3: memref<1x24xf32, #tpu.memory_space<vmem>>, %arg4: memref<1x24xf32, #tpu.memory_space<vmem>>, %arg5: memref<1x24xf32, #tpu.memory_space<vmem>>, %arg6: memref<168x24xbf16, #tpu.memory_space<vmem>>, %arg7: memref<1x24xf32, #tpu.memory_space<vmem>>, %arg8: memref<1x48xf32, #tpu.memory_space<vmem>>, %arg9: memref<1x48xf32, #tpu.memory_space<vmem>>, %arg10: memref<336x24xbf16, #tpu.memory_space<vmem>>, %arg11: memref<1x24xf32, #tpu.memory_space<vmem>>, %arg12: memref<1x72xf32, #tpu.memory_space<vmem>>, %arg13: memref<1x72xf32, #tpu.memory_space<vmem>>, %arg14: memref<504x24xbf16, #tpu.memory_space<vmem>>, %arg15: memref<1x24xf32, #tpu.memory_space<vmem>>, %arg16: memref<1x96xf32, #tpu.memory_space<vmem>>, %arg17: memref<1x96xf32, #tpu.memory_space<vmem>>, %arg18: memref<480x60xbf16, #tpu.memory_space<vmem>>, %arg19: memref<1x60xf32, #tpu.memory_space<vmem>>, %arg20: memref<60x30xf32, #tpu.memory_space<vmem>>, %arg21: memref<1x30xf32, #tpu.memory_space<vmem>>, %arg22: memref<30x60xf32, #tpu.memory_space<vmem>>, %arg23: memref<1x60xf32, #tpu.memory_space<vmem>>, %arg24: memref<16x24xbf16, #tpu.memory_space<vmem>>, %arg25: memref<1x24xf32, #tpu.memory_space<vmem>>, %arg26: memref<1x24xf32, #tpu.memory_space<vmem>>, %arg27: memref<1x24xf32, #tpu.memory_space<vmem>>, %arg28: memref<216x12xbf16, #tpu.memory_space<vmem>>, %arg29: memref<1x12xf32, #tpu.memory_space<vmem>>, %arg30: memref<1x36xf32, #tpu.memory_space<vmem>>, %arg31: memref<1x36xf32, #tpu.memory_space<vmem>>, %arg32: memref<324x12xbf16, #tpu.memory_space<vmem>>, %arg33: memref<1x12xf32, #tpu.memory_space<vmem>>, %arg34: memref<1x48xf32, #tpu.memory_space<vmem>>, %arg35: memref<1x48xf32, #tpu.memory_space<vmem>>, %arg36: memref<432x12xbf16, #tpu.memory_space<vmem>>, %arg37: memref<1x12xf32, #tpu.memory_space<vmem>>, %arg38: memref<18x1xf32, #tpu.memory_space<vmem>>, %arg39: memref<1x1xf32, #tpu.memory_space<vmem>>, %arg40: memref<120x9xf32, #tpu.memory_space<vmem>>, %arg41: memref<1x9xf32, #tpu.memory_space<vmem>>, %arg42: memref<1x1x9xf32, #tpu.memory_space<vmem>>) attributes {dimension_semantics = [#tpu.dimension_semantics<parallel>], iteration_bounds = array<i64: 2>, scalar_prefetch = 0 : i64, scratch_operands = 0 : i64, tpu.core_type = #tpu.core_type<tc>, window_params = [{transform_indices = @transform_0, window_bounds = array<i64: 1, 64, 16>}, {pipeline_mode = #tpu.pipeline_mode<synchronous>, transform_indices = @transform_1, window_bounds = array<i64: 7, 24>}, {pipeline_mode = #tpu.pipeline_mode<synchronous>, transform_indices = @transform_2, window_bounds = array<i64: 1, 24>}, {pipeline_mode = #tpu.pipeline_mode<synchronous>, transform_indices = @transform_3, window_bounds = array<i64: 1, 24>}, {pipeline_mode = #tpu.pipeline_mode<synchronous>, transform_indices = @transform_4, window_bounds = array<i64: 1, 24>}, {pipeline_mode = #tpu.pipeline_mode<synchronous>, transform_indices = @transform_5, window_bounds = array<i64: 168, 24>}, {pipeline_mode = #tpu.pipeline_mode<synchronous>, transform_indices = @transform_6, window_bounds = array<i64: 1, 24>}, {pipeline_mode = #tpu.pipeline_mode<synchronous>, transform_indices = @transform_7, window_bounds = array<i64: 1, 48>}, {pipeline_mode = #tpu.pipeline_mode<synchronous>, transform_indices = @transform_8, window_bounds = array<i64: 1, 48>}, {pipeline_mode = #tpu.pipeline_mode<synchronous>, transform_indices = @transform_9, window_bounds = array<i64: 336, 24>}, {pipeline_mode = #tpu.pipeline_mode<synchronous>, transform_indices = @transform_10, window_bounds = array<i64: 1, 24>}, {pipeline_mode = #tpu.pipeline_mode<synchronous>, transform_indices = @transform_11, window_bounds = array<i64: 1, 72>}, {pipeline_mode = #tpu.pipeline_mode<synchronous>, transform_indices = @transform_12, window_bounds = array<i64: 1, 72>}, {pipeline_mode = #tpu.pipeline_mode<synchronous>, transform_indices = @transform_13, window_bounds = array<i64: 504, 24>}, {pipeline_mode = #tpu.pipeline_mode<synchronous>, transform_indices = @transform_14, window_bounds = array<i64: 1, 24>}, {pipeline_mode = #tpu.pipeline_mode<synchronous>, transform_indices = @transform_15, window_bounds = array<i64: 1, 96>}, {pipeline_mode = #tpu.pipeline_mode<synchronous>, transform_indices = @transform_16, window_bounds = array<i64: 1, 96>}, {pipeline_mode = #tpu.pipeline_mode<synchronous>, transform_indices = @transform_17, window_bounds = array<i64: 480, 60>}, {pipeline_mode = #tpu.pipeline_mode<synchronous>, transform_indices = @transform_18, window_bounds = array<i64: 1, 60>}, {pipeline_mode = #tpu.pipeline_mode<synchronous>, transform_indices = @transform_19, window_bounds = array<i64: 60, 30>}, {pipeline_mode = #tpu.pipeline_mode<synchronous>, transform_indices = @transform_20, window_bounds = array<i64: 1, 30>}, {pipeline_mode = #tpu.pipeline_mode<synchronous>, transform_indices = @transform_21, window_bounds = array<i64: 30, 60>}, {pipeline_mode = #tpu.pipeline_mode<synchronous>, transform_indices = @transform_22, window_bounds = array<i64: 1, 60>}, {pipeline_mode = #tpu.pipeline_mode<synchronous>, transform_indices = @transform_23, window_bounds = array<i64: 16, 24>}, {pipeline_mode = #tpu.pipeline_mode<synchronous>, transform_indices = @transform_24, window_bounds = array<i64: 1, 24>}, {pipeline_mode = #tpu.pipeline_mode<synchronous>, transform_indices = @transform_25, window_bounds = array<i64: 1, 24>}, {pipeline_mode = #tpu.pipeline_mode<synchronous>, transform_indices = @transform_26, window_bounds = array<i64: 1, 24>}, {pipeline_mode = #tpu.pipeline_mode<synchronous>, transform_indices = @transform_27, window_bounds = array<i64: 216, 12>}, {pipeline_mode = #tpu.pipeline_mode<synchronous>, transform_indices = @transform_28, window_bounds = array<i64: 1, 12>}, {pipeline_mode = #tpu.pipeline_mode<synchronous>, transform_indices = @transform_29, window_bounds = array<i64: 1, 36>}, {pipeline_mode = #tpu.pipeline_mode<synchronous>, transform_indices = @transform_30, window_bounds = array<i64: 1, 36>}, {pipeline_mode = #tpu.pipeline_mode<synchronous>, transform_indices = @transform_31, window_bounds = array<i64: 324, 12>}, {pipeline_mode = #tpu.pipeline_mode<synchronous>, transform_indices = @transform_32, window_bounds = array<i64: 1, 12>}, {pipeline_mode = #tpu.pipeline_mode<synchronous>, transform_indices = @transform_33, window_bounds = array<i64: 1, 48>}, {pipeline_mode = #tpu.pipeline_mode<synchronous>, transform_indices = @transform_34, window_bounds = array<i64: 1, 48>}, {pipeline_mode = #tpu.pipeline_mode<synchronous>, transform_indices = @transform_35, window_bounds = array<i64: 432, 12>}, {pipeline_mode = #tpu.pipeline_mode<synchronous>, transform_indices = @transform_36, window_bounds = array<i64: 1, 12>}, {pipeline_mode = #tpu.pipeline_mode<synchronous>, transform_indices = @transform_37, window_bounds = array<i64: 18, 1>}, {pipeline_mode = #tpu.pipeline_mode<synchronous>, transform_indices = @transform_38, window_bounds = array<i64: 1, 1>}, {pipeline_mode = #tpu.pipeline_mode<synchronous>, transform_indices = @transform_39, window_bounds = array<i64: 120, 9>}, {pipeline_mode = #tpu.pipeline_mode<synchronous>, transform_indices = @transform_40, window_bounds = array<i64: 1, 9>}, {transform_indices = @transform_41, window_bounds = array<i64: 1, 1, 9>}]} {
    %c0 = arith.constant 0 : index
    %c0_0 = arith.constant 0 : index
    %c0_1 = arith.constant 0 : index
    %0 = vector.load %arg1[%c0, %c0_0, %c0_1] : memref<1x64x16xf32, #tpu.memory_space<vmem>>, vector<1x64x16xf32>
    %1 = vector.shape_cast %0 : vector<1x64x16xf32> to vector<64x16xf32>
    %2 = vector.extract_strided_slice %1 {offsets = [0, 0], sizes = [64, 7], strides = [1, 1]} : vector<64x16xf32> to vector<64x7xf32>
    %3 = vector.extract_strided_slice %1 {offsets = [0, 2], sizes = [64, 7], strides = [1, 1]} : vector<64x16xf32> to vector<64x7xf32>
    %4 = vector.extract_strided_slice %1 {offsets = [0, 4], sizes = [64, 7], strides = [1, 1]} : vector<64x16xf32> to vector<64x7xf32>
    %5 = vector.extract_strided_slice %1 {offsets = [0, 6], sizes = [64, 7], strides = [1, 1]} : vector<64x16xf32> to vector<64x7xf32>
    %6 = vector.extract_strided_slice %1 {offsets = [0, 8], sizes = [64, 7], strides = [1, 1]} : vector<64x16xf32> to vector<64x7xf32>
    %7 = tpu.concatenate %2, %3, %4, %5, %6 in 0 : vector<64x7xf32>, vector<64x7xf32>, vector<64x7xf32>, vector<64x7xf32>, vector<64x7xf32> -> vector<320x7xf32>
    %c0_2 = arith.constant 0 : index
    %c0_3 = arith.constant 0 : index
    %8 = vector.load %arg2[%c0_2, %c0_3] : memref<7x24xf32, #tpu.memory_space<vmem>>, vector<7x24xf32>
    %cst = arith.constant dense<0.000000e+00> : vector<320x24xf32>
    %9 = tpu.matmul %7, %8, %cst {dimension_numbers = #tpu.dot_dimension_numbers<[1], [0], [0], [1], [0, 0, 1, 1], [], []>} : vector<320x7xf32>, vector<7x24xf32>, vector<320x24xf32> -> vector<320x24xf32>
    %c0_4 = arith.constant 0 : index
    %c0_5 = arith.constant 0 : index
    %10 = vector.load %arg3[%c0_4, %c0_5] : memref<1x24xf32, #tpu.memory_space<vmem>>, vector<1x24xf32>
    %11 = vector.broadcast %10 : vector<1x24xf32> to vector<320x24xf32>
    %12 = arith.addf %9, %11 : vector<320x24xf32>
    %c0_6 = arith.constant 0 : index
    %c0_7 = arith.constant 0 : index
    %13 = vector.load %arg4[%c0_6, %c0_7] : memref<1x24xf32, #tpu.memory_space<vmem>>, vector<1x24xf32>
    %14 = vector.broadcast %13 : vector<1x24xf32> to vector<320x24xf32>
    %15 = arith.mulf %12, %14 : vector<320x24xf32>
    %c0_8 = arith.constant 0 : index
    %c0_9 = arith.constant 0 : index
    %16 = vector.load %arg5[%c0_8, %c0_9] : memref<1x24xf32, #tpu.memory_space<vmem>>, vector<1x24xf32>
    %17 = vector.broadcast %16 : vector<1x24xf32> to vector<320x24xf32>
    %18 = arith.addf %15, %17 : vector<320x24xf32>
    %cst_10 = arith.constant 0.000000e+00 : f32
    %19 = vector.broadcast %cst_10 : f32 to vector<320x24xf32>
    %20 = arith.maximumf %18, %19 : vector<320x24xf32>
    %cst_11 = arith.constant 0.000000e+00 : f32
    %21 = vector.broadcast %cst_11 : f32 to vector<192x24xf32>
    %22 = tpu.concatenate %21, %20, %21 in 0 : vector<192x24xf32>, vector<320x24xf32>, vector<192x24xf32> -> vector<704x24xf32>
    %23 = vector.extract_strided_slice %22 {offsets = [0, 0], sizes = [320, 24], strides = [1, 1]} : vector<704x24xf32> to vector<320x24xf32>
    %24 = vector.extract_strided_slice %22 {offsets = [64, 0], sizes = [320, 24], strides = [1, 1]} : vector<704x24xf32> to vector<320x24xf32>
    %25 = vector.extract_strided_slice %22 {offsets = [128, 0], sizes = [320, 24], strides = [1, 1]} : vector<704x24xf32> to vector<320x24xf32>
    %26 = vector.extract_strided_slice %22 {offsets = [192, 0], sizes = [320, 24], strides = [1, 1]} : vector<704x24xf32> to vector<320x24xf32>
    %27 = vector.extract_strided_slice %22 {offsets = [256, 0], sizes = [320, 24], strides = [1, 1]} : vector<704x24xf32> to vector<320x24xf32>
    %28 = vector.extract_strided_slice %22 {offsets = [320, 0], sizes = [320, 24], strides = [1, 1]} : vector<704x24xf32> to vector<320x24xf32>
    %29 = vector.extract_strided_slice %22 {offsets = [384, 0], sizes = [320, 24], strides = [1, 1]} : vector<704x24xf32> to vector<320x24xf32>
    %30 = tpu.concatenate %23, %24, %25, %26, %27, %28, %29 in 1 : vector<320x24xf32>, vector<320x24xf32>, vector<320x24xf32>, vector<320x24xf32>, vector<320x24xf32>, vector<320x24xf32>, vector<320x24xf32> -> vector<320x168xf32>
    %c0_12 = arith.constant 0 : index
    %c0_13 = arith.constant 0 : index
    %31 = vector.load %arg6[%c0_12, %c0_13] : memref<168x24xbf16, #tpu.memory_space<vmem>>, vector<168x24xbf16>
    %32 = arith.truncf %30 : vector<320x168xf32> to vector<320x168xbf16>
    %cst_14 = arith.constant dense<0.000000e+00> : vector<320x24xf32>
    %33 = tpu.matmul %32, %31, %cst_14 {dimension_numbers = #tpu.dot_dimension_numbers<[1], [0], [0], [1], [0, 0, 1, 1], [], []>} : vector<320x168xbf16>, vector<168x24xbf16>, vector<320x24xf32> -> vector<320x24xf32>
    %c0_15 = arith.constant 0 : index
    %c0_16 = arith.constant 0 : index
    %34 = vector.load %arg7[%c0_15, %c0_16] : memref<1x24xf32, #tpu.memory_space<vmem>>, vector<1x24xf32>
    %35 = vector.broadcast %34 : vector<1x24xf32> to vector<320x24xf32>
    %36 = arith.addf %33, %35 : vector<320x24xf32>
    %37 = tpu.concatenate %12, %36 in 1 : vector<320x24xf32>, vector<320x24xf32> -> vector<320x48xf32>
    %c0_17 = arith.constant 0 : index
    %c0_18 = arith.constant 0 : index
    %38 = vector.load %arg8[%c0_17, %c0_18] : memref<1x48xf32, #tpu.memory_space<vmem>>, vector<1x48xf32>
    %39 = vector.broadcast %38 : vector<1x48xf32> to vector<320x48xf32>
    %40 = arith.mulf %37, %39 : vector<320x48xf32>
    %c0_19 = arith.constant 0 : index
    %c0_20 = arith.constant 0 : index
    %41 = vector.load %arg9[%c0_19, %c0_20] : memref<1x48xf32, #tpu.memory_space<vmem>>, vector<1x48xf32>
    %42 = vector.broadcast %41 : vector<1x48xf32> to vector<320x48xf32>
    %43 = arith.addf %40, %42 : vector<320x48xf32>
    %cst_21 = arith.constant 0.000000e+00 : f32
    %44 = vector.broadcast %cst_21 : f32 to vector<320x48xf32>
    %45 = arith.maximumf %43, %44 : vector<320x48xf32>
    %cst_22 = arith.constant 0.000000e+00 : f32
    %46 = vector.broadcast %cst_22 : f32 to vector<192x48xf32>
    %47 = tpu.concatenate %46, %45, %46 in 0 : vector<192x48xf32>, vector<320x48xf32>, vector<192x48xf32> -> vector<704x48xf32>
    %48 = vector.extract_strided_slice %47 {offsets = [0, 0], sizes = [320, 48], strides = [1, 1]} : vector<704x48xf32> to vector<320x48xf32>
    %49 = vector.extract_strided_slice %47 {offsets = [64, 0], sizes = [320, 48], strides = [1, 1]} : vector<704x48xf32> to vector<320x48xf32>
    %50 = vector.extract_strided_slice %47 {offsets = [128, 0], sizes = [320, 48], strides = [1, 1]} : vector<704x48xf32> to vector<320x48xf32>
    %51 = vector.extract_strided_slice %47 {offsets = [192, 0], sizes = [320, 48], strides = [1, 1]} : vector<704x48xf32> to vector<320x48xf32>
    %52 = vector.extract_strided_slice %47 {offsets = [256, 0], sizes = [320, 48], strides = [1, 1]} : vector<704x48xf32> to vector<320x48xf32>
    %53 = vector.extract_strided_slice %47 {offsets = [320, 0], sizes = [320, 48], strides = [1, 1]} : vector<704x48xf32> to vector<320x48xf32>
    %54 = vector.extract_strided_slice %47 {offsets = [384, 0], sizes = [320, 48], strides = [1, 1]} : vector<704x48xf32> to vector<320x48xf32>
    %55 = tpu.concatenate %48, %49, %50, %51, %52, %53, %54 in 1 : vector<320x48xf32>, vector<320x48xf32>, vector<320x48xf32>, vector<320x48xf32>, vector<320x48xf32>, vector<320x48xf32>, vector<320x48xf32> -> vector<320x336xf32>
    %c0_23 = arith.constant 0 : index
    %c0_24 = arith.constant 0 : index
    %56 = vector.load %arg10[%c0_23, %c0_24] : memref<336x24xbf16, #tpu.memory_space<vmem>>, vector<336x24xbf16>
    %57 = arith.truncf %55 : vector<320x336xf32> to vector<320x336xbf16>
    %cst_25 = arith.constant dense<0.000000e+00> : vector<320x24xf32>
    %58 = tpu.matmul %57, %56, %cst_25 {dimension_numbers = #tpu.dot_dimension_numbers<[1], [0], [0], [1], [0, 0, 1, 1], [], []>} : vector<320x336xbf16>, vector<336x24xbf16>, vector<320x24xf32> -> vector<320x24xf32>
    %c0_26 = arith.constant 0 : index
    %c0_27 = arith.constant 0 : index
    %59 = vector.load %arg11[%c0_26, %c0_27] : memref<1x24xf32, #tpu.memory_space<vmem>>, vector<1x24xf32>
    %60 = vector.broadcast %59 : vector<1x24xf32> to vector<320x24xf32>
    %61 = arith.addf %58, %60 : vector<320x24xf32>
    %62 = tpu.concatenate %12, %36, %61 in 1 : vector<320x24xf32>, vector<320x24xf32>, vector<320x24xf32> -> vector<320x72xf32>
    %c0_28 = arith.constant 0 : index
    %c0_29 = arith.constant 0 : index
    %63 = vector.load %arg12[%c0_28, %c0_29] : memref<1x72xf32, #tpu.memory_space<vmem>>, vector<1x72xf32>
    %64 = vector.broadcast %63 : vector<1x72xf32> to vector<320x72xf32>
    %65 = arith.mulf %62, %64 : vector<320x72xf32>
    %c0_30 = arith.constant 0 : index
    %c0_31 = arith.constant 0 : index
    %66 = vector.load %arg13[%c0_30, %c0_31] : memref<1x72xf32, #tpu.memory_space<vmem>>, vector<1x72xf32>
    %67 = vector.broadcast %66 : vector<1x72xf32> to vector<320x72xf32>
    %68 = arith.addf %65, %67 : vector<320x72xf32>
    %cst_32 = arith.constant 0.000000e+00 : f32
    %69 = vector.broadcast %cst_32 : f32 to vector<320x72xf32>
    %70 = arith.maximumf %68, %69 : vector<320x72xf32>
    %cst_33 = arith.constant 0.000000e+00 : f32
    %71 = vector.broadcast %cst_33 : f32 to vector<192x72xf32>
    %72 = tpu.concatenate %71, %70, %71 in 0 : vector<192x72xf32>, vector<320x72xf32>, vector<192x72xf32> -> vector<704x72xf32>
    %73 = vector.extract_strided_slice %72 {offsets = [0, 0], sizes = [320, 72], strides = [1, 1]} : vector<704x72xf32> to vector<320x72xf32>
    %74 = vector.extract_strided_slice %72 {offsets = [64, 0], sizes = [320, 72], strides = [1, 1]} : vector<704x72xf32> to vector<320x72xf32>
    %75 = vector.extract_strided_slice %72 {offsets = [128, 0], sizes = [320, 72], strides = [1, 1]} : vector<704x72xf32> to vector<320x72xf32>
    %76 = vector.extract_strided_slice %72 {offsets = [192, 0], sizes = [320, 72], strides = [1, 1]} : vector<704x72xf32> to vector<320x72xf32>
    %77 = vector.extract_strided_slice %72 {offsets = [256, 0], sizes = [320, 72], strides = [1, 1]} : vector<704x72xf32> to vector<320x72xf32>
    %78 = vector.extract_strided_slice %72 {offsets = [320, 0], sizes = [320, 72], strides = [1, 1]} : vector<704x72xf32> to vector<320x72xf32>
    %79 = vector.extract_strided_slice %72 {offsets = [384, 0], sizes = [320, 72], strides = [1, 1]} : vector<704x72xf32> to vector<320x72xf32>
    %80 = tpu.concatenate %73, %74, %75, %76, %77, %78, %79 in 1 : vector<320x72xf32>, vector<320x72xf32>, vector<320x72xf32>, vector<320x72xf32>, vector<320x72xf32>, vector<320x72xf32>, vector<320x72xf32> -> vector<320x504xf32>
    %c0_34 = arith.constant 0 : index
    %c0_35 = arith.constant 0 : index
    %81 = vector.load %arg14[%c0_34, %c0_35] : memref<504x24xbf16, #tpu.memory_space<vmem>>, vector<504x24xbf16>
    %82 = arith.truncf %80 : vector<320x504xf32> to vector<320x504xbf16>
    %cst_36 = arith.constant dense<0.000000e+00> : vector<320x24xf32>
    %83 = tpu.matmul %82, %81, %cst_36 {dimension_numbers = #tpu.dot_dimension_numbers<[1], [0], [0], [1], [0, 0, 1, 1], [], []>} : vector<320x504xbf16>, vector<504x24xbf16>, vector<320x24xf32> -> vector<320x24xf32>
    %c0_37 = arith.constant 0 : index
    %c0_38 = arith.constant 0 : index
    %84 = vector.load %arg15[%c0_37, %c0_38] : memref<1x24xf32, #tpu.memory_space<vmem>>, vector<1x24xf32>
    %85 = vector.broadcast %84 : vector<1x24xf32> to vector<320x24xf32>
    %86 = arith.addf %83, %85 : vector<320x24xf32>
    %87 = tpu.concatenate %12, %36, %61, %86 in 1 : vector<320x24xf32>, vector<320x24xf32>, vector<320x24xf32>, vector<320x24xf32> -> vector<320x96xf32>
    %c0_39 = arith.constant 0 : index
    %c0_40 = arith.constant 0 : index
    %88 = vector.load %arg16[%c0_39, %c0_40] : memref<1x96xf32, #tpu.memory_space<vmem>>, vector<1x96xf32>
    %89 = vector.broadcast %88 : vector<1x96xf32> to vector<320x96xf32>
    %90 = arith.mulf %87, %89 : vector<320x96xf32>
    %c0_41 = arith.constant 0 : index
    %c0_42 = arith.constant 0 : index
    %91 = vector.load %arg17[%c0_41, %c0_42] : memref<1x96xf32, #tpu.memory_space<vmem>>, vector<1x96xf32>
    %92 = vector.broadcast %91 : vector<1x96xf32> to vector<320x96xf32>
    %93 = arith.addf %90, %92 : vector<320x96xf32>
    %cst_43 = arith.constant 0.000000e+00 : f32
    %94 = vector.broadcast %cst_43 : f32 to vector<320x96xf32>
    %95 = arith.maximumf %93, %94 : vector<320x96xf32>
    %96 = vector.extract_strided_slice %95 {offsets = [0, 0], sizes = [64, 96], strides = [1, 1]} : vector<320x96xf32> to vector<64x96xf32>
    %97 = vector.extract_strided_slice %95 {offsets = [64, 0], sizes = [64, 96], strides = [1, 1]} : vector<320x96xf32> to vector<64x96xf32>
    %98 = vector.extract_strided_slice %95 {offsets = [128, 0], sizes = [64, 96], strides = [1, 1]} : vector<320x96xf32> to vector<64x96xf32>
    %99 = vector.extract_strided_slice %95 {offsets = [192, 0], sizes = [64, 96], strides = [1, 1]} : vector<320x96xf32> to vector<64x96xf32>
    %100 = vector.extract_strided_slice %95 {offsets = [256, 0], sizes = [64, 96], strides = [1, 1]} : vector<320x96xf32> to vector<64x96xf32>
    %101 = tpu.concatenate %96, %97, %98, %99, %100 in 1 : vector<64x96xf32>, vector<64x96xf32>, vector<64x96xf32>, vector<64x96xf32>, vector<64x96xf32> -> vector<64x480xf32>
    %c0_44 = arith.constant 0 : index
    %c0_45 = arith.constant 0 : index
    %102 = vector.load %arg18[%c0_44, %c0_45] : memref<480x60xbf16, #tpu.memory_space<vmem>>, vector<480x60xbf16>
    %103 = arith.truncf %101 : vector<64x480xf32> to vector<64x480xbf16>
    %cst_46 = arith.constant dense<0.000000e+00> : vector<64x60xf32>
    %104 = tpu.matmul %103, %102, %cst_46 {dimension_numbers = #tpu.dot_dimension_numbers<[1], [0], [0], [1], [0, 0, 1, 1], [], []>} : vector<64x480xbf16>, vector<480x60xbf16>, vector<64x60xf32> -> vector<64x60xf32>
    %c0_47 = arith.constant 0 : index
    %c0_48 = arith.constant 0 : index
    %105 = vector.load %arg19[%c0_47, %c0_48] : memref<1x60xf32, #tpu.memory_space<vmem>>, vector<1x60xf32>
    %106 = vector.broadcast %105 : vector<1x60xf32> to vector<64x60xf32>
    %107 = arith.addf %104, %106 : vector<64x60xf32>
    %cst_49 = arith.constant dense<0.000000e+00> : vector<60xf32>
    %108 = vector.multi_reduction <add>, %107, %cst_49 [0] : vector<64x60xf32> to vector<60xf32>
    %109 = vector.shape_cast %108 : vector<60xf32> to vector<1x60xf32>
    %cst_50 = arith.constant 6.400000e+01 : f32
    %110 = vector.broadcast %cst_50 : f32 to vector<1x60xf32>
    %111 = arith.divf %109, %110 : vector<1x60xf32>
    %c0_51 = arith.constant 0 : index
    %c0_52 = arith.constant 0 : index
    %112 = vector.load %arg20[%c0_51, %c0_52] : memref<60x30xf32, #tpu.memory_space<vmem>>, vector<60x30xf32>
    %cst_53 = arith.constant dense<0.000000e+00> : vector<1x30xf32>
    %113 = tpu.matmul %111, %112, %cst_53 {dimension_numbers = #tpu.dot_dimension_numbers<[1], [0], [0], [1], [0, 0, 1, 1], [], []>} : vector<1x60xf32>, vector<60x30xf32>, vector<1x30xf32> -> vector<1x30xf32>
    %c0_54 = arith.constant 0 : index
    %c0_55 = arith.constant 0 : index
    %114 = vector.load %arg21[%c0_54, %c0_55] : memref<1x30xf32, #tpu.memory_space<vmem>>, vector<1x30xf32>
    %115 = arith.addf %113, %114 : vector<1x30xf32>
    %c0_56 = arith.constant 0 : index
    %c0_57 = arith.constant 0 : index
    %116 = vector.load %arg22[%c0_56, %c0_57] : memref<30x60xf32, #tpu.memory_space<vmem>>, vector<30x60xf32>
    %cst_58 = arith.constant dense<0.000000e+00> : vector<1x60xf32>
    %117 = tpu.matmul %115, %116, %cst_58 {dimension_numbers = #tpu.dot_dimension_numbers<[1], [0], [0], [1], [0, 0, 1, 1], [], []>} : vector<1x30xf32>, vector<30x60xf32>, vector<1x60xf32> -> vector<1x60xf32>
    %c0_59 = arith.constant 0 : index
    %c0_60 = arith.constant 0 : index
    %118 = vector.load %arg23[%c0_59, %c0_60] : memref<1x60xf32, #tpu.memory_space<vmem>>, vector<1x60xf32>
    %119 = arith.addf %117, %118 : vector<1x60xf32>
    %cst_61 = arith.constant 2.000000e+00 : f32
    %120 = vector.broadcast %cst_61 : f32 to vector<1x60xf32>
    %121 = arith.mulf %120, %119 : vector<1x60xf32>
    %122 = arith.negf %121 : vector<1x60xf32>
    %123 = math.exp %122 : vector<1x60xf32>
    %cst_62 = arith.constant 1.000000e+00 : f32
    %124 = vector.broadcast %cst_62 : f32 to vector<1x60xf32>
    %125 = arith.addf %124, %123 : vector<1x60xf32>
    %126 = arith.divf %124, %125 : vector<1x60xf32>
    %127 = vector.broadcast %126 : vector<1x60xf32> to vector<64x60xf32>
    %128 = arith.mulf %107, %127 : vector<64x60xf32>
    %cst_63 = arith.constant dense<0.000000e+00> : vector<60xf32>
    %129 = vector.multi_reduction <add>, %128, %cst_63 [0] : vector<64x60xf32> to vector<60xf32>
    %130 = vector.shape_cast %129 : vector<60xf32> to vector<1x60xf32>
    %cst_64 = arith.constant 6.400000e+01 : f32
    %131 = vector.broadcast %cst_64 : f32 to vector<1x60xf32>
    %132 = arith.divf %130, %131 : vector<1x60xf32>
    %c0_65 = arith.constant 0 : index
    %c0_66 = arith.constant 0 : index
    %133 = vector.load %arg24[%c0_65, %c0_66] : memref<16x24xbf16, #tpu.memory_space<vmem>>, vector<16x24xbf16>
    %134 = arith.truncf %1 : vector<64x16xf32> to vector<64x16xbf16>
    %cst_67 = arith.constant dense<0.000000e+00> : vector<64x24xf32>
    %135 = tpu.matmul %134, %133, %cst_67 {dimension_numbers = #tpu.dot_dimension_numbers<[1], [0], [0], [1], [0, 0, 1, 1], [], []>} : vector<64x16xbf16>, vector<16x24xbf16>, vector<64x24xf32> -> vector<64x24xf32>
    %c0_68 = arith.constant 0 : index
    %c0_69 = arith.constant 0 : index
    %136 = vector.load %arg25[%c0_68, %c0_69] : memref<1x24xf32, #tpu.memory_space<vmem>>, vector<1x24xf32>
    %137 = vector.broadcast %136 : vector<1x24xf32> to vector<64x24xf32>
    %138 = arith.addf %135, %137 : vector<64x24xf32>
    %c0_70 = arith.constant 0 : index
    %c0_71 = arith.constant 0 : index
    %139 = vector.load %arg26[%c0_70, %c0_71] : memref<1x24xf32, #tpu.memory_space<vmem>>, vector<1x24xf32>
    %140 = vector.broadcast %139 : vector<1x24xf32> to vector<64x24xf32>
    %141 = arith.mulf %138, %140 : vector<64x24xf32>
    %c0_72 = arith.constant 0 : index
    %c0_73 = arith.constant 0 : index
    %142 = vector.load %arg27[%c0_72, %c0_73] : memref<1x24xf32, #tpu.memory_space<vmem>>, vector<1x24xf32>
    %143 = vector.broadcast %142 : vector<1x24xf32> to vector<64x24xf32>
    %144 = arith.addf %141, %143 : vector<64x24xf32>
    %cst_74 = arith.constant 0.000000e+00 : f32
    %145 = vector.broadcast %cst_74 : f32 to vector<64x24xf32>
    %146 = arith.maximumf %144, %145 : vector<64x24xf32>
    %147 = vector.shape_cast %146 : vector<64x24xf32> to vector<8x8x24xf32>
    %cst_75 = arith.constant 0.000000e+00 : f32
    %148 = vector.broadcast %cst_75 : f32 to vector<1x8x24xf32>
    %149 = tpu.concatenate %148, %147, %148 in 0 : vector<1x8x24xf32>, vector<8x8x24xf32>, vector<1x8x24xf32> -> vector<10x8x24xf32>
    %cst_76 = arith.constant 0.000000e+00 : f32
    %150 = vector.broadcast %cst_76 : f32 to vector<10x1x24xf32>
    %151 = tpu.concatenate %150, %149, %150 in 1 : vector<10x1x24xf32>, vector<10x8x24xf32>, vector<10x1x24xf32> -> vector<10x10x24xf32>
    %152 = vector.extract_strided_slice %151 {offsets = [0, 0, 0], sizes = [8, 8, 24], strides = [1, 1, 1]} : vector<10x10x24xf32> to vector<8x8x24xf32>
    %153 = vector.extract_strided_slice %151 {offsets = [0, 1, 0], sizes = [8, 8, 24], strides = [1, 1, 1]} : vector<10x10x24xf32> to vector<8x8x24xf32>
    %154 = vector.extract_strided_slice %151 {offsets = [0, 2, 0], sizes = [8, 8, 24], strides = [1, 1, 1]} : vector<10x10x24xf32> to vector<8x8x24xf32>
    %155 = vector.extract_strided_slice %151 {offsets = [1, 0, 0], sizes = [8, 8, 24], strides = [1, 1, 1]} : vector<10x10x24xf32> to vector<8x8x24xf32>
    %156 = vector.extract_strided_slice %151 {offsets = [1, 1, 0], sizes = [8, 8, 24], strides = [1, 1, 1]} : vector<10x10x24xf32> to vector<8x8x24xf32>
    %157 = vector.extract_strided_slice %151 {offsets = [1, 2, 0], sizes = [8, 8, 24], strides = [1, 1, 1]} : vector<10x10x24xf32> to vector<8x8x24xf32>
    %158 = vector.extract_strided_slice %151 {offsets = [2, 0, 0], sizes = [8, 8, 24], strides = [1, 1, 1]} : vector<10x10x24xf32> to vector<8x8x24xf32>
    %159 = vector.extract_strided_slice %151 {offsets = [2, 1, 0], sizes = [8, 8, 24], strides = [1, 1, 1]} : vector<10x10x24xf32> to vector<8x8x24xf32>
    %160 = vector.extract_strided_slice %151 {offsets = [2, 2, 0], sizes = [8, 8, 24], strides = [1, 1, 1]} : vector<10x10x24xf32> to vector<8x8x24xf32>
    %161 = tpu.concatenate %152, %153, %154, %155, %156, %157, %158, %159, %160 in 2 : vector<8x8x24xf32>, vector<8x8x24xf32>, vector<8x8x24xf32>, vector<8x8x24xf32>, vector<8x8x24xf32>, vector<8x8x24xf32>, vector<8x8x24xf32>, vector<8x8x24xf32>, vector<8x8x24xf32> -> vector<8x8x216xf32>
    %162 = vector.shape_cast %161 : vector<8x8x216xf32> to vector<64x216xf32>
    %c0_77 = arith.constant 0 : index
    %c0_78 = arith.constant 0 : index
    %163 = vector.load %arg28[%c0_77, %c0_78] : memref<216x12xbf16, #tpu.memory_space<vmem>>, vector<216x12xbf16>
    %164 = arith.truncf %162 : vector<64x216xf32> to vector<64x216xbf16>
    %cst_79 = arith.constant dense<0.000000e+00> : vector<64x12xf32>
    %165 = tpu.matmul %164, %163, %cst_79 {dimension_numbers = #tpu.dot_dimension_numbers<[1], [0], [0], [1], [0, 0, 1, 1], [], []>} : vector<64x216xbf16>, vector<216x12xbf16>, vector<64x12xf32> -> vector<64x12xf32>
    %c0_80 = arith.constant 0 : index
    %c0_81 = arith.constant 0 : index
    %166 = vector.load %arg29[%c0_80, %c0_81] : memref<1x12xf32, #tpu.memory_space<vmem>>, vector<1x12xf32>
    %167 = vector.broadcast %166 : vector<1x12xf32> to vector<64x12xf32>
    %168 = arith.addf %165, %167 : vector<64x12xf32>
    %169 = tpu.concatenate %138, %168 in 1 : vector<64x24xf32>, vector<64x12xf32> -> vector<64x36xf32>
    %c0_82 = arith.constant 0 : index
    %c0_83 = arith.constant 0 : index
    %170 = vector.load %arg30[%c0_82, %c0_83] : memref<1x36xf32, #tpu.memory_space<vmem>>, vector<1x36xf32>
    %171 = vector.broadcast %170 : vector<1x36xf32> to vector<64x36xf32>
    %172 = arith.mulf %169, %171 : vector<64x36xf32>
    %c0_84 = arith.constant 0 : index
    %c0_85 = arith.constant 0 : index
    %173 = vector.load %arg31[%c0_84, %c0_85] : memref<1x36xf32, #tpu.memory_space<vmem>>, vector<1x36xf32>
    %174 = vector.broadcast %173 : vector<1x36xf32> to vector<64x36xf32>
    %175 = arith.addf %172, %174 : vector<64x36xf32>
    %cst_86 = arith.constant 0.000000e+00 : f32
    %176 = vector.broadcast %cst_86 : f32 to vector<64x36xf32>
    %177 = arith.maximumf %175, %176 : vector<64x36xf32>
    %178 = vector.shape_cast %177 : vector<64x36xf32> to vector<8x8x36xf32>
    %cst_87 = arith.constant 0.000000e+00 : f32
    %179 = vector.broadcast %cst_87 : f32 to vector<1x8x36xf32>
    %180 = tpu.concatenate %179, %178, %179 in 0 : vector<1x8x36xf32>, vector<8x8x36xf32>, vector<1x8x36xf32> -> vector<10x8x36xf32>
    %cst_88 = arith.constant 0.000000e+00 : f32
    %181 = vector.broadcast %cst_88 : f32 to vector<10x1x36xf32>
    %182 = tpu.concatenate %181, %180, %181 in 1 : vector<10x1x36xf32>, vector<10x8x36xf32>, vector<10x1x36xf32> -> vector<10x10x36xf32>
    %183 = vector.extract_strided_slice %182 {offsets = [0, 0, 0], sizes = [8, 8, 36], strides = [1, 1, 1]} : vector<10x10x36xf32> to vector<8x8x36xf32>
    %184 = vector.extract_strided_slice %182 {offsets = [0, 1, 0], sizes = [8, 8, 36], strides = [1, 1, 1]} : vector<10x10x36xf32> to vector<8x8x36xf32>
    %185 = vector.extract_strided_slice %182 {offsets = [0, 2, 0], sizes = [8, 8, 36], strides = [1, 1, 1]} : vector<10x10x36xf32> to vector<8x8x36xf32>
    %186 = vector.extract_strided_slice %182 {offsets = [1, 0, 0], sizes = [8, 8, 36], strides = [1, 1, 1]} : vector<10x10x36xf32> to vector<8x8x36xf32>
    %187 = vector.extract_strided_slice %182 {offsets = [1, 1, 0], sizes = [8, 8, 36], strides = [1, 1, 1]} : vector<10x10x36xf32> to vector<8x8x36xf32>
    %188 = vector.extract_strided_slice %182 {offsets = [1, 2, 0], sizes = [8, 8, 36], strides = [1, 1, 1]} : vector<10x10x36xf32> to vector<8x8x36xf32>
    %189 = vector.extract_strided_slice %182 {offsets = [2, 0, 0], sizes = [8, 8, 36], strides = [1, 1, 1]} : vector<10x10x36xf32> to vector<8x8x36xf32>
    %190 = vector.extract_strided_slice %182 {offsets = [2, 1, 0], sizes = [8, 8, 36], strides = [1, 1, 1]} : vector<10x10x36xf32> to vector<8x8x36xf32>
    %191 = vector.extract_strided_slice %182 {offsets = [2, 2, 0], sizes = [8, 8, 36], strides = [1, 1, 1]} : vector<10x10x36xf32> to vector<8x8x36xf32>
    %192 = tpu.concatenate %183, %184, %185, %186, %187, %188, %189, %190, %191 in 2 : vector<8x8x36xf32>, vector<8x8x36xf32>, vector<8x8x36xf32>, vector<8x8x36xf32>, vector<8x8x36xf32>, vector<8x8x36xf32>, vector<8x8x36xf32>, vector<8x8x36xf32>, vector<8x8x36xf32> -> vector<8x8x324xf32>
    %193 = vector.shape_cast %192 : vector<8x8x324xf32> to vector<64x324xf32>
    %c0_89 = arith.constant 0 : index
    %c0_90 = arith.constant 0 : index
    %194 = vector.load %arg32[%c0_89, %c0_90] : memref<324x12xbf16, #tpu.memory_space<vmem>>, vector<324x12xbf16>
    %195 = arith.truncf %193 : vector<64x324xf32> to vector<64x324xbf16>
    %cst_91 = arith.constant dense<0.000000e+00> : vector<64x12xf32>
    %196 = tpu.matmul %195, %194, %cst_91 {dimension_numbers = #tpu.dot_dimension_numbers<[1], [0], [0], [1], [0, 0, 1, 1], [], []>} : vector<64x324xbf16>, vector<324x12xbf16>, vector<64x12xf32> -> vector<64x12xf32>
    %c0_92 = arith.constant 0 : index
    %c0_93 = arith.constant 0 : index
    %197 = vector.load %arg33[%c0_92, %c0_93] : memref<1x12xf32, #tpu.memory_space<vmem>>, vector<1x12xf32>
    %198 = vector.broadcast %197 : vector<1x12xf32> to vector<64x12xf32>
    %199 = arith.addf %196, %198 : vector<64x12xf32>
    %200 = tpu.concatenate %138, %168, %199 in 1 : vector<64x24xf32>, vector<64x12xf32>, vector<64x12xf32> -> vector<64x48xf32>
    %c0_94 = arith.constant 0 : index
    %c0_95 = arith.constant 0 : index
    %201 = vector.load %arg34[%c0_94, %c0_95] : memref<1x48xf32, #tpu.memory_space<vmem>>, vector<1x48xf32>
    %202 = vector.broadcast %201 : vector<1x48xf32> to vector<64x48xf32>
    %203 = arith.mulf %200, %202 : vector<64x48xf32>
    %c0_96 = arith.constant 0 : index
    %c0_97 = arith.constant 0 : index
    %204 = vector.load %arg35[%c0_96, %c0_97] : memref<1x48xf32, #tpu.memory_space<vmem>>, vector<1x48xf32>
    %205 = vector.broadcast %204 : vector<1x48xf32> to vector<64x48xf32>
    %206 = arith.addf %203, %205 : vector<64x48xf32>
    %cst_98 = arith.constant 0.000000e+00 : f32
    %207 = vector.broadcast %cst_98 : f32 to vector<64x48xf32>
    %208 = arith.maximumf %206, %207 : vector<64x48xf32>
    %209 = vector.shape_cast %208 : vector<64x48xf32> to vector<8x8x48xf32>
    %cst_99 = arith.constant 0.000000e+00 : f32
    %210 = vector.broadcast %cst_99 : f32 to vector<1x8x48xf32>
    %211 = tpu.concatenate %210, %209, %210 in 0 : vector<1x8x48xf32>, vector<8x8x48xf32>, vector<1x8x48xf32> -> vector<10x8x48xf32>
    %cst_100 = arith.constant 0.000000e+00 : f32
    %212 = vector.broadcast %cst_100 : f32 to vector<10x1x48xf32>
    %213 = tpu.concatenate %212, %211, %212 in 1 : vector<10x1x48xf32>, vector<10x8x48xf32>, vector<10x1x48xf32> -> vector<10x10x48xf32>
    %214 = vector.extract_strided_slice %213 {offsets = [0, 0, 0], sizes = [8, 8, 48], strides = [1, 1, 1]} : vector<10x10x48xf32> to vector<8x8x48xf32>
    %215 = vector.extract_strided_slice %213 {offsets = [0, 1, 0], sizes = [8, 8, 48], strides = [1, 1, 1]} : vector<10x10x48xf32> to vector<8x8x48xf32>
    %216 = vector.extract_strided_slice %213 {offsets = [0, 2, 0], sizes = [8, 8, 48], strides = [1, 1, 1]} : vector<10x10x48xf32> to vector<8x8x48xf32>
    %217 = vector.extract_strided_slice %213 {offsets = [1, 0, 0], sizes = [8, 8, 48], strides = [1, 1, 1]} : vector<10x10x48xf32> to vector<8x8x48xf32>
    %218 = vector.extract_strided_slice %213 {offsets = [1, 1, 0], sizes = [8, 8, 48], strides = [1, 1, 1]} : vector<10x10x48xf32> to vector<8x8x48xf32>
    %219 = vector.extract_strided_slice %213 {offsets = [1, 2, 0], sizes = [8, 8, 48], strides = [1, 1, 1]} : vector<10x10x48xf32> to vector<8x8x48xf32>
    %220 = vector.extract_strided_slice %213 {offsets = [2, 0, 0], sizes = [8, 8, 48], strides = [1, 1, 1]} : vector<10x10x48xf32> to vector<8x8x48xf32>
    %221 = vector.extract_strided_slice %213 {offsets = [2, 1, 0], sizes = [8, 8, 48], strides = [1, 1, 1]} : vector<10x10x48xf32> to vector<8x8x48xf32>
    %222 = vector.extract_strided_slice %213 {offsets = [2, 2, 0], sizes = [8, 8, 48], strides = [1, 1, 1]} : vector<10x10x48xf32> to vector<8x8x48xf32>
    %223 = tpu.concatenate %214, %215, %216, %217, %218, %219, %220, %221, %222 in 2 : vector<8x8x48xf32>, vector<8x8x48xf32>, vector<8x8x48xf32>, vector<8x8x48xf32>, vector<8x8x48xf32>, vector<8x8x48xf32>, vector<8x8x48xf32>, vector<8x8x48xf32>, vector<8x8x48xf32> -> vector<8x8x432xf32>
    %224 = vector.shape_cast %223 : vector<8x8x432xf32> to vector<64x432xf32>
    %c0_101 = arith.constant 0 : index
    %c0_102 = arith.constant 0 : index
    %225 = vector.load %arg36[%c0_101, %c0_102] : memref<432x12xbf16, #tpu.memory_space<vmem>>, vector<432x12xbf16>
    %226 = arith.truncf %224 : vector<64x432xf32> to vector<64x432xbf16>
    %cst_103 = arith.constant dense<0.000000e+00> : vector<64x12xf32>
    %227 = tpu.matmul %226, %225, %cst_103 {dimension_numbers = #tpu.dot_dimension_numbers<[1], [0], [0], [1], [0, 0, 1, 1], [], []>} : vector<64x432xbf16>, vector<432x12xbf16>, vector<64x12xf32> -> vector<64x12xf32>
    %c0_104 = arith.constant 0 : index
    %c0_105 = arith.constant 0 : index
    %228 = vector.load %arg37[%c0_104, %c0_105] : memref<1x12xf32, #tpu.memory_space<vmem>>, vector<1x12xf32>
    %229 = vector.broadcast %228 : vector<1x12xf32> to vector<64x12xf32>
    %230 = arith.addf %227, %229 : vector<64x12xf32>
    %231 = tpu.concatenate %138, %168, %199, %230 in 1 : vector<64x24xf32>, vector<64x12xf32>, vector<64x12xf32>, vector<64x12xf32> -> vector<64x60xf32>
    %cst_106 = arith.constant dense<0xFF800000> : vector<64xf32>
    %232 = vector.multi_reduction <maximumf>, %231, %cst_106 [1] : vector<64x60xf32> to vector<64xf32>
    %233 = vector.shape_cast %232 : vector<64xf32> to vector<64x1xf32>
    %cst_107 = arith.constant dense<0.000000e+00> : vector<64xf32>
    %234 = vector.multi_reduction <add>, %231, %cst_107 [1] : vector<64x60xf32> to vector<64xf32>
    %235 = vector.shape_cast %234 : vector<64xf32> to vector<64x1xf32>
    %cst_108 = arith.constant 6.000000e+01 : f32
    %236 = vector.broadcast %cst_108 : f32 to vector<64x1xf32>
    %237 = arith.divf %235, %236 : vector<64x1xf32>
    %238 = tpu.concatenate %233, %237 in 1 : vector<64x1xf32>, vector<64x1xf32> -> vector<64x2xf32>
    %239 = vector.shape_cast %238 : vector<64x2xf32> to vector<8x8x2xf32>
    %cst_109 = arith.constant 0.000000e+00 : f32
    %240 = vector.broadcast %cst_109 : f32 to vector<1x8x2xf32>
    %241 = tpu.concatenate %240, %239, %240 in 0 : vector<1x8x2xf32>, vector<8x8x2xf32>, vector<1x8x2xf32> -> vector<10x8x2xf32>
    %cst_110 = arith.constant 0.000000e+00 : f32
    %242 = vector.broadcast %cst_110 : f32 to vector<10x1x2xf32>
    %243 = tpu.concatenate %242, %241, %242 in 1 : vector<10x1x2xf32>, vector<10x8x2xf32>, vector<10x1x2xf32> -> vector<10x10x2xf32>
    %244 = vector.extract_strided_slice %243 {offsets = [0, 0, 0], sizes = [8, 8, 2], strides = [1, 1, 1]} : vector<10x10x2xf32> to vector<8x8x2xf32>
    %245 = vector.extract_strided_slice %243 {offsets = [0, 1, 0], sizes = [8, 8, 2], strides = [1, 1, 1]} : vector<10x10x2xf32> to vector<8x8x2xf32>
    %246 = vector.extract_strided_slice %243 {offsets = [0, 2, 0], sizes = [8, 8, 2], strides = [1, 1, 1]} : vector<10x10x2xf32> to vector<8x8x2xf32>
    %247 = vector.extract_strided_slice %243 {offsets = [1, 0, 0], sizes = [8, 8, 2], strides = [1, 1, 1]} : vector<10x10x2xf32> to vector<8x8x2xf32>
    %248 = vector.extract_strided_slice %243 {offsets = [1, 1, 0], sizes = [8, 8, 2], strides = [1, 1, 1]} : vector<10x10x2xf32> to vector<8x8x2xf32>
    %249 = vector.extract_strided_slice %243 {offsets = [1, 2, 0], sizes = [8, 8, 2], strides = [1, 1, 1]} : vector<10x10x2xf32> to vector<8x8x2xf32>
    %250 = vector.extract_strided_slice %243 {offsets = [2, 0, 0], sizes = [8, 8, 2], strides = [1, 1, 1]} : vector<10x10x2xf32> to vector<8x8x2xf32>
    %251 = vector.extract_strided_slice %243 {offsets = [2, 1, 0], sizes = [8, 8, 2], strides = [1, 1, 1]} : vector<10x10x2xf32> to vector<8x8x2xf32>
    %252 = vector.extract_strided_slice %243 {offsets = [2, 2, 0], sizes = [8, 8, 2], strides = [1, 1, 1]} : vector<10x10x2xf32> to vector<8x8x2xf32>
    %253 = tpu.concatenate %244, %245, %246, %247, %248, %249, %250, %251, %252 in 2 : vector<8x8x2xf32>, vector<8x8x2xf32>, vector<8x8x2xf32>, vector<8x8x2xf32>, vector<8x8x2xf32>, vector<8x8x2xf32>, vector<8x8x2xf32>, vector<8x8x2xf32>, vector<8x8x2xf32> -> vector<8x8x18xf32>
    %254 = vector.shape_cast %253 : vector<8x8x18xf32> to vector<64x18xf32>
    %c0_111 = arith.constant 0 : index
    %c0_112 = arith.constant 0 : index
    %255 = vector.load %arg38[%c0_111, %c0_112] : memref<18x1xf32, #tpu.memory_space<vmem>>, vector<18x1xf32>
    %cst_113 = arith.constant dense<0.000000e+00> : vector<64x1xf32>
    %256 = tpu.matmul %254, %255, %cst_113 {dimension_numbers = #tpu.dot_dimension_numbers<[1], [0], [0], [1], [0, 0, 1, 1], [], []>} : vector<64x18xf32>, vector<18x1xf32>, vector<64x1xf32> -> vector<64x1xf32>
    %c0_114 = arith.constant 0 : index
    %c0_115 = arith.constant 0 : index
    %257 = vector.load %arg39[%c0_114, %c0_115] : memref<1x1xf32, #tpu.memory_space<vmem>>, vector<1x1xf32>
    %258 = vector.broadcast %257 : vector<1x1xf32> to vector<64x1xf32>
    %259 = arith.addf %256, %258 : vector<64x1xf32>
    %260 = arith.negf %259 : vector<64x1xf32>
    %261 = math.exp %260 : vector<64x1xf32>
    %cst_116 = arith.constant 1.000000e+00 : f32
    %262 = vector.broadcast %cst_116 : f32 to vector<64x1xf32>
    %263 = arith.addf %262, %261 : vector<64x1xf32>
    %264 = arith.divf %262, %263 : vector<64x1xf32>
    %265 = vector.broadcast %264 : vector<64x1xf32> to vector<64x60xf32>
    %266 = arith.mulf %265, %231 : vector<64x60xf32>
    %cst_117 = arith.constant dense<0.000000e+00> : vector<60xf32>
    %267 = vector.multi_reduction <add>, %266, %cst_117 [0] : vector<64x60xf32> to vector<60xf32>
    %268 = vector.shape_cast %267 : vector<60xf32> to vector<1x60xf32>
    %cst_118 = arith.constant 6.400000e+01 : f32
    %269 = vector.broadcast %cst_118 : f32 to vector<1x60xf32>
    %270 = arith.divf %268, %269 : vector<1x60xf32>
    %271 = tpu.concatenate %132, %270 in 1 : vector<1x60xf32>, vector<1x60xf32> -> vector<1x120xf32>
    %c0_119 = arith.constant 0 : index
    %c0_120 = arith.constant 0 : index
    %272 = vector.load %arg40[%c0_119, %c0_120] : memref<120x9xf32, #tpu.memory_space<vmem>>, vector<120x9xf32>
    %cst_121 = arith.constant dense<0.000000e+00> : vector<1x9xf32>
    %273 = tpu.matmul %271, %272, %cst_121 {dimension_numbers = #tpu.dot_dimension_numbers<[1], [0], [0], [1], [0, 0, 1, 1], [], []>} : vector<1x120xf32>, vector<120x9xf32>, vector<1x9xf32> -> vector<1x9xf32>
    %c0_122 = arith.constant 0 : index
    %c0_123 = arith.constant 0 : index
    %274 = vector.load %arg41[%c0_122, %c0_123] : memref<1x9xf32, #tpu.memory_space<vmem>>, vector<1x9xf32>
    %275 = arith.addf %273, %274 : vector<1x9xf32>
    %276 = vector.shape_cast %275 : vector<1x9xf32> to vector<1x1x9xf32>
    %c0_124 = arith.constant 0 : index
    %c0_125 = arith.constant 0 : index
    %c0_126 = arith.constant 0 : index
    %277 = vector.load %arg42[%c0_124, %c0_125, %c0_126] : memref<1x1x9xf32, #tpu.memory_space<vmem>>, vector<1x1x9xf32>
    tpu.vector_store %arg42[%c0_124, %c0_125, %c0_126], %276 {strides = array<i32>} : memref<1x1x9xf32, #tpu.memory_space<vmem>>, vector<1x1x9xf32>,
    return
  }
  func.func @transform_0(%arg0: i32) -> (i32, i32, i32) {
    %c0_i32 = arith.constant 0 : i32
    %c0_i32_0 = arith.constant 0 : i32
    %c0_i32_1 = arith.constant 0 : i32
    return %arg0, %c0_i32, %c0_i32_0 : i32, i32, i32
  }
  func.func @transform_1(%arg0: i32) -> (i32, i32) {
    %c0_i32 = arith.constant 0 : i32
    %c0_i32_0 = arith.constant 0 : i32
    %c0_i32_1 = arith.constant 0 : i32
    return %c0_i32, %c0_i32_0 : i32, i32
  }
  func.func @transform_2(%arg0: i32) -> (i32, i32) {
    %c0_i32 = arith.constant 0 : i32
    %c0_i32_0 = arith.constant 0 : i32
    %c0_i32_1 = arith.constant 0 : i32
    return %c0_i32, %c0_i32_0 : i32, i32
  }
  func.func @transform_3(%arg0: i32) -> (i32, i32) {
    %c0_i32 = arith.constant 0 : i32
    %c0_i32_0 = arith.constant 0 : i32
    %c0_i32_1 = arith.constant 0 : i32
    return %c0_i32, %c0_i32_0 : i32, i32
  }
  func.func @transform_4(%arg0: i32) -> (i32, i32) {
    %c0_i32 = arith.constant 0 : i32
    %c0_i32_0 = arith.constant 0 : i32
    %c0_i32_1 = arith.constant 0 : i32
    return %c0_i32, %c0_i32_0 : i32, i32
  }
  func.func @transform_5(%arg0: i32) -> (i32, i32) {
    %c0_i32 = arith.constant 0 : i32
    %c0_i32_0 = arith.constant 0 : i32
    %c0_i32_1 = arith.constant 0 : i32
    return %c0_i32, %c0_i32_0 : i32, i32
  }
  func.func @transform_6(%arg0: i32) -> (i32, i32) {
    %c0_i32 = arith.constant 0 : i32
    %c0_i32_0 = arith.constant 0 : i32
    %c0_i32_1 = arith.constant 0 : i32
    return %c0_i32, %c0_i32_0 : i32, i32
  }
  func.func @transform_7(%arg0: i32) -> (i32, i32) {
    %c0_i32 = arith.constant 0 : i32
    %c0_i32_0 = arith.constant 0 : i32
    %c0_i32_1 = arith.constant 0 : i32
    return %c0_i32, %c0_i32_0 : i32, i32
  }
  func.func @transform_8(%arg0: i32) -> (i32, i32) {
    %c0_i32 = arith.constant 0 : i32
    %c0_i32_0 = arith.constant 0 : i32
    %c0_i32_1 = arith.constant 0 : i32
    return %c0_i32, %c0_i32_0 : i32, i32
  }
  func.func @transform_9(%arg0: i32) -> (i32, i32) {
    %c0_i32 = arith.constant 0 : i32
    %c0_i32_0 = arith.constant 0 : i32
    %c0_i32_1 = arith.constant 0 : i32
    return %c0_i32, %c0_i32_0 : i32, i32
  }
  func.func @transform_10(%arg0: i32) -> (i32, i32) {
    %c0_i32 = arith.constant 0 : i32
    %c0_i32_0 = arith.constant 0 : i32
    %c0_i32_1 = arith.constant 0 : i32
    return %c0_i32, %c0_i32_0 : i32, i32
  }
  func.func @transform_11(%arg0: i32) -> (i32, i32) {
    %c0_i32 = arith.constant 0 : i32
    %c0_i32_0 = arith.constant 0 : i32
    %c0_i32_1 = arith.constant 0 : i32
    return %c0_i32, %c0_i32_0 : i32, i32
  }
  func.func @transform_12(%arg0: i32) -> (i32, i32) {
    %c0_i32 = arith.constant 0 : i32
    %c0_i32_0 = arith.constant 0 : i32
    %c0_i32_1 = arith.constant 0 : i32
    return %c0_i32, %c0_i32_0 : i32, i32
  }
  func.func @transform_13(%arg0: i32) -> (i32, i32) {
    %c0_i32 = arith.constant 0 : i32
    %c0_i32_0 = arith.constant 0 : i32
    %c0_i32_1 = arith.constant 0 : i32
    return %c0_i32, %c0_i32_0 : i32, i32
  }
  func.func @transform_14(%arg0: i32) -> (i32, i32) {
    %c0_i32 = arith.constant 0 : i32
    %c0_i32_0 = arith.constant 0 : i32
    %c0_i32_1 = arith.constant 0 : i32
    return %c0_i32, %c0_i32_0 : i32, i32
  }
  func.func @transform_15(%arg0: i32) -> (i32, i32) {
    %c0_i32 = arith.constant 0 : i32
    %c0_i32_0 = arith.constant 0 : i32
    %c0_i32_1 = arith.constant 0 : i32
    return %c0_i32, %c0_i32_0 : i32, i32
  }
  func.func @transform_16(%arg0: i32) -> (i32, i32) {
    %c0_i32 = arith.constant 0 : i32
    %c0_i32_0 = arith.constant 0 : i32
    %c0_i32_1 = arith.constant 0 : i32
    return %c0_i32, %c0_i32_0 : i32, i32
  }
  func.func @transform_17(%arg0: i32) -> (i32, i32) {
    %c0_i32 = arith.constant 0 : i32
    %c0_i32_0 = arith.constant 0 : i32
    %c0_i32_1 = arith.constant 0 : i32
    return %c0_i32, %c0_i32_0 : i32, i32
  }
  func.func @transform_18(%arg0: i32) -> (i32, i32) {
    %c0_i32 = arith.constant 0 : i32
    %c0_i32_0 = arith.constant 0 : i32
    %c0_i32_1 = arith.constant 0 : i32
    return %c0_i32, %c0_i32_0 : i32, i32
  }
  func.func @transform_19(%arg0: i32) -> (i32, i32) {
    %c0_i32 = arith.constant 0 : i32
    %c0_i32_0 = arith.constant 0 : i32
    %c0_i32_1 = arith.constant 0 : i32
    return %c0_i32, %c0_i32_0 : i32, i32
  }
  func.func @transform_20(%arg0: i32) -> (i32, i32) {
    %c0_i32 = arith.constant 0 : i32
    %c0_i32_0 = arith.constant 0 : i32
    %c0_i32_1 = arith.constant 0 : i32
    return %c0_i32, %c0_i32_0 : i32, i32
  }
  func.func @transform_21(%arg0: i32) -> (i32, i32) {
    %c0_i32 = arith.constant 0 : i32
    %c0_i32_0 = arith.constant 0 : i32
    %c0_i32_1 = arith.constant 0 : i32
    return %c0_i32, %c0_i32_0 : i32, i32
  }
  func.func @transform_22(%arg0: i32) -> (i32, i32) {
    %c0_i32 = arith.constant 0 : i32
    %c0_i32_0 = arith.constant 0 : i32
    %c0_i32_1 = arith.constant 0 : i32
    return %c0_i32, %c0_i32_0 : i32, i32
  }
  func.func @transform_23(%arg0: i32) -> (i32, i32) {
    %c0_i32 = arith.constant 0 : i32
    %c0_i32_0 = arith.constant 0 : i32
    %c0_i32_1 = arith.constant 0 : i32
    return %c0_i32, %c0_i32_0 : i32, i32
  }
  func.func @transform_24(%arg0: i32) -> (i32, i32) {
    %c0_i32 = arith.constant 0 : i32
    %c0_i32_0 = arith.constant 0 : i32
    %c0_i32_1 = arith.constant 0 : i32
    return %c0_i32, %c0_i32_0 : i32, i32
  }
  func.func @transform_25(%arg0: i32) -> (i32, i32) {
    %c0_i32 = arith.constant 0 : i32
    %c0_i32_0 = arith.constant 0 : i32
    %c0_i32_1 = arith.constant 0 : i32
    return %c0_i32, %c0_i32_0 : i32, i32
  }
  func.func @transform_26(%arg0: i32) -> (i32, i32) {
    %c0_i32 = arith.constant 0 : i32
    %c0_i32_0 = arith.constant 0 : i32
    %c0_i32_1 = arith.constant 0 : i32
    return %c0_i32, %c0_i32_0 : i32, i32
  }
  func.func @transform_27(%arg0: i32) -> (i32, i32) {
    %c0_i32 = arith.constant 0 : i32
    %c0_i32_0 = arith.constant 0 : i32
    %c0_i32_1 = arith.constant 0 : i32
    return %c0_i32, %c0_i32_0 : i32, i32
  }
  func.func @transform_28(%arg0: i32) -> (i32, i32) {
    %c0_i32 = arith.constant 0 : i32
    %c0_i32_0 = arith.constant 0 : i32
    %c0_i32_1 = arith.constant 0 : i32
    return %c0_i32, %c0_i32_0 : i32, i32
  }
  func.func @transform_29(%arg0: i32) -> (i32, i32) {
    %c0_i32 = arith.constant 0 : i32
    %c0_i32_0 = arith.constant 0 : i32
    %c0_i32_1 = arith.constant 0 : i32
    return %c0_i32, %c0_i32_0 : i32, i32
  }
  func.func @transform_30(%arg0: i32) -> (i32, i32) {
    %c0_i32 = arith.constant 0 : i32
    %c0_i32_0 = arith.constant 0 : i32
    %c0_i32_1 = arith.constant 0 : i32
    return %c0_i32, %c0_i32_0 : i32, i32
  }
  func.func @transform_31(%arg0: i32) -> (i32, i32) {
    %c0_i32 = arith.constant 0 : i32
    %c0_i32_0 = arith.constant 0 : i32
    %c0_i32_1 = arith.constant 0 : i32
    return %c0_i32, %c0_i32_0 : i32, i32
  }
  func.func @transform_32(%arg0: i32) -> (i32, i32) {
    %c0_i32 = arith.constant 0 : i32
    %c0_i32_0 = arith.constant 0 : i32
    %c0_i32_1 = arith.constant 0 : i32
    return %c0_i32, %c0_i32_0 : i32, i32
  }
  func.func @transform_33(%arg0: i32) -> (i32, i32) {
    %c0_i32 = arith.constant 0 : i32
    %c0_i32_0 = arith.constant 0 : i32
    %c0_i32_1 = arith.constant 0 : i32
    return %c0_i32, %c0_i32_0 : i32, i32
  }
  func.func @transform_34(%arg0: i32) -> (i32, i32) {
    %c0_i32 = arith.constant 0 : i32
    %c0_i32_0 = arith.constant 0 : i32
    %c0_i32_1 = arith.constant 0 : i32
    return %c0_i32, %c0_i32_0 : i32, i32
  }
  func.func @transform_35(%arg0: i32) -> (i32, i32) {
    %c0_i32 = arith.constant 0 : i32
    %c0_i32_0 = arith.constant 0 : i32
    %c0_i32_1 = arith.constant 0 : i32
    return %c0_i32, %c0_i32_0 : i32, i32
  }
  func.func @transform_36(%arg0: i32) -> (i32, i32) {
    %c0_i32 = arith.constant 0 : i32
    %c0_i32_0 = arith.constant 0 : i32
    %c0_i32_1 = arith.constant 0 : i32
    return %c0_i32, %c0_i32_0 : i32, i32
  }
  func.func @transform_37(%arg0: i32) -> (i32, i32) {
    %c0_i32 = arith.constant 0 : i32
    %c0_i32_0 = arith.constant 0 : i32
    %c0_i32_1 = arith.constant 0 : i32
    return %c0_i32, %c0_i32_0 : i32, i32
  }
  func.func @transform_38(%arg0: i32) -> (i32, i32) {
    %c0_i32 = arith.constant 0 : i32
    %c0_i32_0 = arith.constant 0 : i32
    %c0_i32_1 = arith.constant 0 : i32
    return %c0_i32, %c0_i32_0 : i32, i32
  }
  func.func @transform_39(%arg0: i32) -> (i32, i32) {
    %c0_i32 = arith.constant 0 : i32
    %c0_i32_0 = arith.constant 0 : i32
    %c0_i32_1 = arith.constant 0 : i32
    return %c0_i32, %c0_i32_0 : i32, i32
  }
  func.func @transform_40(%arg0: i32) -> (i32, i32) {
    %c0_i32 = arith.constant 0 : i32
    %c0_i32_0 = arith.constant 0 : i32
    %c0_i32_1 = arith.constant 0 : i32
    return %c0_i32, %c0_i32_0 : i32, i32
  }
  func.func @transform_41(%arg0: i32) -> (i32, i32, i32) {
    %c0_i32 = arith.constant 0 : i32
    %c0_i32_0 = arith.constant 0 : i32
    %c0_i32_1 = arith.constant 0 : i32
    return %arg0, %c0_i32, %c0_i32_0 : i32, i32, i32
  }
}

</mosaic_0001>

<bundles_post_ra>
// kernel: dbma_forward.1
= control target key start
LH: loop header
LB: loop body
LE: loop exit
PB: predicated region body
PF: predicated region fallthrough
CT: control target
= control target key end

     0   :  { %s13850_s6 = smov 1   ;;  %s13851_s10 = smov 2   ;;  %s19827_s0 = inlined_call_operand.smem [shape: u32[42], index: -1, kind: input, shape index: {}] }
   0x1   :  { %s13930_s5 = sld [smem:[%s19827_s0]]   ;;  %s13852_s14 = smov 3  }
   0x2   :  { %s13935_s9 = sld [smem:[%s19827_s0 + %s13850_s6]]   ;;  %s13853_s18 = smov 4  }
   0x3   :  { %s13940_s13 = sld [smem:[%s19827_s0 + %s13851_s10]]   ;;  %s13854_s22 = smov 5  }
   0x4   :  { %s13945_s17 = sld [smem:[%s19827_s0 + %s13852_s14]]   ;;  %s13855_s26 = smov 6  }
   0x5   :  { %s13950_s21 = sld [smem:[%s19827_s0 + %s13853_s18]]   ;;  %s13856_s30 = smov 7  }
   0x6   :  { %s13955_s25 = sld [smem:[%s19827_s0 + %s13854_s22]]   ;;  %s13857_s4 = smov 8  }
   0x7   :  { %20023 = sst [smem:[#allocation6_spill]] %s13930_s5  ;;  %s13858_s10 = smov 9  }
   0x8   :  { %20024 = sst [smem:[#allocation7_spill]] %s13935_s9  ;;  %s13859_s15 = smov 10  }
   0x9   :  { %20025 = sst [smem:[#allocation8_spill]] %s13940_s13  ;;  %s13860_s20 = smov 11  }
   0xa   :  { %20026 = sst [smem:[#allocation9_spill]] %s13945_s17  ;;  %s13862_s1 = smov 13  }
   0xb   :  { %20027 = sst [smem:[#allocation10_spill]] %s13950_s21  ;;  %s13863_s7 = smov 14  }
   0xc   :  { %s13960_s29 = sld [smem:[%s19827_s0 + %s13855_s26]]   ;;  %s13861_s26 = smov 12  }
   0xd   :  { %s13965_s3 = sld [smem:[%s19827_s0 + %s13856_s30]]   ;;  %s13865_s22 = smov 16  }
   0xe   :  { %s13970_s8 = sld [smem:[%s19827_s0 + %s13857_s4]]   ;;  %s13866_s28 = smov 17  }
   0xf   :  { %s13975_s14 = sld [smem:[%s19827_s0 + %s13858_s10]]   ;;  %s13888_s16 = smov 39  }
  0x10   :  { %s13980_s19 = sld [smem:[%s19827_s0 + %s13859_s15]]   ;;  %s13864_s15 = smov 15  }
  0x11   :  { %s13985_s24 = sld [smem:[%s19827_s0 + %s13860_s20]]   ;;  %s13889_s23 = smov 40  }
  0x12   :  { %s13990_s30 = sld [smem:[%s19827_s0 + %s13861_s26]]  }
  0x13   :  { %20028 = sst [smem:[#allocation11_spill]] %s13965_s3 }
  0x14   :  { %20029 = sst [smem:[#allocation12_spill]] %s13970_s8 }
  0x15   :  { %20030 = sst [smem:[#allocation13_spill]] %s13975_s14 }
  0x16   :  { %20031 = sst [smem:[#allocation14_spill]] %s13980_s19 }
  0x17   :  { %s13995_s6 = sld [smem:[%s19827_s0 + %s13862_s1]]   ;;  %s13890_s1 = smov 41  }
  0x18   :  { %s14000_s12 = sld [smem:[%s19827_s0 + %s13863_s7]]   ;;  %s13867_s7 = smov 18  }
  0x19   :  { %s14005_s20 = sld [smem:[%s19827_s0 + %s13864_s15]]   ;;  %s13868_s15 = smov 19  }
  0x1a   :  { %s14010_s27 = sld [smem:[%s19827_s0 + %s13865_s22]]   ;;  %s13869_s22 = smov 20  }
  0x1b   :  { %s14015_s4 = sld [smem:[%s19827_s0 + %s13866_s28]]   ;;  %s13870_s28 = smov 21  }
  0x1d   :  { %20032 = sst [smem:[#allocation15_spill]] %s13995_s6 }
  0x1e   :  { %20033 = sst [smem:[#allocation16_spill]] %s14000_s12 }
  0x1f   :  { %20034 = sst [smem:[#allocation17_spill]] %s14005_s20 }
  0x20   :  { %20035 = sst [smem:[#allocation18_spill]] %s14010_s27 }
  0x21   :  { %20036 = sst [smem:[#allocation19_spill]] %s14015_s4 }
  0x22   :  { %s14020_s12 = sld [smem:[%s19827_s0 + %s13867_s7]]   ;;  %s13871_s7 = smov 22  }
  0x23   :  { %s14025_s20 = sld [smem:[%s19827_s0 + %s13868_s15]]   ;;  %s13872_s15 = smov 23  }
  0x24   :  { %s14030_s27 = sld [smem:[%s19827_s0 + %s13869_s22]]   ;;  %s13873_s22 = smov 24  }
  0x25   :  { %s14035_s4 = sld [smem:[%s19827_s0 + %s13870_s28]]   ;;  %s13874_s28 = smov 25  }
  0x28   :  { %20037 = sst [smem:[#allocation20_spill]] %s14020_s12 }
  0x29   :  { %20038 = sst [smem:[#allocation21_spill]] %s14025_s20 }
  0x2a   :  { %20039 = sst [smem:[#allocation22_spill]] %s14030_s27 }
  0x2b   :  { %20040 = sst [smem:[#allocation23_spill]] %s14035_s4 }
  0x2c   :  { %s14040_s12 = sld [smem:[%s19827_s0 + %s13871_s7]]   ;;  %s13875_s7 = smov 26  }
  0x2d   :  { %s14045_s20 = sld [smem:[%s19827_s0 + %s13872_s15]]   ;;  %s13876_s15 = smov 27  }
  0x2e   :  { %s14050_s27 = sld [smem:[%s19827_s0 + %s13873_s22]]   ;;  %s13877_s22 = smov 28  }
  0x2f   :  { %s14055_s4 = sld [smem:[%s19827_s0 + %s13874_s28]]   ;;  %s13878_s28 = smov 29  }
  0x32   :  { %20041 = sst [smem:[#allocation24_spill]] %s14040_s12 }
  0x33   :  { %20042 = sst [smem:[#allocation25_spill]] %s14045_s20 }
  0x34   :  { %20043 = sst [smem:[#allocation26_spill]] %s14050_s27 }
  0x35   :  { %20044 = sst [smem:[#allocation27_spill]] %s14055_s4 }
  0x36   :  { %s14060_s12 = sld [smem:[%s19827_s0 + %s13875_s7]]   ;;  %s13879_s7 = smov 30  }
  0x37   :  { %s14065_s20 = sld [smem:[%s19827_s0 + %s13876_s15]]   ;;  %s13880_s15 = smov 31  }
  0x38   :  { %s14070_s27 = sld [smem:[%s19827_s0 + %s13877_s22]]   ;;  %s13881_s22 = smov 32  }
  0x39   :  { %s14075_s4 = sld [smem:[%s19827_s0 + %s13878_s28]]   ;;  %s13882_s28 = smov 33  }
  0x3c   :  { %20045 = sst [smem:[#allocation28_spill]] %s14060_s12 }
  0x3d   :  { %20046 = sst [smem:[#allocation29_spill]] %s14065_s20 }
  0x3e   :  { %20047 = sst [smem:[#allocation30_spill]] %s14070_s27 }
  0x3f   :  { %20048 = sst [smem:[#allocation31_spill]] %s14075_s4 }
  0x40   :  { %s14080_s12 = sld [smem:[%s19827_s0 + %s13879_s7]]   ;;  %s13883_s7 = smov 34  }
  0x41   :  { %s14085_s20 = sld [smem:[%s19827_s0 + %s13880_s15]]   ;;  %s13884_s15 = smov 35  }
  0x42   :  { %s14090_s27 = sld [smem:[%s19827_s0 + %s13881_s22]]   ;;  %s13885_s22 = smov 36  }
  0x43   :  { %s14095_s4 = sld [smem:[%s19827_s0 + %s13882_s28]]   ;;  %s13886_s28 = smov 37  }
  0x46   :  { %20049 = sst [smem:[#allocation32_spill]] %s14080_s12 }
  0x47   :  { %20050 = sst [smem:[#allocation33_spill]] %s14085_s20 }
  0x48   :  { %20051 = sst [smem:[#allocation34_spill]] %s14090_s27 }
  0x49   :  { %20052 = sst [smem:[#allocation35_spill]] %s14095_s4 }
  0x4a   :  { %s14100_s12 = sld [smem:[%s19827_s0 + %s13883_s7]]   ;;  %s13887_s7 = smov 38  }
  0x4b   :  { %s14105_s20 = sld [smem:[%s19827_s0 + %s13884_s15]]  }
  0x4c   :  { %s14110_s27 = sld [smem:[%s19827_s0 + %s13885_s22]]  }
  0x4d   :  { %s14115_s4 = sld [smem:[%s19827_s0 + %s13886_s28]]  }
  0x50   :  { %20053 = sst [smem:[#allocation36_spill]] %s14100_s12 }
  0x51   :  { %20054 = sst [smem:[#allocation37_spill]] %s14105_s20 }
  0x52   :  { %20055 = sst [smem:[#allocation38_spill]] %s14110_s27 }
  0x53   :  { %20056 = sst [smem:[#allocation39_spill]] %s14115_s4 }
  0x54   :  { %s10830_s12 = sld [smem:[%s19827_s0 + %s13887_s7]]  }
  0x55   :  { %s14123_s20 = sld [smem:[%s19827_s0 + %s13888_s16]]  }
  0x56   :  { %s14128_s27 = sld [smem:[%s19827_s0 + %s13889_s23]]  }
  0x57   :  { %s14133_s4 = sld [smem:[%s19827_s0 + %s13890_s1]]  }
  0x5a   :  { %v88_v0 = vstv %s10830_s12 }
  0x5b   :  { %89 = vst [vmem:[#allocation2] sm:$0x1] %v88_v0 }
  0x5c   :  { %90 = vsyncpa [#allocation4], 0 }
  0x5d   :  { %92 = vsyncpa [#allocation4 + $0x1], 0  ;;  %s14135_s7 = smov 0   ;;  %s14137_s10 = smov 0  }
  0x5e   :  { %s14139_s11 = smov 0   ;;  %s14141_s16 = smov 0  }
  0x5f LB: > { %s20057_s6 = sld [smem:[#allocation15_spill]]  ;;  %s14156_s0 = sadd.s32 4294967295, %s13848_s16   ;;  %s13840_s10 = sphi %s14137_s10, %s20442_s10   ;;  %s13836_s7 = sphi %s14135_s7, %s20441_s7   ;;  %s13848_s16 = sphi %s14141_s16, %s20444_s16   ;;  %s13844_s11 = sphi %s14139_s11, %s20443_s11  }
  0x60   : > { %s20058_s14 = sld [smem:[#allocation13_spill]]  ;;  %s10835_s12 = sadd.s32 4294967294, %s13848_s16  }
  0x61   : > { %s14160_s15 = sadd.s32 1, %s13848_s16   ;;  %s971_s18 = sadd.s32 1, %s13844_s11 }
  0x62   : > { %s968_s23 = ssub.s32 %s13848_s16, %s14160_s15  ;;  %p981_p0 = scmp.ne.s32.totalorder %s13844_s11, %s13840_s10 }
  0x63   : > { %p969_p1 = scmp.eq.s32.totalorder %s968_s23, 0  ;;  %p982_p2 = scmp.eq.s32.totalorder %s14156_s0, 1 }
  0x64   : > { %p987_p3 = scmp.ne.s32.totalorder %s13840_s10, %s13836_s7  ;;  %p988_p4 = scmp.eq.s32.totalorder %s10835_s12, 1 }
  0x65   : > { %s14171_s22 = scalar_select %p969_p1, %s13844_s11, %s971_s18  }
  0x66   : > { %p14173_p5 = por %p982_p2, %p981_p0  ;;  %p14177_p6 = por %p988_p4, %p987_p3 }
  0x67   : > { %p10838_p7 = scmp.ge.s32.totalorder %s13848_s16, 1  ;;  %p1134_p8 = scmp.lt.s32.totalorder %s13848_s16, 3 }
  0x69   : > { %p1135_p9 = pnand %p10838_p7, %p1134_p8 }
  0x6b   : > { %1138 = sbr.rel (%p1135_p9) target bundleno = 5439 (0x153f), region = 184 }
  0x70   : > { %s20061_s9 = sld [smem:[#allocation7_spill]]  ;;  %p1233_p10 = scmp.lt.s32.totalorder %s14156_s0, 1  ;;  %vm1408_vm0 = vcmask 1046528   ;;  %vm1327_vm1 = vcmask 56320   ;;  %vm2744_vm2 = vcmask 1043456   ;;  %vm2371_vm3 = vcmask 195584  }
  0x71   : > { %s20062_s5 = sld [smem:[#allocation6_spill]]  ;;  %s13891_s18 = smov 126   ;;  %vm2397_vm4 = vcmask 392192   ;;  %vm2431_vm5 = vcmask 588800   ;;  %vm2472_vm6 = vcmask 785408   ;;  %vm20020_vm7 = vcmask 982016  }
  0x72   : > { %s1234_s28 = scalar_select %p1233_p10, %s14156_s0, 1  ;;  %vm2554_vm8 = vcmask 130048   ;;  %vm2704_vm9 = vcmask 326656   ;;  %vm3926_vm10 = vcmask 523264   ;;  %vm3967_vm11 = vcmask 916480   ;;  %vm10996_vm15 = vmneg %vm2431_vm5 }
  0x73   : > { %s19835_s23 = smov 124   ;;  %s20063_s13 = sld [smem:[#allocation8_spill]]  ;;  %vm4008_vm12 = vcmask 261120   ;;  %vm20018_vm13 = vcmask 654336   ;;  %vm5627_vm14 = vcmask 719872  }
  0x74   : > { %s11229_s2 = sshll.u32 %s1234_s28, 6  ;;  %s13893_s28 = smov 122  }
  0x75   : > { %s20064_s17 = sld [smem:[#allocation9_spill]] }
  0x76   : > { %v1319_v1 = vld [vmem:[%s20061_s9] sm:$0x7f]  ;;  %s20065_s21 = sld [smem:[#allocation10_spill]]  ;;  %s20174_s9 = smov 112  }
  0x77   : > { %11471 = vmatprep.subr.msk.mxu0 %vm1408_vm0, %v1319_v1  ;;  %11692 = vmatprep.subr.msk.mxu1 %vm1408_vm0, %v1319_v1  ;;  %s14191_s12 = scalar_lea.vmem %s20062_s5, %s11229_s2  ;;  %s19882_s2 = smov 120  }
  0x78   : > { %11472 = vmatpush3.msk.msra.mxu0 %vm1408_vm0, %v1319_v1  ;;  %11693 = vmatpush3.msk.msra.mxu1 %vm1408_vm0, %v1319_v1  ;;  %v1239_v2 = vld [vmem:[%s14191_s12] sm:$0xff]  ;;  %v1241_v3 = vld [vmem:[%s14191_s12 + $0x10] sm:$0xff]  ;;  %v1240_v4 = vld [vmem:[%s14191_s12 + $0x8] sm:$0xff]  ;;  %s20119_s5 = smov 24   ;;  %s20126_s3 = sld [smem:[#allocation11_spill]] }
  0x79   : > { %1255 = vrot.lane.b32.xlu0 %v1239_v2, %s13891_s18  ;;  %1259 = vrot.lane.b32.xlu1 %v1241_v3, %s13891_s18  ;;  %v1242_v5 = vld [vmem:[%s14191_s12 + $0x18] sm:$0xff]  ;;  %v1243_v6 = vld [vmem:[%s14191_s12 + $0x20] sm:$0xff]  ;;  %s20127_s8 = sld [smem:[#allocation12_spill]] }
  0x7a   : > { %11473 = vmatprep.mubr.msk.f32.mxu0 %vm1327_vm1, %v1239_v2  ;;  %v1244_v7 = vld [vmem:[%s14191_s12 + $0x28] sm:$0xff]  ;;  %v1245_v8 = vld [vmem:[%s14191_s12 + $0x30] sm:$0xff]  ;;  %v1246_v9 = vld [vmem:[%s14191_s12 + $0x38] sm:$0xff]  ;;  %s20238_s19 = sld [smem:[#allocation14_spill]] }
  0x7b   : > { %11474 = vmatmul.mubr.msk.f32.vlgmr.msra.gmra.mxu0 %vm1327_vm1, %v1240_v4  ;;  %v14258_v43 = vld [vmem:[%s20063_s13] ss:$0 sm:$0xff]  ;;  %s19967_s13 = smov 32  }
  0x7c   : > { %11476 = vmatprep.mubr.msk.f32.mxu0 %vm1327_vm1, %v1241_v3  ;;  %v14264_v45 = vld [vmem:[%s20064_s17] ss:$0 sm:$0xff]  ;;  %s13906_s17 = smov 104  }
  0x7d   : > { %1257 = vrot.lane.b32.xlu0 %v1240_v4, %s13891_s18  ;;  %1261 = vrot.lane.b32.xlu1 %v1242_v5, %s13891_s18  ;;  %v14272_v49 = vld [vmem:[%s20065_s21] ss:$0 sm:$0xff]  ;;  %s20379_s21 = sld [smem:[#allocation29_spill]] }
  0x7f   : > { %11477 = vmatmul.mubr.msk.f32.gmra.mxu0 %vm1327_vm1, %v1242_v5 }
  0x80   : > { %11479 = vmatprep.mubr.msk.f32.mxu0 %vm1327_vm1, %v1243_v6 }
  0x81   : > { %1263 = vrot.lane.b32.xlu0 %v1243_v6, %s13891_s18  ;;  %1265 = vrot.lane.b32.xlu1 %v1244_v7, %s13891_s18 }
  0x83   : > { %11480 = vmatmul.mubr.msk.f32.gmra.mxu0 %vm1327_vm1, %v1244_v7 }
  0x84   : > { %11482 = vmatprep.mubr.msk.f32.mxu0 %vm1327_vm1, %v1245_v8 }
  0x85   : > { %1267 = vrot.lane.b32.xlu0 %v1245_v8, %s13891_s18  ;;  %1269 = vrot.lane.b32.xlu1 %v1246_v9, %s13891_s18  ;;  %s19837_s18 = smov 24  }
  0x87   : > { %11483 = vmatmul.mubr.msk.f32.gmra.mxu0 %vm1327_vm1, %v1246_v9 }
  0x89   : > { %1271 = vrot.lane.b32.xlu0 %v1239_v2, %s19835_s23  ;;  %1273 = vrot.lane.b32.xlu1 %v1240_v4, %s19835_s23 }
  0x8d   : > { %1275 = vrot.lane.b32.xlu0 %v1241_v3, %s19835_s23  ;;  %1277 = vrot.lane.b32.xlu1 %v1242_v5, %s19835_s23 }
  0x91   : > { %1279 = vrot.lane.b32.xlu0 %v1243_v6, %s19835_s23  ;;  %1281 = vrot.lane.b32.xlu1 %v1244_v7, %s19835_s23 }
  0x95   : > { %1283 = vrot.lane.b32.xlu0 %v1245_v8, %s19835_s23  ;;  %1285 = vrot.lane.b32.xlu1 %v1246_v9, %s19835_s23  ;;  %s19880_s23 = smov 72  }
  0x99   : > { %1287 = vrot.lane.b32.xlu0 %v1239_v2, %s13893_s28  ;;  %1289 = vrot.lane.b32.xlu1 %v1240_v4, %s13893_s28 }
  0x9d   : > { %1291 = vrot.lane.b32.xlu0 %v1241_v3, %s13893_s28  ;;  %1293 = vrot.lane.b32.xlu1 %v1242_v5, %s13893_s28 }
  0xa1   : > { %1295 = vrot.lane.b32.xlu0 %v1243_v6, %s13893_s28  ;;  %1297 = vrot.lane.b32.xlu1 %v1244_v7, %s13893_s28 }
  0xa5   : > { %1299 = vrot.lane.b32.xlu0 %v1245_v8, %s13893_s28  ;;  %1301 = vrot.lane.b32.xlu1 %v1246_v9, %s13893_s28  ;;  %s19858_s28 = smov 48  }
  0xa9   : > { %1303 = vrot.lane.b32.xlu0 %v1239_v2, %s19882_s2  ;;  %1305 = vrot.lane.b32.xlu1 %v1240_v4, %s19882_s2 }
  0xad   : > { %1307 = vrot.lane.b32.xlu0 %v1241_v3, %s19882_s2  ;;  %1309 = vrot.lane.b32.xlu1 %v1242_v5, %s19882_s2  ;;  %v19839_v3 = vmov 0.0  }
  0xb1   : > { %1311 = vrot.lane.b32.xlu0 %v1243_v6, %s19882_s2  ;;  %1313 = vrot.lane.b32.xlu1 %v1244_v7, %s19882_s2 }
  0xb5   : > { %1315 = vrot.lane.b32.xlu0 %v1245_v8, %s19882_s2  ;;  %1317 = vrot.lane.b32.xlu1 %v1246_v9, %s19882_s2 }
  0xeb   : > { %v1256_v10 = vpop.permute.xlu0 %1255  ;;  %v1260_v11 = vpop.permute.xlu1 %1259 }
  0xec   : > { %11485 = vmatprep.mubr.msk.f32.mxu0 %vm1327_vm1, %v1256_v10 }
  0xef   : > { %v1258_v12 = vpop.permute.xlu0 %1257  ;;  %v1262_v13 = vpop.permute.xlu1 %1261 }
  0xf0   : > { %11486 = vmatmul.mubr.msk.f32.gmra.mxu0 %vm1327_vm1, %v1258_v12 }
  0xf1   : > { %11488 = vmatprep.mubr.msk.f32.mxu0 %vm1327_vm1, %v1260_v11 }
  0xf3   : > { %v1264_v14 = vpop.permute.xlu0 %1263  ;;  %v1266_v15 = vpop.permute.xlu1 %1265 }
  0xf4   : > { %11489 = vmatmul.mubr.msk.f32.gmra.mxu0 %vm1327_vm1, %v1262_v13 }
  0xf5   : > { %11491 = vmatprep.mubr.msk.f32.mxu0 %vm1327_vm1, %v1264_v14 }
  0xf7   : > { %v1268_v16 = vpop.permute.xlu0 %1267  ;;  %v1270_v17 = vpop.permute.xlu1 %1269 }
  0xf8   : > { %11492 = vmatmul.mubr.msk.f32.gmra.mxu0 %vm1327_vm1, %v1266_v15 }
  0xf9   : > { %11494 = vmatprep.mubr.msk.f32.mxu0 %vm1327_vm1, %v1268_v16 }
  0xfb   : > { %v1272_v18 = vpop.permute.xlu0 %1271  ;;  %v1274_v19 = vpop.permute.xlu1 %1273 }
  0xfc   : > { %11495 = vmatmul.mubr.msk.f32.gmra.mxu0 %vm1327_vm1, %v1270_v17 }
  0xfd   : > { %11497 = vmatprep.mubr.msk.f32.mxu0 %vm1327_vm1, %v1272_v18 }
  0xff   : > { %v1276_v20 = vpop.permute.xlu0 %1275  ;;  %v1278_v21 = vpop.permute.xlu1 %1277 }
 0x100   : > { %11498 = vmatmul.mubr.msk.f32.gmra.mxu0 %vm1327_vm1, %v1274_v19 }
 0x101   : > { %11500 = vmatprep.mubr.msk.f32.mxu0 %vm1327_vm1, %v1276_v20 }
 0x103   : > { %v1280_v22 = vpop.permute.xlu0 %1279  ;;  %v1282_v23 = vpop.permute.xlu1 %1281 }
 0x104   : > { %11501 = vmatmul.mubr.msk.f32.gmra.mxu0 %vm1327_vm1, %v1278_v21 }
 0x105   : > { %11503 = vmatprep.mubr.msk.f32.mxu0 %vm1327_vm1, %v1280_v22 }
 0x107   : > { %v1284_v24 = vpop.permute.xlu0 %1283  ;;  %v1286_v25 = vpop.permute.xlu1 %1285 }
 0x108   : > { %11504 = vmatmul.mubr.msk.f32.gmra.mxu0 %vm1327_vm1, %v1282_v23 }
 0x109   : > { %11506 = vmatprep.mubr.msk.f32.mxu0 %vm1327_vm1, %v1284_v24 }
 0x10b   : > { %v1288_v26 = vpop.permute.xlu0 %1287  ;;  %v1290_v27 = vpop.permute.xlu1 %1289 }
 0x10c   : > { %11507 = vmatmul.mubr.msk.f32.gmra.mxu0 %vm1327_vm1, %v1286_v25 }
 0x10d   : > { %11509 = vmatprep.mubr.msk.f32.mxu0 %vm1327_vm1, %v1288_v26 }
 0x10f   : > { %v1292_v28 = vpop.permute.xlu0 %1291  ;;  %v1294_v29 = vpop.permute.xlu1 %1293 }
 0x110   : > { %11510 = vmatmul.mubr.msk.f32.gmra.mxu0 %vm1327_vm1, %v1290_v27 }
 0x111   : > { %11512 = vmatprep.mubr.msk.f32.mxu0 %vm1327_vm1, %v1292_v28 }
 0x113   : > { %v1296_v30 = vpop.permute.xlu0 %1295  ;;  %v1298_v31 = vpop.permute.xlu1 %1297 }
 0x114   : > { %11513 = vmatmul.mubr.msk.f32.gmra.mxu0 %vm1327_vm1, %v1294_v29 }
 0x115   : > { %11515 = vmatprep.mubr.msk.f32.mxu0 %vm1327_vm1, %v1296_v30 }
 0x117   : > { %v1300_v32 = vpop.permute.xlu0 %1299  ;;  %v1302_v33 = vpop.permute.xlu1 %1301 }
 0x118   : > { %11516 = vmatmul.mubr.msk.f32.gmra.mxu0 %vm1327_vm1, %v1298_v31 }
 0x119   : > { %11518 = vmatprep.mubr.msk.f32.mxu0 %vm1327_vm1, %v1300_v32 }
 0x11b   : > { %v1304_v34 = vpop.permute.xlu0 %1303  ;;  %v1306_v35 = vpop.permute.xlu1 %1305 }
 0x11c   : > { %11519 = vmatmul.mubr.msk.f32.gmra.mxu0 %vm1327_vm1, %v1302_v33  ;;  %11521 = vmatprep.mubr.msk.f32.mxu1 %vm1327_vm1, %v1304_v34 }
 0x11d   : > { %11522 = vmatmul.mubr.msk.f32.vlgmr.msra.gmra.mxu1 %vm1327_vm1, %v1306_v35 }
 0x11f   : > { %v1308_v36 = vpop.permute.xlu0 %1307  ;;  %v1310_v37 = vpop.permute.xlu1 %1309 }
 0x120   : > { %11524 = vmatprep.mubr.msk.f32.mxu1 %vm1327_vm1, %v1308_v36 }
 0x121   : > { %11525 = vmatmul.mubr.msk.f32.gmra.mxu1 %vm1327_vm1, %v1310_v37 }
 0x123   : > { %v1312_v38 = vpop.permute.xlu0 %1311  ;;  %v1314_v39 = vpop.permute.xlu1 %1313 }
 0x124   : > { %11527 = vmatprep.mubr.msk.f32.mxu1 %vm1327_vm1, %v1312_v38 }
 0x125   : > { %11528 = vmatmul.mubr.msk.f32.gmra.mxu1 %vm1327_vm1, %v1314_v39 }
 0x127   : > { %v1316_v40 = vpop.permute.xlu0 %1315  ;;  %v1318_v41 = vpop.permute.xlu1 %1317 }
 0x128   : > { %11530 = vmatprep.mubr.msk.f32.mxu1 %vm1327_vm1, %v1316_v40 }
 0x129   : > { %11531 = vmatmul.mubr.msk.f32.gmra.mxu1 %vm1327_vm1, %v1318_v41  ;;  %vm17258_vm1 = vmpackc.low %vm10996_vm15, %vm10996_vm15  ;;  %vm5708_vm15 = vcmask 850944  }
 0x13b   : > { %v11475_v42 = vpop.f32.mrf.mxu0 }
 0x13c   : > { %v14261_v44 = vadd.f32 %v11475_v42, %v14258_v43 }
 0x13d   : > { %v1478_v46 = vpop.f32.mrf.mxu0 }
 0x13e   : > { %20066 = vst [vmem:[#allocation40_spill] sm:$0xff] %v14261_v44  ;;  %v1685_v47 = vmul.f32 %v14264_v45, %v14261_v44  ;;  %v14269_v48 = vadd.f32 %v14258_v43, %v1478_v46 }
 0x13f   : > { %v11478_v50 = vpop.f32.mrf.mxu0 }
 0x140   : > { %20067 = vst [vmem:[#allocation41_spill] sm:$0xff] %v14269_v48  ;;  %v1684_v51 = vmul.f32 %v14264_v45, %v14269_v48  ;;  %v14277_v52 = vadd.f32 %v11478_v50, %v14258_v43  ;;  %v1732_v53 = vadd.f32 %v14272_v49, %v1685_v47 }
 0x141   : > { %v1488_v54 = vpop.f32.mrf.mxu0 }
 0x142   : > { %20068 = vst [vmem:[#allocation42_spill] sm:$0xff] %v14277_v52  ;;  %v1731_v55 = vadd.f32 %v14272_v49, %v1684_v51  ;;  %v1687_v56 = vmul.f32 %v14264_v45, %v14277_v52  ;;  %v14284_v57 = vadd.f32 %v14258_v43, %v1488_v54  ;;  %v14291_v62 = vmax.f32 %v1732_v53, 0.0 }
 0x143   : > { %v11481_v58 = vpop.f32.mrf.mxu0 }
 0x144   : > { %20069 = vst [vmem:[#allocation43_spill] sm:$0xff] %v14284_v57  ;;  %v14286_v59 = vmax.f32 %v1731_v55, 0.0  ;;  %v1734_v60 = vadd.f32 %v14272_v49, %v1687_v56  ;;  %v1686_v61 = vmul.f32 %v14264_v45, %v14284_v57  ;;  %v14294_v63 = vadd.f32 %v11481_v58, %v14258_v43 }
 0x145   : > { %v1498_v0 = vpop.f32.mrf.mxu0  ;;  %v19841_v55 = vmov 0  }
 0x146   : > { %20070 = vst [vmem:[#allocation44_spill] sm:$0xff] %v14294_v63  ;;  %v1733_v1 = vadd.f32 %v14272_v49, %v1686_v61  ;;  %v14298_v2 = vadd.f32 %v14258_v43, %v1498_v0  ;;  %v11805_v4 = vpack.i.bf16 %v14286_v59, %v19839_v3  ;;  %v14302_v6 = vmax.f32 %v1734_v60, 0.0  ;;  %2748 = vmatprep.subr.bf16.mxu1 %v19841_v55  ;;  %v13587_v0 = vld [vmem:[%s13955_s25 + $0x38] sm:$0xff]  }
 0x147   : > { %v11484_v5 = vpop.f32.mrf.mxu0  ;;  %v1689_v9 = vmul.f32 %v14264_v45, %v14294_v63  ;;  %v11815_v12 = vpack.i.bf16 %v14291_v62, %v14286_v59  ;;  %4299 = vmatprep.subr.bf16.mxu0 %v19841_v55  ;;  %13585 = vset.pattern.permute.xlu1 %v19841_v55 }
 0x148   : > { %20071 = vst [vmem:[#allocation45_spill] sm:$0xff] %v14298_v2  ;;  %v1688_v7 = vmul.f32 %v14264_v45, %v14298_v2  ;;  %v14306_v8 = vmax.f32 %v1733_v1, 0.0  ;;  %11806 = vrot.lane.b32.xlu0 %v11805_v4, %s19837_s18  ;;  %v14312_v10 = vadd.f32 %v11484_v5, %v14258_v43  ;;  %11811 = vrot.lane.b32.xlu1 %v11805_v4, %s19858_s28  ;;  %s19897_s18 = smov 96  }
 0x149   : > { %v1508_v11 = vpop.f32.mrf.mxu0  ;;  %v1736_v16 = vadd.f32 %v14272_v49, %v1689_v9  ;;  %13586 = vset.pattern.permute.xlu0 %v19841_v55  ;;  %2749 = vmatpush1.bf16.msra.mxu1 %v13587_v0 }
 0x14a   : > { %20072 = vst [vmem:[#allocation46_spill] sm:$0xff] %v14312_v10  ;;  %v1735_v13 = vadd.f32 %v14272_v49, %v1688_v7  ;;  %v14319_v14 = vadd.f32 %v14258_v43, %v1508_v11  ;;  %v1691_v17 = vmul.f32 %v14264_v45, %v14312_v10  ;;  %v11820_v19 = vpack.i.bf16 %v14302_v6, %v14306_v8 }
 0x14b   : > { %v14337_v21 = vmax.f32 %v1736_v16, 0.0  ;;  %v14344_v24 = vpack.i.bf16 %v14306_v8, %v14291_v62  ;;  %2750 = vmatprep.subr.bf16.mxu1 %v19841_v55 }
 0x14c   : > { %20073 = vst [vmem:[#allocation47_spill] sm:$0xff] %v14319_v14  ;;  %v14321_v15 = vmax.f32 %v1735_v13, 0.0  ;;  %v1690_v18 = vmul.f32 %v14264_v45, %v14319_v14  ;;  %11816 = vrot.lane.b32.xlu0 %v11815_v12, %s19880_s23  ;;  %v1738_v22 = vadd.f32 %v14272_v49, %v1691_v17  ;;  %v13588_v17 = vld [vmem:[%s13955_s25 + $0x30] sm:$0xff]  }
 0x14d   : > { %2751 = vmatpush1.bf16.msra.mxu1 %v13588_v17 }
 0x14e   : > { %v14333_v20 = vpack.i.bf16 %v14321_v15, %v14302_v6  ;;  %v1737_v23 = vadd.f32 %v14272_v49, %v1690_v18  ;;  %v14346_v25 = vmax.f32 %v1738_v22, 0.0  ;;  %v11830_v27 = vpack.i.bf16 %v14337_v21, %v14321_v15  ;;  %2752 = vmatprep.subr.bf16.mxu1 %v19841_v55 }
 0x150   : > { %11836 = vrot.lane.b32.xlu1 %v14333_v20, %s19858_s28  ;;  %11821 = vrot.lane.b32.xlu0 %v11820_v19, %s19880_s23  ;;  %v14348_v26 = vmax.f32 %v1737_v23, 0.0 }
 0x152   : > { %v11840_v28 = vpack.i.bf16 %v14346_v25, %v14348_v26 }
 0x154   : > { %11826 = vrot.lane.b32.xlu0 %v14344_v24, %s19858_s28  ;;  %s19884_s28 = smov 16  }
 0x158   : > { %11831 = vrot.lane.b32.xlu0 %v11830_v27, %s19880_s23  ;;  %v13589_v27 = vld [vmem:[%s13955_s25 + $0x28] sm:$0xff]  }
 0x159   : > { %2753 = vmatpush1.bf16.msra.mxu1 %v13589_v27 }
 0x15a   : > { %2754 = vmatprep.subr.bf16.mxu1 %v19841_v55 }
 0x15c   : > { %11841 = vrot.lane.b32.xlu0 %v11840_v28, %s19880_s23 }
 0x1b0   : > { %v11487_v29 = vpop.f32.mrf.mxu0 }
 0x1b1   : > { %v14359_v30 = vadd.f32 %v11487_v29, %v14258_v43 }
 0x1b2   : > { %v1518_v31 = vpop.f32.mrf.mxu0 }
 0x1b3   : > { %20074 = vst [vmem:[#allocation48_spill] sm:$0xff] %v14359_v30  ;;  %v1693_v32 = vmul.f32 %v14264_v45, %v14359_v30  ;;  %v14364_v33 = vadd.f32 %v14258_v43, %v1518_v31  ;;  %v13595_v30 = vld [vmem:[%s13955_s25 + $0x50] ss:$0 sps:$4 sm:$0xff]  }
 0x1b4   : > { %v11490_v34 = vpop.f32.mrf.mxu0 }
 0x1b5   : > { %20075 = vst [vmem:[#allocation49_spill] sm:$0xff] %v14364_v33  ;;  %v1692_v35 = vmul.f32 %v14264_v45, %v14364_v33  ;;  %v1740_v36 = vadd.f32 %v14272_v49, %v1693_v32  ;;  %v14370_v37 = vadd.f32 %v11490_v34, %v14258_v43 }
 0x1b6   : > { %v1528_v38 = vpop.f32.mrf.mxu0 }
 0x1b7   : > { %20076 = vst [vmem:[#allocation50_spill] sm:$0xff] %v14370_v37  ;;  %v1739_v39 = vadd.f32 %v14272_v49, %v1692_v35  ;;  %v14374_v40 = vadd.f32 %v14258_v43, %v1528_v38  ;;  %v14380_v47 = vmax.f32 %v1740_v36, 0.0  ;;  %v1695_v50 = vmul.f32 %v14264_v45, %v14370_v37 }
 0x1b8   : > { %v11493_v41 = vpop.f32.mrf.mxu0 }
 0x1b9   : > { %20077 = vst [vmem:[#allocation51_spill] sm:$0xff] %v14374_v40  ;;  %v14376_v42 = vmax.f32 %v1739_v39, 0.0  ;;  %v1694_v46 = vmul.f32 %v14264_v45, %v14374_v40  ;;  %v14385_v51 = vadd.f32 %v11493_v41, %v14258_v43  ;;  %v1742_v1 = vadd.f32 %v14272_v49, %v1695_v50 }
 0x1ba   : > { %v1538_v53 = vpop.f32.mrf.mxu0 }
 0x1bb   : > { %20078 = vst [vmem:[#allocation52_spill] sm:$0xff] %v14385_v51  ;;  %v14388_v54 = vadd.f32 %v14258_v43, %v1538_v53  ;;  %v1741_v56 = vadd.f32 %v14272_v49, %v1694_v46  ;;  %v11845_v60 = vpack.i.bf16 %v14380_v47, %v14376_v42  ;;  %v1697_v4 = vmul.f32 %v14264_v45, %v14385_v51  ;;  %v13590_v46 = vld [vmem:[%s13955_s25 + $0x20] sm:$0xff]  }
 0x1bc   : > { %v11496_v58 = vpop.f32.mrf.mxu0  ;;  %v14417_v18 = vmax.f32 %v1742_v1, 0.0  ;;  %2755 = vmatpush1.bf16.msra.mxu1 %v13590_v46 }
 0x1bd   : > { %20079 = vst [vmem:[#allocation53_spill] sm:$0xff] %v14388_v54  ;;  %v1696_v61 = vmul.f32 %v14264_v45, %v14388_v54  ;;  %v14404_v5 = vadd.f32 %v11496_v58, %v14258_v43  ;;  %11846 = vrot.lane.b32.xlu1 %v11845_v60, %s19897_s18  ;;  %v14410_v11 = vmax.f32 %v1741_v56, 0.0  ;;  %v1744_v19 = vadd.f32 %v14272_v49, %v1697_v4 }
 0x1be   : > { %v1548_v7 = vpop.f32.mrf.mxu0  ;;  %2756 = vmatprep.subr.bf16.mxu1 %v19841_v55 }
 0x1bf   : > { %20080 = vst [vmem:[#allocation54_spill] sm:$0xff] %v14404_v5  ;;  %v14408_v9 = vadd.f32 %v14258_v43, %v1548_v7  ;;  %v1743_v12 = vadd.f32 %v14272_v49, %v1696_v61  ;;  %v1699_v22 = vmul.f32 %v14264_v45, %v14404_v5  ;;  %v14429_v32 = vpack.i.bf16 %v14417_v18, %v14410_v11 }
 0x1c0   : > { %v11499_v13 = vpop.f32.mrf.mxu0  ;;  %v14435_v35 = vmax.f32 %v1744_v19, 0.0 }
 0x1c1   : > { %20081 = vst [vmem:[#allocation55_spill] sm:$0xff] %v14408_v9  ;;  %v1698_v16 = vmul.f32 %v14264_v45, %v14408_v9  ;;  %11851 = vrot.lane.b32.xlu1 %v11845_v60, %s19880_s23  ;;  %v14424_v28 = vmax.f32 %v1743_v12, 0.0  ;;  %v1746_v36 = vadd.f32 %v14272_v49, %v1699_v22  ;;  %v14449_v53 = vadd.f32 %v11499_v13, %v14258_v43  ;;  %v13591_v13 = vld [vmem:[%s13955_s25 + $0x18] sm:$0xff]  }
 0x1c2   : > { %v1558_v23 = vpop.f32.mrf.mxu0  ;;  %2757 = vmatpush1.bf16.msra.mxu1 %v13591_v13 }
 0x1c3   : > { %v1745_v29 = vadd.f32 %v14272_v49, %v1698_v16  ;;  %20084 = vst [vmem:[#allocation58_spill] sm:$0xff] %v14449_v53  ;;  %v14453_v58 = vpack.i.bf16 %v14435_v35, %v14424_v28  ;;  %v14458_v61 = vmax.f32 %v1746_v36, 0.0  ;;  %v1701_v16 = vmul.f32 %v14264_v45, %v14449_v53  ;;  %2758 = vmatprep.subr.bf16.mxu1 %v19841_v55 }
 0x1c4   : > { %v11502_v31 = vpop.f32.mrf.mxu0 }
 0x1c5   : > { %v14433_v34 = vadd.f32 %v11502_v31, %v14258_v43  ;;  %11861 = vrot.lane.b32.xlu1 %v14429_v32, %s19897_s18  ;;  %v14446_v50 = vmax.f32 %v1745_v29, 0.0  ;;  %v14493_v46 = vadd.f32 %v14272_v49, %v1701_v16 }
 0x1c6   : > { %v1568_v38 = vpop.f32.mrf.mxu0 }
 0x1c7   : > { %20082 = vst [vmem:[#allocation56_spill] sm:$0xff] %v14433_v34  ;;  %v1703_v39 = vmul.f32 %v14264_v45, %v14433_v34  ;;  %v14443_v41 = vadd.f32 %v14258_v43, %v1568_v38  ;;  %v14477_v19 = vpack.i.bf16 %v14458_v61, %v14446_v50 }
 0x1c8   : > { %v11505_v56 = vpop.f32.mrf.mxu0 }
 0x1c9   : > { %20083 = vst [vmem:[#allocation57_spill] sm:$0xff] %v14443_v41  ;;  %v1702_v60 = vmul.f32 %v14264_v45, %v14443_v41  ;;  %v1750_v0 = vadd.f32 %v14272_v49, %v1703_v39  ;;  %v14462_v1 = vadd.f32 %v11505_v56, %v14258_v43  ;;  %11866 = vrot.lane.b32.xlu1 %v14453_v58, %s19897_s18 }
 0x1ca   : > { %v1578_v4 = vpop.f32.mrf.mxu0 }
 0x1cb   : > { %20085 = vst [vmem:[#allocation59_spill] sm:$0xff] %v14462_v1  ;;  %v1749_v7 = vadd.f32 %v14272_v49, %v1702_v60  ;;  %v14468_v12 = vadd.f32 %v14258_v43, %v1578_v4  ;;  %v1790_v29 = vmax.f32 %v1750_v0, 0.0  ;;  %v1705_v31 = vmul.f32 %v14264_v45, %v14462_v1 }
 0x1cc   : > { %v14473_v17 = vpop.f32.mrf.mxu0  ;;  %v20090_v1 = vmov 0  }
 0x1cd   : > { %20086 = vst [vmem:[#allocation60_spill] sm:$0xff] %v14468_v12  ;;  %v1789_v22 = vmax.f32 %v1749_v7, 0.0  ;;  %v1704_v27 = vmul.f32 %v14264_v45, %v14468_v12  ;;  %11871 = vrot.lane.b32.xlu1 %v14477_v19, %s19897_s18  ;;  %v13592_v7 = vld [vmem:[%s13955_s25 + $0x10] sm:$0xff]  }
 0x1ce   : > { %v1588_v36 = vpop.f32.mrf.mxu0  ;;  %2759 = vmatpush1.bf16.msra.mxu1 %v13592_v7 }
 0x1cf   : > { %v14487_v38 = vadd.f32 %v14272_v49, %v1704_v27  ;;  %v14490_v39 = vadd.f32 %v14258_v43, %v1588_v36  ;;  %v14495_v60 = vpack.i.bf16 %v1790_v29, %v1789_v22  ;;  %v14505_v27 = vadd.f32 %v14272_v49, %v1705_v31  ;;  %2760 = vmatprep.subr.bf16.mxu1 %v20090_v1 }
 0x1d0   : > { %v11511_v56 = vpop.f32.mrf.mxu0  ;;  %v14519_v31 = vadd.f32 %v14258_v43, %v1558_v23  ;;  %v20094_v23 = vmax.f32 %v14493_v46, 0.0 }
 0x1d1   : > { %20087 = vst [vmem:[#allocation61_spill] sm:$0xff] %v14490_v39  ;;  %v1706_v0 = vmul.f32 %v14264_v45, %v14490_v39  ;;  %v14501_v4 = vadd.f32 %v11511_v56, %v14258_v43  ;;  %v19854_v7 = vmax.f32 %v14505_v27, 0.0  ;;  %v20093_v34 = vmax.f32 %v14487_v38, 0.0 }
 0x1d2   : > { %v1598_v16 = vpop.f32.mrf.mxu0  ;;  %20091 = vst [vmem:[#allocation64_spill] sm:$0xff] %v14519_v31  ;;  %v14536_v13 = vpack.i.bf16 %v1789_v22, %v20094_v23 }
 0x1d3   : > { %20088 = vst [vmem:[#allocation62_spill] sm:$0xff] %v14501_v4  ;;  %v14509_v36 = vadd.f32 %v14272_v49, %v1706_v0  ;;  %v1709_v3 = vmul.f32 %v14264_v45, %v14501_v4  ;;  %v14514_v55 = vadd.f32 %v14258_v43, %v1598_v16  ;;  %v13593_v4 = vld [vmem:[%s13955_s25 + $0x8] sm:$0xff]   ;;  %v14532_v41 = vpack.i.bf16 %v20093_v34, %v1790_v29 }
 0x1d4   : > { %v11514_v39 = vpop.f32.mrf.mxu0  ;;  %2761 = vmatpush1.bf16.msra.mxu1 %v13593_v4  ;;  %v1700_v4 = vmul.f32 %v14264_v45, %v14519_v31 }
 0x1d5   : > { %20089 = vst [vmem:[#allocation63_spill] sm:$0xff] %v14514_v55  ;;  %v1708_v0 = vmul.f32 %v14264_v45, %v14514_v55  ;;  %v14525_v12 = vadd.f32 %v11514_v39, %v14258_v43  ;;  %v1756_v16 = vadd.f32 %v14272_v49, %v1709_v3  ;;  %v20096_v34 = vmax.f32 %v14509_v36, 0.0  ;;  %2762 = vmatprep.subr.bf16.mxu1 %v20090_v1 }
 0x1d6   : > { %v1608_v56 = vpop.f32.mrf.mxu0 }
 0x1d7   : > { %20092 = vst [vmem:[#allocation65_spill] sm:$0xff] %v14525_v12  ;;  %v14539_v55 = vadd.f32 %v14272_v49, %v1708_v0  ;;  %v1711_v39 = vmul.f32 %v14264_v45, %v14525_v12  ;;  %v14544_v53 = vadd.f32 %v14258_v43, %v1608_v56  ;;  %v14550_v29 = vpack.i.bf16 %v20096_v34, %v19854_v7  ;;  %v13594_v56 = vld [vmem:[%s13955_s25] sm:$0xff]  }
 0x1d8   : > { %v11517_v3 = vpop.f32.mrf.mxu0  ;;  %v1796_v12 = vmax.f32 %v1756_v16, 0.0  ;;  %2763 = vmatpush1.bf16.msra.mxu1 %v13594_v56  ;;  %v14584_v56 = vadd.f32 %v14272_v49, %v1700_v4 }
 0x1d9   : > { %20095 = vst [vmem:[#allocation66_spill] sm:$0xff] %v14544_v53  ;;  %v1710_v0 = vmul.f32 %v14264_v45, %v14544_v53  ;;  %v14557_v23 = vadd.f32 %v11517_v3, %v14258_v43  ;;  %v14563_v9 = vadd.f32 %v14272_v49, %v1711_v39  ;;  %v20099_v53 = vmax.f32 %v14539_v55, 0.0  ;;  %2774 = vmatprep.subr.bf16.mxu1 %v20090_v1 }
 0x1da   : > { %v1618_v5 = vpop.f32.mrf.mxu0 }
 0x1db   : > { %20097 = vst [vmem:[#allocation67_spill] sm:$0xff] %v14557_v23  ;;  %v1757_v34 = vadd.f32 %v14272_v49, %v1710_v0  ;;  %v1713_v7 = vmul.f32 %v14264_v45, %v14557_v23  ;;  %v14569_v22 = vadd.f32 %v14258_v43, %v1618_v5  ;;  %v14573_v51 = vpack.i.bf16 %v1796_v12, %v20099_v53 }
 0x1dc   : > { %v11520_v3 = vpop.f32.mrf.mxu0  ;;  %v1798_v53 = vmax.f32 %v14563_v9, 0.0 }
 0x1dd   : > { %20098 = vst [vmem:[#allocation68_spill] sm:$0xff] %v14569_v22  ;;  %v1712_v16 = vmul.f32 %v14264_v45, %v14569_v22  ;;  %v11523_v39 = vpop.f32.mrf.mxu1  ;;  %v1797_v0 = vmax.f32 %v1757_v34, 0.0  ;;  %11906 = vrot.lane.b32.xlu1 %v14573_v51, %s19884_s28  ;;  %v14588_v23 = vadd.f32 %v14272_v49, %v1713_v7 }
 0x1de   : > { %v14579_v31 = vadd.f32 %v11523_v39, %v14258_v43  ;;  %v1628_v5 = vpop.f32.mrf.mxu0 }
 0x1df   : > { %v1759_v22 = vadd.f32 %v14272_v49, %v1712_v16  ;;  %v1638_v54 = vpop.f32.mrf.mxu1  ;;  %v14594_v39 = vadd.f32 %v14258_v43, %v1628_v5  ;;  %v14608_v5 = vpack.i.bf16 %v1798_v53, %v1797_v0 }
 0x1e0   : > { %20100 = vst [vmem:[#allocation69_spill] sm:$0xff] %v14579_v31  ;;  %v1717_v34 = vmul.f32 %v14264_v45, %v14579_v31  ;;  %v14597_v37 = vadd.f32 %v14258_v43, %v1638_v54  ;;  %v14613_v31 = vadd.f32 %v11520_v3, %v14258_v43  ;;  %v2746_v3 = vsel %vm2744_vm2, %v13595_v30, 0  ;;  %v13596_v30 = vld [vmem:[%s13955_s25 + $0x48] sm:$0xff]  }
 0x1e1   : > { %20101 = vst [vmem:[#allocation70_spill] sm:$0xff] %v14594_v39  ;;  %v1799_v40 = vmax.f32 %v1759_v22, 0.0  ;;  %v11526_v4 = vpop.f32.mrf.mxu1  ;;  %11911 = vrot.lane.b32.xlu1 %v14573_v51, %s19882_s2  ;;  %v1800_v22 = vmax.f32 %v14588_v23, 0.0  ;;  %v14625_v23 = vpack.i.bf16 %v1797_v0, %v1796_v12  ;;  %2775 = vmatpush2.bf16.msra.mxu1 %v2746_v3  ;;  %v20107_v3 = vmax.f32 %v14584_v56, 0.0 }
 0x1e2   : > { %20102 = vst [vmem:[#allocation71_spill] sm:$0xff] %v14597_v37  ;;  %v1764_v9 = vadd.f32 %v14272_v49, %v1717_v34  ;;  %v1716_v7 = vmul.f32 %v14264_v45, %v14597_v37  ;;  %v14606_v16 = vadd.f32 %v11526_v4, %v14258_v43  ;;  %20104 = vst [vmem:[#allocation73_spill] sm:$0xff] %v14613_v31  ;;  %2776 = vmatprep.subr.bf16.mxu1 %v20090_v1 }
 0x1e3   : > { %v1648_v33 = vpop.f32.mrf.mxu1  ;;  %v1714_v34 = vmul.f32 %v14264_v45, %v14594_v39  ;;  %v14623_v63 = vpack.i.bf16 %v1800_v22, %v1799_v40 }
 0x1e4   : > { %20103 = vst [vmem:[#allocation72_spill] sm:$0xff] %v14606_v16  ;;  %v1763_v37 = vadd.f32 %v14272_v49, %v1716_v7  ;;  %v1719_v10 = vmul.f32 %v14264_v45, %v14606_v16  ;;  %v14621_v4 = vadd.f32 %v14258_v43, %v1648_v33  ;;  %v1804_v14 = vmax.f32 %v1764_v9, 0.0 }
 0x1e5   : > { %v11529_v54 = vpop.f32.mrf.mxu1  ;;  %11916 = vrot.lane.b32.xlu1 %v14608_v5, %s19884_s28  ;;  %v1715_v9 = vmul.f32 %v14264_v45, %v14613_v31  ;;  %v20108_v16 = vmax.f32 %v14493_v46, 0.0  ;;  %2777 = vmatpush2.bf16.msra.mxu1 %v13596_v30 }
 0x1e6   : > { %20105 = vst [vmem:[#allocation74_spill] sm:$0xff] %v14621_v4  ;;  %v1803_v2 = vmax.f32 %v1763_v37, 0.0  ;;  %v1766_v39 = vadd.f32 %v14272_v49, %v1719_v10  ;;  %v1718_v7 = vmul.f32 %v14264_v45, %v14621_v4  ;;  %v14634_v33 = vadd.f32 %v11529_v54, %v14258_v43  ;;  %2778 = vmatprep.subr.bf16.mxu1 %v20090_v1 }
 0x1e7   : > { %v1658_v12 = vpop.f32.mrf.mxu1  ;;  %v1761_v37 = vadd.f32 %v14272_v49, %v1714_v34  ;;  %v14650_v31 = vpack.i.bf16 %v20108_v16, %v20107_v3  ;;  %v14666_v46 = vadd.f32 %v14272_v49, %v1715_v9 }
 0x1e8   : > { %20106 = vst [vmem:[#allocation75_spill] sm:$0xff] %v14634_v33  ;;  %v1765_v10 = vadd.f32 %v14272_v49, %v1718_v7  ;;  %v14642_v0 = vpack.i.bf16 %v1804_v14, %v1803_v2  ;;  %v1721_v4 = vmul.f32 %v14264_v45, %v14634_v33  ;;  %v1806_v54 = vmax.f32 %v1766_v39, 0.0 }
 0x1e9   : > { %v14653_v52 = vadd.f32 %v14258_v43, %v1658_v12  ;;  %v11532_v57 = vpop.f32.mrf.mxu1  ;;  %11921 = vrot.lane.b32.xlu1 %v14495_v60, %s19897_s18  ;;  %v14663_v39 = vpack.i.bf16 %v1799_v40, %v1798_v53  ;;  %v13597_v12 = vld [vmem:[%s13955_s25 + $0x40] sm:$0xff]  }
 0x1ea   : > { %v1805_v34 = vmax.f32 %v1765_v10, 0.0  ;;  %11856 = vrot.lane.b32.xlu0 %v14642_v0, %s19884_s28  ;;  %v1768_v2 = vadd.f32 %v14272_v49, %v1721_v4  ;;  %v14661_v14 = vadd.f32 %v11532_v57, %v14258_v43  ;;  %v1801_v10 = vmax.f32 %v1761_v37, 0.0  ;;  %2779 = vmatpush2.bf16.msra.mxu1 %v13597_v12 }
 0x1eb   : > { %20109 = vst [vmem:[#allocation76_spill] sm:$0xff] %v14653_v52  ;;  %v1720_v16 = vmul.f32 %v14264_v45, %v14653_v52  ;;  %v1668_v7 = vpop.f32.mrf.mxu1 }
 0x1ec   : > { %20110 = vst [vmem:[#allocation77_spill] sm:$0xff] %v14661_v14  ;;  %v1808_v3 = vmax.f32 %v1768_v2, 0.0  ;;  %v1723_v33 = vmul.f32 %v14264_v45, %v14661_v14  ;;  %v14674_v4 = vadd.f32 %v14258_v43, %v1668_v7  ;;  %v14678_v40 = vpack.i.bf16 %v1806_v54, %v1805_v34 }
 0x1ed   : > { %v1767_v57 = vadd.f32 %v14272_v49, %v1720_v16  ;;  %11931 = vrot.lane.b32.xlu1 %v14623_v63, %s19884_s28  ;;  %v14688_v2 = vpack.i.bf16 %v1801_v10, %v1800_v22  ;;  %v14694_v54 = vadd.f32 %v14473_v17, %v14258_v43  ;;  %v19886_v34 = vmax.f32 %v14666_v46, 0.0 }
 0x1ee   : > { %20111 = vst [vmem:[#allocation78_spill] sm:$0xff] %v14674_v4  ;;  %11876 = vrot.lane.b32.xlu0 %v14650_v31, %s19882_s2  ;;  %v1770_v53 = vadd.f32 %v14272_v49, %v1723_v33  ;;  %v1722_v9 = vmul.f32 %v14264_v45, %v14674_v4 }
 0x1ef   : > { %v1807_v30 = vmax.f32 %v1767_v57, 0.0  ;;  %20112 = vst [vmem:[#allocation79_spill] sm:$0xff] %v14694_v54  ;;  %v14703_v22 = vpack.i.bf16 %v19886_v34, %v1801_v10  ;;  %v1707_v43 = vmul.f32 %v14264_v45, %v14694_v54  ;;  %v20113_v10 = vmax.f32 %v14487_v38, 0.0 }
 0x1f0   : > { %v1769_v37 = vadd.f32 %v14272_v49, %v1722_v9  ;;  %v1810_v33 = vmax.f32 %v1770_v53, 0.0  ;;  %v11995_v38 = vpack.i.bf16 %v14410_v11, %v14380_v47 }
 0x1f1   : > { %v14690_v16 = vpack.i.bf16 %v1808_v3, %v1807_v30  ;;  %11936 = vrot.lane.b32.xlu1 %v14678_v40, %s19884_s28  ;;  %v1754_v17 = vadd.f32 %v14272_v49, %v1707_v43  ;;  %v20114_v3 = vmax.f32 %v14505_v27, 0.0  ;;  %v11970_v49 = vpack.i.bf16 %v14376_v42, %v14346_v25 }
 0x1f2   : > { %11881 = vrot.lane.b32.xlu0 %v14650_v31, %s19897_s18  ;;  %v1809_v7 = vmax.f32 %v1769_v37, 0.0  ;;  %v20117_v27 = vmov 0.0  }
 0x1f3   : > { %v11895_v57 = vpack.i.bf16 %v20114_v3, %v20113_v10  ;;  %v14722_v45 = vmax.f32 %v1754_v17, 0.0  ;;  %v20122_v3 = vmax.f32 %v14539_v55, 0.0 }
 0x1f4   : > { %v14705_v12 = vpack.i.bf16 %v1810_v33, %v1809_v7 }
 0x1f5   : > { %11946 = vrot.lane.b32.xlu1 %v14703_v22, %s19884_s28 }
 0x1f6   : > { %11886 = vrot.lane.b32.xlu0 %v14495_v60, %s19882_s2 }
 0x1f9   : > { %11951 = vrot.lane.b32.xlu1 %v14453_v58, %s19880_s23  ;;  %v20115_v58 = vmax.f32 %v14509_v36, 0.0  ;;  %v12025_v36 = vpack.i.bf16 %v14424_v28, %v14417_v18 }
 0x1fa   : > { %11891 = vrot.lane.b32.xlu0 %v14429_v32, %s19880_s23  ;;  %s20116_s23 = smov 48   ;;  %v11940_v32 = vpack.i.bf16 %v14348_v26, %v14337_v21 }
 0x1fb   : > { %v11900_v53 = vpack.i.bf16 %v14722_v45, %v20115_v58 }
 0x1fd   : > { %11961 = vrot.lane.b32.xlu1 %v14623_v63, %s19882_s2 }
 0x1fe   : > { %11896 = vrot.lane.b32.xlu0 %v11895_v57, %s19882_s2 }
 0x201   : > { %11971 = vrot.lane.b32.xlu1 %v11970_v49, %s20116_s23 }
 0x202   : > { %11901 = vrot.lane.b32.xlu0 %v11900_v53, %s19882_s2 }
 0x205   : > { %11981 = vrot.lane.b32.xlu1 %v11900_v53, %s19897_s18 }
 0x206   : > { %11926 = vrot.lane.b32.xlu0 %v14608_v5, %s19882_s2  ;;  %s20118_s2 = smov 72  }
 0x209   : > { %11986 = vrot.lane.b32.xlu1 %v14705_v12, %s19884_s28 }
 0x20a   : > { %11941 = vrot.lane.b32.xlu0 %v11940_v32, %s20116_s23 }
 0x20d   : > { %11996 = vrot.lane.b32.xlu1 %v11995_v38, %s20116_s23 }
 0x20e   : > { %11956 = vrot.lane.b32.xlu0 %v11895_v57, %s19897_s18 }
 0x211   : > { %12006 = vrot.lane.b32.xlu1 %v14573_v51, %s19897_s18 }
 0x212   : > { %11966 = vrot.lane.b32.xlu0 %v14690_v16, %s19884_s28 }
 0x215   : > { %2352 = vrot.lane.b32.xlu1 %v20117_v27, %s19884_s28  ;;  %s20120_s28 = smov 120  }
 0x216   : > { %11976 = vrot.lane.b32.xlu0 %v14477_v19, %s20118_s2  ;;  %v14769_v19 = vpop.permute.xlu1 %11811 }
 0x217   : > { %v14847_v55 = vunpack.i.l.bf16 %v14769_v19 }
 0x219   : > { %12026 = vrot.lane.b32.xlu1 %v12025_v36, %s20116_s23  ;;  %20123 = vst [vmem:[#allocation80_spill] sm:$0xff] %v14847_v55 }
 0x21a   : > { %11991 = vrot.lane.b32.xlu0 %v14344_v24, %s20119_s5  ;;  %v20121_v24 = vmax.f32 %v14584_v56, 0.0  ;;  %v14780_v9 = vpop.permute.xlu1 %11836  ;;  %v14796_v56 = vpop.permute.xlu0 %11806 }
 0x21d   : > { %12036 = vrot.lane.b32.xlu1 %v14608_v5, %s19897_s18 }
 0x21e   : > { %12001 = vrot.lane.b32.xlu0 %v14650_v31, %s20118_s2  ;;  %v14778_v31 = vpack.i.bf16 %v20121_v24, %v14458_v61 }
 0x221   : > { %12046 = vrot.lane.b32.xlu1 %v11940_v32, %s20119_s5 }
 0x222   : > { %12011 = vrot.lane.b32.xlu0 %v14642_v0, %s20120_s28 }
 0x225   : > { %12056 = vrot.lane.b32.xlu1 %v11895_v57, %s20118_s2  ;;  %v12160_v57 = vpack.i.bf16 %v20122_v3, %v14722_v45 }
 0x226   : > { %12016 = vrot.lane.b32.xlu0 %v14703_v22, %s20120_s28 }
 0x229   : > { %12066 = vrot.lane.b32.xlu1 %v14690_v16, %s20120_s28 }
 0x22a   : > { %12021 = vrot.lane.b32.xlu0 %v14333_v20, %s20119_s5  ;;  %v12050_v20 = vpack.i.bf16 %v14446_v50, %v14435_v35 }
 0x22d   : > { %12076 = vrot.lane.b32.xlu1 %v14778_v31, %s20116_s23 }
 0x22e   : > { %12031 = vrot.lane.b32.xlu0 %v14495_v60, %s20118_s2  ;;  %v11817_v60 = vpop.permute.xlu0 %11816 }
 0x22f   : > { %v14789_v30 = vpop.permute.xlu1 %11846  ;;  %v11818_v3 = vunpack.i.l.bf16 %v11817_v60 }
 0x230   : > { %v11848_v14 = vunpack.i.l.bf16 %v14789_v30 }
 0x231   : > { %12091 = vrot.lane.b32.xlu1 %v11995_v38, %s20119_s5 }
 0x232   : > { %12041 = vrot.lane.b32.xlu0 %v14678_v40, %s20120_s28  ;;  %v14812_v7 = vpop.permute.xlu0 %11821 }
 0x233   : > { %v14798_v37 = vpop.permute.xlu1 %11851  ;;  %v11823_v1 = vunpack.i.l.bf16 %v14812_v7 }
 0x235   : > { %12101 = vrot.lane.b32.xlu1 %v14703_v22, %s19897_s18 }
 0x236   : > { %12051 = vrot.lane.b32.xlu0 %v12050_v20, %s20116_s23 }
 0x237   : > { %v14807_v33 = vpop.permute.xlu1 %11861 }
 0x239   : > { %12106 = vrot.lane.b32.xlu1 %v14573_v51, %s20118_s2  ;;  %v14824_v51 = vpop.permute.xlu0 %11826 }
 0x23a   : > { %12061 = vrot.lane.b32.xlu0 %v14623_v63, %s19897_s18 }
 0x23b   : > { %v14814_v43 = vpop.permute.xlu1 %11866 }
 0x23d   : > { %2293 = vrot.lane.b32.xlu1 %v20117_v27, %s20120_s28 }
 0x23e   : > { %12071 = vrot.lane.b32.xlu0 %v11970_v49, %s20119_s5  ;;  %v14835_v49 = vpop.permute.xlu0 %11831 }
 0x23f   : > { %v14826_v17 = vpop.permute.xlu1 %11871 }
 0x241   : > { %12121 = vrot.lane.b32.xlu1 %v14532_v41, %s20116_s23 }
 0x242   : > { %12081 = vrot.lane.b32.xlu0 %v11900_v53, %s20118_s2  ;;  %v11808_v53 = vunpack.i.l.bf16 %v14796_v56  ;;  %v14849_v32 = vpop.permute.xlu0 %11841 }
 0x244   : > { %v14852_v24 = vsel %vm2371_vm3, 0.0, %v11808_v53  ;;  %v11849_v53 = vunpack.i.h.bf16 %v14789_v30 }
 0x245   : > { %12131 = vrot.lane.b32.xlu1 %v14678_v40, %s19897_s18 }
 0x246   : > { %12086 = vrot.lane.b32.xlu0 %v14705_v12, %s20120_s28 }
 0x249   : > { %12141 = vrot.lane.b32.xlu1 %v14550_v29, %s20116_s23 }
 0x24a   : > { %12096 = vrot.lane.b32.xlu0 %v14536_v13, %s20116_s23 }
 0x24d   : > { %12151 = vrot.lane.b32.xlu1 %v14690_v16, %s19897_s18 }
 0x24e   : > { %12111 = vrot.lane.b32.xlu0 %v14642_v0, %s19897_s18 }
 0x24f   : > { %v11907_v10 = vpop.permute.xlu1 %11906 }
 0x250   : > { %v11909_v30 = vunpack.i.h.bf16 %v11907_v10  ;;  %v11908_v52 = vunpack.i.l.bf16 %v11907_v10 }
 0x251   : > { %12161 = vrot.lane.b32.xlu1 %v12160_v57, %s20116_s23 }
 0x252   : > { %12116 = vrot.lane.b32.xlu0 %v12025_v36, %s20119_s5  ;;  %v11819_v36 = vunpack.i.h.bf16 %v11817_v60  ;;  %v11824_v60 = vunpack.i.h.bf16 %v14812_v7 }
 0x253   : > { %v14839_v58 = vpop.permute.xlu1 %11911 }
 0x255   : > { %12166 = vrot.lane.b32.xlu1 %v14705_v12, %s19897_s18 }
 0x256   : > { %12126 = vrot.lane.b32.xlu0 %v14608_v5, %s20118_s2  ;;  %v14860_v5 = vsel %vm2397_vm4, %v14852_v24, %v14847_v55 }
 0x257   : > { %v11917_v38 = vpop.permute.xlu1 %11916 }
 0x259   : > { %12181 = vrot.lane.b32.xlu1 %v14625_v23, %s20116_s23  ;;  %v2432_v23 = vsel %vm2431_vm5, %v14860_v5, %v11818_v3 }
 0x25a   : > { %12136 = vrot.lane.b32.xlu0 %v12050_v20, %s20119_s5  ;;  %v2433_v20 = vsel %vm2431_vm5, %v14860_v5, %v11819_v36 }
 0x25b   : > { %v14862_v57 = vpop.permute.xlu1 %11921  ;;  %v2474_v44 = vsel %vm2472_vm6, %v2433_v20, %v11849_v53  ;;  %v11918_v20 = vunpack.i.l.bf16 %v11917_v38 }
 0x25c   : > { %v14864_v34 = vpop.permute.xlu0 %11856 }
 0x25d   : > { %2210 = vrot.lane.b32.xlu1 %v20117_v27, %s19897_s18  ;;  %s20135_s18 = smov 16  }
 0x25e   : > { %12146 = vrot.lane.b32.xlu0 %v14623_v63, %s20118_s2  ;;  %v2473_v63 = vsel %vm2472_vm6, %v2432_v23, %v11848_v14  ;;  %v11863_v23 = vunpack.i.l.bf16 %v14807_v33 }
 0x25f   : > { %v14877_v55 = vpop.permute.xlu1 %11931 }
 0x260   : > { %v11877_v4 = vpop.permute.xlu0 %11876 }
 0x261   : > { %v11879_v54 = vunpack.i.h.bf16 %v11877_v4  ;;  %v11878_v27 = vunpack.i.l.bf16 %v11877_v4  ;;  %12196 = vrot.lane.b32.xlu1 %v14663_v39, %s20116_s23  ;;  %v11864_v39 = vunpack.i.h.bf16 %v14807_v33 }
 0x262   : > { %12156 = vrot.lane.b32.xlu0 %v14778_v31, %s20119_s5  ;;  %v11919_v31 = vunpack.i.h.bf16 %v11917_v38 }
 0x263   : > { %v2556_v36 = vsel %vm2554_vm8, %v11879_v54, %v11909_v30  ;;  %v2514_v3 = vsel %vm20020_vm7, %v2473_v63, %v11878_v27  ;;  %v2515_v10 = vsel %vm20020_vm7, %v2474_v44, %v11879_v54  ;;  %v2555_v4 = vsel %vm2554_vm8, %v11878_v27, %v11908_v52  ;;  %v14890_v48 = vpop.permute.xlu1 %11936 }
 0x264   : > { %v2601_v7 = vpack.c.bf16 %v2515_v10, %v2514_v3  ;;  %v14892_v14 = vpop.permute.xlu0 %11881  ;;  %v2602_v53 = vpack.c.bf16 %v2556_v36, %v2555_v4  ;;  %v2434_v54 = vsel %vm2431_vm5, %v14860_v5, %v11823_v1  ;;  %v2435_v27 = vsel %vm2431_vm5, %v14860_v5, %v11824_v60 }
 0x265   : > { %12206 = vrot.lane.b32.xlu1 %v14550_v29, %s20119_s5  ;;  %v2475_v29 = vsel %vm2472_vm6, %v2434_v54, %v11863_v23  ;;  %v11834_v36 = vunpack.i.h.bf16 %v14835_v49  ;;  %v11833_v3 = vunpack.i.l.bf16 %v14835_v49 }
 0x266   : > { %12171 = vrot.lane.b32.xlu0 %v14703_v22, %s20118_s2  ;;  %10897 = vmatprep.mubr.msk.bf16.mxu1 %vm2704_vm9, %v2602_v53  ;;  %v2476_v22 = vsel %vm2472_vm6, %v2435_v27, %v11864_v39  ;;  %v11868_v53 = vunpack.i.l.bf16 %v14814_v43  ;;  %v20124_v39 = vmax.f32 %v14666_v46, 0.0  ;;  %v11933_v46 = vunpack.i.l.bf16 %v14877_v55 }
 0x267   : > { %v11947_v44 = vpop.permute.xlu1 %11946  ;;  %2781 = vmatmul.mubr.bf16.vlgmr.msra.gmra.mxu1 %v2601_v7  ;;  %v11869_v7 = vunpack.i.h.bf16 %v14814_v43  ;;  %v2436_v49 = vsel %vm2431_vm5, %v14860_v5, %v11833_v3  ;;  %v2437_v23 = vsel %vm2431_vm5, %v14860_v5, %v11834_v36  ;;  %v11934_v43 = vunpack.i.h.bf16 %v14877_v55 }
 0x268   : > { %v11887_v52 = vpop.permute.xlu0 %11886  ;;  %v11843_v55 = vunpack.i.l.bf16 %v14849_v32  ;;  %v11949_v36 = vunpack.i.h.bf16 %v11947_v44  ;;  %v11948_v3 = vunpack.i.l.bf16 %v11947_v44 }
 0x269   : > { %v11889_v33 = vunpack.i.h.bf16 %v11887_v52  ;;  %v11888_v30 = vunpack.i.l.bf16 %v11887_v52  ;;  %12216 = vrot.lane.b32.xlu1 %v14690_v16, %s20118_s2 }
 0x26a   : > { %12176 = vrot.lane.b32.xlu0 %v14536_v13, %s20119_s5 }
 0x26b   : > { %v2558_v63 = vsel %vm2554_vm8, %v11889_v33, %v11919_v31  ;;  %v2557_v1 = vsel %vm2554_vm8, %v11888_v30, %v11918_v20  ;;  %v2516_v60 = vsel %vm20020_vm7, %v2475_v29, %v11888_v30  ;;  %v2517_v38 = vsel %vm20020_vm7, %v2476_v22, %v11889_v33  ;;  %v14917_v16 = vpop.permute.xlu1 %11951 }
 0x26c   : > { %v14919_v10 = vpop.permute.xlu0 %11891  ;;  %v2604_v13 = vpack.c.bf16 %v2558_v63, %v2557_v1  ;;  %v2603_v4 = vpack.c.bf16 %v2517_v38, %v2516_v60  ;;  %v2478_v20 = vsel %vm2472_vm6, %v2437_v23, %v11869_v7  ;;  %v11844_v63 = vunpack.i.h.bf16 %v14849_v32 }
 0x26d   : > { %1983 = vrot.lane.b32.xlu1 %v20124_v39, %s20116_s23  ;;  %v11874_v7 = vunpack.i.h.bf16 %v14826_v17  ;;  %v11858_v23 = vunpack.i.l.bf16 %v14864_v34 }
 0x26e   : > { %12186 = vrot.lane.b32.xlu0 %v14642_v0, %s20118_s2  ;;  %10898 = vmatprep.mubr.msk.bf16.mxu1 %vm2704_vm9, %v2604_v13  ;;  %v2477_v0 = vsel %vm2472_vm6, %v2436_v49, %v11868_v53  ;;  %v11873_v53 = vunpack.i.l.bf16 %v14826_v17  ;;  %v11859_v49 = vunpack.i.h.bf16 %v14864_v34  ;;  %v11814_v17 = vunpack.i.h.bf16 %v14769_v19 }
 0x26f   : > { %v14933_v52 = vpop.permute.xlu1 %11961  ;;  %2789 = vmatmul.mubr.bf16.gmra.mxu1 %v2603_v4  ;;  %v11913_v34 = vunpack.i.l.bf16 %v14839_v58 }
 0x270   : > { %v11897_v54 = vpop.permute.xlu0 %11896 }
 0x271   : > { %v11899_v27 = vunpack.i.h.bf16 %v11897_v54  ;;  %v11898_v31 = vunpack.i.l.bf16 %v11897_v54 }
 0x272   : > { %12191 = vrot.lane.b32.xlu0 %v14532_v41, %s20119_s5 }
 0x273   : > { %v2560_v33 = vsel %vm2554_vm8, %v11899_v27, %v11934_v43  ;;  %v2559_v30 = vsel %vm2554_vm8, %v11898_v31, %v11933_v46  ;;  %v2518_v29 = vsel %vm20020_vm7, %v2477_v0, %v11898_v31  ;;  %v2519_v22 = vsel %vm20020_vm7, %v2478_v20, %v11899_v27  ;;  %v14947_v1 = vpop.permute.xlu1 %11971 }
 0x274   : > { %v11902_v60 = vpop.permute.xlu0 %11901  ;;  %v2606_v41 = vpack.c.bf16 %v2560_v33, %v2559_v30  ;;  %v2605_v38 = vpack.c.bf16 %v2519_v22, %v2518_v29  ;;  %v2438_v46 = vsel %vm2431_vm5, %v14860_v5, %v11843_v55  ;;  %v2439_v27 = vsel %vm2431_vm5, %v14860_v5, %v11844_v63 }
 0x275   : > { %v11904_v13 = vunpack.i.h.bf16 %v11902_v60  ;;  %v11903_v4 = vunpack.i.l.bf16 %v11902_v60  ;;  %v11914_v31 = vunpack.i.h.bf16 %v14839_v58  ;;  %v2479_v0 = vsel %vm2472_vm6, %v2438_v46, %v11873_v53 }
 0x276   : > { %12201 = vrot.lane.b32.xlu0 %v14678_v40, %s20118_s2  ;;  %10899 = vmatprep.mubr.msk.bf16.mxu1 %vm2704_vm9, %v2606_v41  ;;  %v11828_v40 = vunpack.i.l.bf16 %v14824_v51  ;;  %v2480_v19 = vsel %vm2472_vm6, %v2439_v27, %v11874_v7  ;;  %v11854_v20 = vunpack.i.h.bf16 %v14798_v37  ;;  %v11853_v33 = vunpack.i.l.bf16 %v14798_v37 }
 0x277   : > { %v2562_v32 = vsel %vm2554_vm8, %v11904_v13, %v11949_v36  ;;  %v2561_v39 = vsel %vm2554_vm8, %v11903_v4, %v11948_v3  ;;  %v14958_v44 = vpop.permute.xlu1 %11981  ;;  %2797 = vmatmul.mubr.bf16.gmra.mxu1 %v2605_v38  ;;  %v2520_v30 = vsel %vm20020_vm7, %v2479_v0, %v11903_v4  ;;  %v2521_v5 = vsel %vm20020_vm7, %v2480_v19, %v11904_v13 }
 0x278   : > { %v14960_v54 = vpop.permute.xlu0 %11926  ;;  %v2608_v43 = vpack.c.bf16 %v2562_v32, %v2561_v39  ;;  %v2564_v29 = vsel %vm2554_vm8, %v11914_v31, %v11859_v49  ;;  %v2563_v58 = vsel %vm2554_vm8, %v11913_v34, %v11858_v23  ;;  %v11883_v22 = vunpack.i.l.bf16 %v14892_v14 }
 0x279   : > { %v2399_v60 = vsel %vm2397_vm4, %v14852_v24, %v11814_v17  ;;  %v2400_v37 = vsel %vm2397_vm4, %v14852_v24, %v11828_v40  ;;  %v2607_v41 = vpack.c.bf16 %v2521_v5, %v2520_v30  ;;  %v2610_v3 = vpack.c.bf16 %v2564_v29, %v2563_v58 }
 0x27a   : > { %12211 = vrot.lane.b32.xlu0 %v14688_v2, %s20116_s23  ;;  %10900 = vmatprep.mubr.msk.bf16.mxu1 %vm2704_vm9, %v2608_v43  ;;  %v11884_v2 = vunpack.i.h.bf16 %v14892_v14  ;;  %v2440_v38 = vsel %vm2431_vm5, %v2399_v60, %v11853_v33  ;;  %v2441_v36 = vsel %vm2431_vm5, %v2400_v37, %v11854_v20  ;;  %v11929_v14 = vunpack.i.h.bf16 %v14960_v54 }
 0x27b   : > { %v14983_v63 = vpop.permute.xlu1 %11986  ;;  %v11928_v13 = vunpack.i.l.bf16 %v14960_v54  ;;  %v2481_v53 = vsel %vm2472_vm6, %v2440_v38, %v11883_v22  ;;  %v11838_v39 = vunpack.i.l.bf16 %v14780_v9  ;;  %v11939_v49 = vunpack.i.h.bf16 %v14890_v48 }
 0x27c   : > { %v14985_v55 = vpop.permute.xlu0 %11941  ;;  %v2482_v32 = vsel %vm2472_vm6, %v2441_v36, %v11884_v2  ;;  %v11938_v23 = vunpack.i.l.bf16 %v14890_v48  ;;  %v11894_v54 = vunpack.i.h.bf16 %v14919_v10  ;;  %v11893_v43 = vunpack.i.l.bf16 %v14919_v10 }
 0x27d   : > { %v2522_v17 = vsel %vm20020_vm7, %v2481_v53, %v11913_v34  ;;  %v2523_v40 = vsel %vm20020_vm7, %v2482_v32, %v11914_v31  ;;  %v2566_v46 = vsel %vm2554_vm8, %v11929_v14, %v11939_v49  ;;  %v11943_v31 = vunpack.i.l.bf16 %v14985_v55 }
 0x27e   : > { %1884 = vrot.lane.b32.xlu0 %v14722_v45, %s20119_s5  ;;  %v11829_v45 = vunpack.i.h.bf16 %v14824_v51  ;;  %v2565_v51 = vsel %vm2554_vm8, %v11928_v13, %v11938_v23  ;;  %v2609_v19 = vpack.c.bf16 %v2523_v40, %v2522_v17  ;;  %v11924_v33 = vunpack.i.h.bf16 %v14862_v57 }
 0x27f   : > { %v14997_v4 = vpop.permute.xlu1 %11996  ;;  %2805 = vmatmul.mubr.bf16.gmra.mxu1 %v2607_v41  ;;  %v2612_v20 = vpack.c.bf16 %v2566_v46, %v2565_v51  ;;  %v11923_v30 = vunpack.i.l.bf16 %v14862_v57  ;;  %v11839_v22 = vunpack.i.h.bf16 %v14780_v9  ;;  %v11964_v60 = vunpack.i.h.bf16 %v14933_v52 }
 0x280   : > { %v11957_v7 = vpop.permute.xlu0 %11956  ;;  %10901 = vmatprep.mubr.msk.bf16.mxu1 %vm2704_vm9, %v2610_v3  ;;  %v2401_v48 = vsel %vm2397_vm4, %v14852_v24, %v11829_v45  ;;  %v11963_v37 = vunpack.i.l.bf16 %v14933_v52  ;;  %v11953_v57 = vunpack.i.l.bf16 %v14917_v16  ;;  %v2404_v36 = vsel %vm2397_vm4, %v14852_v24, %v11943_v31 }
 0x281   : > { %v2442_v10 = vsel %vm2431_vm5, %v2401_v48, %v11893_v43  ;;  %v11959_v9 = vunpack.i.h.bf16 %v11957_v7  ;;  %v11958_v32 = vunpack.i.l.bf16 %v11957_v7  ;;  %v11954_v23 = vunpack.i.h.bf16 %v14917_v16 }
 0x282   : > { %12221 = vrot.lane.b32.xlu0 %v14705_v12, %s20118_s2  ;;  %v2402_v12 = vsel %vm2397_vm4, %v14852_v24, %v11838_v39  ;;  %v2483_v41 = vsel %vm2472_vm6, %v2442_v10, %v11923_v30  ;;  %v11944_v16 = vunpack.i.h.bf16 %v14985_v55  ;;  %v11973_v48 = vunpack.i.l.bf16 %v14947_v1 }
 0x283   : > { %v15014_v27 = vpop.permute.xlu1 %12006  ;;  %v2443_v34 = vsel %vm2431_vm5, %v2402_v12, %v11894_v54  ;;  %v2524_v3 = vsel %vm20020_vm7, %v2483_v41, %v11928_v13  ;;  %v2403_v54 = vsel %vm2397_vm4, %v14852_v24, %v11839_v22  ;;  %v11984_v22 = vunpack.i.h.bf16 %v14958_v44 }
 0x284   : > { %v11967_v0 = vpop.permute.xlu0 %11966  ;;  %v2484_v38 = vsel %vm2472_vm6, %v2443_v34, %v11924_v33  ;;  %v2444_v13 = vsel %vm2431_vm5, %v2403_v54, %v11953_v57  ;;  %v2406_v55 = vsel %vm2397_vm4, %v14852_v24, %v11973_v48  ;;  %v11989_v41 = vunpack.i.h.bf16 %v14983_v63 }
 0x285   : > { %v11969_v5 = vunpack.i.h.bf16 %v11967_v0  ;;  %v11968_v29 = vunpack.i.l.bf16 %v11967_v0  ;;  %v2525_v53 = vsel %vm20020_vm7, %v2484_v38, %v11929_v14  ;;  %v2445_v14 = vsel %vm2431_vm5, %v2404_v36, %v11954_v23 }
 0x286   : > { %v2611_v43 = vpack.c.bf16 %v2525_v53, %v2524_v3  ;;  %v2485_v46 = vsel %vm2472_vm6, %v2444_v13, %v11958_v32  ;;  %v2486_v51 = vsel %vm2472_vm6, %v2445_v14, %v11959_v9  ;;  %v11809_v0 = vunpack.i.h.bf16 %v14796_v56 }
 0x287   : > { %v15025_v58 = vpop.permute.xlu1 %2352  ;;  %2813 = vmatmul.mubr.bf16.gmra.mxu1 %v2609_v19  ;;  %v2568_v45 = vsel %vm2554_vm8, %v11964_v60, %v11969_v5  ;;  %v2567_v39 = vsel %vm2554_vm8, %v11963_v37, %v11968_v29  ;;  %v2526_v10 = vsel %vm20020_vm7, %v2485_v46, %v11963_v37  ;;  %v2527_v34 = vsel %vm20020_vm7, %v2486_v51, %v11964_v60 }
 0x288   : > { %20125 = vst [vmem:[#allocation81_spill] sm:$0xff] %v15025_v58  ;;  %v11977_v2 = vpop.permute.xlu0 %11976  ;;  %10902 = vmatprep.mubr.msk.bf16.mxu1 %vm2704_vm9, %v2612_v20  ;;  %v2614_v17 = vpack.c.bf16 %v2568_v45, %v2567_v39  ;;  %v2373_v33 = vsel %vm2371_vm3, 0.0, %v11809_v0  ;;  %v2405_v56 = vsel %vm2397_vm4, %v14852_v24, %v11944_v16  ;;  %v2613_v29 = vpack.c.bf16 %v2527_v34, %v2526_v10 }
 0x289   : > { %v11978_v12 = vunpack.i.l.bf16 %v11977_v2  ;;  %v11979_v19 = vunpack.i.h.bf16 %v11977_v2  ;;  %v11974_v2 = vunpack.i.h.bf16 %v14947_v1  ;;  %v11983_v60 = vunpack.i.l.bf16 %v14958_v44 }
 0x28a   : > { %v11988_v38 = vunpack.i.l.bf16 %v14983_v63  ;;  %v11998_v53 = vunpack.i.l.bf16 %v14997_v4  ;;  %v12008_v10 = vunpack.i.l.bf16 %v15014_v27 }
 0x28b   : > { %v15040_v52 = vpop.permute.xlu1 %12026  ;;  %v2446_v30 = vsel %vm2431_vm5, %v2405_v56, %v11978_v12  ;;  %v2447_v37 = vsel %vm2431_vm5, %v2406_v55, %v11979_v19  ;;  %v2407_v16 = vsel %vm2397_vm4, %v2373_v33, %v11974_v2  ;;  %v12009_v55 = vunpack.i.h.bf16 %v15014_v27 }
 0x28c   : > { %v15042_v49 = vpop.permute.xlu0 %11991  ;;  %v2487_v32 = vsel %vm2472_vm6, %v2446_v30, %v11983_v60  ;;  %v2488_v23 = vsel %vm2472_vm6, %v2447_v37, %v11984_v22 }
 0x28d   : > { %v11993_v5 = vunpack.i.l.bf16 %v15042_v49  ;;  %v11994_v48 = vunpack.i.h.bf16 %v15042_v49 }
 0x28f   : > { %v15049_v7 = vpop.permute.xlu1 %12036  ;;  %2821 = vmatmul.mubr.bf16.gmra.mxu1 %v2611_v43  ;;  %v2374_v44 = vsel %vm2371_vm3, 0.0, %v11993_v5  ;;  %v11999_v5 = vunpack.i.h.bf16 %v14997_v4 }
 0x290   : > { %v12002_v40 = vpop.permute.xlu0 %12001  ;;  %10903 = vmatprep.mubr.msk.bf16.mxu1 %vm2704_vm9, %v2614_v17  ;;  %v2408_v12 = vsel %vm2397_vm4, %v2374_v44, %v11998_v53  ;;  %v12039_v44 = vunpack.i.h.bf16 %v15049_v7 }
 0x291   : > { %v12004_v45 = vunpack.i.h.bf16 %v12002_v40  ;;  %v12003_v39 = vunpack.i.l.bf16 %v12002_v40 }
 0x293   : > { %v15059_v31 = vpop.permute.xlu1 %12046  ;;  %v2448_v19 = vsel %vm2431_vm5, %v2407_v16, %v12003_v39  ;;  %v2449_v34 = vsel %vm2431_vm5, %v2408_v12, %v12004_v45 }
 0x294   : > { %v12012_v20 = vpop.permute.xlu0 %12011  ;;  %v2489_v49 = vsel %vm2472_vm6, %v2448_v19, %v12008_v10  ;;  %v2490_v2 = vsel %vm2472_vm6, %v2449_v34, %v12009_v55 }
 0x295   : > { %v12014_v57 = vunpack.i.h.bf16 %v12012_v20  ;;  %v12013_v36 = vunpack.i.l.bf16 %v12012_v20 }
 0x297   : > { %v15074_v24 = vpop.permute.xlu1 %12056  ;;  %2829 = vmatmul.mubr.bf16.gmra.mxu1 %v2613_v29  ;;  %v2572_v17 = vsel %vm2554_vm8, %v12014_v57, %v15025_v58  ;;  %v2571_v14 = vsel %vm2554_vm8, %v12013_v36, %v15025_v58  ;;  %v2375_v29 = vsel %vm2371_vm3, 0.0, %v11994_v48  ;;  %v2530_v22 = vsel %vm20020_vm7, %v2489_v49, %v12013_v36 }
 0x298   : > { %v12017_v3 = vpop.permute.xlu0 %12016  ;;  %v2618_v56 = vpack.c.bf16 %v2572_v17, %v2571_v14  ;;  %v12048_v36 = vunpack.i.l.bf16 %v15059_v31  ;;  %v12029_v48 = vunpack.i.h.bf16 %v15040_v52  ;;  %v12059_v49 = vunpack.i.h.bf16 %v15074_v24 }
 0x299   : > { %v12019_v9 = vunpack.i.h.bf16 %v12017_v3  ;;  %v12018_v1 = vunpack.i.l.bf16 %v12017_v3 }
 0x29b   : > { %v2570_v63 = vsel %vm2554_vm8, %v12019_v9, %v11989_v41  ;;  %v2569_v54 = vsel %vm2554_vm8, %v12018_v1, %v11988_v38  ;;  %v2528_v43 = vsel %vm20020_vm7, %v2487_v32, %v12018_v1  ;;  %v2529_v13 = vsel %vm20020_vm7, %v2488_v23, %v12019_v9  ;;  %v15088_v46 = vpop.permute.xlu1 %12066 }
 0x29c   : > { %v12022_v51 = vpop.permute.xlu0 %12021  ;;  %v2616_v40 = vpack.c.bf16 %v2570_v63, %v2569_v54  ;;  %v2615_v0 = vpack.c.bf16 %v2529_v13, %v2528_v43  ;;  %v2531_v41 = vsel %vm20020_vm7, %v2490_v2, %v12014_v57  ;;  %v12028_v38 = vunpack.i.l.bf16 %v15040_v52 }
 0x29d   : > { %v12023_v20 = vunpack.i.l.bf16 %v12022_v51  ;;  %v2409_v9 = vsel %vm2397_vm4, %v2375_v29, %v11999_v5  ;;  %v12024_v4 = vunpack.i.h.bf16 %v12022_v51  ;;  %v2617_v39 = vpack.c.bf16 %v2531_v41, %v2530_v22 }
 0x29e   : > { %10904 = vmatprep.mubr.msk.bf16.mxu1 %vm2704_vm9, %v2616_v40  ;;  %v12038_v43 = vunpack.i.l.bf16 %v15049_v7  ;;  %v12069_v13 = vunpack.i.h.bf16 %v15088_v46  ;;  %v12068_v17 = vunpack.i.l.bf16 %v15088_v46  ;;  %v2378_v7 = vsel %vm2371_vm3, 0.0, %v12048_v36 }
 0x29f   : > { %v15098_v30 = vpop.permute.xlu1 %12076  ;;  %2837 = vmatmul.mubr.bf16.gmra.mxu1 %v2615_v0  ;;  %v2376_v60 = vsel %vm2371_vm3, 0.0, %v12023_v20  ;;  %v2377_v0 = vsel %vm2371_vm3, 0.0, %v12024_v4  ;;  %v12058_v5 = vunpack.i.l.bf16 %v15074_v24  ;;  %v12049_v4 = vunpack.i.h.bf16 %v15059_v31 }
 0x2a0   : > { %v12032_v33 = vpop.permute.xlu0 %12031  ;;  %10905 = vmatprep.mubr.msk.bf16.mxu1 %vm2704_vm9, %v2618_v56  ;;  %v2410_v45 = vsel %vm2397_vm4, %v2376_v60, %v12028_v38  ;;  %v2576_v34 = vsel %vm2554_vm8, %v12069_v13, %v15025_v58  ;;  %v2575_v20 = vsel %vm2554_vm8, %v12068_v17, %v15025_v58  ;;  %v2411_v52 = vsel %vm2397_vm4, %v2377_v0, %v12029_v48 }
 0x2a1   : > { %v12034_v37 = vunpack.i.h.bf16 %v12032_v33  ;;  %v12033_v27 = vunpack.i.l.bf16 %v12032_v33  ;;  %v2622_v60 = vpack.c.bf16 %v2576_v34, %v2575_v20 }
 0x2a3   : > { %v15109_v3 = vpop.permute.xlu1 %12091  ;;  %v2450_v23 = vsel %vm2431_vm5, %v2409_v9, %v12033_v27  ;;  %v2451_v57 = vsel %vm2431_vm5, %v2410_v45, %v12034_v37  ;;  %v2452_v37 = vsel %vm2431_vm5, %v2411_v52, %v12058_v5  ;;  %v12078_v45 = vunpack.i.l.bf16 %v15098_v30 }
 0x2a4   : > { %v12042_v53 = vpop.permute.xlu0 %12041  ;;  %v2491_v12 = vsel %vm2472_vm6, %v2450_v23, %v12038_v43  ;;  %v2492_v19 = vsel %vm2472_vm6, %v2451_v57, %v12039_v44  ;;  %v2379_v57 = vsel %vm2371_vm3, 0.0, %v12049_v4 }
 0x2a5   : > { %v12044_v1 = vunpack.i.h.bf16 %v12042_v53  ;;  %v12043_v32 = vunpack.i.l.bf16 %v12042_v53 }
 0x2a7   : > { %v2574_v63 = vsel %vm2554_vm8, %v12044_v1, %v15025_v58  ;;  %v2573_v54 = vsel %vm2554_vm8, %v12043_v32, %v15025_v58  ;;  %v12102_v14 = vpop.permute.xlu1 %12101  ;;  %2845 = vmatmul.mubr.bf16.gmra.mxu1 %v2617_v39  ;;  %v2532_v10 = vsel %vm20020_vm7, %v2491_v12, %v12043_v32  ;;  %v2533_v46 = vsel %vm20020_vm7, %v2492_v19, %v12044_v1 }
 0x2a8   : > { %v12052_v51 = vpop.permute.xlu0 %12051  ;;  %v2620_v40 = vpack.c.bf16 %v2574_v63, %v2573_v54  ;;  %v2619_v22 = vpack.c.bf16 %v2533_v46, %v2532_v10  ;;  %v12104_v0 = vunpack.i.h.bf16 %v12102_v14  ;;  %v12093_v10 = vunpack.i.l.bf16 %v15109_v3 }
 0x2a9   : > { %v12053_v16 = vunpack.i.l.bf16 %v12052_v51  ;;  %v12054_v24 = vunpack.i.h.bf16 %v12052_v51 }
 0x2aa   : > { %10906 = vmatprep.mubr.msk.bf16.mxu1 %vm2704_vm9, %v2620_v40 }
 0x2ab   : > { %v2412_v56 = vsel %vm2397_vm4, %v2378_v7, %v12053_v16  ;;  %v15138_v55 = vpop.permute.xlu1 %12106  ;;  %v2413_v31 = vsel %vm2397_vm4, %v2379_v57, %v12054_v24 }
 0x2ac   : > { %v12062_v33 = vpop.permute.xlu0 %12061  ;;  %v2453_v27 = vsel %vm2431_vm5, %v2412_v56, %v12059_v49  ;;  %v12108_v4 = vunpack.i.l.bf16 %v15138_v55 }
 0x2ad   : > { %v12064_v29 = vunpack.i.h.bf16 %v12062_v33  ;;  %v12063_v2 = vunpack.i.l.bf16 %v12062_v33 }
 0x2af   : > { %v15144_v41 = vpop.permute.xlu1 %2293  ;;  %2853 = vmatmul.mubr.bf16.gmra.mxu1 %v2619_v22  ;;  %v2493_v53 = vsel %vm2472_vm6, %v2452_v37, %v12063_v2  ;;  %v2494_v9 = vsel %vm2472_vm6, %v2453_v27, %v12064_v29  ;;  %v2382_v27 = vsel %vm2371_vm3, %v14291_v62, %v12093_v10 }
 0x2b0   : > { %v12072_v38 = vpop.permute.xlu0 %12071  ;;  %10907 = vmatprep.mubr.msk.bf16.mxu1 %vm2704_vm9, %v2622_v60  ;;  %v2534_v44 = vsel %vm20020_vm7, %v2493_v53, %v12068_v17  ;;  %v2535_v36 = vsel %vm20020_vm7, %v2494_v9, %v12069_v13  ;;  %v12103_v13 = vunpack.i.l.bf16 %v12102_v14  ;;  %v2579_v22 = vsel %vm2554_vm8, %v15144_v41, %v15025_v58 }
 0x2b1   : > { %v12073_v1 = vunpack.i.l.bf16 %v12072_v38  ;;  %v2621_v51 = vpack.c.bf16 %v2535_v36, %v2534_v44  ;;  %v12074_v16 = vunpack.i.h.bf16 %v12072_v38  ;;  %v12079_v60 = vunpack.i.h.bf16 %v15098_v30 }
 0x2b2   : > { %v15185_v53 = vpack.c.bf16 %v2579_v22, %v2579_v22  ;;  %v12109_v9 = vunpack.i.h.bf16 %v15138_v55 }
 0x2b3   : > { %v2380_v32 = vsel %vm2371_vm3, 0.0, %v12073_v1  ;;  %v15154_v39 = vpop.permute.xlu1 %12121  ;;  %v2381_v33 = vsel %vm2371_vm3, %v14286_v59, %v12074_v16 }
 0x2b4   : > { %v12082_v23 = vpop.permute.xlu0 %12081  ;;  %v2414_v43 = vsel %vm2397_vm4, %v2380_v32, %v12078_v45  ;;  %v2415_v38 = vsel %vm2397_vm4, %v2381_v33, %v12079_v60  ;;  %v12124_v22 = vunpack.i.h.bf16 %v15154_v39 }
 0x2b5   : > { %v12084_v63 = vunpack.i.h.bf16 %v12082_v23  ;;  %v12083_v54 = vunpack.i.l.bf16 %v12082_v23  ;;  %v2456_v62 = vsel %vm2431_vm5, %v2415_v38, %v12108_v4 }
 0x2b7   : > { %v2454_v40 = vsel %vm2431_vm5, %v2413_v31, %v12083_v54  ;;  %v2455_v17 = vsel %vm2431_vm5, %v2414_v43, %v12084_v63  ;;  %v15161_v48 = vpop.permute.xlu1 %12131  ;;  %2861 = vmatmul.mubr.bf16.gmra.mxu1 %v2621_v51  ;;  %v12094_v63 = vunpack.i.h.bf16 %v15109_v3 }
 0x2b8   : > { %v12087_v12 = vpop.permute.xlu0 %12086  ;;  %v2495_v46 = vsel %vm2472_vm6, %v2454_v40, %v12103_v13  ;;  %v2496_v34 = vsel %vm2472_vm6, %v2455_v17, %v12104_v0  ;;  %v12123_v17 = vunpack.i.l.bf16 %v15154_v39  ;;  %v12134_v3 = vunpack.i.h.bf16 %v15161_v48 }
 0x2b9   : > { %v12089_v19 = vunpack.i.h.bf16 %v12087_v12  ;;  %v12088_v7 = vunpack.i.l.bf16 %v12087_v12  ;;  %v2383_v13 = vsel %vm2371_vm3, %v14306_v8, %v12094_v63 }
 0x2bb   : > { %v2578_v20 = vsel %vm2554_vm8, %v12089_v19, %v15025_v58  ;;  %v2577_v52 = vsel %vm2554_vm8, %v12088_v7, %v15025_v58  ;;  %v2536_v14 = vsel %vm20020_vm7, %v2495_v46, %v12088_v7  ;;  %v2537_v56 = vsel %vm20020_vm7, %v2496_v34, %v12089_v19  ;;  %v15174_v49 = vpop.permute.xlu1 %12141 }
 0x2bc   : > { %v12097_v5 = vpop.permute.xlu0 %12096  ;;  %v2624_v29 = vpack.c.bf16 %v2578_v20, %v2577_v52  ;;  %v2623_v2 = vpack.c.bf16 %v2537_v56, %v2536_v14  ;;  %v12133_v19 = vunpack.i.l.bf16 %v15161_v48  ;;  %v12143_v60 = vunpack.i.l.bf16 %v15174_v49 }
 0x2bd   : > { %v12098_v37 = vunpack.i.l.bf16 %v12097_v5  ;;  %v12099_v31 = vunpack.i.h.bf16 %v12097_v5  ;;  %v12144_v63 = vunpack.i.h.bf16 %v15174_v49 }
 0x2be   : > { %10908 = vmatprep.mubr.msk.bf16.mxu1 %vm2704_vm9, %v2624_v29 }
 0x2bf   : > { %v2416_v59 = vsel %vm2397_vm4, %v2382_v27, %v12098_v37  ;;  %2869 = vmatmul.mubr.bf16.gmra.mxu1 %v2623_v2  ;;  %v12152_v24 = vpop.permute.xlu1 %12151  ;;  %v2417_v7 = vsel %vm2397_vm4, %v2383_v13, %v12099_v31 }
 0x2c0   : > { %v12112_v1 = vpop.permute.xlu0 %12111  ;;  %10909 = vmatprep.mubr.msk.bf16.mxu1 %vm2704_vm9, %v15185_v53  ;;  %v2457_v44 = vsel %vm2431_vm5, %v2416_v59, %v12109_v9  ;;  %v12154_v59 = vunpack.i.h.bf16 %v12152_v24  ;;  %v12153_v9 = vunpack.i.l.bf16 %v12152_v24 }
 0x2c1   : > { %v12114_v30 = vunpack.i.h.bf16 %v12112_v1  ;;  %v12113_v32 = vunpack.i.l.bf16 %v12112_v1 }
 0x2c3   : > { %v2497_v36 = vsel %vm2472_vm6, %v2456_v62, %v12113_v32  ;;  %v2498_v45 = vsel %vm2472_vm6, %v2457_v44, %v12114_v30  ;;  %v15200_v51 = vpop.permute.xlu1 %12161 }
 0x2c4   : > { %v12117_v23 = vpop.permute.xlu0 %12116  ;;  %v2538_v55 = vsel %vm20020_vm7, %v2497_v36, %v15144_v41  ;;  %v2539_v57 = vsel %vm20020_vm7, %v2498_v45, %v15144_v41 }
 0x2c5   : > { %v12118_v54 = vunpack.i.l.bf16 %v12117_v23  ;;  %v2625_v43 = vpack.c.bf16 %v2539_v57, %v2538_v55  ;;  %v12119_v10 = vunpack.i.h.bf16 %v12117_v23 }
 0x2c7   : > { %v2384_v40 = vsel %vm2371_vm3, %v14302_v6, %v12118_v54  ;;  %2877 = vmatmul.mubr.bf16.gmra.mxu1 %v2625_v43  ;;  %v12167_v14 = vpop.permute.xlu1 %12166  ;;  %v2385_v5 = vsel %vm2371_vm3, %v14321_v15, %v12119_v10  ;;  %v12163_v54 = vunpack.i.l.bf16 %v15200_v51 }
 0x2c8   : > { %v12127_v0 = vpop.permute.xlu0 %12126  ;;  %10910 = vmatprep.mubr.msk.bf16.mxu1 %vm2704_vm9, %v15185_v53  ;;  %v2418_v6 = vsel %vm2397_vm4, %v2384_v40, %v12123_v17  ;;  %v2419_v4 = vsel %vm2397_vm4, %v2385_v5, %v12124_v22  ;;  %v12168_v13 = vunpack.i.l.bf16 %v12167_v14 }
 0x2c9   : > { %v12129_v16 = vunpack.i.h.bf16 %v12127_v0  ;;  %v12128_v12 = vunpack.i.l.bf16 %v12127_v0  ;;  %v12169_v0 = vunpack.i.h.bf16 %v12167_v14  ;;  %v12164_v14 = vunpack.i.h.bf16 %v15200_v51 }
 0x2cb   : > { %v2458_v46 = vsel %vm2431_vm5, %v2417_v7, %v12128_v12  ;;  %v2459_v34 = vsel %vm2431_vm5, %v2418_v6, %v12129_v16  ;;  %v15231_v15 = vpop.permute.xlu1 %12181 }
 0x2cc   : > { %v12137_v20 = vpop.permute.xlu0 %12136  ;;  %v2499_v8 = vsel %vm2472_vm6, %v2458_v46, %v12133_v19  ;;  %v2500_v52 = vsel %vm2472_vm6, %v2459_v34, %v12134_v3 }
 0x2cd   : > { %v12138_v56 = vunpack.i.l.bf16 %v12137_v20  ;;  %v2540_v33 = vsel %vm20020_vm7, %v2499_v8, %v15144_v41  ;;  %v2541_v48 = vsel %vm20020_vm7, %v2500_v52, %v15144_v41 }
 0x2ce   : > { %v2627_v2 = vpack.c.bf16 %v2541_v48, %v2540_v33 }
 0x2cf   : > { %v2386_v29 = vsel %vm2371_vm3, %v14337_v21, %v12138_v56  ;;  %v12139_v21 = vunpack.i.h.bf16 %v12137_v20  ;;  %v15247_v43 = vpop.permute.xlu1 %2210  ;;  %v12183_v56 = vunpack.i.l.bf16 %v15231_v15 }
 0x2d0   : > { %v12147_v37 = vpop.permute.xlu0 %12146  ;;  %2885 = vmatmul.mubr.bf16.gmra.mxu1 %v2627_v2  ;;  %v2420_v1 = vsel %vm2397_vm4, %v2386_v29, %v12143_v60 }
 0x2d1   : > { %v12149_v27 = vunpack.i.h.bf16 %v12147_v37  ;;  %v12148_v38 = vunpack.i.l.bf16 %v12147_v37  ;;  %10911 = vmatprep.mubr.msk.bf16.mxu1 %vm2704_vm9, %v15185_v53  ;;  %v2387_v23 = vsel %vm2371_vm3, %v14348_v26, %v12139_v21 }
 0x2d2   : > { %v2421_v16 = vsel %vm2397_vm4, %v2387_v23, %v12144_v63 }
 0x2d3   : > { %v2460_v39 = vsel %vm2431_vm5, %v2419_v4, %v12148_v38  ;;  %v2461_v30 = vsel %vm2431_vm5, %v2420_v1, %v12149_v27  ;;  %v12197_v34 = vpop.permute.xlu1 %12196 }
 0x2d4   : > { %v12157_v32 = vpop.permute.xlu0 %12156  ;;  %v2501_v62 = vsel %vm2472_vm6, %v2460_v39, %v12153_v9  ;;  %v2502_v44 = vsel %vm2472_vm6, %v2461_v30, %v12154_v59  ;;  %v12184_v30 = vunpack.i.h.bf16 %v15231_v15 }
 0x2d5   : > { %v12158_v24 = vunpack.i.l.bf16 %v12157_v32  ;;  %v2542_v36 = vsel %vm20020_vm7, %v2501_v62, %v15144_v41  ;;  %v2543_v45 = vsel %vm20020_vm7, %v2502_v44, %v15144_v41 }
 0x2d6   : > { %v2628_v57 = vpack.c.bf16 %v2543_v45, %v2542_v36 }
 0x2d7   : > { %v2388_v55 = vsel %vm2371_vm3, %v14346_v25, %v12158_v24  ;;  %v12159_v25 = vunpack.i.h.bf16 %v12157_v32  ;;  %v12207_v27 = vpop.permute.xlu1 %12206  ;;  %v12198_v32 = vunpack.i.l.bf16 %v12197_v34 }
 0x2d8   : > { %v12172_v31 = vpop.permute.xlu0 %12171  ;;  %2893 = vmatmul.mubr.bf16.gmra.mxu1 %v2628_v57  ;;  %v2422_v26 = vsel %vm2397_vm4, %v2388_v55, %v12163_v54  ;;  %v12208_v36 = vunpack.i.l.bf16 %v12207_v27 }
 0x2d9   : > { %v12174_v40 = vunpack.i.h.bf16 %v12172_v31  ;;  %v12173_v17 = vunpack.i.l.bf16 %v12172_v31  ;;  %10912 = vmatprep.mubr.msk.bf16.mxu1 %vm2704_vm9, %v15185_v53  ;;  %v2389_v20 = vsel %vm2371_vm3, %v14376_v42, %v12159_v25 }
 0x2da   : > { %v2423_v29 = vsel %vm2397_vm4, %v2389_v20, %v12164_v14 }
 0x2db   : > { %v2462_v49 = vsel %vm2431_vm5, %v2421_v16, %v12173_v17  ;;  %v2463_v12 = vsel %vm2431_vm5, %v2422_v26, %v12174_v40 }
 0x2dc   : > { %v12177_v3 = vpop.permute.xlu0 %12176  ;;  %v2503_v19 = vsel %vm2472_vm6, %v2462_v49, %v12168_v13  ;;  %v2504_v7 = vsel %vm2472_vm6, %v2463_v12, %v12169_v0  ;;  %v2394_v13 = vsel %vm2371_vm3, %v14435_v35, %v12208_v36 }
 0x2dd   : > { %v12178_v6 = vunpack.i.l.bf16 %v12177_v3  ;;  %v2544_v10 = vsel %vm20020_vm7, %v2503_v19, %v15144_v41  ;;  %v2545_v46 = vsel %vm20020_vm7, %v2504_v7, %v15144_v41  ;;  %v12179_v42 = vunpack.i.h.bf16 %v12177_v3 }
 0x2de   : > { %v2629_v52 = vpack.c.bf16 %v2545_v46, %v2544_v10  ;;  %v12209_v7 = vunpack.i.h.bf16 %v12207_v27 }
 0x2df   : > { %v2390_v8 = vsel %vm2371_vm3, %v14380_v47, %v12178_v6  ;;  %v2391_v21 = vsel %vm2371_vm3, %v14410_v11, %v12179_v42  ;;  %v12199_v11 = vunpack.i.h.bf16 %v12197_v34 }
 0x2e0   : > { %v12187_v33 = vpop.permute.xlu0 %12186  ;;  %2901 = vmatmul.mubr.bf16.gmra.mxu1 %v2629_v52  ;;  %v2424_v2 = vsel %vm2397_vm4, %v2390_v8, %v12183_v56  ;;  %v2425_v23 = vsel %vm2397_vm4, %v2391_v21, %v12184_v30  ;;  %v2395_v8 = vsel %vm2371_vm3, %v14446_v50, %v12209_v7 }
 0x2e1   : > { %v12189_v48 = vunpack.i.h.bf16 %v12187_v33  ;;  %v12188_v5 = vunpack.i.l.bf16 %v12187_v33  ;;  %10913 = vmatprep.mubr.msk.bf16.mxu1 %vm2704_vm9, %v15185_v53 }
 0x2e3   : > { %v2464_v22 = vsel %vm2431_vm5, %v2423_v29, %v12188_v5  ;;  %v2465_v47 = vsel %vm2431_vm5, %v2424_v2, %v12189_v48 }
 0x2e4   : > { %v12192_v60 = vpop.permute.xlu0 %12191  ;;  %v2505_v51 = vsel %vm2472_vm6, %v2464_v22, %v15247_v43  ;;  %v2506_v37 = vsel %vm2472_vm6, %v2465_v47, %v15247_v43 }
 0x2e5   : > { %v12193_v38 = vunpack.i.l.bf16 %v12192_v60  ;;  %v2546_v59 = vsel %vm20020_vm7, %v2505_v51, %v15144_v41  ;;  %v2547_v9 = vsel %vm20020_vm7, %v2506_v37, %v15144_v41  ;;  %v12194_v4 = vunpack.i.h.bf16 %v12192_v60  ;;  %v15337_v51 = vld [vmem:[%s13960_s29] ss:$0 sm:$0xff] }
 0x2e6   : > { %v2630_v1 = vpack.c.bf16 %v2547_v9, %v2546_v59 }
 0x2e7   : > { %v2392_v39 = vsel %vm2371_vm3, %v14417_v18, %v12193_v38  ;;  %v2393_v45 = vsel %vm2371_vm3, %v14424_v28, %v12194_v4  ;;  %v12217_v18 = vpop.permute.xlu1 %12216 }
 0x2e8   : > { %v12202_v62 = vpop.permute.xlu0 %12201  ;;  %2909 = vmatmul.mubr.bf16.gmra.mxu1 %v2630_v1  ;;  %v2426_v55 = vsel %vm2397_vm4, %v2392_v39, %v12198_v32  ;;  %v2427_v31 = vsel %vm2397_vm4, %v2393_v45, %v12199_v11  ;;  %v12219_v16 = vunpack.i.h.bf16 %v12217_v18  ;;  %v12218_v26 = vunpack.i.l.bf16 %v12217_v18 }
 0x2e9   : > { %v12204_v44 = vunpack.i.h.bf16 %v12202_v62  ;;  %v12203_v24 = vunpack.i.l.bf16 %v12202_v62  ;;  %10914 = vmatprep.mubr.msk.bf16.mxu1 %vm2704_vm9, %v15185_v53 }
 0x2ea   : > { %v2468_v3 = vsel %vm2431_vm5, %v2427_v31, %v12218_v26 }
 0x2eb   : > { %v2466_v15 = vsel %vm2431_vm5, %v2425_v23, %v12203_v24  ;;  %v2467_v57 = vsel %vm2431_vm5, %v2426_v55, %v12204_v44  ;;  %v2509_v46 = vsel %vm2472_vm6, %v2468_v3, %v15247_v43  ;;  %v1984_v52 = vpop.permute.xlu1 %1983 }
 0x2ec   : > { %v12212_v63 = vpop.permute.xlu0 %12211  ;;  %v2507_v54 = vsel %vm2472_vm6, %v2466_v15, %v15247_v43  ;;  %v2508_v28 = vsel %vm2472_vm6, %v2467_v57, %v15247_v43 }
 0x2ed   : > { %v12213_v40 = vunpack.i.l.bf16 %v12212_v63  ;;  %v2548_v17 = vsel %vm20020_vm7, %v2507_v54, %v15144_v41  ;;  %v2549_v0 = vsel %vm20020_vm7, %v2508_v28, %v15144_v41  ;;  %v12214_v10 = vunpack.i.h.bf16 %v12212_v63 }
 0x2ee   : > { %v2631_v25 = vpack.c.bf16 %v2549_v0, %v2548_v17 }
 0x2ef   : > { %v2428_v49 = vsel %vm2397_vm4, %v2394_v13, %v12213_v40  ;;  %v2429_v33 = vsel %vm2397_vm4, %v2395_v8, %v12214_v10 }
 0x2f0   : > { %v1885_v12 = vpop.permute.xlu0 %1884  ;;  %v2469_v19 = vsel %vm2431_vm5, %v2428_v49, %v12219_v16  ;;  %2917 = vmatmul.mubr.bf16.gmra.mxu1 %v2631_v25 }
 0x2f1   : > { %v2510_v6 = vsel %vm2472_vm6, %v2469_v19, %v15247_v43  ;;  %10915 = vmatprep.mubr.msk.bf16.mxu1 %vm2704_vm9, %v15185_v53  ;;  %v2396_v35 = vsel %vm2371_vm3, %v14458_v61, %v1885_v12  ;;  %v2550_v61 = vsel %vm20020_vm7, %v2509_v46, %v15144_v41 }
 0x2f2   : > { %v2551_v20 = vsel %vm20020_vm7, %v2510_v6, %v15144_v41  ;;  %v2430_v48 = vsel %vm2397_vm4, %v2396_v35, %v1984_v52 }
 0x2f3   : > { %v2632_v2 = vpack.c.bf16 %v2551_v20, %v2550_v61 }
 0x2f4   : > { %v12222_v34 = vpop.permute.xlu0 %12221 }
 0x2f5   : > { %v12224_v14 = vunpack.i.h.bf16 %v12222_v34  ;;  %v12223_v56 = vunpack.i.l.bf16 %v12222_v34 }
 0x2f7   : > { %v2471_v5 = vsel %vm2431_vm5, %v2430_v48, %v12224_v14  ;;  %v2470_v29 = vsel %vm2431_vm5, %v2429_v33, %v12223_v56 }
 0x2f8   : > { %2925 = vmatmul.mubr.bf16.gmra.mxu1 %v2632_v2  ;;  %v2511_v50 = vsel %vm2472_vm6, %v2470_v29, %v15247_v43  ;;  %v2512_v42 = vsel %vm2472_vm6, %v2471_v5, %v15247_v43 }
 0x2f9   : > { %10916 = vmatprep.mubr.msk.bf16.mxu1 %vm2704_vm9, %v15185_v53  ;;  %v2552_v22 = vsel %vm20020_vm7, %v2511_v50, %v15144_v41  ;;  %v2553_v47 = vsel %vm20020_vm7, %v2512_v42, %v15144_v41 }
 0x2fa   : > { %v2633_v60 = vpack.c.bf16 %v2553_v47, %v2552_v22 }
 0x300   : > { %2933 = vmatmul.mubr.bf16.gmra.mxu1 %v2633_v60 }
 0x327   : > { %v2782_v37 = vpop.f32.mrf.mxu1 }
 0x328   : > { %v2783_v27 = vadd.f32 %v15337_v51, %v2782_v37 }
 0x329   : > { %v2784_v38 = vpop.f32.mrf.mxu1 }
 0x32a   : > { %2981 = vrot.lane.b32.xlu1 %v2783_v27, %s20119_s5 }
 0x32b   : > { %v2785_v59 = vpop.f32.mrf.mxu1 }
 0x32c   : > { %v2786_v9 = vadd.f32 %v15337_v51, %v2785_v59 }
 0x32d   : > { %v2787_v53 = vpop.f32.mrf.mxu1 }
 0x32e   : > { %2983 = vrot.lane.b32.xlu0 %v2786_v9, %s20119_s5 }
 0x32f   : > { %v2790_v4 = vpop.f32.mrf.mxu1 }
 0x330   : > { %v2791_v1 = vadd.f32 %v15337_v51, %v2790_v4 }
 0x331   : > { %v2792_v41 = vpop.f32.mrf.mxu1 }
 0x332   : > { %2985 = vrot.lane.b32.xlu1 %v2791_v1, %s20119_s5 }
 0x333   : > { %v2793_v21 = vpop.f32.mrf.mxu1 }
 0x334   : > { %v2794_v39 = vadd.f32 %v15337_v51, %v2793_v21 }
 0x335   : > { %v2795_v30 = vpop.f32.mrf.mxu1 }
 0x336   : > { %2987 = vrot.lane.b32.xlu0 %v2794_v39, %s20119_s5 }
 0x337   : > { %v2798_v32 = vpop.f32.mrf.mxu1 }
 0x338   : > { %v2799_v62 = vadd.f32 %v15337_v51, %v2798_v32 }
 0x339   : > { %v2800_v44 = vpop.f32.mrf.mxu1 }
 0x33a   : > { %2989 = vrot.lane.b32.xlu1 %v2799_v62, %s20119_s5 }
 0x33b   : > { %v2801_v24 = vpop.f32.mrf.mxu1 }
 0x33c   : > { %v2802_v36 = vadd.f32 %v15337_v51, %v2801_v24 }
 0x33d   : > { %v2803_v45 = vpop.f32.mrf.mxu1 }
 0x33e   : > { %2991 = vrot.lane.b32.xlu0 %v2802_v36, %s20119_s5  ;;  %v13598_v45 = vld [vmem:[%s20058_s14 + $0xa0] sm:$0xff]  }
 0x33f   : > { %v2806_v23 = vpop.f32.mrf.mxu1  ;;  %11533 = vmatprep.subr.bf16.mxu1 %v13598_v45 }
 0x340   : > { %v2807_v55 = vadd.f32 %v15337_v51, %v2806_v23  ;;  %11534 = vmatpush3.bf16.msra.mxu1 %v13598_v45 }
 0x341   : > { %v2808_v11 = vpop.f32.mrf.mxu1 }
 0x342   : > { %2993 = vrot.lane.b32.xlu1 %v2807_v55, %s20119_s5 }
 0x343   : > { %v2809_v18 = vpop.f32.mrf.mxu1 }
 0x344   : > { %v2810_v15 = vadd.f32 %v15337_v51, %v2809_v18 }
 0x345   : > { %v2811_v57 = vpop.f32.mrf.mxu1 }
 0x346   : > { %2995 = vrot.lane.b32.xlu0 %v2810_v15, %s20119_s5 }
 0x347   : > { %v2814_v63 = vpop.f32.mrf.mxu1 }
 0x348   : > { %v2815_v54 = vadd.f32 %v15337_v51, %v2814_v63 }
 0x349   : > { %v2816_v28 = vpop.f32.mrf.mxu1 }
 0x34a   : > { %2997 = vrot.lane.b32.xlu1 %v2815_v54, %s20119_s5 }
 0x34b   : > { %v2817_v31 = vpop.f32.mrf.mxu1 }
 0x34c   : > { %v2818_v40 = vadd.f32 %v15337_v51, %v2817_v31  ;;  %v15399_v31 = vld [vmem:[%s20126_s3] ss:$0 sm:$0xff]  ;;  %s20136_s3 = smov 96  }
 0x34d   : > { %v2819_v17 = vpop.f32.mrf.mxu1 }
 0x34e   : > { %2999 = vrot.lane.b32.xlu0 %v2818_v40, %s20119_s5 }
 0x34f   : > { %v2822_v0 = vpop.f32.mrf.mxu1 }
 0x350   : > { %v2823_v13 = vadd.f32 %v15337_v51, %v2822_v0 }
 0x351   : > { %v2824_v16 = vpop.f32.mrf.mxu1 }
 0x352   : > { %3001 = vrot.lane.b32.xlu1 %v2823_v13, %s20119_s5  ;;  %v20128_v13 = vld [vmem:[#allocation41_spill] sm:$0xff] }
 0x353   : > { %v2825_v26 = vpop.f32.mrf.mxu1 }
 0x354   : > { %v2826_v25 = vadd.f32 %v15337_v51, %v2825_v26 }
 0x355   : > { %v2827_v49 = vpop.f32.mrf.mxu1 }
 0x356   : > { %3003 = vrot.lane.b32.xlu0 %v2826_v25, %s20119_s5  ;;  %v15409_v49 = vld [vmem:[%s20127_s8] ss:$0 sm:$0xff]  ;;  %s19912_s8 = smov 64  }
 0x357   : > { %v2830_v12 = vpop.f32.mrf.mxu1 }
 0x358   : > { %v2831_v3 = vadd.f32 %v15337_v51, %v2830_v12 }
 0x359   : > { %v2832_v19 = vpop.f32.mrf.mxu1 }
 0x35a   : > { %3005 = vrot.lane.b32.xlu1 %v2831_v3, %s20119_s5 }
 0x35b   : > { %v2833_v7 = vpop.f32.mrf.mxu1 }
 0x35c   : > { %v2834_v6 = vadd.f32 %v15337_v51, %v2833_v7  ;;  %v20130_v7 = vld [vmem:[#allocation40_spill] sm:$0xff] }
 0x35d   : > { %v2835_v10 = vpop.f32.mrf.mxu1 }
 0x35e   : > { %3007 = vrot.lane.b32.xlu0 %v2834_v6, %s20119_s5 }
 0x35f   : > { %v2838_v35 = vpop.f32.mrf.mxu1 }
 0x360   : > { %v2839_v46 = vadd.f32 %v15337_v51, %v2838_v35 }
 0x361   : > { %v2840_v34 = vpop.f32.mrf.mxu1 }
 0x362   : > { %3009 = vrot.lane.b32.xlu1 %v2839_v46, %s20119_s5  ;;  %v13599_v34 = vld [vmem:[%s20058_s14 + $0x38] sm:$0xff]  }
 0x363   : > { %v2841_v20 = vpop.f32.mrf.mxu1  ;;  %4300 = vmatpush1.bf16.msra.mxu0 %v13599_v34  ;;  %v20143_v34 = vld [vmem:[#allocation46_spill] sm:$0xff] }
 0x364   : > { %v2842_v8 = vadd.f32 %v15337_v51, %v2841_v20 }
 0x365   : > { %v2843_v52 = vpop.f32.mrf.mxu1 }
 0x366   : > { %3011 = vrot.lane.b32.xlu0 %v2842_v8, %s20119_s5 }
 0x367   : > { %v2846_v14 = vpop.f32.mrf.mxu1 }
 0x368   : > { %v2847_v56 = vadd.f32 %v15337_v51, %v2846_v14 }
 0x369   : > { %v2848_v33 = vpop.f32.mrf.mxu1 }
 0x36a   : > { %3013 = vrot.lane.b32.xlu1 %v2847_v56, %s20119_s5  ;;  %v20132_v56 = vld [vmem:[#allocation43_spill] sm:$0xff] }
 0x36b   : > { %v2849_v48 = vpop.f32.mrf.mxu1 }
 0x36c   : > { %v2850_v61 = vadd.f32 %v15337_v51, %v2849_v48 }
 0x36d   : > { %v2851_v5 = vpop.f32.mrf.mxu1 }
 0x36e   : > { %3015 = vrot.lane.b32.xlu0 %v2850_v61, %s20119_s5 }
 0x36f   : > { %v2854_v29 = vpop.f32.mrf.mxu1 }
 0x370   : > { %v2855_v2 = vadd.f32 %v15337_v51, %v2854_v29 }
 0x371   : > { %v2856_v50 = vpop.f32.mrf.mxu1 }
 0x372   : > { %3017 = vrot.lane.b32.xlu1 %v2855_v2, %s20119_s5  ;;  %v20133_v2 = vmov 0  }
 0x373   : > { %v2857_v42 = vpop.f32.mrf.mxu1  ;;  %4301 = vmatprep.subr.bf16.mxu0 %v20133_v2 }
 0x374   : > { %v2858_v22 = vadd.f32 %v15337_v51, %v2857_v42 }
 0x375   : > { %v2859_v47 = vpop.f32.mrf.mxu1 }
 0x376   : > { %3019 = vrot.lane.b32.xlu0 %v2858_v22, %s20119_s5 }
 0x377   : > { %v2862_v60 = vpop.f32.mrf.mxu1 }
 0x378   : > { %v2863_v37 = vadd.f32 %v15337_v51, %v2862_v60  ;;  %v20134_v60 = vld [vmem:[#allocation42_spill] sm:$0xff] }
 0x379   : > { %v2864_v27 = vpop.f32.mrf.mxu1 }
 0x37a   : > { %3021 = vrot.lane.b32.xlu1 %v2863_v37, %s20119_s5 }
 0x37b   : > { %v2865_v38 = vpop.f32.mrf.mxu1 }
 0x37c   : > { %v2866_v59 = vadd.f32 %v15337_v51, %v2865_v38 }
 0x37d   : > { %v2867_v9 = vpop.f32.mrf.mxu1 }
 0x37e   : > { %3023 = vrot.lane.b32.xlu0 %v2866_v59, %s20119_s5  ;;  %v13600_v9 = vld [vmem:[%s20058_s14 + $0x30] sm:$0xff]  }
 0x37f   : > { %v2870_v53 = vpop.f32.mrf.mxu1  ;;  %4302 = vmatpush1.bf16.msra.mxu0 %v13600_v9 }
 0x380   : > { %v2871_v4 = vadd.f32 %v15337_v51, %v2870_v53  ;;  %4303 = vmatprep.subr.bf16.mxu0 %v20133_v2 }
 0x381   : > { %v2872_v1 = vpop.f32.mrf.mxu1 }
 0x382   : > { %3025 = vrot.lane.b32.xlu1 %v2871_v4, %s20119_s5 }
 0x383   : > { %v2873_v41 = vpop.f32.mrf.mxu1 }
 0x384   : > { %v2874_v21 = vadd.f32 %v15337_v51, %v2873_v41 }
 0x385   : > { %v2875_v39 = vpop.f32.mrf.mxu1 }
 0x386   : > { %3027 = vrot.lane.b32.xlu0 %v2874_v21, %s20119_s5 }
 0x387   : > { %v2878_v30 = vpop.f32.mrf.mxu1 }
 0x388   : > { %v2879_v32 = vadd.f32 %v15337_v51, %v2878_v30  ;;  %v20137_v30 = vld [vmem:[#allocation45_spill] sm:$0xff] }
 0x389   : > { %v2880_v62 = vpop.f32.mrf.mxu1 }
 0x38a   : > { %3029 = vrot.lane.b32.xlu1 %v2879_v32, %s20119_s5  ;;  %v13601_v62 = vld [vmem:[%s20058_s14 + $0x28] sm:$0xff]  }
 0x38b   : > { %v2881_v44 = vpop.f32.mrf.mxu1  ;;  %4304 = vmatpush1.bf16.msra.mxu0 %v13601_v62  ;;  %v13606_v62 = vld [vmem:[%s20058_s14 + $0x8] sm:$0xff]  }
 0x38c   : > { %v2882_v24 = vadd.f32 %v15337_v51, %v2881_v44  ;;  %4305 = vmatprep.subr.bf16.mxu0 %v20133_v2 }
 0x38d   : > { %v2883_v36 = vpop.f32.mrf.mxu1 }
 0x38e   : > { %3031 = vrot.lane.b32.xlu0 %v2882_v24, %s20119_s5 }
 0x390   : > { %v2886_v23 = vpop.f32.mrf.mxu1 }
 0x391   : > { %v2887_v55 = vadd.f32 %v15337_v51, %v2886_v23  ;;  %v20139_v23 = vld [vmem:[#allocation44_spill] sm:$0xff] }
 0x392   : > { %v2888_v11 = vpop.f32.mrf.mxu1 }
 0x393   : > { %3033 = vrot.lane.b32.xlu1 %v2887_v55, %s20119_s5 }
 0x394   : > { %v2889_v18 = vpop.f32.mrf.mxu1 }
 0x395   : > { %v2890_v15 = vadd.f32 %v15337_v51, %v2889_v18 }
 0x396   : > { %v2891_v57 = vpop.f32.mrf.mxu1 }
 0x397   : > { %3035 = vrot.lane.b32.xlu0 %v2890_v15, %s20119_s5  ;;  %v13602_v57 = vld [vmem:[%s20058_s14 + $0x98] sm:$0xff]  }
 0x398   : > { %v2894_v63 = vpop.f32.mrf.mxu1  ;;  %11535 = vmatprep.subr.bf16.mxu1 %v13602_v57 }
 0x399   : > { %v2895_v54 = vadd.f32 %v15337_v51, %v2894_v63  ;;  %v13603_v63 = vld [vmem:[%s20058_s14 + $0x20] sm:$0xff]   ;;  %11536 = vmatpush3.bf16.msra.mxu1 %v13602_v57 }
 0x39a   : > { %v2896_v28 = vpop.f32.mrf.mxu1  ;;  %4306 = vmatpush1.bf16.msra.mxu0 %v13603_v63 }
 0x39b   : > { %3037 = vrot.lane.b32.xlu1 %v2895_v54, %s20119_s5  ;;  %4307 = vmatprep.subr.bf16.mxu0 %v20133_v2 }
 0x39c   : > { %v2897_v40 = vpop.f32.mrf.mxu1  ;;  %v2982_v17 = vpop.permute.xlu1 %2981 }
 0x39d   : > { %v2898_v0 = vadd.f32 %v15337_v51, %v2897_v40  ;;  %v15404_v16 = vsel %vm2371_vm3, %v20128_v13, %v2982_v17 }
 0x39e   : > { %20129 = vst [vmem:[#allocation41_spill] sm:$0xff] %v15404_v16  ;;  %v3148_v26 = vmul.f32 %v15399_v31, %v15404_v16  ;;  %v2899_v25 = vpop.f32.mrf.mxu1 }
 0x39f   : > { %3039 = vrot.lane.b32.xlu0 %v2898_v0, %s20119_s5  ;;  %v20141_v0 = vld [vmem:[#allocation47_spill] sm:$0xff] }
 0x3a0   : > { %v2902_v12 = vpop.f32.mrf.mxu1  ;;  %v2984_v3 = vpop.permute.xlu0 %2983  ;;  %v15418_v10 = vadd.f32 %v15409_v49, %v3148_v26 }
 0x3a1   : > { %v2903_v19 = vadd.f32 %v15337_v51, %v2902_v12  ;;  %v15415_v6 = vsel %vm2371_vm3, %v20130_v7, %v2984_v3  ;;  %v13604_v3 = vld [vmem:[%s20058_s14 + $0x18] sm:$0xff]  }
 0x3a2   : > { %20131 = vst [vmem:[#allocation40_spill] sm:$0xff] %v15415_v6  ;;  %v3149_v35 = vmul.f32 %v15399_v31, %v15415_v6  ;;  %v2904_v46 = vpop.f32.mrf.mxu1  ;;  %v19918_v48 = vmax.f32 %v15418_v10, 0.0  ;;  %4308 = vmatpush1.bf16.msra.mxu0 %v13604_v3  ;;  %v20149_v3 = vld [vmem:[#allocation51_spill] sm:$0xff] }
 0x3a3   : > { %3041 = vrot.lane.b32.xlu1 %v2903_v19, %s20119_s5  ;;  %4309 = vmatprep.subr.bf16.mxu0 %v20133_v2 }
 0x3a4   : > { %v15425_v20 = vadd.f32 %v15409_v49, %v3149_v35  ;;  %v2905_v8 = vpop.f32.mrf.mxu1  ;;  %v2986_v52 = vpop.permute.xlu1 %2985 }
 0x3a5   : > { %v2906_v14 = vadd.f32 %v15337_v51, %v2905_v8  ;;  %v15430_v33 = vsel %vm2371_vm3, %v20132_v56, %v2986_v52 }
 0x3a6   : > { %v19915_v61 = vmax.f32 %v15425_v20, 0.0  ;;  %v3150_v5 = vmul.f32 %v15399_v31, %v15430_v33  ;;  %v2907_v29 = vpop.f32.mrf.mxu1 }
 0x3a7   : > { %3043 = vrot.lane.b32.xlu0 %v2906_v14, %s20119_s5  ;;  %v13605_v29 = vld [vmem:[%s20058_s14 + $0x10] sm:$0xff]  }
 0x3a8   : > { %v2910_v50 = vpop.f32.mrf.mxu1  ;;  %v2988_v42 = vpop.permute.xlu0 %2987  ;;  %v15442_v22 = vpack.i.bf16 %v19915_v61, %v19918_v48  ;;  %v15450_v27 = vadd.f32 %v15409_v49, %v3150_v5  ;;  %4310 = vmatpush1.bf16.msra.mxu0 %v13605_v29 }
 0x3a9   : > { %v2911_v47 = vadd.f32 %v15337_v51, %v2910_v50  ;;  %v15447_v37 = vsel %vm2371_vm3, %v20134_v60, %v2988_v42  ;;  %4311 = vmatprep.subr.bf16.mxu0 %v20133_v2 }
 0x3aa   : > { %v3151_v38 = vmul.f32 %v15399_v31, %v15447_v37  ;;  %v2912_v59 = vpop.f32.mrf.mxu1  ;;  %12226 = vrot.lane.b32.xlu1 %v15442_v22, %s20135_s18  ;;  %v19914_v41 = vmax.f32 %v15450_v27, 0.0 }
 0x3ab   : > { %3045 = vrot.lane.b32.xlu0 %v2911_v47, %s20119_s5  ;;  %v20145_v59 = vld [vmem:[#allocation49_spill] sm:$0xff] }
 0x3ac   : > { %v15459_v53 = vadd.f32 %v15409_v49, %v3151_v38  ;;  %v2913_v4 = vpop.f32.mrf.mxu1  ;;  %v2990_v1 = vpop.permute.xlu1 %2989  ;;  %4312 = vmatpush1.bf16.msra.mxu0 %v13606_v62 }
 0x3ad   : > { %v15468_v32 = vsel %vm2371_vm3, %v20137_v30, %v2990_v1  ;;  %v2914_v44 = vadd.f32 %v15337_v51, %v2913_v4  ;;  %4313 = vmatprep.subr.bf16.mxu0 %v20133_v2 }
 0x3ae   : > { %v19911_v21 = vmax.f32 %v15459_v53, 0.0  ;;  %v2915_v39 = vpop.f32.mrf.mxu1  ;;  %12231 = vrot.lane.b32.xlu1 %v15442_v22, %s20136_s3  ;;  %20138 = vst [vmem:[#allocation43_spill] sm:$0xff] %v15468_v32  ;;  %v3152_v11 = vmul.f32 %v15399_v31, %v15468_v32 }
 0x3b0   : > { %v2918_v24 = vpop.f32.mrf.mxu1  ;;  %v2992_v36 = vpop.permute.xlu0 %2991  ;;  %v15476_v45 = vpack.i.bf16 %v19911_v21, %v19914_v41  ;;  %v15501_v26 = vadd.f32 %v15409_v49, %v3152_v11  ;;  %v20147_v11 = vld [vmem:[#allocation48_spill] sm:$0xff] }
 0x3b1   : > { %v15480_v55 = vsel %vm2371_vm3, %v20139_v23, %v2992_v36  ;;  %v2919_v19 = vadd.f32 %v15337_v51, %v2918_v24 }
 0x3b2   : > { %20140 = vst [vmem:[#allocation42_spill] sm:$0xff] %v15480_v55  ;;  %v3153_v18 = vmul.f32 %v15399_v31, %v15480_v55  ;;  %v2920_v15 = vpop.f32.mrf.mxu1  ;;  %3047 = vrot.lane.b32.xlu1 %v2914_v44, %s20119_s5  ;;  %12236 = vrot.lane.b32.xlu0 %v15476_v45, %s20135_s18  ;;  %v19910_v52 = vmax.f32 %v15501_v26, 0.0 }
 0x3b3   : > { %v13607_v15 = vld [vmem:[%s20058_s14] sm:$0xff]  }
 0x3b4   : > { %v15493_v54 = vadd.f32 %v15409_v49, %v3153_v18  ;;  %v2921_v28 = vpop.f32.mrf.mxu1  ;;  %v2994_v40 = vpop.permute.xlu1 %2993  ;;  %4314 = vmatpush1.bf16.msra.mxu0 %v13607_v15 }
 0x3b5   : > { %v2922_v17 = vadd.f32 %v15337_v51, %v2921_v28  ;;  %v15498_v13 = vsel %vm2371_vm3, %v20141_v0, %v2994_v40  ;;  %4315 = vmatprep.subr.bf16.mxu0 %v20133_v2 }
 0x3b6   : > { %20142 = vst [vmem:[#allocation45_spill] sm:$0xff] %v15498_v13  ;;  %v3154_v25 = vmul.f32 %v15399_v31, %v15498_v13  ;;  %v2923_v12 = vpop.f32.mrf.mxu1  ;;  %12241 = vrot.lane.b32.xlu1 %v15476_v45, %s20136_s3  ;;  %v19909_v7 = vmax.f32 %v15493_v54, 0.0 }
 0x3b7   : > { %3051 = vrot.lane.b32.xlu0 %v2922_v17, %s20119_s5 }
 0x3b8   : > { %v2926_v35 = vpop.f32.mrf.mxu1  ;;  %v2996_v46 = vpop.permute.xlu0 %2995  ;;  %v15518_v14 = vadd.f32 %v15409_v49, %v3154_v25  ;;  %v15532_v60 = vpack.i.bf16 %v19909_v7, %v19910_v52  ;;  %v20167_v52 = vld [vmem:[#allocation56_spill] sm:$0xff] }
 0x3b9   : > { %v15514_v8 = vsel %vm2371_vm3, %v20143_v34, %v2996_v46  ;;  %v2927_v44 = vadd.f32 %v15337_v51, %v2926_v35  ;;  %v13608_v35 = vld [vmem:[%s20058_s14 + $0x78] sm:$0xff]  }
 0x3ba   : > { %20144 = vst [vmem:[#allocation44_spill] sm:$0xff] %v15514_v8  ;;  %v3155_v56 = vmul.f32 %v15399_v31, %v15514_v8  ;;  %v2928_v5 = vpop.f32.mrf.mxu1  ;;  %3049 = vrot.lane.b32.xlu1 %v2919_v19, %s20119_s5  ;;  %v19908_v4 = vmax.f32 %v15518_v14, 0.0  ;;  %4316 = vmatpush2.bf16.msra.mxu0 %v13608_v35  ;;  %v20185_v8 = vld [vmem:[#allocation65_spill] sm:$0xff] }
 0x3bb   : > { %4317 = vmatprep.subr.bf16.mxu0 %v20133_v2 }
 0x3bc   : > { %v15526_v50 = vadd.f32 %v15409_v49, %v3155_v56  ;;  %v2929_v42 = vpop.f32.mrf.mxu1  ;;  %v2998_v47 = vpop.permute.xlu1 %2997 }
 0x3bd   : > { %v2930_v38 = vadd.f32 %v15337_v51, %v2929_v42  ;;  %v15537_v9 = vsel %vm2371_vm3, %v20145_v59, %v2998_v47  ;;  %v20151_v42 = vld [vmem:[#allocation50_spill] sm:$0xff] }
 0x3be   : > { %20146 = vst [vmem:[#allocation47_spill] sm:$0xff] %v15537_v9  ;;  %v19905_v1 = vmax.f32 %v15526_v50, 0.0  ;;  %v3156_v39 = vmul.f32 %v15399_v31, %v15537_v9  ;;  %v2931_v30 = vpop.f32.mrf.mxu1  ;;  %12246 = vrot.lane.b32.xlu1 %v15532_v60, %s20135_s18 }
 0x3bf   : > { %3055 = vrot.lane.b32.xlu0 %v2930_v38, %s20119_s5  ;;  %v13609_v38 = vld [vmem:[%s20058_s14 + $0x70] sm:$0xff]  }
 0x3c0   : > { %v2934_v24 = vpop.f32.mrf.mxu1  ;;  %v3000_v36 = vpop.permute.xlu0 %2999  ;;  %v15553_v23 = vpack.i.bf16 %v19905_v1, %v19908_v4  ;;  %v15561_v57 = vadd.f32 %v15409_v49, %v3156_v39  ;;  %4318 = vmatpush2.bf16.msra.mxu0 %v13609_v38 }
 0x3c1   : > { %v15557_v18 = vsel %vm2371_vm3, %v20147_v11, %v3000_v36  ;;  %v2935_v25 = vadd.f32 %v15337_v51, %v2934_v24  ;;  %v13610_v36 = vld [vmem:[%s20058_s14 + $0x68] sm:$0xff]   ;;  %v13611_v11 = vld [vmem:[%s20058_s14 + $0x90] sm:$0xff]   ;;  %4319 = vmatprep.subr.bf16.mxu0 %v20133_v2 }
 0x3c2   : > { %20148 = vst [vmem:[#allocation46_spill] sm:$0xff] %v15557_v18  ;;  %v3157_v63 = vmul.f32 %v15399_v31, %v15557_v18  ;;  %v2936_v28 = vpop.f32.mrf.mxu1  ;;  %3053 = vrot.lane.b32.xlu1 %v2927_v44, %s20119_s5  ;;  %v19904_v46 = vmax.f32 %v15561_v57, 0.0  ;;  %v20153_v44 = vld [vmem:[#allocation53_spill] sm:$0xff]  ;;  %11537 = vmatprep.subr.bf16.mxu1 %v13611_v11 }
 0x3c3   : > { %12251 = vrot.lane.b32.xlu0 %v15553_v23, %s20135_s18  ;;  %11538 = vmatpush3.bf16.msra.mxu1 %v13611_v11 }
 0x3c4   : > { %v15570_v40 = vadd.f32 %v15409_v49, %v3157_v63  ;;  %v2937_v17 = vpop.f32.mrf.mxu1  ;;  %v3002_v0 = vpop.permute.xlu1 %3001  ;;  %4320 = vmatpush2.bf16.msra.mxu0 %v13610_v36 }
 0x3c5   : > { %v2938_v12 = vadd.f32 %v15337_v51, %v2937_v17  ;;  %v15576_v19 = vsel %vm2371_vm3, %v20149_v3, %v3002_v0  ;;  %v13612_v3 = vld [vmem:[%s20058_s14 + $0x60] sm:$0xff]   ;;  %4321 = vmatprep.subr.bf16.mxu0 %v20133_v2 }
 0x3c6   : > { %20150 = vst [vmem:[#allocation49_spill] sm:$0xff] %v15576_v19  ;;  %v19903_v34 = vmax.f32 %v15570_v40, 0.0  ;;  %v3158_v56 = vmul.f32 %v15399_v31, %v15576_v19  ;;  %v2939_v5 = vpop.f32.mrf.mxu1 }
 0x3c7   : > { %3059 = vrot.lane.b32.xlu1 %v2938_v12, %s20119_s5  ;;  %3057 = vrot.lane.b32.xlu0 %v2935_v25, %s20119_s5  ;;  %v20155_v25 = vld [vmem:[#allocation52_spill] sm:$0xff] }
 0x3c8   : > { %v3004_v51 = vpop.permute.xlu0 %3003  ;;  %v15590_v29 = vpack.i.bf16 %v19903_v34, %v19904_v46  ;;  %v15598_v59 = vadd.f32 %v15409_v49, %v3158_v56  ;;  %4322 = vmatpush2.bf16.msra.mxu0 %v13612_v3  ;;  %v13614_v3 = vld [vmem:[%s20058_s14 + $0x50] sm:$0xff]  }
 0x3c9   : > { %v15594_v47 = vsel %vm2371_vm3, %v20151_v42, %v3004_v51  ;;  %v20157_v42 = vld [vmem:[#allocation55_spill] sm:$0xff]  ;;  %4323 = vmatprep.subr.bf16.mxu0 %v20133_v2 }
 0x3ca   : > { %20152 = vst [vmem:[#allocation48_spill] sm:$0xff] %v15594_v47  ;;  %v3159_v39 = vmul.f32 %v15399_v31, %v15594_v47  ;;  %v19902_v15 = vmax.f32 %v15598_v59, 0.0 }
 0x3cb   : > { %12256 = vrot.lane.b32.xlu0 %v15590_v29, %s19912_s8 }
 0x3cc   : > { %v15606_v30 = vadd.f32 %v15409_v49, %v3159_v39  ;;  %v3006_v62 = vpop.permute.xlu1 %3005  ;;  %v13613_v39 = vld [vmem:[%s20058_s14 + $0x58] sm:$0xff]  }
 0x3cd   : > { %v15610_v24 = vsel %vm2371_vm3, %v20153_v44, %v3006_v62  ;;  %4324 = vmatpush2.bf16.msra.mxu0 %v13613_v39 }
 0x3ce   : > { %20154 = vst [vmem:[#allocation51_spill] sm:$0xff] %v15610_v24  ;;  %v19901_v63 = vmax.f32 %v15606_v30, 0.0  ;;  %v3160_v28 = vmul.f32 %v15399_v31, %v15610_v24  ;;  %4325 = vmatprep.subr.bf16.mxu0 %v20133_v2 }
 0x3cf   : > { %12261 = vrot.lane.b32.xlu0 %v15590_v29, %s20135_s18 }
 0x3d0   : > { %v3008_v17 = vpop.permute.xlu0 %3007  ;;  %v15625_v0 = vpack.i.bf16 %v19901_v63, %v19902_v15  ;;  %v15633_v35 = vadd.f32 %v15409_v49, %v3160_v28  ;;  %v13616_v15 = vld [vmem:[%s20058_s14 + $0x40] sm:$0xff]  }
 0x3d1   : > { %v15629_v12 = vsel %vm2371_vm3, %v20155_v25, %v3008_v17  ;;  %v20159_v17 = vld [vmem:[#allocation54_spill] sm:$0xff]  ;;  %4326 = vmatpush2.bf16.msra.mxu0 %v13614_v3 }
 0x3d2   : > { %20156 = vst [vmem:[#allocation50_spill] sm:$0xff] %v15629_v12  ;;  %v3161_v56 = vmul.f32 %v15399_v31, %v15629_v12  ;;  %12266 = vrot.lane.b32.xlu1 %v15625_v0, %s19912_s8  ;;  %v19900_v62 = vmax.f32 %v15633_v35, 0.0  ;;  %4327 = vmatprep.subr.bf16.mxu0 %v20133_v2  ;;  %v20163_v3 = vld [vmem:[#allocation58_spill] sm:$0xff] }
 0x3d3   : > { %12271 = vrot.lane.b32.xlu0 %v15625_v0, %s20135_s18 }
 0x3d4   : > { %v15643_v5 = vadd.f32 %v15409_v49, %v3161_v56  ;;  %v3010_v51 = vpop.permute.xlu1 %3009 }
 0x3d5   : > { %v15647_v38 = vsel %vm2371_vm3, %v20157_v42, %v3010_v51 }
 0x3d6   : > { %20158 = vst [vmem:[#allocation53_spill] sm:$0xff] %v15647_v38  ;;  %v19899_v44 = vmax.f32 %v15643_v5, 0.0  ;;  %v3162_v36 = vmul.f32 %v15399_v31, %v15647_v38 }
 0x3d8   : > { %v3012_v11 = vpop.permute.xlu0 %3011  ;;  %v15659_v28 = vpack.i.bf16 %v19899_v44, %v19900_v62  ;;  %v15667_v56 = vadd.f32 %v15409_v49, %v3162_v36  ;;  %v13615_v36 = vld [vmem:[%s20058_s14 + $0x48] sm:$0xff]  }
 0x3d9   : > { %v15663_v25 = vsel %vm2371_vm3, %v20159_v17, %v3012_v11  ;;  %v20161_v11 = vld [vmem:[#allocation64_spill] sm:$0xff]  ;;  %4328 = vmatpush2.bf16.msra.mxu0 %v13615_v36 }
 0x3da   : > { %20160 = vst [vmem:[#allocation52_spill] sm:$0xff] %v15663_v25  ;;  %v3163_v51 = vmul.f32 %v15399_v31, %v15663_v25  ;;  %12276 = vrot.lane.b32.xlu0 %v15659_v28, %s19912_s8  ;;  %v19907_v17 = vmax.f32 %v15667_v56, 0.0  ;;  %4329 = vmatprep.subr.bf16.mxu0 %v20133_v2 }
 0x3dc   : > { %v15675_v42 = vadd.f32 %v15409_v49, %v3163_v51  ;;  %v3014_v44 = vpop.permute.xlu1 %3013 }
 0x3dd   : > { %v15679_v39 = vsel %vm2371_vm3, %v20161_v11, %v3014_v44  ;;  %4330 = vmatpush2.bf16.msra.mxu0 %v13616_v15  ;;  %v20169_v15 = vld [vmem:[#allocation60_spill] sm:$0xff] }
 0x3de   : > { %20162 = vst [vmem:[#allocation55_spill] sm:$0xff] %v15679_v39  ;;  %v19906_v62 = vmax.f32 %v15675_v42, 0.0  ;;  %v3164_v63 = vmul.f32 %v15399_v31, %v15679_v39  ;;  %12296 = vrot.lane.b32.xlu0 %v15659_v28, %s20135_s18  ;;  %6141 = vmatprep.subr.bf16.mxu0 %v20133_v2 }
 0x3e0   : > { %v3016_v51 = vpop.permute.xlu0 %3015  ;;  %v15693_v44 = vpack.i.bf16 %v19906_v62, %v19907_v17  ;;  %v3211_v34 = vadd.f32 %v15409_v49, %v3164_v63  ;;  %v20165_v17 = vld [vmem:[#allocation57_spill] sm:$0xff] }
 0x3e1   : > { %v15697_v11 = vsel %vm2371_vm3, %v20163_v3, %v3016_v51 }
 0x3e2   : > { %20164 = vst [vmem:[#allocation54_spill] sm:$0xff] %v15697_v11  ;;  %v3165_v46 = vmul.f32 %v15399_v31, %v15697_v11  ;;  %12281 = vrot.lane.b32.xlu1 %v15693_v44, %s19912_s8  ;;  %v3251_v36 = vmax.f32 %v3211_v34, 0.0  ;;  %s19916_s8 = smov 112  }
 0x3e4   : > { %v3212_v1 = vadd.f32 %v15409_v49, %v3165_v46  ;;  %v3018_v62 = vpop.permute.xlu1 %3017 }
 0x3e5   : > { %v15709_v4 = vsel %vm2371_vm3, %v20165_v17, %v3018_v62 }
 0x3e6   : > { %20166 = vst [vmem:[#allocation64_spill] sm:$0xff] %v15709_v4  ;;  %v3252_v51 = vmax.f32 %v3212_v1, 0.0  ;;  %v3166_v63 = vmul.f32 %v15399_v31, %v15709_v4 }
 0x3e8   : > { %v3020_v3 = vpop.permute.xlu0 %3019  ;;  %v15714_v7 = vpack.i.bf16 %v3252_v51, %v3251_v36  ;;  %v3213_v21 = vadd.f32 %v15409_v49, %v3166_v63  ;;  %v13617_v36 = vld [vmem:[%s20058_s14 + $0x88] sm:$0xff]  }
 0x3e9   : > { %v15718_v46 = vsel %vm2371_vm3, %v20167_v52, %v3020_v3  ;;  %11539 = vmatprep.subr.bf16.mxu1 %v13617_v36 }
 0x3ea   : > { %20168 = vst [vmem:[#allocation58_spill] sm:$0xff] %v15718_v46  ;;  %v3167_v62 = vmul.f32 %v15399_v31, %v15718_v46  ;;  %12286 = vrot.lane.b32.xlu1 %v15714_v7, %s19916_s8  ;;  %v3253_v51 = vmax.f32 %v3213_v21, 0.0  ;;  %11540 = vmatpush3.bf16.msra.mxu1 %v13617_v36  ;;  %s20173_s8 = smov 64  }
 0x3ec   : > { %v3214_v1 = vadd.f32 %v15409_v49, %v3167_v62  ;;  %v3022_v34 = vpop.permute.xlu1 %3021  ;;  %v20171_v62 = vld [vmem:[#allocation59_spill] sm:$0xff] }
 0x3ed   : > { %v15728_v17 = vsel %vm2371_vm3, %v20169_v15, %v3022_v34 }
 0x3ee   : > { %20170 = vst [vmem:[#allocation57_spill] sm:$0xff] %v15728_v17  ;;  %v3254_v52 = vmax.f32 %v3214_v1, 0.0  ;;  %v3168_v63 = vmul.f32 %v15399_v31, %v15728_v17  ;;  %12291 = vrot.lane.b32.xlu1 %v15532_v60, %s20136_s3  ;;  %v20199_v17 = vld [vmem:[#allocation72_spill] sm:$0xff] }
 0x3f0   : > { %v3024_v3 = vpop.permute.xlu0 %3023  ;;  %v15735_v41 = vpack.i.bf16 %v3254_v52, %v3253_v51  ;;  %v3215_v34 = vadd.f32 %v15409_v49, %v3168_v63  ;;  %v20175_v51 = vld [vmem:[#allocation61_spill] sm:$0xff] }
 0x3f1   : > { %v15739_v61 = vsel %vm2371_vm3, %v20171_v62, %v3024_v3 }
 0x3f2   : > { %20172 = vst [vmem:[#allocation56_spill] sm:$0xff] %v15739_v61  ;;  %v3169_v21 = vmul.f32 %v15399_v31, %v15739_v61  ;;  %12301 = vrot.lane.b32.xlu1 %v15714_v7, %s20173_s8  ;;  %12306 = vrot.lane.b32.xlu0 %v15735_v41, %s20174_s9  ;;  %v3255_v52 = vmax.f32 %v3215_v34, 0.0 }
 0x3f4   : > { %v3216_v1 = vadd.f32 %v15409_v49, %v3169_v21  ;;  %v3026_v15 = vpop.permute.xlu1 %3025  ;;  %v20177_v21 = vld [vmem:[#allocation79_spill] sm:$0xff] }
 0x3f5   : > { %v15751_v36 = vsel %vm2371_vm3, %v20175_v51, %v3026_v15 }
 0x3f6   : > { %20176 = vst [vmem:[#allocation60_spill] sm:$0xff] %v15751_v36  ;;  %v3256_v3 = vmax.f32 %v3216_v1, 0.0  ;;  %v3170_v63 = vmul.f32 %v15399_v31, %v15751_v36  ;;  %12311 = vrot.lane.b32.xlu1 %v15735_v41, %s20173_s8  ;;  %12326 = vrot.lane.b32.xlu0 %v15693_v44, %s20135_s18 }
 0x3f8   : > { %v3028_v62 = vpop.permute.xlu0 %3027  ;;  %v15759_v48 = vpack.i.bf16 %v3256_v3, %v3255_v52  ;;  %v3217_v15 = vadd.f32 %v15409_v49, %v3170_v63  ;;  %v20179_v52 = vld [vmem:[#allocation63_spill] sm:$0xff] }
 0x3f9   : > { %v15763_v58 = vsel %vm2371_vm3, %v20177_v21, %v3028_v62 }
 0x3fa   : > { %20178 = vst [vmem:[#allocation59_spill] sm:$0xff] %v15763_v58  ;;  %v3171_v34 = vmul.f32 %v15399_v31, %v15763_v58  ;;  %12336 = vrot.lane.b32.xlu0 %v15714_v7, %s20135_s18  ;;  %12316 = vrot.lane.b32.xlu1 %v15759_v48, %s20174_s9  ;;  %v3257_v62 = vmax.f32 %v3217_v15, 0.0 }
 0x3fc   : > { %v3218_v1 = vadd.f32 %v15409_v49, %v3171_v34  ;;  %v3030_v51 = vpop.permute.xlu1 %3029  ;;  %v20181_v34 = vld [vmem:[#allocation62_spill] sm:$0xff] }
 0x3fd   : > { %v15775_v3 = vsel %vm2371_vm3, %v20179_v52, %v3030_v51 }
 0x3fe   : > { %20180 = vst [vmem:[#allocation61_spill] sm:$0xff] %v15775_v3  ;;  %v3258_v21 = vmax.f32 %v3218_v1, 0.0  ;;  %v3172_v63 = vmul.f32 %v15399_v31, %v15775_v3  ;;  %12341 = vrot.lane.b32.xlu0 %v15442_v22, %s20116_s23  ;;  %12321 = vrot.lane.b32.xlu1 %v15553_v23, %s20136_s3 }
 0x400   : > { %v3032_v58 = vpop.permute.xlu0 %3031  ;;  %v15783_v36 = vpack.i.bf16 %v3258_v21, %v3257_v62  ;;  %v3219_v51 = vadd.f32 %v15409_v49, %v3172_v63  ;;  %v20183_v21 = vld [vmem:[#allocation66_spill] sm:$0xff] }
 0x401   : > { %v15787_v25 = vsel %vm2371_vm3, %v20181_v34, %v3032_v58 }
 0x402   : > { %20182 = vst [vmem:[#allocation79_spill] sm:$0xff] %v15787_v25  ;;  %v3173_v15 = vmul.f32 %v15399_v31, %v15787_v25  ;;  %12346 = vrot.lane.b32.xlu0 %v15625_v0, %s20136_s3  ;;  %12331 = vrot.lane.b32.xlu1 %v15590_v29, %s20136_s3  ;;  %v3259_v52 = vmax.f32 %v3219_v51, 0.0 }
 0x404   : > { %v3220_v22 = vadd.f32 %v15409_v49, %v3173_v15 }
 0x405   : > { %v3034_v1 = vpop.permute.xlu1 %3033 }
 0x406   : > { %v3260_v62 = vmax.f32 %v3220_v22, 0.0  ;;  %v15799_v58 = vsel %vm2371_vm3, %v20183_v21, %v3034_v1  ;;  %12351 = vrot.lane.b32.xlu1 %v15735_v41, %s20135_s18  ;;  %12371 = vrot.lane.b32.xlu0 %v15783_v36, %s20174_s9 }
 0x407   : > { %20184 = vst [vmem:[#allocation63_spill] sm:$0xff] %v15799_v58  ;;  %v3174_v63 = vmul.f32 %v15399_v31, %v15799_v58  ;;  %v20205_v58 = vld [vmem:[#allocation76_spill] sm:$0xff] }
 0x408   : > { %v15807_v34 = vpack.i.bf16 %v3260_v62, %v3259_v52  ;;  %v20187_v62 = vld [vmem:[#allocation68_spill] sm:$0xff] }
 0x409   : > { %v3036_v15 = vpop.permute.xlu0 %3035  ;;  %v3221_v22 = vadd.f32 %v15409_v49, %v3174_v63 }
 0x40a   : > { %v15811_v51 = vsel %vm2371_vm3, %v20185_v8, %v3036_v15  ;;  %12356 = vrot.lane.b32.xlu1 %v15476_v45, %s20116_s23  ;;  %12376 = vrot.lane.b32.xlu0 %v15759_v48, %s20135_s18  ;;  %v13618_v15 = vld [vmem:[%s20058_s14 + $0x80] sm:$0xff]   ;;  %s20293_s14 = smov 88  }
 0x40b   : > { %20186 = vst [vmem:[#allocation62_spill] sm:$0xff] %v15811_v51  ;;  %v3175_v1 = vmul.f32 %v15399_v31, %v15811_v51  ;;  %v3261_v45 = vmax.f32 %v3221_v22, 0.0  ;;  %11541 = vmatprep.subr.bf16.mxu1 %v13618_v15 }
 0x40c   : > { %11542 = vmatpush3.bf16.msra.mxu1 %v13618_v15 }
 0x40d   : > { %v3222_v21 = vadd.f32 %v15409_v49, %v3175_v1  ;;  %v3038_v52 = vpop.permute.xlu1 %3037  ;;  %v20189_v1 = vld [vmem:[#allocation67_spill] sm:$0xff]  ;;  %6334 = vmatprep.subr.bf16.mxu1 %v20133_v2 }
 0x40e   : > { %v15823_v12 = vsel %vm2371_vm3, %v20187_v62, %v3038_v52  ;;  %12361 = vrot.lane.b32.xlu1 %v15659_v28, %s20136_s3  ;;  %12386 = vrot.lane.b32.xlu0 %v15807_v34, %s20174_s9 }
 0x40f   : > { %20188 = vst [vmem:[#allocation66_spill] sm:$0xff] %v15823_v12  ;;  %v3262_v8 = vmax.f32 %v3222_v21, 0.0  ;;  %v3176_v63 = vmul.f32 %v15399_v31, %v15823_v12  ;;  %v20193_v12 = vld [vmem:[#allocation73_spill] sm:$0xff] }
 0x411   : > { %v3040_v24 = vpop.permute.xlu0 %3039  ;;  %v15832_v38 = vpack.i.bf16 %v3262_v8, %v3261_v45  ;;  %v3223_v21 = vadd.f32 %v15409_v49, %v3176_v63  ;;  %v20191_v8 = vld [vmem:[#allocation70_spill] sm:$0xff] }
 0x412   : > { %v15836_v52 = vsel %vm2371_vm3, %v20189_v1, %v3040_v24  ;;  %12366 = vrot.lane.b32.xlu1 %v15759_v48, %s20173_s8 }
 0x413   : > { %20190 = vst [vmem:[#allocation65_spill] sm:$0xff] %v15836_v52  ;;  %v3177_v22 = vmul.f32 %v15399_v31, %v15836_v52  ;;  %12401 = vrot.lane.b32.xlu0 %v15832_v38, %s20174_s9  ;;  %v3263_v52 = vmax.f32 %v3223_v21, 0.0 }
 0x415   : > { %v3224_v62 = vadd.f32 %v15409_v49, %v3177_v22  ;;  %v3042_v45 = vpop.permute.xlu1 %3041 }
 0x416   : > { %v15849_v24 = vsel %vm2371_vm3, %v20191_v8, %v3042_v45  ;;  %12381 = vrot.lane.b32.xlu1 %v15783_v36, %s20173_s8 }
 0x417   : > { %20192 = vst [vmem:[#allocation68_spill] sm:$0xff] %v15849_v24  ;;  %v3264_v15 = vmax.f32 %v3224_v62, 0.0  ;;  %v3178_v1 = vmul.f32 %v15399_v31, %v15849_v24  ;;  %12406 = vrot.lane.b32.xlu0 %v15832_v38, %s19967_s13 }
 0x419   : > { %v3044_v63 = vpop.permute.xlu0 %3043  ;;  %v15863_v45 = vpack.i.bf16 %v3264_v15, %v3263_v52  ;;  %v3225_v62 = vadd.f32 %v15409_v49, %v3178_v1  ;;  %v20195_v52 = vld [vmem:[#allocation71_spill] sm:$0xff] }
 0x41a   : > { %v15859_v22 = vsel %vm2371_vm3, %v20193_v12, %v3044_v63  ;;  %12391 = vrot.lane.b32.xlu1 %v15807_v34, %s19967_s13 }
 0x41b   : > { %20194 = vst [vmem:[#allocation67_spill] sm:$0xff] %v15859_v22  ;;  %v3179_v8 = vmul.f32 %v15399_v31, %v15859_v22  ;;  %12411 = vrot.lane.b32.xlu0 %v15832_v38, %s20173_s8  ;;  %v3265_v12 = vmax.f32 %v3225_v62, 0.0 }
 0x41c   : > { %v15870_v24 = vpop.permute.xlu1 %12226 }
 0x41d   : > { %v3226_v21 = vadd.f32 %v15409_v49, %v3179_v8  ;;  %v3046_v61 = vpop.permute.xlu0 %3045 }
 0x41e   : > { %12396 = vrot.lane.b32.xlu1 %v15807_v34, %s20173_s8  ;;  %v15877_v15 = vsel %vm2371_vm3, %v20195_v52, %v3046_v61 }
 0x41f   : > { %v3266_v63 = vmax.f32 %v3226_v21, 0.0  ;;  %20196 = vst [vmem:[#allocation70_spill] sm:$0xff] %v15877_v15  ;;  %12416 = vrot.lane.b32.xlu0 %v15863_v45, %s20174_s9  ;;  %v3180_v8 = vmul.f32 %v15399_v31, %v15877_v15  ;;  %v20197_v21 = vld [vmem:[#allocation69_spill] sm:$0xff] }
 0x420   : > { %v15881_v1 = vpop.permute.xlu1 %12231 }
 0x421   : > { %v15883_v22 = vpack.i.bf16 %v3266_v63, %v3265_v12  ;;  %v3227_v32 = vadd.f32 %v15409_v49, %v3180_v8 }
 0x422   : > { %12421 = vrot.lane.b32.xlu1 %v15863_v45, %s19967_s13 }
 0x423   : > { %12426 = vrot.lane.b32.xlu0 %v15883_v22, %s20174_s9  ;;  %v3267_v55 = vmax.f32 %v3227_v32, 0.0 }
 0x424   : > { %v15891_v62 = vpop.permute.xlu0 %12236  ;;  %v3048_v61 = vpop.permute.xlu1 %3047 }
 0x425   : > { %v15895_v52 = vsel %vm2371_vm3, %v20197_v21, %v3048_v61 }
 0x426   : > { %20198 = vst [vmem:[#allocation73_spill] sm:$0xff] %v15895_v52  ;;  %v3181_v12 = vmul.f32 %v15399_v31, %v15895_v52  ;;  %v20201_v52 = vld [vmem:[#allocation74_spill] sm:$0xff] }
 0x427   : > { %12431 = vrot.lane.b32.xlu0 %v15883_v22, %s19967_s13 }
 0x428   : > { %v3228_v63 = vadd.f32 %v15409_v49, %v3181_v12  ;;  %v15903_v15 = vpop.permute.xlu1 %12241 }
 0x429   : > { %v3052_v13 = vpop.permute.xlu0 %3051 }
 0x42a   : > { %v3268_v25 = vmax.f32 %v3228_v63, 0.0  ;;  %v15907_v3 = vsel %vm2371_vm3, %v20199_v17, %v3052_v13 }
 0x42b   : > { %20200 = vst [vmem:[#allocation71_spill] sm:$0xff] %v15907_v3  ;;  %v3183_v8 = vmul.f32 %v15399_v31, %v15907_v3 }
 0x42c   : > { %v3050_v61 = vpop.permute.xlu1 %3049  ;;  %v15911_v21 = vpack.i.bf16 %v3268_v25, %v3267_v55 }
 0x42d   : > { %v15915_v51 = vsel %vm2371_vm3, %v20201_v52, %v3050_v61  ;;  %v3230_v12 = vadd.f32 %v15409_v49, %v3183_v8  ;;  %v20203_v52 = vld [vmem:[#allocation75_spill] sm:$0xff] }
 0x42e   : > { %20202 = vst [vmem:[#allocation69_spill] sm:$0xff] %v15915_v51  ;;  %v3182_v32 = vmul.f32 %v15399_v31, %v15915_v51  ;;  %12441 = vrot.lane.b32.xlu0 %v15911_v21, %s19967_s13  ;;  %12436 = vrot.lane.b32.xlu1 %v15911_v21, %s20174_s9 }
 0x42f   : > { %v3270_v25 = vmax.f32 %v3230_v12, 0.0 }
 0x430   : > { %v3229_v13 = vadd.f32 %v15409_v49, %v3182_v32  ;;  %v15925_v17 = vpop.permute.xlu1 %12246 }
 0x431   : > { %v3056_v55 = vpop.permute.xlu0 %3055 }
 0x432   : > { %v3269_v63 = vmax.f32 %v3229_v13, 0.0  ;;  %v15929_v61 = vsel %vm2371_vm3, %v20203_v52, %v3056_v55  ;;  %12456 = vrot.lane.b32.xlu0 %v15532_v60, %s20116_s23 }
 0x433   : > { %20204 = vst [vmem:[#allocation72_spill] sm:$0xff] %v15929_v61  ;;  %v3185_v8 = vmul.f32 %v15399_v31, %v15929_v61 }
 0x434   : > { %v3054_v3 = vpop.permute.xlu1 %3053  ;;  %v15935_v51 = vpack.i.bf16 %v3270_v25, %v3269_v63 }
 0x435   : > { %v15939_v32 = vsel %vm2371_vm3, %v20205_v58, %v3054_v3  ;;  %v15941_v11 = vpop.permute.xlu0 %12251  ;;  %v3232_v12 = vadd.f32 %v15409_v49, %v3185_v8  ;;  %v20207_v58 = vld [vmem:[#allocation78_spill] sm:$0xff]  ;;  %v20209_v8 = vld [vmem:[#allocation77_spill] sm:$0xff] }
 0x436   : > { %20206 = vst [vmem:[#allocation74_spill] sm:$0xff] %v15939_v32  ;;  %v3184_v13 = vmul.f32 %v15399_v31, %v15939_v32  ;;  %12461 = vrot.lane.b32.xlu0 %v15935_v51, %s20174_s9  ;;  %12446 = vrot.lane.b32.xlu1 %v15935_v51, %s19967_s13 }
 0x437   : > { %v3272_v63 = vmax.f32 %v3232_v12, 0.0 }
 0x438   : > { %v3231_v60 = vadd.f32 %v15409_v49, %v3184_v13 }
 0x439   : > { %v3058_v55 = vpop.permute.xlu0 %3057  ;;  %v3060_v25 = vpop.permute.xlu1 %3059 }
 0x43a   : > { %v3271_v3 = vmax.f32 %v3231_v60, 0.0  ;;  %v15953_v52 = vsel %vm2371_vm3, %v20207_v58, %v3058_v55  ;;  %v15957_v61 = vsel %vm2371_vm3, %v20209_v8, %v3060_v25  ;;  %12451 = vrot.lane.b32.xlu1 %v15863_v45, %s20173_s8 }
 0x43b   : > { %20208 = vst [vmem:[#allocation75_spill] sm:$0xff] %v15953_v52  ;;  %20210 = vst [vmem:[#allocation76_spill] sm:$0xff] %v15957_v61  ;;  %v3186_v32 = vmul.f32 %v15399_v31, %v15953_v52  ;;  %v3187_v13 = vmul.f32 %v15399_v31, %v15957_v61  ;;  %v20211_v31 = vmov 0.0  }
 0x43c   : > { %v15965_v39 = vpack.i.bf16 %v3272_v63, %v3271_v3 }
 0x43d   : > { %v3233_v12 = vadd.f32 %v15409_v49, %v3186_v32  ;;  %v3234_v60 = vadd.f32 %v15409_v49, %v3187_v13  ;;  %v12257_v49 = vpop.permute.xlu0 %12256  ;;  %v12228_v13 = vunpack.i.l.bf16 %v15870_v24 }
 0x43e   : > { %12466 = vrot.lane.b32.xlu1 %v15965_v39, %s19967_s13 }
 0x43f   : > { %v3273_v55 = vmax.f32 %v3233_v12, 0.0  ;;  %v3274_v25 = vmax.f32 %v3234_v60, 0.0  ;;  %v12259_v12 = vunpack.i.h.bf16 %v12257_v49  ;;  %v12258_v60 = vunpack.i.l.bf16 %v12257_v49 }
 0x440   : > { %v3886_v49 = vsel %vm2554_vm8, %v15247_v43, %v12228_v13 }
 0x441   : > { %v15971_v58 = vpack.i.bf16 %v3274_v25, %v3273_v55  ;;  %v15989_v32 = vpop.permute.xlu0 %12261  ;;  %v20212_v25 = vld [vmem:[#allocation80_spill] sm:$0xff]  ;;  %v3927_v4 = vsel %vm3926_vm10, %v3886_v49, %v12258_v60  ;;  %v12238_v49 = vunpack.i.l.bf16 %v15891_v62 }
 0x442   : > { %12471 = vrot.lane.b32.xlu1 %v15965_v39, %s20174_s9  ;;  %v16015_v61 = vsel %vm2397_vm4, 0.0, %v20212_v25 }
 0x443   : > { %12476 = vrot.lane.b32.xlu0 %v15971_v58, %s19967_s13  ;;  %v3853_v25 = vsel %vm2472_vm6, %v16015_v61, %v15247_v43 }
 0x444   : > { %v12267_v63 = vpop.permute.xlu1 %12266  ;;  %v16044_v47 = vpack.c.bf16 %v3853_v25, %v3853_v25  ;;  %v3888_v25 = vsel %vm2554_vm8, %v15247_v43, %v12238_v49 }
 0x445   : > { %v15995_v3 = vpop.permute.xlu0 %12271  ;;  %v12269_v19 = vunpack.i.h.bf16 %v12267_v63  ;;  %v12268_v6 = vunpack.i.l.bf16 %v12267_v63 }
 0x446   : > { %12481 = vrot.lane.b32.xlu1 %v15693_v44, %s20136_s3 }
 0x447   : > { %3809 = vrot.lane.b32.xlu0 %v20211_v31, %s19967_s13  ;;  %s19969_s13 = smov 88  }
 0x44a   : > { %12491 = vrot.lane.b32.xlu1 %v15883_v22, %s20173_s8 }
 0x44b   : > { %12486 = vrot.lane.b32.xlu0 %v15783_v36, %s20135_s18 }
 0x44c   : > { %v16005_v55 = vpop.permute.xlu0 %12276 }
 0x44e   : > { %12506 = vrot.lane.b32.xlu1 %v15971_v58, %s20174_s9 }
 0x44f   : > { %12496 = vrot.lane.b32.xlu0 %v15553_v23, %s20116_s23  ;;  %v12229_v23 = vunpack.i.h.bf16 %v15870_v24 }
 0x450   : > { %v16038_v9 = vpop.permute.xlu0 %12296 }
 0x451   : > { %v3887_v24 = vsel %vm2554_vm8, %v15247_v43, %v12229_v23 }
 0x452   : > { %12511 = vrot.lane.b32.xlu1 %v15807_v34, %s20135_s18  ;;  %v3928_v18 = vsel %vm3926_vm10, %v3887_v24, %v12259_v12  ;;  %v12239_v24 = vunpack.i.h.bf16 %v15891_v62 }
 0x453   : > { %12501 = vrot.lane.b32.xlu0 %v15714_v7, %s20136_s3 }
 0x454   : > { %v16001_v8 = vpop.permute.xlu1 %12281  ;;  %v3889_v62 = vsel %vm2554_vm8, %v15247_v43, %v12239_v24 }
 0x456   : > { %12521 = vrot.lane.b32.xlu1 %v15590_v29, %s20116_s23 }
 0x457   : > { %12516 = vrot.lane.b32.xlu0 %v15911_v21, %s20173_s8 }
 0x45a   : > { %12526 = vrot.lane.b32.xlu1 %v15735_v41, %s20136_s3 }
 0x45b   : > { %3750 = vrot.lane.b32.xlu0 %v20211_v31, %s20174_s9 }
 0x45c   : > { %v16011_v29 = vpop.permute.xlu1 %12286 }
 0x45d   : > { %v19957_v52 = vunpack.i.h.bf16 %v16011_v29  ;;  %v19958_v46 = vunpack.i.l.bf16 %v16011_v29 }
 0x45e   : > { %12536 = vrot.lane.b32.xlu1 %v15935_v51, %s20173_s8 }
 0x45f   : > { %12531 = vrot.lane.b32.xlu0 %v15832_v38, %s20135_s18  ;;  %v3968_v23 = vsel %vm3967_vm11, %v3927_v4, %v19958_v46  ;;  %v3969_v13 = vsel %vm3967_vm11, %v3928_v18, %v19957_v52 }
 0x460   : > { %v16040_v60 = vpop.permute.xlu1 %12291  ;;  %v4077_v12 = vpack.c.bf16 %v3969_v13, %v3968_v23  ;;  %v3930_v13 = vsel %vm3926_vm10, %v3889_v62, %v12269_v19  ;;  %v12248_v19 = vunpack.i.l.bf16 %v15925_v17  ;;  %v12279_v62 = vunpack.i.h.bf16 %v16005_v55 }
 0x462   : > { %12546 = vrot.lane.b32.xlu1 %v15759_v48, %s20136_s3  ;;  %4331 = vmatprep.mubr.bf16.mxu0 %v4077_v12 }
 0x463   : > { %12541 = vrot.lane.b32.xlu0 %v15625_v0, %s20116_s23  ;;  %4332 = vmatmul.mubr.bf16.vlgmr.msra.gmra.mxu0 %v16044_v47  ;;  %v3929_v0 = vsel %vm3926_vm10, %v3888_v25, %v12268_v6  ;;  %v12249_v6 = vunpack.i.h.bf16 %v15925_v17  ;;  %v12278_v25 = vunpack.i.l.bf16 %v16005_v55 }
 0x464   : > { %v16051_v4 = vpop.permute.xlu0 %12306  ;;  %v16053_v18 = vpop.permute.xlu1 %12301 }
 0x465   : > { %v19960_v63 = vunpack.i.h.bf16 %v16051_v4  ;;  %v19959_v23 = vunpack.i.l.bf16 %v16051_v4  ;;  %v3891_v17 = vsel %vm2554_vm8, %v15247_v43, %v12249_v6 }
 0x466   : > { %12556 = vrot.lane.b32.xlu1 %v15965_v39, %s20173_s8 }
 0x467   : > { %12551 = vrot.lane.b32.xlu0 %v15863_v45, %s20135_s18  ;;  %v3970_v12 = vsel %vm3967_vm11, %v3929_v0, %v19959_v23  ;;  %v3971_v24 = vsel %vm3967_vm11, %v3930_v13, %v19960_v63 }
 0x468   : > { %v16073_v49 = vpop.permute.xlu0 %12326  ;;  %v16075_v52 = vpop.permute.xlu1 %12311  ;;  %v4079_v46 = vpack.c.bf16 %v3971_v24, %v3970_v12  ;;  %v3890_v12 = vsel %vm2554_vm8, %v15247_v43, %v12248_v19 }
 0x46a   : > { %12566 = vrot.lane.b32.xlu1 %v15783_v36, %s20136_s3  ;;  %4339 = vmatprep.mubr.bf16.mxu0 %v4079_v46  ;;  %v3932_v46 = vsel %vm3926_vm10, %v3891_v17, %v12279_v62  ;;  %v12254_v17 = vunpack.i.h.bf16 %v15941_v11 }
 0x46b   : > { %12561 = vrot.lane.b32.xlu0 %v15659_v28, %s20116_s23  ;;  %4340 = vmatmul.mubr.bf16.gmra.mxu0 %v16044_v47  ;;  %v3931_v28 = vsel %vm3926_vm10, %v3890_v12, %v12278_v25  ;;  %v12253_v12 = vunpack.i.l.bf16 %v15941_v11 }
 0x46c   : > { %v16086_v0 = vpop.permute.xlu0 %12336  ;;  %v16088_v13 = vpop.permute.xlu1 %12316 }
 0x46d   : > { %v19962_v55 = vunpack.i.h.bf16 %v16088_v13  ;;  %v19965_v24 = vunpack.i.l.bf16 %v16088_v13  ;;  %v3892_v11 = vsel %vm2554_vm8, %v15247_v43, %v12253_v12  ;;  %v12234_v12 = vunpack.i.h.bf16 %v15881_v1 }
 0x46e   : > { %12581 = vrot.lane.b32.xlu1 %v15971_v58, %s20173_s8 }
 0x46f   : > { %12571 = vrot.lane.b32.xlu0 %v15883_v22, %s20135_s18  ;;  %v3972_v6 = vsel %vm3967_vm11, %v3931_v28, %v19965_v24  ;;  %v3973_v19 = vsel %vm3967_vm11, %v3932_v46, %v19962_v55  ;;  %v12284_v28 = vunpack.i.h.bf16 %v16001_v8  ;;  %v12283_v46 = vunpack.i.l.bf16 %v16001_v8 }
 0x470   : > { %v16108_v23 = vpop.permute.xlu0 %12341  ;;  %v16110_v63 = vpop.permute.xlu1 %12321  ;;  %v4081_v16 = vpack.c.bf16 %v3973_v19, %v3972_v6  ;;  %v12233_v55 = vunpack.i.l.bf16 %v15881_v1  ;;  %v12314_v24 = vunpack.i.h.bf16 %v16075_v52 }
 0x471   : > { %v3933_v19 = vsel %vm3926_vm10, %v3892_v11, %v12283_v46  ;;  %v12304_v11 = vunpack.i.h.bf16 %v16053_v18 }
 0x472   : > { %12586 = vrot.lane.b32.xlu1 %v15807_v34, %s20136_s3  ;;  %4347 = vmatprep.mubr.bf16.mxu0 %v4081_v16  ;;  %v3893_v34 = vsel %vm2554_vm8, %v15247_v43, %v12254_v17 }
 0x473   : > { %12576 = vrot.lane.b32.xlu0 %v15693_v44, %s20116_s23  ;;  %4348 = vmatmul.mubr.bf16.gmra.mxu0 %v16044_v47 }
 0x474   : > { %v16117_v62 = vpop.permute.xlu0 %12346  ;;  %v16119_v25 = vpop.permute.xlu1 %12331 }
 0x476   : > { %3667 = vrot.lane.b32.xlu1 %v20211_v31, %s20173_s8 }
 0x477   : > { %12591 = vrot.lane.b32.xlu0 %v15911_v21, %s20135_s18  ;;  %v3934_v21 = vsel %vm3926_vm10, %v3893_v34, %v12284_v28  ;;  %v12264_v34 = vunpack.i.h.bf16 %v15989_v32 }
 0x478   : > { %v16129_v16 = vpop.permute.xlu0 %12371  ;;  %v16131_v44 = vpop.permute.xlu1 %12351 }
 0x479   : > { %v19964_v6 = vunpack.i.h.bf16 %v16129_v16  ;;  %v19963_v8 = vunpack.i.l.bf16 %v16129_v16 }
 0x47a   : > { %12601 = vrot.lane.b32.xlu1 %v15832_v38, %s20136_s3 }
 0x47b   : > { %12596 = vrot.lane.b32.xlu0 %v15714_v7, %s20116_s23  ;;  %v3974_v17 = vsel %vm3967_vm11, %v3933_v19, %v19963_v8  ;;  %v3975_v43 = vsel %vm3967_vm11, %v3934_v21, %v19964_v6  ;;  %v12263_v7 = vunpack.i.l.bf16 %v15989_v32  ;;  %v12303_v19 = vunpack.i.l.bf16 %v16053_v18 }
 0x47c   : > { %v16153_v38 = vpop.permute.xlu0 %12376  ;;  %v16155_v46 = vpop.permute.xlu1 %12356  ;;  %v4083_v28 = vpack.c.bf16 %v3975_v43, %v3974_v17  ;;  %v3854_v32 = vsel %vm2472_vm6, %v16015_v61, %v12233_v55  ;;  %v3855_v17 = vsel %vm2472_vm6, %v16015_v61, %v12234_v12 }
 0x47d   : > { %v3894_v18 = vsel %vm2554_vm8, %v12233_v55, %v12263_v7  ;;  %v12313_v55 = vunpack.i.l.bf16 %v16075_v52  ;;  %v4085_v52 = vpack.c.bf16 %v3855_v17, %v3854_v32 }
 0x47e   : > { %12611 = vrot.lane.b32.xlu1 %v15735_v41, %s20116_s23  ;;  %4355 = vmatprep.mubr.bf16.mxu0 %v4083_v28  ;;  %v3895_v41 = vsel %vm2554_vm8, %v12234_v12, %v12264_v34  ;;  %v12273_v28 = vunpack.i.l.bf16 %v15995_v3  ;;  %v3935_v8 = vsel %vm3926_vm10, %v3894_v18, %v12303_v19  ;;  %v12243_v34 = vunpack.i.l.bf16 %v15903_v15 }
 0x47f   : > { %12606 = vrot.lane.b32.xlu0 %v15935_v51, %s20135_s18  ;;  %4356 = vmatmul.mubr.bf16.gmra.mxu0 %v16044_v47  ;;  %v12274_v47 = vunpack.i.h.bf16 %v15995_v3  ;;  %v3936_v6 = vsel %vm3926_vm10, %v3895_v41, %v12304_v11 }
 0x480   : > { %v16166_v1 = vpop.permute.xlu0 %12386  ;;  %v16168_v21 = vpop.permute.xlu1 %12361 }
 0x481   : > { %v12389_v43 = vunpack.i.h.bf16 %v16166_v1  ;;  %v12388_v51 = vunpack.i.l.bf16 %v16166_v1  ;;  %v12348_v1 = vunpack.i.l.bf16 %v16117_v62 }
 0x482   : > { %12621 = vrot.lane.b32.xlu1 %v15965_v39, %s20135_s18  ;;  %v12244_v39 = vunpack.i.h.bf16 %v15903_v15 }
 0x483   : > { %12616 = vrot.lane.b32.xlu0 %v15863_v45, %s20136_s3  ;;  %v3976_v12 = vsel %vm3967_vm11, %v3935_v8, %v12388_v51  ;;  %v3977_v3 = vsel %vm3967_vm11, %v3936_v6, %v12389_v43  ;;  %v3896_v45 = vsel %vm2554_vm8, %v12243_v34, %v12273_v28 }
 0x484   : > { %v16196_v7 = vpop.permute.xlu1 %12366  ;;  %v4086_v11 = vpack.c.bf16 %v3977_v3, %v3976_v12  ;;  %v3897_v18 = vsel %vm2554_vm8, %v12244_v39, %v12274_v47  ;;  %v3937_v15 = vsel %vm3926_vm10, %v3896_v45, %v12313_v55  ;;  %v12294_v55 = vunpack.i.h.bf16 %v16040_v60 }
 0x485   : > { %v16198_v19 = vpop.permute.xlu0 %12401  ;;  %v3938_v6 = vsel %vm3926_vm10, %v3897_v18, %v12314_v24  ;;  %v3857_v24 = vsel %vm2472_vm6, %v16015_v61, %v12244_v39  ;;  %v12298_v39 = vunpack.i.l.bf16 %v16038_v9 }
 0x486   : > { %v12404_v8 = vunpack.i.h.bf16 %v16198_v19  ;;  %v12403_v41 = vunpack.i.l.bf16 %v16198_v19  ;;  %12631 = vrot.lane.b32.xlu1 %v15883_v22, %s20136_s3  ;;  %4363 = vmatprep.mubr.bf16.mxu0 %v4086_v11  ;;  %v12364_v19 = vunpack.i.h.bf16 %v16168_v21 }
 0x487   : > { %12626 = vrot.lane.b32.xlu0 %v15759_v48, %s20116_s23  ;;  %4364 = vmatmul.mubr.bf16.gmra.mxu0 %v4085_v52  ;;  %v3856_v48 = vsel %vm2472_vm6, %v16015_v61, %v12243_v34  ;;  %v12293_v52 = vunpack.i.l.bf16 %v16040_v60  ;;  %v12299_v34 = vunpack.i.h.bf16 %v16038_v9  ;;  %v12368_v60 = vunpack.i.l.bf16 %v16196_v7 }
 0x488   : > { %v16210_v32 = vpop.permute.xlu1 %12381  ;;  %v3978_v17 = vsel %vm3967_vm11, %v3937_v15, %v12403_v41  ;;  %v3979_v47 = vsel %vm3967_vm11, %v3938_v6, %v12404_v8  ;;  %v4088_v15 = vpack.c.bf16 %v3857_v24, %v3856_v48  ;;  %v20213_v6 = vunpack.i.h.bf16 %v16051_v4 }
 0x489   : > { %v12407_v22 = vpop.permute.xlu0 %12406  ;;  %v4089_v28 = vpack.c.bf16 %v3979_v47, %v3978_v17  ;;  %v20214_v17 = vunpack.i.l.bf16 %v16051_v4  ;;  %v20216_v24 = vunpack.i.h.bf16 %v16011_v29 }
 0x48a   : > { %v12409_v12 = vunpack.i.h.bf16 %v12407_v22  ;;  %v12408_v3 = vunpack.i.l.bf16 %v12407_v22  ;;  %12641 = vrot.lane.b32.xlu1 %v15783_v36, %s20116_s23  ;;  %v12369_v22 = vunpack.i.h.bf16 %v16196_v7  ;;  %v3858_v7 = vsel %vm2472_vm6, %v16015_v61, %v12293_v52 }
 0x48b   : > { %12636 = vrot.lane.b32.xlu0 %v15971_v58, %s20135_s18  ;;  %4371 = vmatprep.mubr.bf16.mxu0 %v4089_v28  ;;  %v20215_v28 = vunpack.i.l.bf16 %v16011_v29  ;;  %v12324_v29 = vunpack.i.h.bf16 %v16110_v63 }
 0x48c   : > { %v12392_v11 = vpop.permute.xlu1 %12391  ;;  %v4012_v58 = vsel %vm4008_vm12, %v20213_v6, %v12409_v12  ;;  %v4011_v47 = vsel %vm4008_vm12, %v20214_v17, %v12408_v3  ;;  %v3898_v3 = vsel %vm2554_vm8, %v12293_v52, %v12298_v39  ;;  %v12384_v39 = vunpack.i.h.bf16 %v16210_v32 }
 0x48d   : > { %v12394_v45 = vunpack.i.h.bf16 %v12392_v11  ;;  %v12393_v18 = vunpack.i.l.bf16 %v12392_v11  ;;  %v16228_v36 = vpop.permute.xlu0 %12411  ;;  %v3899_v11 = vsel %vm2554_vm8, %v12294_v55, %v12299_v34  ;;  %v4080_v6 = vpack.c.bf16 %v4012_v58, %v4011_v47 }
 0x48e   : > { %v12383_v58 = vunpack.i.l.bf16 %v16210_v32  ;;  %v3939_v52 = vsel %vm3926_vm10, %v3898_v3, %v12368_v60  ;;  %v12329_v47 = vunpack.i.h.bf16 %v16073_v49 }
 0x48f   : > { %v4009_v48 = vsel %vm4008_vm12, %v20215_v28, %v12393_v18  ;;  %v4010_v9 = vsel %vm4008_vm12, %v20216_v24, %v12394_v45  ;;  %4372 = vmatmul.mubr.bf16.gmra.mxu0 %v4088_v15  ;;  %v3859_v18 = vsel %vm2472_vm6, %v16015_v61, %v12294_v55  ;;  %v12323_v45 = vunpack.i.l.bf16 %v16110_v63 }
 0x490   : > { %v16247_v12 = vpop.permute.xlu1 %12396  ;;  %v4078_v4 = vpack.c.bf16 %v4010_v9, %v4009_v48  ;;  %v3940_v55 = vsel %vm3926_vm10, %v3899_v11, %v12369_v22  ;;  %v12328_v63 = vunpack.i.l.bf16 %v16073_v49  ;;  %v4091_v3 = vpack.c.bf16 %v3859_v18, %v3858_v7 }
 0x491   : > { %v16250_v17 = vpop.permute.xlu0 %12416  ;;  %v3901_v22 = vsel %vm2554_vm8, %v12324_v29, %v12329_v47 }
 0x492   : > { %v12419_v15 = vunpack.i.h.bf16 %v16250_v17  ;;  %v19966_v34 = vunpack.i.l.bf16 %v16250_v17  ;;  %11543 = vmatprep.mubr.msk.bf16.mxu1 %vm20018_vm13, %v4078_v4  ;;  %v3900_v11 = vsel %vm2554_vm8, %v12323_v45, %v12328_v63  ;;  %v3942_v7 = vsel %vm3926_vm10, %v3901_v22, %v12384_v39 }
 0x493   : > { %11544 = vmatmul.mubr.msk.bf16.vlgmr.msra.gmra.mxu1 %vm20018_vm13, %v4080_v6  ;;  %v12343_v39 = vunpack.i.l.bf16 %v16108_v23  ;;  %v20219_v22 = vunpack.i.h.bf16 %v16129_v16 }
 0x494   : > { %v12422_v28 = vpop.permute.xlu1 %12421  ;;  %v3980_v48 = vsel %vm3967_vm11, %v3939_v52, %v19966_v34  ;;  %v3981_v24 = vsel %vm3967_vm11, %v3940_v55, %v12419_v15  ;;  %v20217_v52 = vunpack.i.l.bf16 %v16088_v13  ;;  %v20218_v55 = vunpack.i.h.bf16 %v16088_v13 }
 0x495   : > { %v12424_v32 = vunpack.i.h.bf16 %v12422_v28  ;;  %v12423_v9 = vunpack.i.l.bf16 %v12422_v28  ;;  %v16274_v4 = vpop.permute.xlu0 %12426  ;;  %v4092_v60 = vpack.c.bf16 %v3981_v24, %v3980_v48  ;;  %v3941_v48 = vsel %vm3926_vm10, %v3900_v11, %v12383_v58 }
 0x496   : > { %v12429_v49 = vunpack.i.h.bf16 %v16274_v4  ;;  %v12428_v6 = vunpack.i.l.bf16 %v16274_v4  ;;  %v12344_v58 = vunpack.i.h.bf16 %v16108_v23  ;;  %v12339_v23 = vunpack.i.h.bf16 %v16086_v0 }
 0x497   : > { %v4013_v34 = vsel %vm4008_vm12, %v20217_v52, %v12423_v9  ;;  %v4014_v28 = vsel %vm4008_vm12, %v20218_v55, %v12424_v32  ;;  %4379 = vmatprep.mubr.bf16.mxu0 %v4092_v60  ;;  %v3861_v32 = vsel %vm2472_vm6, %v16015_v61, %v12324_v29  ;;  %v12334_v60 = vunpack.i.h.bf16 %v16119_v25 }
 0x498   : > { %4380 = vmatmul.mubr.bf16.gmra.mxu0 %v4091_v3  ;;  %v4082_v18 = vpack.c.bf16 %v4014_v28, %v4013_v34  ;;  %v3982_v47 = vsel %vm3967_vm11, %v3941_v48, %v12428_v6  ;;  %v3983_v63 = vsel %vm3967_vm11, %v3942_v7, %v12429_v49  ;;  %v3860_v34 = vsel %vm2472_vm6, %v16015_v61, %v12323_v45 }
 0x499   : > { %v12432_v24 = vpop.permute.xlu0 %12431  ;;  %v4095_v9 = vpack.c.bf16 %v3983_v63, %v3982_v47  ;;  %v12333_v3 = vunpack.i.l.bf16 %v16119_v25  ;;  %v20220_v55 = vunpack.i.l.bf16 %v16129_v16  ;;  %v12338_v45 = vunpack.i.l.bf16 %v16086_v0 }
 0x49a   : > { %v12434_v13 = vunpack.i.h.bf16 %v12432_v24  ;;  %v12433_v52 = vunpack.i.l.bf16 %v12432_v24  ;;  %11547 = vmatprep.mubr.msk.bf16.mxu1 %vm20018_vm13, %v4082_v18  ;;  %v12399_v7 = vunpack.i.h.bf16 %v16247_v12  ;;  %v12398_v61 = vunpack.i.l.bf16 %v16247_v12 }
 0x49b   : > { %4387 = vmatprep.mubr.bf16.mxu0 %v4095_v9  ;;  %v4094_v29 = vpack.c.bf16 %v3861_v32, %v3860_v34  ;;  %v3830_v25 = vsel %vm2397_vm4, 0.0, %v12344_v58  ;;  %v3829_v18 = vsel %vm2397_vm4, 0.0, %v12343_v39  ;;  %v3903_v16 = vsel %vm2554_vm8, %v12334_v60, %v12339_v23 }
 0x49c   : > { %v4016_v11 = vsel %vm4008_vm12, %v20219_v22, %v12434_v13  ;;  %v4015_v28 = vsel %vm4008_vm12, %v20220_v55, %v12433_v52  ;;  %v3902_v47 = vsel %vm2554_vm8, %v12333_v3, %v12338_v45  ;;  %v3862_v0 = vsel %vm2472_vm6, %v3829_v18, %v12333_v3 }
 0x49d   : > { %v4084_v48 = vpack.c.bf16 %v4016_v11, %v4015_v28  ;;  %v3863_v9 = vsel %vm2472_vm6, %v3830_v25, %v12334_v60  ;;  %v12359_v39 = vunpack.i.h.bf16 %v16155_v46  ;;  %v12358_v34 = vunpack.i.l.bf16 %v16155_v46 }
 0x49e   : > { %v3943_v32 = vsel %vm3926_vm10, %v3902_v47, %v12398_v61  ;;  %v3944_v22 = vsel %vm3926_vm10, %v3903_v16, %v12399_v7  ;;  %v12354_v55 = vunpack.i.h.bf16 %v16131_v44  ;;  %v12353_v28 = vunpack.i.l.bf16 %v16131_v44 }
 0x49f   : > { %11548 = vmatmul.mubr.msk.bf16.gmra.mxu1 %vm20018_vm13, %v4084_v48  ;;  %v12413_v7 = vunpack.i.l.bf16 %v16228_v36  ;;  %v4097_v61 = vpack.c.bf16 %v3863_v9, %v3862_v0  ;;  %v3831_v25 = vsel %vm2397_vm4, 0.0, %v12358_v34 }
 0x4a0   : > { %v12442_v63 = vpop.permute.xlu0 %12441  ;;  %v16318_v24 = vpop.permute.xlu1 %12436  ;;  %4388 = vmatmul.mubr.bf16.gmra.mxu0 %v4094_v29  ;;  %v3832_v29 = vsel %vm2397_vm4, 0.0, %v12359_v39  ;;  %v3904_v18 = vsel %vm2554_vm8, %v12348_v1, %v12353_v28 }
 0x4a1   : > { %v12444_v12 = vunpack.i.h.bf16 %v12442_v63  ;;  %v12443_v13 = vunpack.i.l.bf16 %v12442_v63  ;;  %v12439_v52 = vunpack.i.h.bf16 %v16318_v24  ;;  %v12438_v58 = vunpack.i.l.bf16 %v16318_v24 }
 0x4a2   : > { %v3945_v0 = vsel %vm3926_vm10, %v3904_v18, %v12413_v7 }
 0x4a3   : > { %v4018_v3 = vsel %vm4008_vm12, %v12389_v43, %v12444_v12  ;;  %v4017_v60 = vsel %vm4008_vm12, %v12388_v51, %v12443_v13  ;;  %v3984_v11 = vsel %vm3967_vm11, %v3943_v32, %v12438_v58  ;;  %v3985_v46 = vsel %vm3967_vm11, %v3944_v22, %v12439_v52 }
 0x4a4   : > { %v12457_v23 = vpop.permute.xlu0 %12456  ;;  %v4098_v48 = vpack.c.bf16 %v3985_v46, %v3984_v11  ;;  %v4087_v45 = vpack.c.bf16 %v4018_v3, %v4017_v60  ;;  %v12349_v43 = vunpack.i.h.bf16 %v16117_v62  ;;  %v12414_v51 = vunpack.i.h.bf16 %v16228_v36 }
 0x4a5   : > { %v3864_v13 = vsel %vm2472_vm6, %v3831_v25, %v12348_v1  ;;  %v12458_v28 = vunpack.i.l.bf16 %v12457_v23 }
 0x4a6   : > { %4395 = vmatprep.mubr.bf16.mxu0 %v4098_v48  ;;  %11551 = vmatprep.mubr.msk.bf16.mxu1 %vm20018_vm13, %v4087_v45  ;;  %v3905_v44 = vsel %vm2554_vm8, %v12349_v43, %v12354_v55  ;;  %v3865_v39 = vsel %vm2472_vm6, %v3832_v29, %v12349_v43  ;;  %v12459_v55 = vunpack.i.h.bf16 %v12457_v23  ;;  %v12379_v45 = vunpack.i.h.bf16 %v16153_v38 }
 0x4a7   : > { %v3946_v9 = vsel %vm3926_vm10, %v3905_v44, %v12414_v51  ;;  %v12378_v43 = vunpack.i.l.bf16 %v16153_v38  ;;  %v3833_v23 = vsel %vm2397_vm4, 0.0, %v12458_v28 }
 0x4a8   : > { %v16351_v16 = vpop.permute.xlu0 %12461  ;;  %v12447_v47 = vpop.permute.xlu1 %12446  ;;  %4396 = vmatmul.mubr.bf16.gmra.mxu0 %v4097_v61  ;;  %v3834_v7 = vsel %vm2397_vm4, 0.0, %v12459_v55  ;;  %v3907_v18 = vsel %vm2554_vm8, %v12364_v19, %v12379_v45 }
 0x4a9   : > { %v12464_v62 = vunpack.i.h.bf16 %v16351_v16  ;;  %v12463_v36 = vunpack.i.l.bf16 %v16351_v16  ;;  %v12449_v63 = vunpack.i.h.bf16 %v12447_v47  ;;  %v12448_v12 = vunpack.i.l.bf16 %v12447_v47 }
 0x4ab   : > { %v4020_v34 = vsel %vm4008_vm12, %v12404_v8, %v12449_v63  ;;  %v4019_v32 = vsel %vm4008_vm12, %v12403_v41, %v12448_v12  ;;  %v3986_v22 = vsel %vm3967_vm11, %v3945_v0, %v12463_v36  ;;  %v3987_v3 = vsel %vm3967_vm11, %v3946_v9, %v12464_v62 }
 0x4ac   : > { %v12452_v60 = vpop.permute.xlu1 %12451  ;;  %v4101_v11 = vpack.c.bf16 %v3987_v3, %v3986_v22  ;;  %v4090_v46 = vpack.c.bf16 %v4020_v34, %v4019_v32  ;;  %v4100_v8 = vpack.c.bf16 %v3865_v39, %v3864_v13  ;;  %v12363_v41 = vunpack.i.l.bf16 %v16168_v21 }
 0x4ad   : > { %v12454_v61 = vunpack.i.h.bf16 %v12452_v60  ;;  %v12453_v29 = vunpack.i.l.bf16 %v12452_v60  ;;  %v20221_v21 = vunpack.i.l.bf16 %v16250_v17  ;;  %v3867_v39 = vsel %vm2472_vm6, %v3834_v7, %v12364_v19 }
 0x4ae   : > { %4403 = vmatprep.mubr.bf16.mxu0 %v4101_v11  ;;  %11552 = vmatmul.mubr.msk.bf16.gmra.mxu1 %vm20018_vm13, %v4090_v46  ;;  %v3906_v38 = vsel %vm2554_vm8, %v12363_v41, %v12378_v43  ;;  %v3866_v13 = vsel %vm2472_vm6, %v3833_v23, %v12363_v41 }
 0x4af   : > { %v3947_v17 = vsel %vm3926_vm10, %v3906_v38, %v12453_v29 }
 0x4b0   : > { %v12467_v48 = vpop.permute.xlu1 %12466  ;;  %4404 = vmatmul.mubr.bf16.gmra.mxu0 %v4100_v8  ;;  %v4103_v8 = vpack.c.bf16 %v3867_v39, %v3866_v13 }
 0x4b1   : > { %v12469_v1 = vunpack.i.h.bf16 %v12467_v48  ;;  %v12468_v51 = vunpack.i.l.bf16 %v12467_v48 }
 0x4b3   : > { %v4022_v25 = vsel %vm4008_vm12, %v12419_v15, %v12469_v1  ;;  %v4021_v44 = vsel %vm4008_vm12, %v20221_v21, %v12468_v51  ;;  %v3948_v15 = vsel %vm3926_vm10, %v3907_v18, %v12454_v61 }
 0x4b4   : > { %v12472_v47 = vpop.permute.xlu1 %12471  ;;  %v4093_v63 = vpack.c.bf16 %v4022_v25, %v4021_v44 }
 0x4b5   : > { %v12474_v12 = vunpack.i.h.bf16 %v12472_v47  ;;  %v12473_v0 = vunpack.i.l.bf16 %v12472_v47  ;;  %v12477_v9 = vpop.permute.xlu0 %12476 }
 0x4b6   : > { %v12479_v34 = vunpack.i.h.bf16 %v12477_v9  ;;  %v12478_v32 = vunpack.i.l.bf16 %v12477_v9  ;;  %11555 = vmatprep.mubr.msk.bf16.mxu1 %vm20018_vm13, %v4093_v63 }
 0x4b7   : > { %v3988_v22 = vsel %vm3967_vm11, %v3947_v17, %v12473_v0  ;;  %v3989_v3 = vsel %vm3967_vm11, %v3948_v15, %v12474_v12 }
 0x4b8   : > { %v4024_v60 = vsel %vm4008_vm12, %v12429_v49, %v12479_v34  ;;  %v4023_v11 = vsel %vm4008_vm12, %v12428_v6, %v12478_v32  ;;  %v12482_v46 = vpop.permute.xlu1 %12481  ;;  %v4104_v55 = vpack.c.bf16 %v3989_v3, %v3988_v22 }
 0x4b9   : > { %v16399_v28 = vpop.permute.xlu0 %3809  ;;  %v4096_v19 = vpack.c.bf16 %v4024_v60, %v4023_v11 }
 0x4ba   : > { %4411 = vmatprep.mubr.bf16.mxu0 %v4104_v55  ;;  %v4025_v41 = vsel %vm4008_vm12, %v12438_v58, %v16399_v28  ;;  %v4026_v49 = vsel %vm4008_vm12, %v12439_v52, %v16399_v28  ;;  %v4027_v45 = vsel %vm4008_vm12, %v12463_v36, %v16399_v28  ;;  %v4028_v24 = vsel %vm4008_vm12, %v12464_v62, %v16399_v28 }
 0x4bb   : > { %4412 = vmatmul.mubr.bf16.gmra.mxu0 %v4103_v8  ;;  %11556 = vmatmul.mubr.msk.bf16.gmra.mxu1 %vm20018_vm13, %v4096_v19  ;;  %v4099_v4 = vpack.c.bf16 %v4026_v49, %v4025_v41  ;;  %v12484_v58 = vunpack.i.h.bf16 %v12482_v46  ;;  %v12483_v52 = vunpack.i.l.bf16 %v12482_v46  ;;  %v4029_v23 = vsel %vm4008_vm12, %v12473_v0, %v16399_v28 }
 0x4bc   : > { %v12492_v6 = vpop.permute.xlu1 %12491  ;;  %v4030_v61 = vsel %vm4008_vm12, %v12474_v12, %v16399_v28  ;;  %v4102_v16 = vpack.c.bf16 %v4028_v24, %v4027_v45 }
 0x4bd   : > { %v12487_v48 = vpop.permute.xlu0 %12486  ;;  %11559 = vmatprep.mubr.msk.bf16.mxu1 %vm20018_vm13, %v4099_v4  ;;  %v12494_v51 = vunpack.i.h.bf16 %v12492_v6  ;;  %v12493_v7 = vunpack.i.l.bf16 %v12492_v6  ;;  %v4105_v9 = vpack.c.bf16 %v4030_v61, %v4029_v23 }
 0x4be   : > { %v12489_v43 = vunpack.i.h.bf16 %v12487_v48  ;;  %v12488_v1 = vunpack.i.l.bf16 %v12487_v48 }
 0x4c0   : > { %v3908_v29 = vsel %vm2554_vm8, %v12483_v52, %v12488_v1  ;;  %v3909_v36 = vsel %vm2554_vm8, %v12484_v58, %v12489_v43  ;;  %v12507_v25 = vpop.permute.xlu1 %12506  ;;  %v20222_v43 = vmax.f32 %v15418_v10, 0.0 }
 0x4c1   : > { %v12509_v21 = vunpack.i.h.bf16 %v12507_v25  ;;  %v12508_v62 = vunpack.i.l.bf16 %v12507_v25  ;;  %v12497_v44 = vpop.permute.xlu0 %12496  ;;  %v3949_v18 = vsel %vm3926_vm10, %v3908_v29, %v12493_v7  ;;  %v3950_v38 = vsel %vm3926_vm10, %v3909_v36, %v12494_v51 }
 0x4c2   : > { %v12499_v47 = vunpack.i.h.bf16 %v12497_v44  ;;  %v12498_v63 = vunpack.i.l.bf16 %v12497_v44  ;;  %v20223_v51 = vmax.f32 %v15425_v20, 0.0 }
 0x4c3   : > { %11560 = vmatmul.mubr.msk.bf16.gmra.mxu1 %vm20018_vm13, %v4102_v16  ;;  %v3990_v12 = vsel %vm3967_vm11, %v3949_v18, %v12508_v62  ;;  %v3991_v0 = vsel %vm3967_vm11, %v3950_v38, %v12509_v21  ;;  %v4032_v3 = vsel %vm4008_vm12, %v12509_v21, %v16399_v28  ;;  %v4031_v60 = vsel %vm4008_vm12, %v12508_v62, %v16399_v28 }
 0x4c4   : > { %v3836_v13 = vsel %vm2397_vm4, 0.0, %v12499_v47  ;;  %v3835_v39 = vsel %vm2397_vm4, 0.0, %v12498_v63  ;;  %v12512_v34 = vpop.permute.xlu1 %12511  ;;  %11563 = vmatprep.mubr.msk.bf16.mxu1 %vm20018_vm13, %v4105_v9  ;;  %v4107_v32 = vpack.c.bf16 %v3991_v0, %v3990_v12  ;;  %v4108_v48 = vpack.c.bf16 %v4032_v3, %v4031_v60 }
 0x4c5   : > { %v12502_v17 = vpop.permute.xlu0 %12501  ;;  %v3868_v15 = vsel %vm2472_vm6, %v3835_v39, %v12483_v52  ;;  %v3869_v22 = vsel %vm2472_vm6, %v3836_v13, %v12484_v58  ;;  %v12514_v46 = vunpack.i.h.bf16 %v12512_v34  ;;  %v12513_v55 = vunpack.i.l.bf16 %v12512_v34 }
 0x4c6   : > { %4419 = vmatprep.mubr.bf16.mxu0 %v4107_v32  ;;  %v4106_v11 = vpack.c.bf16 %v3869_v22, %v3868_v15  ;;  %v12504_v8 = vunpack.i.h.bf16 %v12502_v17  ;;  %v12503_v19 = vunpack.i.l.bf16 %v12502_v17 }
 0x4c8   : > { %v12522_v41 = vpop.permute.xlu1 %12521  ;;  %4420 = vmatmul.mubr.bf16.gmra.mxu0 %v4106_v11  ;;  %v3910_v58 = vsel %vm2554_vm8, %v12503_v19, %v12513_v55  ;;  %v3911_v52 = vsel %vm2554_vm8, %v12504_v8, %v12514_v46 }
 0x4c9   : > { %v12524_v49 = vunpack.i.h.bf16 %v12522_v41  ;;  %v12523_v4 = vunpack.i.l.bf16 %v12522_v41  ;;  %v12517_v6 = vpop.permute.xlu0 %12516  ;;  %v20224_v41 = vmax.f32 %v15450_v27, 0.0 }
 0x4ca   : > { %v12519_v45 = vunpack.i.h.bf16 %v12517_v6  ;;  %v12518_v24 = vunpack.i.l.bf16 %v12517_v6 }
 0x4cb   : > { %11564 = vmatmul.mubr.msk.bf16.gmra.mxu1 %vm20018_vm13, %v4108_v48  ;;  %v3837_v1 = vsel %vm2397_vm4, %v20222_v43, %v12523_v4  ;;  %v3838_v7 = vsel %vm2397_vm4, %v20223_v51, %v12524_v49  ;;  %v20225_v4 = vmax.f32 %v15459_v53, 0.0 }
 0x4cc   : > { %v12527_v23 = vpop.permute.xlu1 %12526  ;;  %v3951_v61 = vsel %vm3926_vm10, %v3910_v58, %v12518_v24  ;;  %v3952_v29 = vsel %vm3926_vm10, %v3911_v52, %v12519_v45  ;;  %v3870_v25 = vsel %vm2472_vm6, %v3837_v1, %v12503_v19  ;;  %v3871_v16 = vsel %vm2472_vm6, %v3838_v7, %v12504_v8 }
 0x4cd   : > { %v16450_v36 = vpop.permute.xlu0 %3750  ;;  %v4109_v38 = vpack.c.bf16 %v3871_v16, %v3870_v25  ;;  %v12529_v63 = vunpack.i.h.bf16 %v12527_v23  ;;  %v12528_v9 = vunpack.i.l.bf16 %v12527_v23 }
 0x4ce   : > { %v3992_v10 = vsel %vm3967_vm11, %v3951_v61, %v16450_v36  ;;  %v3993_v21 = vsel %vm3967_vm11, %v3952_v29, %v16450_v36  ;;  %v4033_v20 = vsel %vm4008_vm12, %v16450_v36, %v16399_v28 }
 0x4cf   : > { %v4110_v62 = vpack.c.bf16 %v3993_v21, %v3992_v10  ;;  %v16461_v44 = vpack.c.bf16 %v4033_v20, %v4033_v20 }
 0x4d0   : > { %v12537_v18 = vpop.permute.xlu1 %12536 }
 0x4d1   : > { %v12532_v47 = vpop.permute.xlu0 %12531  ;;  %4427 = vmatprep.mubr.bf16.mxu0 %v4110_v62  ;;  %11567 = vmatprep.mubr.msk.bf16.mxu1 %vm20018_vm13, %v16461_v44  ;;  %v12539_v13 = vunpack.i.h.bf16 %v12537_v18  ;;  %v12538_v39 = vunpack.i.l.bf16 %v12537_v18 }
 0x4d2   : > { %v12534_v12 = vunpack.i.h.bf16 %v12532_v47  ;;  %v12533_v0 = vunpack.i.l.bf16 %v12532_v47  ;;  %4428 = vmatmul.mubr.bf16.gmra.mxu0 %v4109_v38  ;;  %v20226_v47 = vmax.f32 %v15501_v26, 0.0 }
 0x4d3   : > { %11568 = vmatmul.mubr.msk.bf16.gmra.mxu1 %vm20018_vm13, %v16461_v44 }
 0x4d4   : > { %v3912_v34 = vsel %vm2554_vm8, %v12528_v9, %v12533_v0  ;;  %v3913_v32 = vsel %vm2554_vm8, %v12529_v63, %v12534_v12  ;;  %v12547_v17 = vpop.permute.xlu1 %12546  ;;  %11571 = vmatprep.mubr.msk.bf16.mxu1 %vm20018_vm13, %v16461_v44 }
 0x4d5   : > { %v12542_v15 = vpop.permute.xlu0 %12541  ;;  %v3953_v22 = vsel %vm3926_vm10, %v3912_v34, %v12538_v39  ;;  %v3954_v3 = vsel %vm3926_vm10, %v3913_v32, %v12539_v13  ;;  %v12549_v48 = vunpack.i.h.bf16 %v12547_v17  ;;  %v12548_v52 = vunpack.i.l.bf16 %v12547_v17 }
 0x4d6   : > { %v12544_v60 = vunpack.i.h.bf16 %v12542_v15  ;;  %v12543_v11 = vunpack.i.l.bf16 %v12542_v15  ;;  %v3994_v46 = vsel %vm3967_vm11, %v3953_v22, %v16450_v36  ;;  %v3995_v55 = vsel %vm3967_vm11, %v3954_v3, %v16450_v36 }
 0x4d7   : > { %v4113_v8 = vpack.c.bf16 %v3995_v55, %v3994_v46 }
 0x4d8   : > { %v12557_v19 = vpop.permute.xlu1 %12556  ;;  %v3839_v49 = vsel %vm2397_vm4, %v20224_v41, %v12543_v11  ;;  %v3840_v6 = vsel %vm2397_vm4, %v20225_v4, %v12544_v60 }
 0x4d9   : > { %v12552_v45 = vpop.permute.xlu0 %12551  ;;  %4435 = vmatprep.mubr.bf16.mxu0 %v4113_v8  ;;  %v3872_v24 = vsel %vm2472_vm6, %v3839_v49, %v12528_v9  ;;  %v3873_v58 = vsel %vm2472_vm6, %v3840_v6, %v12529_v63  ;;  %v12559_v7 = vunpack.i.h.bf16 %v12557_v19  ;;  %v12558_v23 = vunpack.i.l.bf16 %v12557_v19 }
 0x4da   : > { %v12554_v43 = vunpack.i.h.bf16 %v12552_v45  ;;  %v12553_v1 = vunpack.i.l.bf16 %v12552_v45  ;;  %v4112_v51 = vpack.c.bf16 %v3873_v58, %v3872_v24  ;;  %v20227_v9 = vmax.f32 %v15493_v54, 0.0 }
 0x4db   : > { %11572 = vmatmul.mubr.msk.bf16.gmra.mxu1 %vm20018_vm13, %v16461_v44  ;;  %v20228_v45 = vmax.f32 %v15518_v14, 0.0  ;;  %v20229_v58 = vmax.f32 %v15526_v50, 0.0 }
 0x4dc   : > { %v3914_v27 = vsel %vm2554_vm8, %v12548_v52, %v12553_v1  ;;  %v3915_v53 = vsel %vm2554_vm8, %v12549_v48, %v12554_v43  ;;  %v12567_v61 = vpop.permute.xlu1 %12566  ;;  %4436 = vmatmul.mubr.bf16.gmra.mxu0 %v4112_v51  ;;  %11575 = vmatprep.mubr.msk.bf16.mxu1 %vm20018_vm13, %v16461_v44 }
 0x4dd   : > { %v12562_v29 = vpop.permute.xlu0 %12561  ;;  %v3955_v25 = vsel %vm3926_vm10, %v3914_v27, %v12558_v23  ;;  %v3956_v16 = vsel %vm3926_vm10, %v3915_v53, %v12559_v7  ;;  %v12569_v0 = vunpack.i.h.bf16 %v12567_v61  ;;  %v12568_v32 = vunpack.i.l.bf16 %v12567_v61 }
 0x4de   : > { %v12564_v10 = vunpack.i.h.bf16 %v12562_v29  ;;  %v12563_v21 = vunpack.i.l.bf16 %v12562_v29  ;;  %v3996_v20 = vsel %vm3967_vm11, %v3955_v25, %v16450_v36  ;;  %v3997_v62 = vsel %vm3967_vm11, %v3956_v16, %v16450_v36 }
 0x4df   : > { %v4115_v18 = vpack.c.bf16 %v3997_v62, %v3996_v20 }
 0x4e0   : > { %v12582_v38 = vpop.permute.xlu1 %12581  ;;  %v3841_v63 = vsel %vm2397_vm4, %v20226_v47, %v12563_v21  ;;  %v3842_v12 = vsel %vm2397_vm4, %v20227_v9, %v12564_v10 }
 0x4e1   : > { %v12572_v13 = vpop.permute.xlu0 %12571  ;;  %4443 = vmatprep.mubr.bf16.mxu0 %v4115_v18  ;;  %v3874_v39 = vsel %vm2472_vm6, %v3841_v63, %v12548_v52  ;;  %v3875_v34 = vsel %vm2472_vm6, %v3842_v12, %v12549_v48  ;;  %v12584_v3 = vunpack.i.h.bf16 %v12582_v38  ;;  %v12583_v60 = vunpack.i.l.bf16 %v12582_v38 }
 0x4e2   : > { %v12574_v17 = vunpack.i.h.bf16 %v12572_v13  ;;  %v12573_v15 = vunpack.i.l.bf16 %v12572_v13  ;;  %v4114_v22 = vpack.c.bf16 %v3875_v34, %v3874_v39  ;;  %v20230_v63 = vmax.f32 %v15561_v57, 0.0 }
 0x4e3   : > { %11576 = vmatmul.mubr.msk.bf16.gmra.mxu1 %vm20018_vm13, %v16461_v44  ;;  %v20231_v12 = vmax.f32 %v15570_v40, 0.0  ;;  %v20232_v57 = vmax.f32 %v15598_v59, 0.0  ;;  %v20233_v40 = vmax.f32 %v15606_v30, 0.0 }
 0x4e4   : > { %v3916_v54 = vsel %vm2554_vm8, %v12568_v32, %v12573_v15  ;;  %v3917_v26 = vsel %vm2554_vm8, %v12569_v0, %v12574_v17  ;;  %v12587_v11 = vpop.permute.xlu1 %12586  ;;  %4444 = vmatmul.mubr.bf16.gmra.mxu0 %v4114_v22  ;;  %11579 = vmatprep.mubr.msk.bf16.mxu1 %vm20018_vm13, %v16461_v44 }
 0x4e5   : > { %v12577_v46 = vpop.permute.xlu0 %12576  ;;  %v3957_v55 = vsel %vm3926_vm10, %v3916_v54, %v12583_v60  ;;  %v3958_v8 = vsel %vm3926_vm10, %v3917_v26, %v12584_v3  ;;  %v12589_v43 = vunpack.i.h.bf16 %v12587_v11  ;;  %v12588_v23 = vunpack.i.l.bf16 %v12587_v11 }
 0x4e6   : > { %v12579_v19 = vunpack.i.h.bf16 %v12577_v46  ;;  %v12578_v41 = vunpack.i.l.bf16 %v12577_v46  ;;  %v3998_v49 = vsel %vm3967_vm11, %v3957_v55, %v16450_v36  ;;  %v3999_v4 = vsel %vm3967_vm11, %v3958_v8, %v16450_v36 }
 0x4e7   : > { %v4117_v6 = vpack.c.bf16 %v3999_v4, %v3998_v49 }
 0x4e8   : > { %v16517_v48 = vpop.permute.xlu1 %3667  ;;  %v3843_v24 = vsel %vm2397_vm4, %v20228_v45, %v12578_v41  ;;  %v3844_v52 = vsel %vm2397_vm4, %v20229_v58, %v12579_v19 }
 0x4e9   : > { %v12592_v1 = vpop.permute.xlu0 %12591  ;;  %4451 = vmatprep.mubr.bf16.mxu0 %v4117_v6  ;;  %v3876_v51 = vsel %vm2472_vm6, %v3843_v24, %v12568_v32  ;;  %v3877_v7 = vsel %vm2472_vm6, %v3844_v52, %v12569_v0 }
 0x4ea   : > { %v12594_v27 = vunpack.i.h.bf16 %v12592_v1  ;;  %v12593_v53 = vunpack.i.l.bf16 %v12592_v1  ;;  %v4116_v61 = vpack.c.bf16 %v3877_v7, %v3876_v51 }
 0x4eb   : > { %11580 = vmatmul.mubr.msk.bf16.gmra.mxu1 %vm20018_vm13, %v16461_v44  ;;  %vm7504_vm13 = vcmask 1045504  }
 0x4ec   : > { %v3918_v14 = vsel %vm2554_vm8, %v12588_v23, %v12593_v53  ;;  %v3919_v50 = vsel %vm2554_vm8, %v12589_v43, %v12594_v27  ;;  %v12602_v29 = vpop.permute.xlu1 %12601  ;;  %4452 = vmatmul.mubr.bf16.gmra.mxu0 %v4116_v61 }
 0x4ed   : > { %v12597_v25 = vpop.permute.xlu0 %12596  ;;  %v3959_v16 = vsel %vm3926_vm10, %v3918_v14, %v16517_v48  ;;  %v3960_v10 = vsel %vm3926_vm10, %v3919_v50, %v16517_v48  ;;  %v12604_v38 = vunpack.i.h.bf16 %v12602_v29  ;;  %v12603_v15 = vunpack.i.l.bf16 %v12602_v29 }
 0x4ee   : > { %v12599_v21 = vunpack.i.h.bf16 %v12597_v25  ;;  %v12598_v20 = vunpack.i.l.bf16 %v12597_v25  ;;  %v4000_v62 = vsel %vm3967_vm11, %v3959_v16, %v16450_v36  ;;  %v4001_v44 = vsel %vm3967_vm11, %v3960_v10, %v16450_v36 }
 0x4ef   : > { %v4119_v18 = vpack.c.bf16 %v4001_v44, %v4000_v62  ;;  %v20234_v16 = vmax.f32 %v15633_v35, 0.0 }
 0x4f0   : > { %v12612_v47 = vpop.permute.xlu1 %12611  ;;  %v3845_v9 = vsel %vm2397_vm4, %v20230_v63, %v12598_v20  ;;  %v3846_v0 = vsel %vm2397_vm4, %v20231_v12, %v12599_v21  ;;  %v20235_v21 = vmax.f32 %v15643_v5, 0.0 }
 0x4f1   : > { %v12614_v13 = vunpack.i.h.bf16 %v12612_v47  ;;  %v12613_v39 = vunpack.i.l.bf16 %v12612_v47  ;;  %v12607_v34 = vpop.permute.xlu0 %12606  ;;  %4459 = vmatprep.mubr.bf16.mxu0 %v4119_v18  ;;  %v3878_v32 = vsel %vm2472_vm6, %v3845_v9, %v12588_v23  ;;  %v3879_v17 = vsel %vm2472_vm6, %v3846_v0, %v12589_v43 }
 0x4f2   : > { %v12609_v22 = vunpack.i.h.bf16 %v12607_v34  ;;  %v12608_v3 = vunpack.i.l.bf16 %v12607_v34  ;;  %v4118_v60 = vpack.c.bf16 %v3879_v17, %v3878_v32 }
 0x4f3   : > { %v3847_v54 = vsel %vm2397_vm4, %v20232_v57, %v12613_v39  ;;  %v3848_v26 = vsel %vm2397_vm4, %v20233_v40, %v12614_v13  ;;  %v20237_v57 = vmax.f32 %v15675_v42, 0.0 }
 0x4f4   : > { %v3920_v11 = vsel %vm2554_vm8, %v12603_v15, %v12608_v3  ;;  %v3921_v46 = vsel %vm2554_vm8, %v12604_v38, %v12609_v22  ;;  %v12622_v55 = vpop.permute.xlu1 %12621  ;;  %4460 = vmatmul.mubr.bf16.gmra.mxu0 %v4118_v60  ;;  %v3880_v8 = vsel %vm2472_vm6, %v3847_v54, %v12603_v15  ;;  %v3881_v19 = vsel %vm2472_vm6, %v3848_v26, %v12604_v38 }
 0x4f5   : > { %v12624_v41 = vunpack.i.h.bf16 %v12622_v55  ;;  %v12623_v49 = vunpack.i.l.bf16 %v12622_v55  ;;  %v12617_v4 = vpop.permute.xlu0 %12616  ;;  %v3961_v59 = vsel %vm3926_vm10, %v3920_v11, %v16517_v48  ;;  %v3962_v30 = vsel %vm3926_vm10, %v3921_v46, %v16517_v48 }
 0x4f6   : > { %v12619_v6 = vunpack.i.h.bf16 %v12617_v4  ;;  %v12618_v45 = vunpack.i.l.bf16 %v12617_v4  ;;  %v4002_v24 = vsel %vm3967_vm11, %v3961_v59, %v16450_v36  ;;  %v4003_v58 = vsel %vm3967_vm11, %v3962_v30, %v16450_v36 }
 0x4f7   : > { %v4121_v52 = vpack.c.bf16 %v4003_v58, %v4002_v24  ;;  %v4120_v23 = vpack.c.bf16 %v3881_v19, %v3880_v8  ;;  %v20236_v3 = vmax.f32 %v15667_v56, 0.0 }
 0x4f8   : > { %v3922_v43 = vsel %vm2554_vm8, %v12618_v45, %v12623_v49  ;;  %v3923_v1 = vsel %vm2554_vm8, %v12619_v6, %v12624_v41  ;;  %v12632_v51 = vpop.permute.xlu1 %12631 }
 0x4f9   : > { %v12627_v7 = vpop.permute.xlu0 %12626  ;;  %4467 = vmatprep.mubr.bf16.mxu0 %v4121_v52  ;;  %v3963_v27 = vsel %vm3926_vm10, %v3922_v43, %v16517_v48  ;;  %v3964_v53 = vsel %vm3926_vm10, %v3923_v1, %v16517_v48  ;;  %v12634_v18 = vunpack.i.h.bf16 %v12632_v51  ;;  %v12633_v38 = vunpack.i.l.bf16 %v12632_v51 }
 0x4fa   : > { %v12629_v61 = vunpack.i.h.bf16 %v12627_v7  ;;  %v12628_v14 = vunpack.i.l.bf16 %v12627_v7  ;;  %v4004_v50 = vsel %vm3967_vm11, %v3963_v27, %v16450_v36  ;;  %v4005_v29 = vsel %vm3967_vm11, %v3964_v53, %v16450_v36  ;;  %v16604_v7 = vld [vmem:[%s20238_s19] ss:$0 sm:$0xff]  ;;  %s20335_s19 = sld [smem:[#allocation18_spill]] }
 0x4fb   : > { %v4123_v25 = vpack.c.bf16 %v4005_v29, %v4004_v50 }
 0x4fc   : > { %4468 = vmatmul.mubr.bf16.gmra.mxu0 %v4120_v23  ;;  %v3849_v10 = vsel %vm2397_vm4, %v20234_v16, %v12628_v14  ;;  %v3850_v20 = vsel %vm2397_vm4, %v20235_v21, %v12629_v61  ;;  %v12642_v62 = vpop.permute.xlu1 %12641 }
 0x4fd   : > { %v12637_v44 = vpop.permute.xlu0 %12636  ;;  %4475 = vmatprep.mubr.bf16.mxu0 %v4123_v25  ;;  %v3882_v9 = vsel %vm2472_vm6, %v3849_v10, %v12618_v45  ;;  %v3883_v12 = vsel %vm2472_vm6, %v3850_v20, %v12619_v6  ;;  %v12644_v0 = vunpack.i.h.bf16 %v12642_v62  ;;  %v12643_v13 = vunpack.i.l.bf16 %v12642_v62 }
 0x4fe   : > { %v12639_v47 = vunpack.i.h.bf16 %v12637_v44  ;;  %v12638_v63 = vunpack.i.l.bf16 %v12637_v44  ;;  %v4122_v32 = vpack.c.bf16 %v3883_v12, %v3882_v9 }
 0x4ff   : > { %v3851_v60 = vsel %vm2397_vm4, %v20236_v3, %v12643_v13  ;;  %v3852_v54 = vsel %vm2397_vm4, %v20237_v57, %v12644_v0 }
 0x500   : > { %v3924_v35 = vsel %vm2554_vm8, %v12633_v38, %v12638_v63  ;;  %v3925_v39 = vsel %vm2554_vm8, %v12634_v18, %v12639_v47  ;;  %v3885_v40 = vsel %vm2472_vm6, %v3852_v54, %v12634_v18 }
 0x501   : > { %v3965_v5 = vsel %vm3926_vm10, %v3924_v35, %v16517_v48  ;;  %v3966_v34 = vsel %vm3926_vm10, %v3925_v39, %v16517_v48  ;;  %v3884_v48 = vsel %vm2472_vm6, %v3851_v60, %v12633_v38 }
 0x502   : > { %v4006_v17 = vsel %vm3967_vm11, %v3965_v5, %v16450_v36  ;;  %v4007_v15 = vsel %vm3967_vm11, %v3966_v34, %v16450_v36  ;;  %v4124_v26 = vpack.c.bf16 %v3885_v40, %v3884_v48 }
 0x503   : > { %v4125_v22 = vpack.c.bf16 %v4007_v15, %v4006_v17 }
 0x504   : > { %4476 = vmatmul.mubr.bf16.gmra.mxu0 %v4122_v32 }
 0x505   : > { %4483 = vmatprep.mubr.bf16.mxu0 %v4125_v22 }
 0x50c   : > { %4484 = vmatmul.mubr.bf16.gmra.mxu0 %v4124_v26 }
 0x523   : > { %v4333_v11 = vpop.f32.mrf.mxu0 }
 0x524   : > { %v4334_v25 = vadd.f32 %v16604_v7, %v4333_v11 }
 0x525   : > { %v4335_v46 = vpop.f32.mrf.mxu0 }
 0x527   : > { %v4336_v36 = vpop.f32.mrf.mxu0 }
 0x528   : > { %v4337_v18 = vadd.f32 %v16604_v7, %v4336_v36 }
 0x529   : > { %v4338_v55 = vpop.f32.mrf.mxu0 }
 0x52b   : > { %v4341_v8 = vpop.f32.mrf.mxu0 }
 0x52c   : > { %v4342_v27 = vadd.f32 %v16604_v7, %v4341_v8 }
 0x52d   : > { %v4343_v19 = vpop.f32.mrf.mxu0 }
 0x52f   : > { %v4344_v56 = vpop.f32.mrf.mxu0 }
 0x530   : > { %v4345_v16 = vadd.f32 %v16604_v7, %v4344_v56 }
 0x531   : > { %v4346_v41 = vpop.f32.mrf.mxu0 }
 0x533   : > { %v4349_v49 = vpop.f32.mrf.mxu0 }
 0x534   : > { %v4350_v13 = vadd.f32 %v16604_v7, %v4349_v49 }
 0x535   : > { %v4351_v42 = vpop.f32.mrf.mxu0 }
 0x537   : > { %v4352_v4 = vpop.f32.mrf.mxu0 }
 0x538   : > { %v4353_v22 = vadd.f32 %v16604_v7, %v4352_v4 }
 0x539   : > { %v4354_v59 = vpop.f32.mrf.mxu0 }
 0x53f   : > { %v4357_v30 = vpop.f32.mrf.mxu0 }
 0x540   : > { %v4358_v9 = vadd.f32 %v16604_v7, %v4357_v30 }
 0x541   : > { %v4359_v6 = vpop.f32.mrf.mxu0 }
 0x543   : > { %v4360_v45 = vpop.f32.mrf.mxu0 }
 0x544   : > { %v4361_v34 = vadd.f32 %v16604_v7, %v4360_v45 }
 0x545   : > { %v4362_v24 = vpop.f32.mrf.mxu0 }
 0x547   : > { %v4365_v58 = vpop.f32.mrf.mxu0 }
 0x548   : > { %v4366_v41 = vadd.f32 %v16604_v7, %v4365_v58 }
 0x549   : > { %v4367_v52 = vpop.f32.mrf.mxu0 }
 0x54b   : > { %v16601_v43 = vpop.f32.mrf.mxu0 }
 0x54c   : > { %v4369_v24 = vadd.f32 %v16604_v7, %v16601_v43 }
 0x54d   : > { %v4370_v1 = vpop.f32.mrf.mxu0 }
 0x54f   : > { %v4373_v51 = vpop.f32.mrf.mxu0 }
 0x550   : > { %v4374_v46 = vadd.f32 %v16604_v7, %v4373_v51 }
 0x551   : > { %v4375_v23 = vpop.f32.mrf.mxu0 }
 0x553   : > { %v4376_v53 = vpop.f32.mrf.mxu0  ;;  %v11545_v61 = vpop.f32.mrf.mxu1 }
 0x554   : > { %v4535_v14 = vadd.f32 %v11545_v61, %v4342_v27  ;;  %v4377_v49 = vadd.f32 %v16604_v7, %v4376_v53 }
 0x555   : > { %v4378_v50 = vpop.f32.mrf.mxu0  ;;  %v4526_v29 = vpop.f32.mrf.mxu1 }
 0x556   : > { %4729 = vrot.lane.b32.xlu0 %v4535_v14, %s20116_s23  ;;  %v4527_v21 = vadd.f32 %v4526_v29, %v4334_v25 }
 0x557   : > { %v11546_v10 = vpop.f32.mrf.mxu1 }
 0x558   : > { %v4538_v20 = vadd.f32 %v11546_v10, %v4345_v16  ;;  %v4381_v62 = vpop.f32.mrf.mxu0 }
 0x559   : > { %v4529_v44 = vpop.f32.mrf.mxu1  ;;  %v4382_v23 = vadd.f32 %v16604_v7, %v4381_v62 }
 0x55a   : > { %v4383_v38 = vpop.f32.mrf.mxu0  ;;  %4731 = vrot.lane.b32.xlu1 %v4538_v20, %s20116_s23  ;;  %4725 = vrot.lane.b32.xlu0 %v4527_v21, %s20116_s23  ;;  %v4530_v47 = vadd.f32 %v4529_v44, %v4337_v18 }
 0x55c   : > { %v4384_v63 = vpop.f32.mrf.mxu0 }
 0x55d   : > { %v4385_v43 = vadd.f32 %v16604_v7, %v4384_v63 }
 0x55e   : > { %v4386_v12 = vpop.f32.mrf.mxu0  ;;  %4727 = vrot.lane.b32.xlu1 %v4530_v47, %s20116_s23 }
 0x55f   : > { %v11549_v0 = vpop.f32.mrf.mxu1 }
 0x560   : > { %v16616_v35 = vadd.f32 %v11549_v0, %v4358_v9  ;;  %v16618_v39 = vpop.f32.mrf.mxu0 }
 0x561   : > { %v4542_v5 = vpop.f32.mrf.mxu1 }
 0x562   : > { %v4543_v32 = vadd.f32 %v4542_v5, %v4350_v13  ;;  %v4391_v17 = vpop.f32.mrf.mxu0 }
 0x563   : > { %v11550_v15 = vpop.f32.mrf.mxu1 }
 0x564   : > { %v16622_v3 = vadd.f32 %v11550_v15, %v4361_v34  ;;  %v16624_v60 = vpop.f32.mrf.mxu0  ;;  %4733 = vrot.lane.b32.xlu0 %v4543_v32, %s20116_s23 }
 0x565   : > { %v4545_v57 = vpop.f32.mrf.mxu1 }
 0x566   : > { %v4546_v54 = vadd.f32 %v4545_v57, %v4353_v22  ;;  %v4394_v48 = vpop.f32.mrf.mxu0 }
 0x568   : > { %v4397_v40 = vpop.f32.mrf.mxu0  ;;  %4735 = vrot.lane.b32.xlu1 %v4546_v54, %s20116_s23 }
 0x569   : > { %v4398_v44 = vadd.f32 %v16604_v7, %v4397_v40 }
 0x56a   : > { %v4399_v26 = vpop.f32.mrf.mxu0 }
 0x56c   : > { %v4400_v11 = vpop.f32.mrf.mxu0 }
 0x56d   : > { %v4401_v0 = vadd.f32 %v16604_v7, %v4400_v11 }
 0x56e   : > { %v4402_v36 = vpop.f32.mrf.mxu0  ;;  %v11553_v55 = vpop.f32.mrf.mxu1 }
 0x56f   : > { %v4567_v8 = vadd.f32 %v11553_v55, %v4374_v46 }
 0x570   : > { %v4405_v19 = vpop.f32.mrf.mxu0  ;;  %v4558_v56 = vpop.f32.mrf.mxu1 }
 0x571   : > { %4745 = vrot.lane.b32.xlu0 %v4567_v8, %s20116_s23  ;;  %v4559_v59 = vadd.f32 %v4558_v56, %v4366_v41  ;;  %v4406_v16 = vadd.f32 %v16604_v7, %v4405_v19  ;;  %v13619_v19 = vld [vmem:[%s20057_s6 + $0x38] sm:$0xff]  }
 0x572   : > { %v4407_v42 = vpop.f32.mrf.mxu0  ;;  %v11554_v4 = vpop.f32.mrf.mxu1  ;;  %6142 = vmatpush1.bf16.msra.mxu0 %v13619_v19 }
 0x573   : > { %v4570_v30 = vadd.f32 %v11554_v4, %v4377_v49  ;;  %6143 = vmatprep.subr.bf16.mxu0 %v20133_v2  ;;  %v13620_v42 = vld [vmem:[%s20057_s6 + $0x30] sm:$0xff]  }
 0x574   : > { %v4408_v6 = vpop.f32.mrf.mxu0  ;;  %v4561_v45 = vpop.f32.mrf.mxu1 }
 0x575   : > { %4747 = vrot.lane.b32.xlu1 %v4570_v30, %s20116_s23  ;;  %4741 = vrot.lane.b32.xlu0 %v4559_v59, %s20116_s23  ;;  %v4562_v1 = vadd.f32 %v4561_v45, %v4369_v24  ;;  %v4409_v18 = vadd.f32 %v16604_v7, %v4408_v6 }
 0x576   : > { %v4410_v52 = vpop.f32.mrf.mxu0  ;;  %6144 = vmatpush1.bf16.msra.mxu0 %v13620_v42 }
 0x577   : > { %6145 = vmatprep.subr.bf16.mxu0 %v20133_v2  ;;  %v13621_v52 = vld [vmem:[%s20057_s6 + $0x28] sm:$0xff]  }
 0x579   : > { %4743 = vrot.lane.b32.xlu1 %v4562_v1, %s20116_s23 }
 0x57a   : > { %6146 = vmatpush1.bf16.msra.mxu0 %v13621_v52 }
 0x57b   : > { %v4413_v58 = vpop.f32.mrf.mxu0  ;;  %v16637_v51 = vpop.f32.mrf.mxu1  ;;  %6147 = vmatprep.subr.bf16.mxu0 %v20133_v2 }
 0x57c   : > { %v4414_v34 = vadd.f32 %v16604_v7, %v4413_v58 }
 0x57d   : > { %v4415_v27 = vpop.f32.mrf.mxu0  ;;  %v4574_v53 = vpop.f32.mrf.mxu1 }
 0x57e   : > { %v4575_v61 = vadd.f32 %v4574_v53, %v4382_v23 }
 0x57f   : > { %v16640_v14 = vpop.f32.mrf.mxu0  ;;  %v16642_v50 = vpop.f32.mrf.mxu1 }
 0x580   : > { %4749 = vrot.lane.b32.xlu0 %v4575_v61, %s20116_s23 }
 0x581   : > { %v4418_v29 = vpop.f32.mrf.mxu0  ;;  %v4577_v25 = vpop.f32.mrf.mxu1 }
 0x582   : > { %v4578_v10 = vadd.f32 %v4577_v25, %v4385_v43  ;;  %v13622_v43 = vld [vmem:[%s20057_s6 + $0x20] sm:$0xff]  }
 0x583   : > { %v11561_v21 = vpop.f32.mrf.mxu1  ;;  %6148 = vmatpush1.bf16.msra.mxu0 %v13622_v43 }
 0x584   : > { %v4599_v20 = vadd.f32 %v11561_v21, %v4406_v16  ;;  %4751 = vrot.lane.b32.xlu1 %v4578_v10, %s20116_s23  ;;  %6149 = vmatprep.subr.bf16.mxu0 %v20133_v2  ;;  %v4390_v21 = vadd.f32 %v16604_v7, %v16618_v39 }
 0x585   : > { %v4590_v62 = vpop.f32.mrf.mxu1 }
 0x586   : > { %4761 = vrot.lane.b32.xlu0 %v4599_v20, %s20116_s23  ;;  %v4591_v47 = vadd.f32 %v4590_v62, %v4398_v44  ;;  %v4417_v20 = vadd.f32 %v16604_v7, %v16640_v14  ;;  %v13623_v62 = vld [vmem:[%s20057_s6 + $0x18] sm:$0xff]   ;;  %v13624_v14 = vld [vmem:[%s20057_s6 + $0x10] sm:$0xff]  }
 0x587   : > { %v11562_v38 = vpop.f32.mrf.mxu1  ;;  %6150 = vmatpush1.bf16.msra.mxu0 %v13623_v62 }
 0x588   : > { %v4602_v63 = vadd.f32 %v11562_v38, %v4409_v18  ;;  %v16651_v9 = vpop.f32.mrf.mxu0  ;;  %v4583_v38 = vadd.f32 %v16637_v51, %v4390_v21  ;;  %6151 = vmatprep.subr.bf16.mxu0 %v20133_v2 }
 0x589   : > { %v4593_v12 = vpop.f32.mrf.mxu1 }
 0x58a   : > { %v4423_v13 = vpop.f32.mrf.mxu0  ;;  %4763 = vrot.lane.b32.xlu1 %v4602_v63, %s20116_s23  ;;  %4757 = vrot.lane.b32.xlu0 %v4591_v47, %s20116_s23  ;;  %v4594_v32 = vadd.f32 %v4593_v12, %v4401_v0  ;;  %v4422_v47 = vadd.f32 %v16604_v7, %v16651_v9  ;;  %v4393_v9 = vadd.f32 %v16604_v7, %v16624_v60 }
 0x58b   : > { %v16656_v5 = vpop.f32.mrf.mxu1  ;;  %6152 = vmatpush1.bf16.msra.mxu0 %v13624_v14 }
 0x58c   : > { %v16659_v17 = vpop.f32.mrf.mxu0  ;;  %v4615_v0 = vadd.f32 %v16656_v5, %v4422_v47  ;;  %6153 = vmatprep.subr.bf16.mxu0 %v20133_v2  ;;  %v4586_v5 = vadd.f32 %v16642_v50, %v4393_v9  ;;  %v16747_v47 = vld [vmem:[%s13985_s24] ss:$0 sm:$0xff] }
 0x58d   : > { %v4606_v15 = vpop.f32.mrf.mxu1  ;;  %v4425_v50 = vadd.f32 %v16604_v7, %v16659_v17 }
 0x58e   : > { %v4607_v22 = vadd.f32 %v4606_v15, %v4414_v34  ;;  %v4426_v57 = vpop.f32.mrf.mxu0  ;;  %4759 = vrot.lane.b32.xlu1 %v4594_v32, %s20116_s23  ;;  %v13625_v34 = vld [vmem:[%s20057_s6 + $0x8] sm:$0xff]  }
 0x58f   : > { %v16662_v54 = vpop.f32.mrf.mxu1  ;;  %6154 = vmatpush1.bf16.msra.mxu0 %v13625_v34  ;;  %v16764_v34 = vld [vmem:[%s13990_s30] ss:$0 sm:$0xff] }
 0x590   : > { %4765 = vrot.lane.b32.xlu0 %v4607_v22, %s20116_s23  ;;  %6155 = vmatprep.subr.bf16.mxu0 %v20133_v2 }
 0x591   : > { %v4609_v48 = vpop.f32.mrf.mxu1 }
 0x592   : > { %v4429_v40 = vpop.f32.mrf.mxu0  ;;  %v4610_v63 = vadd.f32 %v4609_v48, %v4417_v20 }
 0x593   : > { %v11569_v26 = vpop.f32.mrf.mxu1  ;;  %v4430_v30 = vadd.f32 %v16604_v7, %v4429_v40 }
 0x594   : > { %v4431_v11 = vpop.f32.mrf.mxu0 }
 0x595   : > { %v4622_v46 = vpop.f32.mrf.mxu1 }
 0x596   : > { %v4432_v36 = vpop.f32.mrf.mxu0  ;;  %v4623_v23 = vadd.f32 %v4622_v46, %v4430_v30 }
 0x597   : > { %v11570_v55 = vpop.f32.mrf.mxu1  ;;  %v4433_v27 = vadd.f32 %v16604_v7, %v4432_v36 }
 0x598   : > { %v4434_v8 = vpop.f32.mrf.mxu0 }
 0x599   : > { %v4625_v56 = vpop.f32.mrf.mxu1  ;;  %v13627_v8 = vld [vmem:[%s20057_s6 + $0x78] sm:$0xff]  }
 0x59a   : > { %v4626_v16 = vadd.f32 %v4625_v56, %v4433_v27 }
 0x59b   : > { %v16669_v4 = vpop.f32.mrf.mxu1 }
 0x59c   : > { %v4437_v41 = vpop.f32.mrf.mxu0 }
 0x59d   : > { %v4438_v49 = vadd.f32 %v16604_v7, %v4437_v41  ;;  %v4638_v1 = vpop.f32.mrf.mxu1  ;;  %v4618_v41 = vadd.f32 %v16662_v54, %v4425_v50 }
 0x59e   : > { %v4439_v59 = vpop.f32.mrf.mxu0 }
 0x59f   : > { %v4631_v6 = vadd.f32 %v11569_v26, %v4438_v49  ;;  %v16681_v29 = vpop.f32.mrf.mxu1  ;;  %v13628_v59 = vld [vmem:[%s20057_s6 + $0x70] sm:$0xff]  }
 0x5a0   : > { %v4440_v45 = vpop.f32.mrf.mxu0 }
 0x5a1   : > { %v4441_v24 = vadd.f32 %v16604_v7, %v4440_v45  ;;  %4777 = vrot.lane.b32.xlu0 %v4631_v6, %s20116_s23  ;;  %v4641_v44 = vpop.f32.mrf.mxu1 }
 0x5a2   : > { %v4442_v58 = vpop.f32.mrf.mxu0 }
 0x5a3   : > { %v4634_v53 = vadd.f32 %v11570_v55, %v4441_v24 }
 0x5a4   : > { %v4445_v61 = vpop.f32.mrf.mxu0 }
 0x5a5   : > { %4779 = vrot.lane.b32.xlu1 %v4634_v53, %s20116_s23  ;;  %4773 = vrot.lane.b32.xlu0 %v4623_v23, %s20116_s23  ;;  %v4446_v51 = vadd.f32 %v16604_v7, %v4445_v61 }
 0x5a6   : > { %v4447_v25 = vpop.f32.mrf.mxu0 }
 0x5a7   : > { %v4639_v22 = vadd.f32 %v4638_v1, %v4446_v51  ;;  %v13629_v1 = vld [vmem:[%s20057_s6 + $0x68] sm:$0xff]  }
 0x5a8   : > { %v4448_v10 = vpop.f32.mrf.mxu0 }
 0x5a9   : > { %4775 = vrot.lane.b32.xlu1 %v4626_v16, %s20116_s23  ;;  %4737 = vrot.lane.b32.xlu0 %v16616_v35, %s20116_s23  ;;  %v11577_v35 = vpop.f32.mrf.mxu1  ;;  %v4449_v57 = vadd.f32 %v16604_v7, %v4448_v10 }
 0x5aa   : > { %v4450_v18 = vpop.f32.mrf.mxu0 }
 0x5ab   : > { %v4654_v32 = vpop.f32.mrf.mxu1  ;;  %v4642_v11 = vadd.f32 %v4641_v44, %v4449_v57  ;;  %v13631_v18 = vld [vmem:[%s20057_s6 + $0x58] sm:$0xff]  }
 0x5ac   : > { %v4453_v39 = vpop.f32.mrf.mxu0 }
 0x5ad   : > { %4767 = vrot.lane.b32.xlu1 %v4610_v63, %s20116_s23  ;;  %4753 = vrot.lane.b32.xlu0 %v4583_v38, %s20116_s23  ;;  %v4454_v48 = vadd.f32 %v16604_v7, %v4453_v39  ;;  %v11578_v60 = vpop.f32.mrf.mxu1 }
 0x5ae   : > { %v4455_v12 = vpop.f32.mrf.mxu0 }
 0x5af   : > { %v4647_v46 = vadd.f32 %v16669_v4, %v4454_v48  ;;  %v4657_v19 = vpop.f32.mrf.mxu1 }
 0x5b0   : > { %v4456_v13 = vpop.f32.mrf.mxu0 }
 0x5b1   : > { %4739 = vrot.lane.b32.xlu1 %v16622_v3, %s20116_s23  ;;  %4769 = vrot.lane.b32.xlu0 %v4615_v0, %s20116_s23  ;;  %v13626_v3 = vld [vmem:[%s20057_s6] sm:$0xff]   ;;  %v4457_v17 = vadd.f32 %v16604_v7, %v4456_v13  ;;  %v11581_v30 = vpop.f32.mrf.mxu1 }
 0x5b2   : > { %v4458_v15 = vpop.f32.mrf.mxu0  ;;  %6156 = vmatpush1.bf16.msra.mxu0 %v13626_v3 }
 0x5b3   : > { %6157 = vmatprep.subr.bf16.mxu0 %v20133_v2  ;;  %v4650_v45 = vadd.f32 %v16681_v29, %v4457_v17  ;;  %v4670_v58 = vpop.f32.mrf.mxu1  ;;  %v13630_v29 = vld [vmem:[%s20057_s6 + $0x60] sm:$0xff]   ;;  %v20241_v15 = vld [vmem:[#allocation41_spill] sm:$0xff] }
 0x5b4   : > { %v4461_v40 = vpop.f32.mrf.mxu0  ;;  %v13634_v17 = vld [vmem:[%s20057_s6 + $0x40] sm:$0xff]  }
 0x5b5   : > { %4755 = vrot.lane.b32.xlu1 %v4586_v5, %s20116_s23  ;;  %4781 = vrot.lane.b32.xlu0 %v4639_v22, %s20116_s23  ;;  %v4462_v36 = vadd.f32 %v16604_v7, %v4461_v40  ;;  %v11582_v25 = vpop.f32.mrf.mxu1 }
 0x5b6   : > { %v4463_v26 = vpop.f32.mrf.mxu0  ;;  %6158 = vmatpush2.bf16.msra.mxu0 %v13627_v8 }
 0x5b7   : > { %v4655_v49 = vadd.f32 %v4654_v32, %v4462_v36  ;;  %6159 = vmatprep.subr.bf16.mxu0 %v20133_v2  ;;  %v4673_v38 = vpop.f32.mrf.mxu1 }
 0x5b8   : > { %v4464_v55 = vpop.f32.mrf.mxu0 }
 0x5b9   : > { %4783 = vrot.lane.b32.xlu1 %v4642_v11, %s20116_s23  ;;  %4785 = vrot.lane.b32.xlu0 %v4647_v46, %s20116_s23  ;;  %v4465_v54 = vadd.f32 %v16604_v7, %v4464_v55  ;;  %v20243_v46 = vld [vmem:[#allocation40_spill] sm:$0xff] }
 0x5ba   : > { %v4466_v56 = vpop.f32.mrf.mxu0  ;;  %6160 = vmatpush2.bf16.msra.mxu0 %v13628_v59 }
 0x5bb   : > { %6161 = vmatprep.subr.bf16.mxu0 %v20133_v2  ;;  %v4658_v27 = vadd.f32 %v4657_v19, %v4465_v54 }
 0x5bc   : > { %v4469_v42 = vpop.f32.mrf.mxu0 }
 0x5bd   : > { %v4470_v4 = vadd.f32 %v16604_v7, %v4469_v42  ;;  %4771 = vrot.lane.b32.xlu1 %v4618_v41, %s20116_s23  ;;  %4789 = vrot.lane.b32.xlu0 %v4655_v49, %s20116_s23 }
 0x5be   : > { %v4471_v6 = vpop.f32.mrf.mxu0  ;;  %6162 = vmatpush2.bf16.msra.mxu0 %v13629_v1 }
 0x5bf   : > { %v4663_v24 = vadd.f32 %v11577_v35, %v4470_v4  ;;  %6163 = vmatprep.subr.bf16.mxu0 %v20133_v2 }
 0x5c0   : > { %v4472_v52 = vpop.f32.mrf.mxu0 }
 0x5c1   : > { %4787 = vrot.lane.b32.xlu1 %v4650_v45, %s20116_s23  ;;  %4793 = vrot.lane.b32.xlu0 %v4663_v24, %s20116_s23  ;;  %v4473_v53 = vadd.f32 %v16604_v7, %v4472_v52  ;;  %v20245_v24 = vld [vmem:[#allocation49_spill] sm:$0xff] }
 0x5c2   : > { %v4474_v23 = vpop.f32.mrf.mxu0  ;;  %6164 = vmatpush2.bf16.msra.mxu0 %v13630_v29 }
 0x5c3   : > { %v4666_v10 = vadd.f32 %v11578_v60, %v4473_v53  ;;  %6165 = vmatprep.subr.bf16.mxu0 %v20133_v2 }
 0x5c4   : > { %v4477_v61 = vpop.f32.mrf.mxu0 }
 0x5c5   : > { %v4478_v43 = vadd.f32 %v16604_v7, %v4477_v61  ;;  %4791 = vrot.lane.b32.xlu1 %v4658_v27, %s20116_s23  ;;  %v20246_v27 = vld [vmem:[#allocation48_spill] sm:$0xff]  ;;  %v20248_v61 = vld [vmem:[#allocation47_spill] sm:$0xff] }
 0x5c6   : > { %v4479_v16 = vpop.f32.mrf.mxu0  ;;  %6166 = vmatpush2.bf16.msra.mxu0 %v13631_v18  ;;  %v13636_v18 = vld [vmem:[%s20057_s6 + $0xb0] sm:$0xff]  }
 0x5c7   : > { %v4671_v21 = vadd.f32 %v4670_v58, %v4478_v43  ;;  %6167 = vmatprep.subr.bf16.mxu0 %v20133_v2 }
 0x5c8   : > { %v4480_v20 = vpop.f32.mrf.mxu0  ;;  %v4730_v62 = vpop.permute.xlu0 %4729 }
 0x5c9   : > { %v4481_v44 = vadd.f32 %v16604_v7, %v4480_v20  ;;  %4795 = vrot.lane.b32.xlu1 %v4666_v10, %s20116_s23  ;;  %4797 = vrot.lane.b32.xlu0 %v4671_v21, %s20116_s23  ;;  %v16751_v63 = vsel %vm2397_vm4, %v15430_v33, %v4730_v62  ;;  %v13632_v33 = vld [vmem:[%s20057_s6 + $0x50] sm:$0xff]   ;;  %v13635_v10 = vld [vmem:[%s20057_s6 + $0xb8] sm:$0xff]  }
 0x5ca   : > { %20239 = vst [vmem:[#allocation78_spill] sm:$0xff] %v16751_v63  ;;  %v4482_v39 = vpop.f32.mrf.mxu0  ;;  %v4894_v0 = vmul.f32 %v16747_v47, %v16751_v63  ;;  %6168 = vmatpush2.bf16.msra.mxu0 %v13632_v33  ;;  %v20249_v62 = vld [vmem:[#allocation46_spill] sm:$0xff]  ;;  %6335 = vmatpush1.bf16.msra.mxu1 %v13635_v10  ;;  %v13637_v33 = vld [vmem:[%s20057_s6 + $0xa8] sm:$0xff]  }
 0x5cb   : > { %v4674_v14 = vadd.f32 %v4673_v38, %v4481_v44  ;;  %6169 = vmatprep.subr.bf16.mxu0 %v20133_v2  ;;  %6336 = vmatprep.subr.bf16.mxu1 %v20133_v2 }
 0x5cc   : > { %v4485_v35 = vpop.f32.mrf.mxu0  ;;  %v4732_v12 = vpop.permute.xlu1 %4731  ;;  %v4941_v26 = vadd.f32 %v16764_v34, %v4894_v0 }
 0x5cd   : > { %v4486_v51 = vadd.f32 %v16604_v7, %v4485_v35  ;;  %v16759_v13 = vsel %vm2397_vm4, %v15447_v37, %v4732_v12  ;;  %v4726_v9 = vpop.permute.xlu0 %4725  ;;  %4799 = vrot.lane.b32.xlu1 %v4674_v14, %s20116_s23  ;;  %v13633_v37 = vld [vmem:[%s20057_s6 + $0x48] sm:$0xff]  }
 0x5ce   : > { %20240 = vst [vmem:[#allocation77_spill] sm:$0xff] %v16759_v13  ;;  %v4895_v32 = vmul.f32 %v16747_v47, %v16759_v13  ;;  %v16770_v5 = vsel %vm2397_vm4, %v20241_v15, %v4726_v9  ;;  %v4487_v22 = vpop.f32.mrf.mxu0  ;;  %6170 = vmatpush2.bf16.msra.mxu0 %v13633_v37  ;;  %6337 = vmatpush1.bf16.msra.mxu1 %v13636_v18  ;;  %v20251_v37 = vld [vmem:[#allocation64_spill] sm:$0xff]  ;;  %v13643_v18 = vld [vmem:[%s20057_s6 + $0xf8] ss:$0 sps:$4 sm:$0xff]  }
 0x5cf   : > { %20242 = vst [vmem:[#allocation41_spill] sm:$0xff] %v16770_v5  ;;  %v4679_v57 = vadd.f32 %v11581_v30, %v4486_v51  ;;  %v4892_v48 = vmul.f32 %v16747_v47, %v16770_v5  ;;  %6171 = vmatprep.subr.bf16.mxu0 %v20133_v2  ;;  %6338 = vmatprep.subr.bf16.mxu1 %v20133_v2  ;;  %v13638_v22 = vld [vmem:[%s20057_s6 + $0xa0] sm:$0xff]  }
 0x5d0   : > { %v4942_v40 = vadd.f32 %v16764_v34, %v4895_v32  ;;  %v4488_v3 = vpop.f32.mrf.mxu0  ;;  %v4728_v60 = vpop.permute.xlu1 %4727 }
 0x5d1   : > { %v4939_v50 = vadd.f32 %v16764_v34, %v4892_v48  ;;  %v4489_v11 = vadd.f32 %v16604_v7, %v4488_v3  ;;  %v16782_v36 = vsel %vm2397_vm4, %v20243_v46, %v4728_v60  ;;  %4801 = vrot.lane.b32.xlu0 %v4679_v57, %s20116_s23  ;;  %v16794_v7 = vmax.f32 %v4941_v26, 0.0  ;;  %v13639_v3 = vld [vmem:[%s20057_s6 + $0x98] sm:$0xff]  }
 0x5d2   : > { %20244 = vst [vmem:[#allocation40_spill] sm:$0xff] %v16782_v36  ;;  %v4893_v55 = vmul.f32 %v16747_v47, %v16782_v36  ;;  %v4490_v8 = vpop.f32.mrf.mxu0  ;;  %v16787_v19 = vmax.f32 %v4942_v40, 0.0  ;;  %6172 = vmatpush2.bf16.msra.mxu0 %v13634_v17  ;;  %6339 = vmatpush1.bf16.msra.mxu1 %v13637_v33 }
 0x5d3   : > { %v16789_v56 = vmax.f32 %v4939_v50, 0.0  ;;  %v4682_v41 = vadd.f32 %v11582_v25, %v4489_v11  ;;  %6340 = vmatprep.subr.bf16.mxu1 %v20133_v2  ;;  %v20253_v11 = vld [vmem:[#allocation58_spill] sm:$0xff] }
 0x5d4   : > { %v4940_v49 = vadd.f32 %v16764_v34, %v4893_v55  ;;  %v16804_v59 = vpack.i.bf16 %v16787_v19, %v16794_v7  ;;  %v20255_v55 = vld [vmem:[#allocation55_spill] sm:$0xff] }
 0x5d5   : > { %4803 = vrot.lane.b32.xlu1 %v4682_v41, %s20116_s23  ;;  %v12645_v42 = vpack.i.bf16 %v16789_v56, %v20211_v31  ;;  %v13640_v41 = vld [vmem:[%s20057_s6 + $0x90] sm:$0xff]  }
 0x5d6   : > { %v16799_v4 = vmax.f32 %v4940_v49, 0.0  ;;  %v16811_v6 = vpop.permute.xlu0 %4733  ;;  %6341 = vmatpush1.bf16.msra.mxu1 %v13638_v22  ;;  %v20259_v22 = vld [vmem:[#allocation63_spill] sm:$0xff] }
 0x5d7   : > { %12646 = vrot.lane.b32.xlu0 %v12645_v42, %s20118_s2  ;;  %6342 = vmatprep.subr.bf16.mxu1 %v20133_v2 }
 0x5d8   : > { %v12655_v30 = vpack.i.bf16 %v16799_v4, %v16789_v56 }
 0x5d9   : > { %12651 = vrot.lane.b32.xlu1 %v16804_v59, %s19969_s13 }
 0x5da   : > { %v16814_v45 = vpop.permute.xlu1 %4735  ;;  %6343 = vmatpush1.bf16.msra.mxu1 %v13639_v3 }
 0x5db   : > { %6344 = vmatprep.subr.bf16.mxu1 %v20133_v2 }
 0x5dd   : > { %12656 = vrot.lane.b32.xlu1 %v12655_v30, %s19969_s13  ;;  %s20250_s13 = smov 32  }
 0x5de   : > { %6345 = vmatpush1.bf16.msra.mxu1 %v13640_v41 }
 0x5df   : > { %6346 = vmatprep.subr.bf16.mxu1 %v20133_v2 }
 0x5e1   : > { %12661 = vrot.lane.b32.xlu1 %v12655_v30, %s20135_s18 }
 0x5e3   : > { %v4746_v54 = vpop.permute.xlu0 %4745 }
 0x5e4   : > { %v16818_v52 = vsel %vm2397_vm4, %v20245_v24, %v4746_v54  ;;  %v20257_v24 = vld [vmem:[#allocation54_spill] sm:$0xff] }
 0x5e5   : > { %v4902_v1 = vmul.f32 %v16747_v47, %v16818_v52 }
 0x5e7   : > { %v4748_v58 = vpop.permute.xlu1 %4747  ;;  %v4742_v23 = vpop.permute.xlu0 %4741  ;;  %v4949_v29 = vadd.f32 %v16764_v34, %v4902_v1 }
 0x5e8   : > { %v16824_v53 = vsel %vm2397_vm4, %v20246_v27, %v4748_v58  ;;  %v16828_v43 = vsel %vm2397_vm4, %v20248_v61, %v4742_v23 }
 0x5e9   : > { %20247 = vst [vmem:[#allocation49_spill] sm:$0xff] %v16824_v53  ;;  %v4903_v25 = vmul.f32 %v16747_v47, %v16824_v53  ;;  %v4900_v16 = vmul.f32 %v16747_v47, %v16828_v43  ;;  %v16842_v38 = vmax.f32 %v4949_v29, 0.0 }
 0x5eb   : > { %v4950_v21 = vadd.f32 %v16764_v34, %v4903_v25  ;;  %v4744_v20 = vpop.permute.xlu1 %4743  ;;  %v4947_v14 = vadd.f32 %v16764_v34, %v4900_v16  ;;  %v13641_v16 = vld [vmem:[%s20057_s6 + $0x88] sm:$0xff]  }
 0x5ec   : > { %v16839_v44 = vsel %vm2397_vm4, %v20249_v62, %v4744_v20  ;;  %6347 = vmatpush1.bf16.msra.mxu1 %v13641_v16  ;;  %v13642_v20 = vld [vmem:[%s20057_s6 + $0x80] sm:$0xff]  }
 0x5ed   : > { %v16844_v39 = vmax.f32 %v4950_v21, 0.0  ;;  %v4901_v35 = vmul.f32 %v16747_v47, %v16839_v44  ;;  %v16855_v51 = vmax.f32 %v4947_v14, 0.0  ;;  %6348 = vmatprep.subr.bf16.mxu1 %v20133_v2 }
 0x5ef   : > { %v4948_v12 = vadd.f32 %v16764_v34, %v4901_v35  ;;  %v16853_v0 = vpack.i.bf16 %v16844_v39, %v16842_v38  ;;  %v6139_v35 = vsel %vm2744_vm2, %v13643_v18, 0 }
 0x5f0   : > { %6349 = vmatpush1.bf16.msra.mxu1 %v13642_v20 }
 0x5f1   : > { %v16857_v9 = vmax.f32 %v4948_v12, 0.0  ;;  %12676 = vrot.lane.b32.xlu0 %v16853_v0, %s20250_s13  ;;  %6350 = vmatprep.subr.bf16.mxu1 %v20133_v2  ;;  %v13644_v12 = vld [vmem:[%s20057_s6 + $0xf0] sm:$0xff]  }
 0x5f2   : > { %v16867_v15 = vpop.permute.xlu0 %4749 }
 0x5f3   : > { %v16865_v32 = vpack.i.bf16 %v16857_v9, %v16855_v51 }
 0x5f4   : > { %6351 = vmatpush2.bf16.msra.mxu1 %v6139_v35  ;;  %v20271_v35 = vld [vmem:[#allocation45_spill] sm:$0xff] }
 0x5f5   : > { %12681 = vrot.lane.b32.xlu0 %v16865_v32, %s20250_s13  ;;  %6352 = vmatprep.subr.bf16.mxu1 %v20133_v2 }
 0x5f6   : > { %v16873_v57 = vpop.permute.xlu1 %4751 }
 0x5f8   : > { %v4762_v48 = vpop.permute.xlu0 %4761  ;;  %6353 = vmatpush2.bf16.msra.mxu1 %v13644_v12 }
 0x5f9   : > { %v16877_v40 = vsel %vm2397_vm4, %v20251_v37, %v4762_v48  ;;  %6354 = vmatprep.subr.bf16.mxu1 %v20133_v2 }
 0x5fa   : > { %20252 = vst [vmem:[#allocation48_spill] sm:$0xff] %v16877_v40  ;;  %v4910_v60 = vmul.f32 %v16747_v47, %v16877_v40 }
 0x5fc   : > { %v4764_v26 = vpop.permute.xlu1 %4763  ;;  %v4758_v50 = vpop.permute.xlu0 %4757  ;;  %v4957_v49 = vadd.f32 %v16764_v34, %v4910_v60 }
 0x5fd   : > { %v16885_v46 = vsel %vm2397_vm4, %v20253_v11, %v4764_v26  ;;  %v16889_v8 = vsel %vm2397_vm4, %v20255_v55, %v4758_v50  ;;  %v20261_v26 = vld [vmem:[#allocation62_spill] sm:$0xff]  ;;  %v20263_v55 = vld [vmem:[#allocation61_spill] sm:$0xff] }
 0x5fe   : > { %20254 = vst [vmem:[#allocation47_spill] sm:$0xff] %v16885_v46  ;;  %20256 = vst [vmem:[#allocation46_spill] sm:$0xff] %v16889_v8  ;;  %v4911_v17 = vmul.f32 %v16747_v47, %v16885_v46  ;;  %v4908_v42 = vmul.f32 %v16747_v47, %v16889_v8  ;;  %v4997_v27 = vmax.f32 %v4957_v49, 0.0 }
 0x600   : > { %v4958_v30 = vadd.f32 %v16764_v34, %v4911_v17  ;;  %v4760_v54 = vpop.permute.xlu1 %4759  ;;  %v4955_v61 = vadd.f32 %v16764_v34, %v4908_v42  ;;  %v13645_v17 = vld [vmem:[%s20057_s6 + $0xe8] sm:$0xff]  }
 0x601   : > { %v16901_v1 = vsel %vm2397_vm4, %v20257_v24, %v4760_v54  ;;  %v20265_v42 = vld [vmem:[#allocation57_spill] sm:$0xff]  ;;  %6355 = vmatpush2.bf16.msra.mxu1 %v13645_v17 }
 0x602   : > { %20258 = vst [vmem:[#allocation64_spill] sm:$0xff] %v16901_v1  ;;  %v4998_v58 = vmax.f32 %v4958_v30, 0.0  ;;  %v4909_v23 = vmul.f32 %v16747_v47, %v16901_v1  ;;  %v4995_v21 = vmax.f32 %v4955_v61, 0.0  ;;  %v4766_v14 = vpop.permute.xlu0 %4765  ;;  %6356 = vmatprep.subr.bf16.mxu1 %v20133_v2 }
 0x603   : > { %v16941_v30 = vsel %vm2397_vm4, %v20265_v42, %v4766_v14 }
 0x604   : > { %v4956_v29 = vadd.f32 %v16764_v34, %v4909_v23  ;;  %v16908_v25 = vpack.i.bf16 %v4998_v58, %v4997_v27  ;;  %20266 = vst [vmem:[#allocation63_spill] sm:$0xff] %v16941_v30  ;;  %v20267_v27 = vld [vmem:[#allocation79_spill] sm:$0xff]  ;;  %v4912_v18 = vmul.f32 %v16747_v47, %v16941_v30 }
 0x606   : > { %v4996_v10 = vmax.f32 %v4956_v29, 0.0  ;;  %v4959_v42 = vadd.f32 %v16764_v34, %v4912_v18  ;;  %v20281_v18 = vld [vmem:[#allocation50_spill] sm:$0xff] }
 0x608   : > { %v16913_v62 = vpack.i.bf16 %v4996_v10, %v4995_v21  ;;  %v13646_v10 = vld [vmem:[%s20057_s6 + $0xe0] sm:$0xff]   ;;  %v20269_v21 = vld [vmem:[#allocation42_spill] sm:$0xff] }
 0x609   : > { %v16957_v20 = vsel %vm2397_vm4, %v20269_v21, %v16814_v45  ;;  %6357 = vmatpush2.bf16.msra.mxu1 %v13646_v10  ;;  %v20279_v10 = vld [vmem:[#allocation51_spill] sm:$0xff] }
 0x60a   : > { %20270 = vst [vmem:[#allocation61_spill] sm:$0xff] %v16957_v20  ;;  %6358 = vmatprep.subr.bf16.mxu1 %v20133_v2  ;;  %v4897_v17 = vmul.f32 %v16747_v47, %v16957_v20  ;;  %v16996_v21 = vsel %vm2397_vm4, %v20279_v10, %v16867_v15  ;;  %v20291_v20 = vld [vmem:[#allocation65_spill] sm:$0xff] }
 0x613   : > { %v4778_v33 = vpop.permute.xlu0 %4777 }
 0x614   : > { %v16922_v48 = vsel %vm2397_vm4, %v20259_v22, %v4778_v33  ;;  %v20273_v33 = vld [vmem:[#allocation43_spill] sm:$0xff] }
 0x615   : > { %20260 = vst [vmem:[#allocation58_spill] sm:$0xff] %v16922_v48  ;;  %v4918_v37 = vmul.f32 %v16747_v47, %v16922_v48  ;;  %v16968_v22 = vsel %vm2397_vm4, %v20273_v33, %v16811_v6  ;;  %20280 = vst [vmem:[#allocation43_spill] sm:$0xff] %v16996_v21  ;;  %v20283_v33 = vld [vmem:[#allocation44_spill] sm:$0xff] }
 0x616   : > { %20274 = vst [vmem:[#allocation79_spill] sm:$0xff] %v16968_v22 }
 0x617   : > { %v4780_v3 = vpop.permute.xlu1 %4779  ;;  %v4774_v60 = vpop.permute.xlu0 %4773  ;;  %v4965_v49 = vadd.f32 %v16764_v34, %v4918_v37 }
 0x618   : > { %v16929_v50 = vsel %vm2397_vm4, %v20261_v26, %v4780_v3  ;;  %v16935_v41 = vsel %vm2397_vm4, %v20263_v55, %v4774_v60  ;;  %v20275_v26 = vld [vmem:[#allocation56_spill] sm:$0xff] }
 0x619   : > { %20262 = vst [vmem:[#allocation55_spill] sm:$0xff] %v16929_v50  ;;  %v4919_v11 = vmul.f32 %v16747_v47, %v16929_v50  ;;  %20264 = vst [vmem:[#allocation54_spill] sm:$0xff] %v16935_v41  ;;  %v4916_v23 = vmul.f32 %v16747_v47, %v16935_v41  ;;  %v5005_v14 = vmax.f32 %v4965_v49, 0.0 }
 0x61b   : > { %v4966_v54 = vadd.f32 %v16764_v34, %v4919_v11  ;;  %v4776_v24 = vpop.permute.xlu1 %4775  ;;  %v4738_v58 = vpop.permute.xlu0 %4737  ;;  %v4963_v45 = vadd.f32 %v16764_v34, %v4916_v23  ;;  %v4896_v23 = vmul.f32 %v16747_v47, %v16968_v22 }
 0x61c   : > { %v16948_v61 = vsel %vm2397_vm4, %v20267_v27, %v4776_v24  ;;  %v16963_v12 = vsel %vm2397_vm4, %v20271_v35, %v4738_v58  ;;  %v20277_v24 = vld [vmem:[#allocation53_spill] sm:$0xff] }
 0x61d   : > { %20268 = vst [vmem:[#allocation62_spill] sm:$0xff] %v16948_v61  ;;  %v5006_v29 = vmax.f32 %v4966_v54, 0.0  ;;  %v4917_v16 = vmul.f32 %v16747_v47, %v16948_v61  ;;  %20272 = vst [vmem:[#allocation57_spill] sm:$0xff] %v16963_v12  ;;  %v4898_v6 = vmul.f32 %v16747_v47, %v16963_v12  ;;  %v5003_v35 = vmax.f32 %v4963_v45, 0.0 }
 0x61e   : > { %v4943_v45 = vadd.f32 %v16764_v34, %v4896_v23 }
 0x61f   : > { %v4964_v37 = vadd.f32 %v16764_v34, %v4917_v16  ;;  %v4768_v3 = vpop.permute.xlu1 %4767  ;;  %v4754_v60 = vpop.permute.xlu0 %4753  ;;  %v16976_v55 = vpack.i.bf16 %v5006_v29, %v5005_v14  ;;  %v17001_v14 = vsel %vm2397_vm4, %v20281_v18, %v16873_v57  ;;  %v13647_v57 = vld [vmem:[%s20057_s6 + $0xd8] sm:$0xff]  }
 0x620   : > { %v16974_v11 = vsel %vm2397_vm4, %v20275_v26, %v4768_v3  ;;  %v16988_v58 = vsel %vm2397_vm4, %v20277_v24, %v4754_v60  ;;  %20282 = vst [vmem:[#allocation56_spill] sm:$0xff] %v17001_v14  ;;  %v4945_v3 = vadd.f32 %v16764_v34, %v4898_v6  ;;  %v4999_v24 = vmax.f32 %v4959_v42, 0.0  ;;  %v20287_v42 = vld [vmem:[#allocation66_spill] sm:$0xff]  ;;  %6359 = vmatpush2.bf16.msra.mxu1 %v13647_v57 }
 0x621   : > { %20276 = vst [vmem:[#allocation42_spill] sm:$0xff] %v16974_v11  ;;  %v4913_v49 = vmul.f32 %v16747_v47, %v16974_v11  ;;  %v5004_v54 = vmax.f32 %v4964_v37, 0.0  ;;  %20278 = vst [vmem:[#allocation45_spill] sm:$0xff] %v16988_v58  ;;  %v4906_v26 = vmul.f32 %v16747_v47, %v16988_v58  ;;  %v4905_v6 = vmul.f32 %v16747_v47, %v17001_v14 }
 0x622   : > { %6360 = vmatprep.subr.bf16.mxu1 %v20133_v2 }
 0x623   : > { %v4960_v27 = vadd.f32 %v16764_v34, %v4913_v49  ;;  %v4740_v29 = vpop.permute.xlu1 %4739  ;;  %v4770_v16 = vpop.permute.xlu0 %4769  ;;  %v4944_v49 = vadd.f32 %v16764_v34, %v4897_v17  ;;  %v17013_v10 = vpack.i.bf16 %v5004_v54, %v5003_v35  ;;  %v17032_v35 = vmax.f32 %v4945_v3, 0.0 }
 0x624   : > { %v17005_v37 = vsel %vm2397_vm4, %v20283_v33, %v4740_v29  ;;  %v4904_v29 = vmul.f32 %v16747_v47, %v16996_v21  ;;  %v4953_v12 = vadd.f32 %v16764_v34, %v4906_v26 }
 0x625   : > { %20284 = vst [vmem:[#allocation53_spill] sm:$0xff] %v17005_v37  ;;  %v5000_v60 = vmax.f32 %v4960_v27, 0.0  ;;  %v4899_v15 = vmul.f32 %v16747_v47, %v17005_v37  ;;  %v20285_v37 = vld [vmem:[#allocation52_spill] sm:$0xff] }
 0x627   : > { %v4946_v27 = vadd.f32 %v16764_v34, %v4899_v15  ;;  %v4756_v18 = vpop.permute.xlu1 %4755  ;;  %v4782_v33 = vpop.permute.xlu0 %4781  ;;  %v17030_v23 = vpack.i.bf16 %v5000_v60, %v4999_v24  ;;  %v4952_v60 = vadd.f32 %v16764_v34, %v4905_v6  ;;  %v20289_v24 = vld [vmem:[#allocation60_spill] sm:$0xff]  ;;  %v4951_v6 = vadd.f32 %v16764_v34, %v4904_v29 }
 0x628   : > { %v17024_v17 = vsel %vm2397_vm4, %v20285_v37, %v4756_v18  ;;  %v17028_v54 = vsel %vm2397_vm4, %v20287_v42, %v4782_v33  ;;  %v17040_v37 = vmax.f32 %v4944_v49, 0.0  ;;  %v13648_v33 = vld [vmem:[%s20057_s6 + $0xd0] sm:$0xff]   ;;  %v17048_v3 = vsel %vm2397_vm4, %v20289_v24, %v4770_v16 }
 0x629   : > { %20286 = vst [vmem:[#allocation51_spill] sm:$0xff] %v17024_v17  ;;  %20288 = vst [vmem:[#allocation50_spill] sm:$0xff] %v17028_v54  ;;  %v17035_v22 = vmax.f32 %v4946_v27, 0.0  ;;  %v4907_v15 = vmul.f32 %v16747_v47, %v17024_v17  ;;  %v4920_v18 = vmul.f32 %v16747_v47, %v17028_v54  ;;  %v17055_v49 = vmax.f32 %v4943_v45, 0.0  ;;  %6361 = vmatpush2.bf16.msra.mxu1 %v13648_v33  ;;  %v13650_v17 = vld [vmem:[%s20057_s6 + $0xc0] sm:$0xff]  }
 0x62a   : > { %20290 = vst [vmem:[#allocation44_spill] sm:$0xff] %v17048_v3  ;;  %v17062_v16 = vmax.f32 %v4953_v12, 0.0  ;;  %6362 = vmatprep.subr.bf16.mxu1 %v20133_v2  ;;  %v17078_v12 = vmax.f32 %v4952_v60, 0.0  ;;  %v17094_v60 = vmax.f32 %v4951_v6, 0.0  ;;  %v20298_v6 = vld [vmem:[#allocation70_spill] sm:$0xff] }
 0x62b   : > { %v4954_v26 = vadd.f32 %v16764_v34, %v4907_v15  ;;  %v4784_v57 = vpop.permute.xlu1 %4783  ;;  %v4786_v27 = vpop.permute.xlu0 %4785  ;;  %v17053_v42 = vpack.i.bf16 %v17035_v22, %v17032_v35  ;;  %v4967_v45 = vadd.f32 %v16764_v34, %v4920_v18  ;;  %v17076_v29 = vpack.i.bf16 %v17040_v37, %v17055_v49  ;;  %v20296_v18 = vld [vmem:[#allocation59_spill] sm:$0xff] }
 0x62c   : > { %v17059_v13 = vsel %vm2397_vm4, %v20291_v20, %v4784_v57  ;;  %v4914_v20 = vmul.f32 %v16747_v47, %v17048_v3  ;;  %v13649_v3 = vld [vmem:[%s20057_s6 + $0xc8] sm:$0xff]   ;;  %s20334_s6 = sld [smem:[#allocation17_spill]] }
 0x62d   : > { %20292 = vst [vmem:[#allocation52_spill] sm:$0xff] %v17059_v13  ;;  %v17064_v24 = vmax.f32 %v4954_v26, 0.0  ;;  %v4921_v15 = vmul.f32 %v16747_v47, %v17059_v13  ;;  %12666 = vrot.lane.b32.xlu1 %v17053_v42, %s20293_s14  ;;  %v20294_v26 = vld [vmem:[#allocation68_spill] sm:$0xff]  ;;  %6363 = vmatpush2.bf16.msra.mxu1 %v13649_v3 }
 0x62e   : > { %v17083_v57 = vsel %vm2397_vm4, %v20294_v26, %v4786_v27  ;;  %v4961_v27 = vadd.f32 %v16764_v34, %v4914_v20  ;;  %v5007_v26 = vmax.f32 %v4967_v45, 0.0  ;;  %6364 = vmatprep.subr.bf16.mxu1 %v20133_v2  ;;  %v20300_v20 = vld [vmem:[#allocation67_spill] sm:$0xff] }
 0x62f   : > { %v4968_v33 = vadd.f32 %v16764_v34, %v4921_v15  ;;  %20295 = vst [vmem:[#allocation66_spill] sm:$0xff] %v17083_v57  ;;  %v4772_v63 = vpop.permute.xlu1 %4771  ;;  %v4790_v36 = vpop.permute.xlu0 %4789  ;;  %v17087_v5 = vpack.i.bf16 %v17064_v24, %v17062_v16  ;;  %v4922_v54 = vmul.f32 %v16747_v47, %v17083_v57 }
 0x630   : > { %v17092_v13 = vsel %vm2397_vm4, %v20296_v18, %v4772_v63 }
 0x631   : > { %20297 = vst [vmem:[#allocation60_spill] sm:$0xff] %v17092_v13  ;;  %v5008_v58 = vmax.f32 %v4968_v33, 0.0  ;;  %v4915_v15 = vmul.f32 %v16747_v47, %v17092_v13  ;;  %12671 = vrot.lane.b32.xlu1 %v17076_v29, %s20293_s14  ;;  %12686 = vrot.lane.b32.xlu0 %v17087_v5, %s20250_s13  ;;  %v17108_v33 = vsel %vm2397_vm4, %v20298_v6, %v4790_v36  ;;  %v5001_v6 = vmax.f32 %v4961_v27, 0.0 }
 0x632   : > { %20299 = vst [vmem:[#allocation65_spill] sm:$0xff] %v17108_v33  ;;  %v17112_v13 = vpack.i.bf16 %v17078_v12, %v17094_v60  ;;  %v4969_v50 = vadd.f32 %v16764_v34, %v4922_v54  ;;  %6365 = vmatpush2.bf16.msra.mxu1 %v13650_v17 }
 0x633   : > { %v4962_v63 = vadd.f32 %v16764_v34, %v4915_v15  ;;  %v4788_v18 = vpop.permute.xlu1 %4787  ;;  %v4794_v57 = vpop.permute.xlu0 %4793  ;;  %v17120_v3 = vpack.i.bf16 %v5008_v58, %v5007_v26  ;;  %v20302_v26 = vld [vmem:[#allocation69_spill] sm:$0xff]  ;;  %7321 = vmatprep.subr.bf16.mxu1 %v20133_v2 }
 0x634   : > { %v17118_v45 = vsel %vm2397_vm4, %v20300_v20, %v4788_v18  ;;  %v4924_v18 = vmul.f32 %v16747_v47, %v17108_v33  ;;  %v5009_v17 = vmax.f32 %v4969_v50, 0.0 }
 0x635   : > { %20301 = vst [vmem:[#allocation68_spill] sm:$0xff] %v17118_v45  ;;  %v5002_v15 = vmax.f32 %v4962_v63, 0.0  ;;  %v4923_v36 = vmul.f32 %v16747_v47, %v17118_v45  ;;  %12696 = vrot.lane.b32.xlu1 %v16908_v25, %s13906_s17  ;;  %12691 = vrot.lane.b32.xlu0 %v17112_v13, %s20250_s13  ;;  %v17134_v63 = vsel %vm2397_vm4, %v20302_v26, %v4794_v57  ;;  %v20304_v45 = vld [vmem:[#allocation73_spill] sm:$0xff] }
 0x636   : > { %20303 = vst [vmem:[#allocation59_spill] sm:$0xff] %v17134_v63  ;;  %v4971_v57 = vadd.f32 %v16764_v34, %v4924_v18 }
 0x637   : > { %v4970_v58 = vadd.f32 %v16764_v34, %v4923_v36  ;;  %v4792_v20 = vpop.permute.xlu1 %4791  ;;  %v17141_v27 = vpack.i.bf16 %v5002_v15, %v5001_v6  ;;  %v4926_v36 = vmul.f32 %v16747_v47, %v17134_v63 }
 0x638   : > { %v17139_v48 = vsel %vm2397_vm4, %v20304_v45, %v4792_v20  ;;  %v20308_v20 = vld [vmem:[#allocation74_spill] sm:$0xff] }
 0x639   : > { %20305 = vst [vmem:[#allocation70_spill] sm:$0xff] %v17139_v48  ;;  %v5010_v54 = vmax.f32 %v4970_v58, 0.0  ;;  %v4925_v33 = vmul.f32 %v16747_v47, %v17139_v48  ;;  %12701 = vrot.lane.b32.xlu1 %v16913_v62, %s13906_s17  ;;  %12716 = vrot.lane.b32.xlu0 %v16976_v55, %s20116_s23  ;;  %v20306_v58 = vld [vmem:[#allocation71_spill] sm:$0xff] }
 0x63b   : > { %v4972_v45 = vadd.f32 %v16764_v34, %v4925_v33  ;;  %v4796_v15 = vpop.permute.xlu1 %4795  ;;  %v4798_v6 = vpop.permute.xlu0 %4797  ;;  %v17161_v11 = vpack.i.bf16 %v5010_v54, %v5009_v17  ;;  %v5011_v33 = vmax.f32 %v4971_v57, 0.0  ;;  %v20310_v17 = vld [vmem:[#allocation72_spill] sm:$0xff] }
 0x63c   : > { %v17155_v26 = vsel %vm2397_vm4, %v20306_v58, %v4796_v15  ;;  %v17159_v48 = vsel %vm2397_vm4, %v20308_v20, %v4798_v6  ;;  %v4973_v15 = vadd.f32 %v16764_v34, %v4926_v36 }
 0x63d   : > { %20307 = vst [vmem:[#allocation67_spill] sm:$0xff] %v17155_v26  ;;  %20309 = vst [vmem:[#allocation69_spill] sm:$0xff] %v17159_v48  ;;  %v5012_v50 = vmax.f32 %v4972_v45, 0.0  ;;  %v4927_v18 = vmul.f32 %v16747_v47, %v17155_v26  ;;  %v4928_v63 = vmul.f32 %v16747_v47, %v17159_v48  ;;  %12721 = vrot.lane.b32.xlu0 %v17013_v10, %s20116_s23  ;;  %12706 = vrot.lane.b32.xlu1 %v17141_v27, %s13906_s17 }
 0x63e   : > { %v5013_v57 = vmax.f32 %v4973_v15, 0.0 }
 0x63f   : > { %v4974_v6 = vadd.f32 %v16764_v34, %v4927_v18  ;;  %v4800_v54 = vpop.permute.xlu1 %4799  ;;  %v17177_v58 = vpack.i.bf16 %v5012_v50, %v5011_v33  ;;  %v4975_v48 = vadd.f32 %v16764_v34, %v4928_v63 }
 0x640   : > { %v17175_v45 = vsel %vm2397_vm4, %v20310_v17, %v4800_v54  ;;  %v20312_v54 = vld [vmem:[#allocation75_spill] sm:$0xff] }
 0x641   : > { %20311 = vst [vmem:[#allocation73_spill] sm:$0xff] %v17175_v45  ;;  %v5014_v20 = vmax.f32 %v4974_v6, 0.0  ;;  %v4929_v26 = vmul.f32 %v16747_v47, %v17175_v45  ;;  %12726 = vrot.lane.b32.xlu0 %v16865_v32, %s20293_s14  ;;  %12711 = vrot.lane.b32.xlu1 %v17030_v23, %s13906_s17  ;;  %v5015_v63 = vmax.f32 %v4975_v48, 0.0  ;;  %v20314_v45 = vld [vmem:[#allocation76_spill] sm:$0xff] }
 0x643   : > { %v4976_v36 = vadd.f32 %v16764_v34, %v4929_v26  ;;  %v4802_v18 = vpop.permute.xlu0 %4801  ;;  %v17191_v33 = vpack.i.bf16 %v5014_v20, %v5013_v57 }
 0x644   : > { %v17189_v50 = vsel %vm2397_vm4, %v20312_v54, %v4802_v18 }
 0x645   : > { %20313 = vst [vmem:[#allocation71_spill] sm:$0xff] %v17189_v50  ;;  %v5016_v6 = vmax.f32 %v4976_v36, 0.0  ;;  %12736 = vrot.lane.b32.xlu0 %v16804_v59, %s20135_s18  ;;  %12731 = vrot.lane.b32.xlu1 %v16913_v62, %s20250_s13  ;;  %v4930_v15 = vmul.f32 %v16747_v47, %v17189_v50 }
 0x647   : > { %v4804_v17 = vpop.permute.xlu1 %4803  ;;  %v17199_v26 = vpack.i.bf16 %v5016_v6, %v5015_v63  ;;  %v4977_v59 = vadd.f32 %v16764_v34, %v4930_v15 }
 0x648   : > { %v17203_v18 = vsel %vm2397_vm4, %v20314_v45, %v4804_v17 }
 0x649   : > { %20315 = vst [vmem:[#allocation74_spill] sm:$0xff] %v17203_v18  ;;  %v4931_v48 = vmul.f32 %v16747_v47, %v17203_v18  ;;  %12746 = vrot.lane.b32.xlu0 %v17013_v10, %s13906_s17  ;;  %12741 = vrot.lane.b32.xlu1 %v16853_v0, %s20293_s14  ;;  %v17212_v20 = vpop.permute.xlu0 %12646  ;;  %v5017_v47 = vmax.f32 %v4977_v59, 0.0  ;;  %v20316_v59 = vld [vmem:[#allocation81_spill] sm:$0xff] }
 0x64a   : > { %v17218_v45 = vunpack.i.l.bf16 %v17212_v20 }
 0x64b   : > { %v4978_v57 = vadd.f32 %v16764_v34, %v4931_v48  ;;  %v17215_v36 = vpop.permute.xlu1 %12651 }
 0x64c   : > { %v20001_v6 = vunpack.i.l.bf16 %v17215_v36  ;;  %v20323_v1 = vunpack.i.l.bf16 %v17215_v36 }
 0x64d   : > { %v5018_v54 = vmax.f32 %v4978_v57, 0.0  ;;  %12761 = vrot.lane.b32.xlu1 %v16976_v55, %s13906_s17  ;;  %12751 = vrot.lane.b32.xlu0 %v17120_v3, %s20116_s23  ;;  %v17239_v57 = vsel %vm2554_vm8, %v17218_v45, %v20316_v59  ;;  %v20317_v59 = vunpack.i.h.bf16 %v17215_v36 }
 0x64f   : > { %v17226_v15 = vpop.permute.xlu1 %12656  ;;  %v17230_v48 = vpack.i.bf16 %v5018_v54, %v5017_v47  ;;  %v5630_v47 = vsel %vm5627_vm14, %v17239_v57, %v20001_v6  ;;  %v5631_v50 = vsel %vm5627_vm14, %v17239_v57, %v20317_v59 }
 0x650   : > { %v20000_v34 = vunpack.i.h.bf16 %v17226_v15  ;;  %v19999_v17 = vunpack.i.l.bf16 %v17226_v15 }
 0x651   : > { %12766 = vrot.lane.b32.xlu1 %v17076_v29, %s20135_s18  ;;  %12756 = vrot.lane.b32.xlu0 %v16908_v25, %s20250_s13 }
 0x652   : > { %v5628_v63 = vsel %vm5627_vm14, %v17239_v57, %v19999_v17  ;;  %v5629_v29 = vsel %vm5627_vm14, %v17239_v57, %v20000_v34 }
 0x653   : > { %v5838_v54 = vpack.c.bf16 %v5629_v29, %v5628_v63  ;;  %v17268_v63 = vpack.c.bf16 %v17218_v45, %v17218_v45  ;;  %v5841_v29 = vpack.c.bf16 %v5631_v50, %v5630_v47  ;;  %v12820_v50 = vpack.i.bf16 %v16794_v7, %v16799_v4 }
 0x655   : > { %12781 = vrot.lane.b32.xlu1 %v17030_v23, %s20250_s13  ;;  %12771 = vrot.lane.b32.xlu0 %v17161_v11, %s20116_s23 }
 0x656   : > { %6173 = vmatprep.mubr.bf16.mxu0 %v5838_v54  ;;  %v12925_v54 = vpack.i.bf16 %v16842_v38, %v16857_v9 }
 0x657   : > { %11000 = vmatmul.mubr.msk.bf16.vlgmr.msra.gmra.mxu0 %vm17258_vm1, %v17268_v63 }
 0x658   : > { %6181 = vmatprep.mubr.bf16.mxu0 %v5841_v29  ;;  %v12950_v29 = vpack.i.bf16 %v17094_v60, %v16844_v39 }
 0x659   : > { %12776 = vrot.lane.b32.xlu0 %v17112_v13, %s20293_s14  ;;  %12796 = vrot.lane.b32.xlu1 %v17177_v58, %s20116_s23 }
 0x65d   : > { %12786 = vrot.lane.b32.xlu0 %v17120_v3, %s13906_s17  ;;  %12801 = vrot.lane.b32.xlu1 %v17087_v5, %s20293_s14 }
 0x65f   : > { %11005 = vmatmul.mubr.msk.bf16.gmra.mxu0 %vm17258_vm1, %v17268_v63 }
 0x661   : > { %12791 = vrot.lane.b32.xlu0 %v17053_v42, %s20135_s18  ;;  %12816 = vrot.lane.b32.xlu1 %v17161_v11, %s13906_s17  ;;  %v12855_v42 = vpack.i.bf16 %v17055_v49, %v16787_v19 }
 0x665   : > { %12821 = vrot.lane.b32.xlu1 %v12820_v50, %s20118_s2  ;;  %12806 = vrot.lane.b32.xlu0 %v17191_v33, %s20116_s23 }
 0x669   : > { %12811 = vrot.lane.b32.xlu0 %v17141_v27, %s20250_s13  ;;  %12831 = vrot.lane.b32.xlu1 %v17199_v26, %s20116_s23 }
 0x66d   : > { %12826 = vrot.lane.b32.xlu0 %v16865_v32, %s20135_s18  ;;  %12836 = vrot.lane.b32.xlu1 %v16913_v62, %s20293_s14  ;;  %v12880_v32 = vpack.i.bf16 %v17032_v35, %v17040_v37 }
 0x671   : > { %12841 = vrot.lane.b32.xlu0 %v17013_v10, %s20250_s13  ;;  %12846 = vrot.lane.b32.xlu1 %v17177_v58, %s13906_s17 }
 0x675   : > { %12861 = vrot.lane.b32.xlu1 %v16853_v0, %s20135_s18  ;;  %12851 = vrot.lane.b32.xlu0 %v17230_v48, %s20116_s23  ;;  %v12905_v0 = vpack.i.bf16 %v16855_v51, %v17035_v22 }
 0x679   : > { %12871 = vrot.lane.b32.xlu1 %v16976_v55, %s20250_s13  ;;  %12856 = vrot.lane.b32.xlu0 %v12855_v42, %s20118_s2 }
 0x67d   : > { %12881 = vrot.lane.b32.xlu1 %v12880_v32, %s20118_s2  ;;  %12866 = vrot.lane.b32.xlu0 %v16908_v25, %s20293_s14 }
 0x681   : > { %12891 = vrot.lane.b32.xlu1 %v17030_v23, %s20293_s14  ;;  %12876 = vrot.lane.b32.xlu0 %v17191_v33, %s13906_s17 }
 0x685   : > { %12901 = vrot.lane.b32.xlu1 %v17199_v26, %s13906_s17  ;;  %12886 = vrot.lane.b32.xlu0 %v17112_v13, %s20135_s18  ;;  %v12677_v13 = vpop.permute.xlu0 %12676 }
 0x686   : > { %v12679_v34 = vunpack.i.h.bf16 %v12677_v13  ;;  %v12678_v6 = vunpack.i.l.bf16 %v12677_v13  ;;  %v12970_v13 = vpack.i.bf16 %v17062_v16, %v17078_v12 }
 0x689   : > { %12911 = vrot.lane.b32.xlu1 %v17087_v5, %s20135_s18  ;;  %12896 = vrot.lane.b32.xlu0 %v17120_v3, %s20250_s13  ;;  %v17349_v5 = vpop.permute.xlu1 %12661  ;;  %v12682_v47 = vpop.permute.xlu0 %12681 }
 0x68a   : > { %v12683_v8 = vunpack.i.l.bf16 %v12682_v47 }
 0x68d   : > { %12921 = vrot.lane.b32.xlu1 %v17161_v11, %s20250_s13  ;;  %12906 = vrot.lane.b32.xlu0 %v12905_v0, %s20118_s2 }
 0x691   : > { %12926 = vrot.lane.b32.xlu1 %v12925_v54, %s20118_s2  ;;  %12916 = vrot.lane.b32.xlu0 %v17141_v27, %s20293_s14 }
 0x695   : > { %12941 = vrot.lane.b32.xlu1 %v17013_v10, %s20293_s14  ;;  %12931 = vrot.lane.b32.xlu0 %v17230_v48, %s13906_s17 }
 0x699   : > { %5494 = vrot.lane.b32.xlu1 %v20211_v31, %s13906_s17  ;;  %12936 = vrot.lane.b32.xlu0 %v16913_v62, %s20135_s18  ;;  %s20332_s17 = sld [smem:[#allocation16_spill]] }
 0x69d   : > { %12956 = vrot.lane.b32.xlu1 %v16908_v25, %s20135_s18  ;;  %12946 = vrot.lane.b32.xlu0 %v17177_v58, %s20250_s13 }
 0x69f   : > { %v17355_v59 = vpop.permute.xlu1 %12666 }
 0x6a0   : > { %v20320_v21 = vunpack.i.l.bf16 %v17355_v59  ;;  %v20321_v14 = vunpack.i.h.bf16 %v17355_v59 }
 0x6a1   : > { %12966 = vrot.lane.b32.xlu1 %v17191_v33, %s20250_s13  ;;  %12951 = vrot.lane.b32.xlu0 %v12950_v29, %s20118_s2 }
 0x6a2   : > { %v5634_v41 = vsel %vm5627_vm14, %v17239_v57, %v20320_v21 }
 0x6a3   : > { %v17364_v32 = vpop.permute.xlu1 %12671  ;;  %v17366_v0 = vpop.permute.xlu0 %12686 }
 0x6a4   : > { %v20010_v54 = vunpack.i.h.bf16 %v17364_v32  ;;  %v20007_v17 = vunpack.i.l.bf16 %v17364_v32 }
 0x6a5   : > { %12976 = vrot.lane.b32.xlu1 %v17030_v23, %s20135_s18  ;;  %12961 = vrot.lane.b32.xlu0 %v16976_v55, %s20293_s14 }
 0x6a6   : > { %v5632_v29 = vsel %vm5627_vm14, %v17239_v57, %v20007_v17  ;;  %v5633_v50 = vsel %vm5627_vm14, %v17239_v57, %v20010_v54  ;;  %v5635_v17 = vsel %vm5627_vm14, %v17239_v57, %v20321_v14  ;;  %v20322_v54 = vunpack.i.h.bf16 %v17215_v36 }
 0x6a7   : > { %v12697_v42 = vpop.permute.xlu1 %12696  ;;  %v17382_v30 = vpop.permute.xlu0 %12691  ;;  %v5844_v61 = vpack.c.bf16 %v5633_v50, %v5632_v29  ;;  %v5670_v50 = vsel %vm4008_vm12, %v20323_v1, %v12678_v6  ;;  %v12684_v29 = vunpack.i.h.bf16 %v12682_v47  ;;  %v5847_v57 = vpack.c.bf16 %v5635_v17, %v5634_v41 }
 0x6a8   : > { %v12699_v46 = vunpack.i.h.bf16 %v12697_v42  ;;  %v12698_v40 = vunpack.i.l.bf16 %v12697_v42  ;;  %v5671_v31 = vsel %vm4008_vm12, %v20322_v54, %v12679_v34  ;;  %v20324_v42 = vunpack.i.h.bf16 %v17226_v15 }
 0x6a9   : > { %12986 = vrot.lane.b32.xlu1 %v17199_v26, %s20250_s13  ;;  %12971 = vrot.lane.b32.xlu0 %v12970_v13, %s20118_s2 }
 0x6aa   : > { %v17404_v21 = vsel %vm5708_vm15, %v5670_v50, %v12698_v40  ;;  %v17407_v14 = vsel %vm5708_vm15, %v5671_v31, %v12699_v46  ;;  %6189 = vmatprep.mubr.bf16.mxu0 %v5844_v61  ;;  %v5669_v54 = vsel %vm4008_vm12, %v20324_v42, %v12684_v29  ;;  %v20325_v31 = vunpack.i.l.bf16 %v17226_v15 }
 0x6ab   : > { %11010 = vmatmul.mubr.msk.bf16.gmra.mxu0 %vm17258_vm1, %v17268_v63  ;;  %v12702_v1 = vpop.permute.xlu1 %12701  ;;  %v12717_v36 = vpop.permute.xlu0 %12716 }
 0x6ac   : > { %v12704_v34 = vunpack.i.h.bf16 %v12702_v1  ;;  %v12703_v47 = vunpack.i.l.bf16 %v12702_v1  ;;  %6197 = vmatprep.mubr.bf16.mxu0 %v5847_v57  ;;  %v5668_v41 = vsel %vm4008_vm12, %v20325_v31, %v12683_v8  ;;  %v12719_v50 = vunpack.i.h.bf16 %v12717_v36 }
 0x6ad   : > { %12991 = vrot.lane.b32.xlu1 %v17141_v27, %s20135_s18  ;;  %12981 = vrot.lane.b32.xlu0 %v17120_v3, %s20293_s14  ;;  %v12718_v57 = vunpack.i.l.bf16 %v12717_v36  ;;  %v12664_v8 = vunpack.i.h.bf16 %v17349_v5  ;;  %v12663_v31 = vunpack.i.l.bf16 %v17349_v5 }
 0x6ae   : > { %v5709_v61 = vsel %vm5708_vm15, %v5668_v41, %v12703_v47  ;;  %v5710_v17 = vsel %vm5708_vm15, %v5669_v54, %v12704_v34  ;;  %v5752_v36 = vsel %vm2397_vm4, %v12699_v46, %v12719_v50 }
 0x6af   : > { %v5839_v13 = vpack.c.bf16 %v5710_v17, %v5709_v61  ;;  %v17426_v1 = vpop.permute.xlu1 %12706  ;;  %v12722_v29 = vpop.permute.xlu0 %12721  ;;  %v5751_v61 = vsel %vm2397_vm4, %v12698_v40, %v12718_v57  ;;  %v5595_v40 = vsel %vm2554_vm8, %v17218_v45, %v12663_v31  ;;  %v5596_v46 = vsel %vm2554_vm8, %v17218_v45, %v12664_v8 }
 0x6b0   : > { %v12724_v42 = vunpack.i.h.bf16 %v12722_v29  ;;  %v12723_v15 = vunpack.i.l.bf16 %v12722_v29 }
 0x6b1   : > { %13001 = vrot.lane.b32.xlu1 %v17230_v48, %s20250_s13  ;;  %5075 = vrot.lane.b32.xlu0 %v17064_v24, %s20118_s2 }
 0x6b2   : > { %v5750_v54 = vsel %vm2397_vm4, %v12704_v34, %v12724_v42  ;;  %v5749_v41 = vsel %vm2397_vm4, %v12703_v47, %v12723_v15  ;;  %v5843_v34 = vpack.c.bf16 %v5752_v36, %v5751_v61  ;;  %v12694_v36 = vunpack.i.h.bf16 %v17382_v30 }
 0x6b3   : > { %11015 = vmatmul.mubr.msk.bf16.gmra.mxu0 %vm17258_vm1, %v17268_v63  ;;  %v12712_v17 = vpop.permute.xlu1 %12711  ;;  %v17441_v5 = vpop.permute.xlu0 %12726  ;;  %v5840_v29 = vpack.c.bf16 %v5750_v54, %v5749_v41 }
 0x6b4   : > { %v12729_v6 = vunpack.i.h.bf16 %v17441_v5  ;;  %v12728_v53 = vunpack.i.l.bf16 %v17441_v5 }
 0x6b5   : > { %13011 = vrot.lane.b32.xlu1 %v17013_v10, %s20135_s18  ;;  %12996 = vrot.lane.b32.xlu0 %v17161_v11, %s20293_s14 }
 0x6b6   : > { %11056 = vmatprep.mubr.msk.bf16.mxu1 %vm20020_vm7, %v5840_v29  ;;  %v5636_v47 = vsel %vm5627_vm14, %v5595_v40, %v12728_v53  ;;  %v5637_v10 = vsel %vm5627_vm14, %v5596_v46, %v12729_v6  ;;  %v12714_v29 = vunpack.i.h.bf16 %v12712_v17  ;;  %v12713_v40 = vunpack.i.l.bf16 %v12712_v17 }
 0x6b7   : > { %6367 = vmatmul.mubr.bf16.vlgmr.msra.gmra.mxu1 %v5839_v13  ;;  %v17460_v50 = vpop.permute.xlu1 %12731  ;;  %v12737_v57 = vpop.permute.xlu0 %12736  ;;  %v5850_v42 = vpack.c.bf16 %v5637_v10, %v5636_v47  ;;  %v20327_v17 = vunpack.i.h.bf16 %v17364_v32 }
 0x6b8   : > { %11057 = vmatprep.mubr.msk.bf16.mxu1 %vm20020_vm7, %v5843_v34  ;;  %v12739_v15 = vunpack.i.h.bf16 %v12737_v57  ;;  %v12738_v8 = vunpack.i.l.bf16 %v12737_v57 }
 0x6b9   : > { %13021 = vrot.lane.b32.xlu1 %v16908_v25, %s20118_s2  ;;  %13006 = vrot.lane.b32.xlu0 %v16913_v62, %s20118_s2  ;;  %v12693_v25 = vunpack.i.l.bf16 %v17382_v30 }
 0x6ba   : > { %6205 = vmatprep.mubr.bf16.mxu0 %v5850_v42  ;;  %v5597_v62 = vsel %vm2554_vm8, %v17218_v45, %v12738_v8  ;;  %v5598_v61 = vsel %vm2554_vm8, %v17218_v45, %v12739_v15  ;;  %v5673_v42 = vsel %vm4008_vm12, %v20327_v17, %v12694_v36  ;;  %v20328_v15 = vunpack.i.l.bf16 %v17364_v32 }
 0x6bb   : > { %11020 = vmatmul.mubr.msk.bf16.gmra.mxu0 %vm17258_vm1, %v17268_v63  ;;  %v17470_v13 = vpop.permute.xlu1 %12741  ;;  %v17472_v31 = vpop.permute.xlu0 %12746 }
 0x6bc   : > { %v12744_v54 = vunpack.i.h.bf16 %v17470_v13  ;;  %v12743_v41 = vunpack.i.l.bf16 %v17470_v13  ;;  %v5672_v8 = vsel %vm4008_vm12, %v20328_v15, %v12693_v25  ;;  %v12689_v25 = vunpack.i.h.bf16 %v17366_v0 }
 0x6bd   : > { %13031 = vrot.lane.b32.xlu1 %v17191_v33, %s20293_s14  ;;  %13016 = vrot.lane.b32.xlu0 %v17177_v58, %s20293_s14  ;;  %v20326_v33 = vpack.c.bf16 %v17407_v14, %v17404_v21  ;;  %v5713_v21 = vsel %vm5708_vm15, %v5672_v8, %v12713_v40  ;;  %v5714_v14 = vsel %vm5708_vm15, %v5673_v42, %v12714_v29  ;;  %v12749_v8 = vunpack.i.h.bf16 %v17472_v31 }
 0x6be   : > { %v5638_v46 = vsel %vm5627_vm14, %v5597_v62, %v12743_v41  ;;  %v5639_v30 = vsel %vm5627_vm14, %v5598_v61, %v12744_v54 }
 0x6bf   : > { %6375 = vmatmul.mubr.bf16.gmra.mxu1 %v20326_v33  ;;  %v17495_v58 = vpop.permute.xlu1 %12761  ;;  %v12752_v34 = vpop.permute.xlu0 %12751  ;;  %v5853_v47 = vpack.c.bf16 %v5639_v30, %v5638_v46  ;;  %v12709_v46 = vunpack.i.h.bf16 %v17426_v1  ;;  %v12708_v30 = vunpack.i.l.bf16 %v17426_v1 }
 0x6c0   : > { %v12754_v10 = vunpack.i.h.bf16 %v12752_v34  ;;  %v12753_v57 = vunpack.i.l.bf16 %v12752_v34  ;;  %v20329_v34 = vunpack.i.h.bf16 %v17355_v59 }
 0x6c1   : > { %13041 = vrot.lane.b32.xlu1 %v17120_v3, %s20135_s18  ;;  %13026 = vrot.lane.b32.xlu0 %v16976_v55, %s20135_s18  ;;  %v12688_v55 = vunpack.i.l.bf16 %v17366_v0 }
 0x6c2   : > { %v5754_v62 = vsel %vm2397_vm4, %v12714_v29, %v12754_v10  ;;  %v5753_v61 = vsel %vm2397_vm4, %v12713_v40, %v12753_v57  ;;  %6213 = vmatprep.mubr.bf16.mxu0 %v5853_v47  ;;  %v5845_v29 = vpack.c.bf16 %v5714_v14, %v5713_v21  ;;  %v5675_v0 = vsel %vm4008_vm12, %v20329_v34, %v12689_v25 }
 0x6c3   : > { %11025 = vmatmul.mubr.msk.bf16.gmra.mxu0 %vm17258_vm1, %v17268_v63  ;;  %v12767_v32 = vpop.permute.xlu1 %12766  ;;  %v17514_v36 = vpop.permute.xlu0 %12756  ;;  %v5846_v3 = vpack.c.bf16 %v5754_v62, %v5753_v61  ;;  %v20330_v47 = vunpack.i.l.bf16 %v17355_v59  ;;  %v12748_v21 = vunpack.i.l.bf16 %v17472_v31 }
 0x6c4   : > { %v12769_v17 = vunpack.i.h.bf16 %v12767_v32  ;;  %v12768_v42 = vunpack.i.l.bf16 %v12767_v32  ;;  %v12734_v32 = vunpack.i.h.bf16 %v17460_v50 }
 0x6c5   : > { %13051 = vrot.lane.b32.xlu1 %v17141_v27, %s20118_s2  ;;  %13036 = vrot.lane.b32.xlu0 %v17030_v23, %s20118_s2  ;;  %v5674_v1 = vsel %vm4008_vm12, %v20330_v47, %v12688_v55  ;;  %v5716_v23 = vsel %vm5708_vm15, %v5675_v0, %v12709_v46  ;;  %v12733_v55 = vunpack.i.l.bf16 %v17460_v50 }
 0x6c6   : > { %11058 = vmatprep.mubr.msk.bf16.mxu1 %vm20020_vm7, %v5846_v3  ;;  %v5715_v57 = vsel %vm5708_vm15, %v5674_v1, %v12708_v30 }
 0x6c7   : > { %6383 = vmatmul.mubr.bf16.gmra.mxu1 %v5845_v29  ;;  %v17525_v40 = vpop.permute.xlu1 %12781  ;;  %v12772_v33 = vpop.permute.xlu0 %12771  ;;  %v5848_v31 = vpack.c.bf16 %v5716_v23, %v5715_v57  ;;  %v5599_v29 = vsel %vm2554_vm8, %v17218_v45, %v12768_v42  ;;  %v5676_v1 = vsel %vm4008_vm12, %v12728_v53, %v12733_v55  ;;  %v12758_v42 = vunpack.i.l.bf16 %v17514_v36 }
 0x6c8   : > { %v12774_v10 = vunpack.i.h.bf16 %v12772_v33  ;;  %v12773_v27 = vunpack.i.l.bf16 %v12772_v33  ;;  %v5600_v33 = vsel %vm2554_vm8, %v17218_v45, %v12769_v17  ;;  %v5717_v57 = vsel %vm5708_vm15, %v5676_v1, %v12748_v21 }
 0x6c9   : > { %13061 = vrot.lane.b32.xlu1 %v17230_v48, %s20293_s14  ;;  %13046 = vrot.lane.b32.xlu0 %v17199_v26, %s20293_s14  ;;  %v12759_v17 = vunpack.i.h.bf16 %v17514_v36 }
 0x6ca   : > { %v5756_v15 = vsel %vm2397_vm4, %v12709_v46, %v12774_v10  ;;  %v5755_v59 = vsel %vm2397_vm4, %v12708_v30, %v12773_v27  ;;  %v5677_v10 = vsel %vm4008_vm12, %v12729_v6, %v12734_v32 }
 0x6cb   : > { %v12797_v14 = vpop.permute.xlu1 %12796  ;;  %v17543_v62 = vpop.permute.xlu0 %12776  ;;  %v5849_v61 = vpack.c.bf16 %v5756_v15, %v5755_v59  ;;  %v5718_v23 = vsel %vm5708_vm15, %v5677_v10, %v12749_v8 }
 0x6cc   : > { %v12799_v3 = vunpack.i.h.bf16 %v12797_v14  ;;  %v12798_v25 = vunpack.i.l.bf16 %v12797_v14  ;;  %v12779_v48 = vunpack.i.h.bf16 %v17543_v62  ;;  %v12778_v26 = vunpack.i.l.bf16 %v17543_v62 }
 0x6cd   : > { %13056 = vrot.lane.b32.xlu0 %v17161_v11, %s20135_s18  ;;  %11059 = vmatprep.mubr.msk.bf16.mxu1 %vm20020_vm7, %v5849_v61  ;;  %v5851_v14 = vpack.c.bf16 %v5718_v23, %v5717_v57  ;;  %v5679_v61 = vsel %vm4008_vm12, %v12744_v54, %v12759_v17  ;;  %v12783_v23 = vunpack.i.l.bf16 %v17525_v40 }
 0x6ce   : > { %v5757_v46 = vsel %vm2397_vm4, %v12748_v21, %v12798_v25  ;;  %v5758_v30 = vsel %vm2397_vm4, %v12749_v8, %v12799_v3  ;;  %v5640_v11 = vsel %vm5627_vm14, %v5599_v29, %v12778_v26  ;;  %v5641_v0 = vsel %vm5627_vm14, %v5600_v33, %v12779_v48 }
 0x6cf   : > { %6391 = vmatmul.mubr.bf16.gmra.mxu1 %v5848_v31  ;;  %v17558_v34 = vpop.permute.xlu1 %12801  ;;  %v17560_v50 = vpop.permute.xlu0 %12786  ;;  %v5852_v47 = vpack.c.bf16 %v5758_v30, %v5757_v46  ;;  %v5856_v27 = vpack.c.bf16 %v5641_v0, %v5640_v11  ;;  %v5678_v3 = vsel %vm4008_vm12, %v12743_v41, %v12758_v42  ;;  %v12763_v46 = vunpack.i.l.bf16 %v17495_v58 }
 0x6d0   : > { %v12804_v5 = vunpack.i.h.bf16 %v17558_v34  ;;  %v12803_v21 = vunpack.i.l.bf16 %v17558_v34  ;;  %v12789_v10 = vunpack.i.h.bf16 %v17560_v50  ;;  %v12649_v42 = vunpack.i.h.bf16 %v17212_v20 }
 0x6d1   : > { %11060 = vmatprep.mubr.msk.bf16.mxu1 %vm20020_vm7, %v5852_v47  ;;  %6221 = vmatprep.mubr.bf16.mxu0 %v5856_v27  ;;  %v5719_v33 = vsel %vm5708_vm15, %v5678_v3, %v12763_v46  ;;  %v12788_v27 = vunpack.i.l.bf16 %v17560_v50  ;;  %v5680_v50 = vsel %vm4008_vm12, %v12778_v26, %v12783_v23 }
 0x6d2   : > { %11030 = vmatmul.mubr.msk.bf16.gmra.mxu0 %vm17258_vm1, %v17268_v63 }
 0x6d3   : > { %v17579_v15 = vpop.permute.xlu1 %12816  ;;  %v12792_v59 = vpop.permute.xlu0 %12791 }
 0x6d4   : > { %v12794_v53 = vunpack.i.h.bf16 %v12792_v59  ;;  %v12793_v6 = vunpack.i.l.bf16 %v12792_v59 }
 0x6d6   : > { %v5601_v8 = vsel %vm2554_vm8, %v17218_v45, %v12793_v6  ;;  %v5602_v36 = vsel %vm2554_vm8, %v17218_v45, %v12794_v53  ;;  %v12764_v45 = vunpack.i.h.bf16 %v17495_v58  ;;  %v12784_v6 = vunpack.i.h.bf16 %v17525_v40 }
 0x6d7   : > { %6399 = vmatmul.mubr.bf16.gmra.mxu1 %v5851_v14  ;;  %v17596_v25 = vpop.permute.xlu1 %12821  ;;  %v12807_v32 = vpop.permute.xlu0 %12806  ;;  %v5642_v55 = vsel %vm5627_vm14, %v5601_v8, %v12803_v21  ;;  %v5643_v31 = vsel %vm5627_vm14, %v5602_v36, %v12804_v5  ;;  %v5721_v40 = vsel %vm5708_vm15, %v5680_v50, %v12788_v27 }
 0x6d8   : > { %v12809_v30 = vunpack.i.h.bf16 %v12807_v32  ;;  %v12808_v54 = vunpack.i.l.bf16 %v12807_v32  ;;  %v5859_v29 = vpack.c.bf16 %v5643_v31, %v5642_v55  ;;  %v5720_v11 = vsel %vm5708_vm15, %v5679_v61, %v12764_v45 }
 0x6d9   : > { %v5854_v17 = vpack.c.bf16 %v5720_v11, %v5719_v33  ;;  %v12823_v14 = vunpack.i.l.bf16 %v17596_v25  ;;  %v5681_v55 = vsel %vm4008_vm12, %v12779_v48, %v12784_v6 }
 0x6da   : > { %v5760_v13 = vsel %vm2397_vm4, %v12764_v45, %v12809_v30  ;;  %v5759_v41 = vsel %vm2397_vm4, %v12763_v46, %v12808_v54  ;;  %6229 = vmatprep.mubr.bf16.mxu0 %v5859_v29  ;;  %v5722_v26 = vsel %vm5708_vm15, %v5681_v55, %v12789_v10 }
 0x6db   : > { %v12832_v0 = vpop.permute.xlu1 %12831  ;;  %v12812_v47 = vpop.permute.xlu0 %12811  ;;  %v5855_v1 = vpack.c.bf16 %v5760_v13, %v5759_v41  ;;  %11035 = vmatmul.mubr.msk.bf16.gmra.mxu0 %vm17258_vm1, %v17268_v63  ;;  %v5857_v48 = vpack.c.bf16 %v5722_v26, %v5721_v40  ;;  %v11039_v33 = vpack.c.bf16 %v12823_v14, %v12649_v42  ;;  %v12824_v40 = vunpack.i.h.bf16 %v17596_v25 }
 0x6dc   : > { %v12834_v58 = vunpack.i.h.bf16 %v12832_v0  ;;  %v12833_v57 = vunpack.i.l.bf16 %v12832_v0  ;;  %v12813_v31 = vunpack.i.l.bf16 %v12812_v47  ;;  %v12814_v30 = vunpack.i.h.bf16 %v12812_v47 }
 0x6dd   : > { %11061 = vmatprep.mubr.msk.bf16.mxu1 %vm20020_vm7, %v5855_v1  ;;  %v12818_v0 = vunpack.i.l.bf16 %v17579_v15 }
 0x6de   : > { %v5761_v59 = vsel %vm2397_vm4, %v12788_v27, %v12833_v57  ;;  %v5762_v53 = vsel %vm2397_vm4, %v12789_v10, %v12834_v58  ;;  %v5682_v11 = vsel %vm4008_vm12, %v12803_v21, %v12813_v31  ;;  %v5683_v1 = vsel %vm4008_vm12, %v12804_v5, %v12814_v30 }
 0x6df   : > { %6407 = vmatmul.mubr.bf16.gmra.mxu1 %v5854_v17  ;;  %v12837_v63 = vpop.permute.xlu1 %12836  ;;  %v12827_v8 = vpop.permute.xlu0 %12826  ;;  %v5858_v36 = vpack.c.bf16 %v5762_v53, %v5761_v59  ;;  %v12819_v57 = vunpack.i.h.bf16 %v17579_v15  ;;  %v5723_v21 = vsel %vm5708_vm15, %v5682_v11, %v12818_v0  ;;  %v20331_v53 = vld [vmem:[#allocation80_spill] sm:$0xff] }
 0x6e0   : > { %v12839_v61 = vunpack.i.h.bf16 %v12837_v63  ;;  %v12838_v3 = vunpack.i.l.bf16 %v12837_v63  ;;  %v12829_v32 = vunpack.i.h.bf16 %v12827_v8  ;;  %v12828_v20 = vunpack.i.l.bf16 %v12827_v8 }
 0x6e1   : > { %11062 = vmatprep.mubr.msk.bf16.mxu1 %vm20020_vm7, %v5858_v36  ;;  %v5724_v59 = vsel %vm5708_vm15, %v5683_v1, %v12819_v57 }
 0x6e2   : > { %v5603_v45 = vsel %vm2554_vm8, %v12649_v42, %v12828_v20  ;;  %v5604_v46 = vsel %vm2554_vm8, %v12823_v14, %v12829_v32  ;;  %v5860_v32 = vpack.c.bf16 %v5724_v59, %v5723_v21 }
 0x6e3   : > { %v12847_v54 = vpop.permute.xlu1 %12846  ;;  %v12842_v29 = vpop.permute.xlu0 %12841  ;;  %v5644_v13 = vsel %vm5627_vm14, %v5603_v45, %v12838_v3  ;;  %v5645_v62 = vsel %vm5627_vm14, %v5604_v46, %v12839_v61 }
 0x6e4   : > { %v5863_v41 = vpack.c.bf16 %v5645_v62, %v5644_v13  ;;  %v12849_v10 = vunpack.i.h.bf16 %v12847_v54  ;;  %v12848_v27 = vunpack.i.l.bf16 %v12847_v54  ;;  %v12844_v42 = vunpack.i.h.bf16 %v12842_v29 }
 0x6e5   : > { %v12843_v50 = vunpack.i.l.bf16 %v12842_v29 }
 0x6e6   : > { %6237 = vmatprep.mubr.bf16.mxu0 %v5863_v41  ;;  %v5766_v6 = vsel %vm2397_vm4, %v12849_v10, %v20331_v53  ;;  %v5765_v15 = vsel %vm2397_vm4, %v12848_v27, %v20331_v53  ;;  %v5685_v26 = vsel %vm4008_vm12, %v12839_v61, %v12844_v42 }
 0x6e7   : > { %6415 = vmatmul.mubr.bf16.gmra.mxu1 %v5857_v48  ;;  %v12862_v47 = vpop.permute.xlu1 %12861  ;;  %v12852_v58 = vpop.permute.xlu0 %12851  ;;  %11040 = vmatmul.mubr.msk.bf16.gmra.mxu0 %vm17258_vm1, %v11039_v33  ;;  %v5865_v55 = vpack.c.bf16 %v5766_v6, %v5765_v15  ;;  %v5684_v31 = vsel %vm4008_vm12, %v12838_v3, %v12843_v50  ;;  %v5726_v61 = vsel %vm5708_vm15, %v5685_v26, %v12849_v10 }
 0x6e8   : > { %v12854_v23 = vunpack.i.h.bf16 %v12852_v58  ;;  %v12853_v17 = vunpack.i.l.bf16 %v12852_v58  ;;  %v12863_v36 = vunpack.i.l.bf16 %v12862_v47  ;;  %v12864_v30 = vunpack.i.h.bf16 %v12862_v47 }
 0x6e9   : > { %v5725_v25 = vsel %vm5708_vm15, %v5684_v31, %v12848_v27 }
 0x6ea   : > { %v5764_v34 = vsel %vm2397_vm4, %v12819_v57, %v12854_v23  ;;  %v5763_v5 = vsel %vm2397_vm4, %v12818_v0, %v12853_v17  ;;  %v5605_v13 = vsel %vm2554_vm8, %v12824_v40, %v12863_v36  ;;  %v5864_v47 = vpack.c.bf16 %v5726_v61, %v5725_v25 }
 0x6eb   : > { %v12872_v14 = vpop.permute.xlu1 %12871  ;;  %v17649_v63 = vpop.permute.xlu0 %12856  ;;  %v5861_v8 = vpack.c.bf16 %v5764_v34, %v5763_v5 }
 0x6ec   : > { %v12858_v20 = vunpack.i.l.bf16 %v17649_v63  ;;  %v12874_v58 = vunpack.i.h.bf16 %v12872_v14  ;;  %v12873_v21 = vunpack.i.l.bf16 %v12872_v14  ;;  %v12859_v27 = vunpack.i.h.bf16 %v17649_v63 }
 0x6ed   : > { %11063 = vmatprep.mubr.msk.bf16.mxu1 %vm20020_vm7, %v5861_v8 }
 0x6ee   : > { %v5606_v62 = vsel %vm2554_vm8, %v12858_v20, %v12864_v30  ;;  %v11044_v57 = vpack.c.bf16 %v12858_v20, %v12824_v40 }
 0x6ef   : > { %6423 = vmatmul.mubr.bf16.gmra.mxu1 %v5860_v32  ;;  %v17656_v45 = vpop.permute.xlu1 %12881  ;;  %v12867_v46 = vpop.permute.xlu0 %12866 }
 0x6f0   : > { %v12869_v54 = vunpack.i.h.bf16 %v12867_v46  ;;  %v12868_v29 = vunpack.i.l.bf16 %v12867_v46  ;;  %11064 = vmatprep.mubr.msk.bf16.mxu1 %vm20020_vm7, %v5865_v55  ;;  %v12883_v10 = vunpack.i.l.bf16 %v17656_v45 }
 0x6f2   : > { %v5646_v41 = vsel %vm5627_vm14, %v5605_v13, %v12868_v29  ;;  %v5647_v33 = vsel %vm5627_vm14, %v5606_v62, %v12869_v54  ;;  %v5687_v8 = vsel %vm4008_vm12, %v12869_v54, %v12874_v58  ;;  %v5686_v14 = vsel %vm4008_vm12, %v12868_v29, %v12873_v21 }
 0x6f3   : > { %v12892_v3 = vpop.permute.xlu1 %12891  ;;  %v12877_v48 = vpop.permute.xlu0 %12876  ;;  %v5867_v1 = vpack.c.bf16 %v5647_v33, %v5646_v41  ;;  %v11049_v61 = vpack.c.bf16 %v12883_v10, %v12859_v27  ;;  %v12884_v21 = vunpack.i.h.bf16 %v17656_v45 }
 0x6f4   : > { %v12879_v11 = vunpack.i.h.bf16 %v12877_v48  ;;  %v12878_v0 = vunpack.i.l.bf16 %v12877_v48  ;;  %v12894_v36 = vunpack.i.h.bf16 %v12892_v3  ;;  %v12893_v63 = vunpack.i.l.bf16 %v12892_v3 }
 0x6f5   : > { %6245 = vmatprep.mubr.bf16.mxu0 %v5867_v1 }
 0x6f6   : > { %v5768_v23 = vsel %vm2397_vm4, %v12879_v11, %v20331_v53  ;;  %v5767_v17 = vsel %vm2397_vm4, %v12878_v0, %v20331_v53  ;;  %11045 = vmatmul.mubr.msk.bf16.gmra.mxu0 %vm17258_vm1, %v11044_v57  ;;  %v5727_v32 = vsel %vm5708_vm15, %v5686_v14, %v12878_v0  ;;  %v5728_v20 = vsel %vm5708_vm15, %v5687_v8, %v12879_v11 }
 0x6f7   : > { %6431 = vmatmul.mubr.bf16.gmra.mxu1 %v5864_v47  ;;  %v12902_v42 = vpop.permute.xlu1 %12901  ;;  %v12887_v34 = vpop.permute.xlu0 %12886  ;;  %v5869_v5 = vpack.c.bf16 %v5768_v23, %v5767_v17  ;;  %v5868_v25 = vpack.c.bf16 %v5728_v20, %v5727_v32 }
 0x6f8   : > { %v12904_v59 = vunpack.i.h.bf16 %v12902_v42  ;;  %v12903_v6 = vunpack.i.l.bf16 %v12902_v42  ;;  %v12889_v15 = vunpack.i.h.bf16 %v12887_v34  ;;  %v12888_v50 = vunpack.i.l.bf16 %v12887_v34 }
 0x6f9   : > { %11065 = vmatprep.mubr.msk.bf16.mxu1 %vm20020_vm7, %v5869_v5 }
 0x6fa   : > { %v5607_v55 = vsel %vm2554_vm8, %v12859_v27, %v12888_v50  ;;  %v5608_v40 = vsel %vm2554_vm8, %v12883_v10, %v12889_v15  ;;  %v5770_v26 = vsel %vm2397_vm4, %v12904_v59, %v20331_v53  ;;  %v5769_v31 = vsel %vm2397_vm4, %v12903_v6, %v20331_v53 }
 0x6fb   : > { %v12912_v46 = vpop.permute.xlu1 %12911  ;;  %v12897_v30 = vpop.permute.xlu0 %12896  ;;  %v5648_v54 = vsel %vm5627_vm14, %v5607_v55, %v12893_v63  ;;  %v5649_v29 = vsel %vm5627_vm14, %v5608_v40, %v12894_v36  ;;  %v5873_v3 = vpack.c.bf16 %v5770_v26, %v5769_v31 }
 0x6fc   : > { %v12899_v13 = vunpack.i.h.bf16 %v12897_v30  ;;  %v12898_v62 = vunpack.i.l.bf16 %v12897_v30  ;;  %v5871_v41 = vpack.c.bf16 %v5649_v29, %v5648_v54  ;;  %v12913_v1 = vunpack.i.l.bf16 %v12912_v46 }
 0x6fd   : > { %v12914_v27 = vunpack.i.h.bf16 %v12912_v46 }
 0x6fe   : > { %v5689_v48 = vsel %vm4008_vm12, %v12894_v36, %v12899_v13  ;;  %v5688_v33 = vsel %vm4008_vm12, %v12893_v63, %v12898_v62  ;;  %6253 = vmatprep.mubr.bf16.mxu0 %v5871_v41  ;;  %v5609_v5 = vsel %vm2554_vm8, %v12884_v21, %v12913_v1 }
 0x6ff   : > { %6439 = vmatmul.mubr.bf16.gmra.mxu1 %v5868_v25  ;;  %v12922_v11 = vpop.permute.xlu1 %12921  ;;  %v12907_v0 = vpop.permute.xlu0 %12906  ;;  %11050 = vmatmul.mubr.msk.bf16.gmra.mxu0 %vm17258_vm1, %v11049_v61  ;;  %v5729_v58 = vsel %vm5708_vm15, %v5688_v33, %v12903_v6  ;;  %v5730_v57 = vsel %vm5708_vm15, %v5689_v48, %v12904_v59 }
 0x700   : > { %11066 = vmatprep.mubr.msk.bf16.mxu1 %vm20020_vm7, %v5873_v3  ;;  %v12908_v47 = vunpack.i.l.bf16 %v12907_v0  ;;  %v5872_v34 = vpack.c.bf16 %v5730_v57, %v5729_v58  ;;  %v12924_v50 = vunpack.i.h.bf16 %v12922_v11  ;;  %v12923_v8 = vunpack.i.l.bf16 %v12922_v11 }
 0x701   : > { %v12909_v25 = vunpack.i.h.bf16 %v12907_v0 }
 0x702   : > { %v5610_v15 = vsel %vm2554_vm8, %v12908_v47, %v12914_v27  ;;  %v11054_v45 = vpack.c.bf16 %v12908_v47, %v12884_v21 }
 0x703   : > { %v17693_v23 = vpop.permute.xlu1 %12926  ;;  %v12917_v17 = vpop.permute.xlu0 %12916 }
 0x704   : > { %v12919_v10 = vunpack.i.h.bf16 %v12917_v17  ;;  %v12918_v42 = vunpack.i.l.bf16 %v12917_v17  ;;  %v12928_v54 = vunpack.i.l.bf16 %v17693_v23 }
 0x706   : > { %v5650_v59 = vsel %vm5627_vm14, %v5609_v5, %v12918_v42  ;;  %v5651_v36 = vsel %vm5627_vm14, %v5610_v15, %v12919_v10  ;;  %v5691_v20 = vsel %vm4008_vm12, %v12919_v10, %v12924_v50  ;;  %v5690_v55 = vsel %vm4008_vm12, %v12918_v42, %v12923_v8 }
 0x707   : > { %6447 = vmatmul.mubr.bf16.gmra.mxu1 %v5872_v34  ;;  %v12942_v14 = vpop.permute.xlu1 %12941  ;;  %v12932_v6 = vpop.permute.xlu0 %12931  ;;  %v5875_v40 = vpack.c.bf16 %v5651_v36, %v5650_v59  ;;  %v5579_v18 = vsel %vm2431_vm5, %v16799_v4, %v12928_v54  ;;  %v5578_v10 = vsel %vm2431_vm5, %v16789_v56, %v12909_v25 }
 0x708   : > { %v12934_v63 = vunpack.i.h.bf16 %v12932_v6  ;;  %v12933_v32 = vunpack.i.l.bf16 %v12932_v6  ;;  %v12944_v33 = vunpack.i.h.bf16 %v12942_v14  ;;  %v12943_v11 = vunpack.i.l.bf16 %v12942_v14 }
 0x709   : > { %6261 = vmatprep.mubr.bf16.mxu0 %v5875_v40  ;;  %v5878_v5 = vpack.c.bf16 %v5579_v18, %v5578_v10 }
 0x70a   : > { %v5772_v26 = vsel %vm2397_vm4, %v12934_v63, %v20331_v53  ;;  %v5731_v31 = vsel %vm5708_vm15, %v5690_v55, %v12933_v32  ;;  %v5732_v46 = vsel %vm5708_vm15, %v5691_v20, %v12934_v63  ;;  %v5771_v30 = vsel %vm2397_vm4, %v12933_v32, %v20331_v53  ;;  %11055 = vmatmul.mubr.msk.bf16.gmra.mxu0 %vm17258_vm1, %v11054_v45 }
 0x70b   : > { %v17709_v29 = vpop.permute.xlu1 %5494  ;;  %v12937_v13 = vpop.permute.xlu0 %12936  ;;  %v5877_v62 = vpack.c.bf16 %v5772_v26, %v5771_v30  ;;  %v5876_v41 = vpack.c.bf16 %v5732_v46, %v5731_v31  ;;  %v12929_v32 = vunpack.i.h.bf16 %v17693_v23  ;;  %vm20021_vm1 = vmmov 0  }
 0x70c   : > { %v12939_v61 = vunpack.i.h.bf16 %v12937_v13  ;;  %v12938_v3 = vunpack.i.l.bf16 %v12937_v13  ;;  %v5773_v48 = vsel %vm2397_vm4, %v17709_v29, %v20331_v53 }
 0x70d   : > { %11067 = vmatprep.mubr.msk.bf16.mxu1 %vm20020_vm7, %v5877_v62  ;;  %v17717_v1 = vpack.c.bf16 %v5773_v48, %v5773_v48  ;;  %v5580_v48 = vsel %vm2431_vm5, %v16794_v7, %v12929_v32 }
 0x70e   : > { %v5611_v47 = vsel %vm2554_vm8, %v12909_v25, %v12938_v3  ;;  %v5612_v58 = vsel %vm2554_vm8, %v12928_v54, %v12939_v61 }
 0x70f   : > { %6455 = vmatmul.mubr.bf16.gmra.mxu1 %v5876_v41  ;;  %v12957_v0 = vpop.permute.xlu1 %12956  ;;  %v12947_v57 = vpop.permute.xlu0 %12946  ;;  %v5652_v17 = vsel %vm5627_vm14, %v5611_v47, %v12943_v11  ;;  %v5653_v53 = vsel %vm5627_vm14, %v5612_v58, %v12944_v33 }
 0x710   : > { %v12949_v21 = vunpack.i.h.bf16 %v12947_v57  ;;  %v12948_v27 = vunpack.i.l.bf16 %v12947_v57  ;;  %11068 = vmatprep.mubr.msk.bf16.mxu1 %vm20020_vm7, %v17717_v1  ;;  %v5879_v42 = vpack.c.bf16 %v5653_v53, %v5652_v17  ;;  %v12958_v59 = vunpack.i.l.bf16 %v12957_v0 }
 0x711   : > { %v12959_v45 = vunpack.i.h.bf16 %v12957_v0 }
 0x712   : > { %v5693_v34 = vsel %vm4008_vm12, %v12944_v33, %v12949_v21  ;;  %v5692_v4 = vsel %vm4008_vm12, %v12943_v11, %v12948_v27  ;;  %6269 = vmatprep.mubr.bf16.mxu0 %v5879_v42  ;;  %v5613_v54 = vsel %vm2554_vm8, %v12929_v32, %v12958_v59 }
 0x713   : > { %v12967_v15 = vpop.permute.xlu1 %12966  ;;  %v17731_v50 = vpop.permute.xlu0 %12951  ;;  %v5733_v8 = vsel %vm5708_vm15, %v5692_v4, %v17709_v29  ;;  %v5734_v14 = vsel %vm5708_vm15, %v5693_v34, %v17709_v29  ;;  %6270 = vmatmul.mubr.bf16.gmra.mxu0 %v5878_v5 }
 0x714   : > { %v5880_v6 = vpack.c.bf16 %v5734_v14, %v5733_v8  ;;  %v12953_v56 = vunpack.i.l.bf16 %v17731_v50  ;;  %v12969_v55 = vunpack.i.h.bf16 %v12967_v15  ;;  %v12968_v40 = vunpack.i.l.bf16 %v12967_v15 }
 0x715   : > { %v12954_v21 = vunpack.i.h.bf16 %v17731_v50 }
 0x716   : > { %v5581_v30 = vsel %vm2431_vm5, %v16787_v19, %v12953_v56  ;;  %v5614_v13 = vsel %vm2554_vm8, %v12953_v56, %v12959_v45 }
 0x717   : > { %v17738_v36 = vpop.f32.mrf.mxu0  ;;  %6463 = vmatmul.mubr.bf16.gmra.mxu1 %v5880_v6  ;;  %v12977_v63 = vpop.permute.xlu1 %12976  ;;  %v5882_v47 = vpack.c.bf16 %v5581_v30, %v5580_v48 }
 0x718   : > { %v12962_v20 = vpop.permute.xlu0 %12961  ;;  %11069 = vmatprep.mubr.msk.bf16.mxu1 %vm20020_vm7, %v17717_v1  ;;  %v12978_v0 = vunpack.i.l.bf16 %v12977_v63  ;;  %v12979_v27 = vunpack.i.h.bf16 %v12977_v63 }
 0x719   : > { %v12964_v26 = vunpack.i.h.bf16 %v12962_v20  ;;  %v12963_v31 = vunpack.i.l.bf16 %v12962_v20  ;;  %v6177_v46 = vpop.f32.mrf.mxu0  ;;  %v5582_v20 = vsel %vm2431_vm5, %v17055_v49, %v12954_v21 }
 0x71a   : > { %v5615_v14 = vsel %vm2554_vm8, %v12954_v21, %v12978_v0 }
 0x71b   : > { %v5695_v62 = vsel %vm4008_vm12, %v12964_v26, %v12969_v55  ;;  %v5694_v23 = vsel %vm4008_vm12, %v12963_v31, %v12968_v40  ;;  %v17749_v41 = vpop.f32.mrf.mxu0  ;;  %v12987_v25 = vpop.permute.xlu1 %12986  ;;  %v5654_v61 = vsel %vm5627_vm14, %v5613_v54, %v12963_v31  ;;  %v5655_v3 = vsel %vm5627_vm14, %v5614_v13, %v12964_v26 }
 0x71c   : > { %v17755_v33 = vpop.permute.xlu0 %12971  ;;  %v5883_v19 = vpack.c.bf16 %v5655_v3, %v5654_v61  ;;  %v5735_v58 = vsel %vm5708_vm15, %v5694_v23, %v17709_v29  ;;  %v5736_v18 = vsel %vm5708_vm15, %v5695_v62, %v17709_v29  ;;  %v12989_v42 = vunpack.i.h.bf16 %v12987_v25 }
 0x71d   : > { %v6180_v11 = vpop.f32.mrf.mxu0  ;;  %v12973_v57 = vunpack.i.l.bf16 %v17755_v33  ;;  %v5884_v17 = vpack.c.bf16 %v5736_v18, %v5735_v58  ;;  %v12988_v34 = vunpack.i.l.bf16 %v12987_v25  ;;  %v12974_v62 = vunpack.i.h.bf16 %v17755_v33 }
 0x71e   : > { %6277 = vmatprep.mubr.bf16.mxu0 %v5883_v19 }
 0x71f   : > { %v17762_v53 = vpop.f32.mrf.mxu0  ;;  %6278 = vmatmul.mubr.bf16.gmra.mxu0 %v5882_v47  ;;  %v12992_v7 = vpop.permute.xlu1 %12991  ;;  %6471 = vmatmul.mubr.bf16.gmra.mxu1 %v5884_v17  ;;  %v5583_v8 = vsel %vm2431_vm5, %v17040_v37, %v12973_v57  ;;  %v5616_v6 = vsel %vm2554_vm8, %v12973_v57, %v12979_v27  ;;  %v5584_v17 = vsel %vm2431_vm5, %v17032_v35, %v12974_v62 }
 0x720   : > { %v12982_v10 = vpop.permute.xlu0 %12981  ;;  %11070 = vmatprep.mubr.msk.bf16.mxu1 %vm20020_vm7, %v17717_v1  ;;  %v5885_v26 = vpack.c.bf16 %v5583_v8, %v5582_v20  ;;  %v12993_v30 = vunpack.i.l.bf16 %v12992_v7  ;;  %v12994_v23 = vunpack.i.h.bf16 %v12992_v7 }
 0x721   : > { %v12984_v4 = vunpack.i.h.bf16 %v12982_v10  ;;  %v12983_v5 = vunpack.i.l.bf16 %v12982_v10  ;;  %v6185_v15 = vpop.f32.mrf.mxu0 }
 0x722   : > { %v5617_v47 = vsel %vm2554_vm8, %v12974_v62, %v12993_v30 }
 0x723   : > { %v5697_v50 = vsel %vm4008_vm12, %v12984_v4, %v12989_v42  ;;  %v5696_v59 = vsel %vm4008_vm12, %v12983_v5, %v12988_v34  ;;  %v17773_v56 = vpop.f32.mrf.mxu0  ;;  %v13002_v63 = vpop.permute.xlu1 %13001  ;;  %v5656_v32 = vsel %vm5627_vm14, %v5615_v14, %v12983_v5  ;;  %v5657_v45 = vsel %vm5627_vm14, %v5616_v6, %v12984_v4 }
 0x724   : > { %v5076_v55 = vpop.permute.xlu0 %5075  ;;  %v5886_v37 = vpack.c.bf16 %v5657_v45, %v5656_v32  ;;  %v5737_v31 = vsel %vm5708_vm15, %v5696_v59, %v17709_v29  ;;  %v5738_v46 = vsel %vm5708_vm15, %v5697_v50, %v17709_v29  ;;  %v13004_v25 = vunpack.i.h.bf16 %v13002_v63 }
 0x725   : > { %v6188_v40 = vpop.f32.mrf.mxu0  ;;  %v5887_v54 = vpack.c.bf16 %v5738_v46, %v5737_v31  ;;  %v13003_v61 = vunpack.i.l.bf16 %v13002_v63  ;;  %v5585_v19 = vsel %vm2431_vm5, %v17035_v22, %v5076_v55  ;;  %v5618_v11 = vsel %vm2554_vm8, %v5076_v55, %v12994_v23 }
 0x726   : > { %6285 = vmatprep.mubr.bf16.mxu0 %v5886_v37  ;;  %v5888_v27 = vpack.c.bf16 %v5585_v19, %v5584_v17 }
 0x727   : > { %6286 = vmatmul.mubr.bf16.gmra.mxu0 %v5885_v26  ;;  %v13012_v13 = vpop.permute.xlu1 %13011  ;;  %6479 = vmatmul.mubr.bf16.gmra.mxu1 %v5887_v54 }
 0x728   : > { %v12997_v49 = vpop.permute.xlu0 %12996  ;;  %11071 = vmatprep.mubr.msk.bf16.mxu1 %vm20020_vm7, %v17717_v1  ;;  %v13014_v15 = vunpack.i.h.bf16 %v13012_v13  ;;  %v13013_v8 = vunpack.i.l.bf16 %v13012_v13 }
 0x729   : > { %v12999_v3 = vunpack.i.h.bf16 %v12997_v49  ;;  %v12998_v48 = vunpack.i.l.bf16 %v12997_v49 }
 0x72b   : > { %v5699_v58 = vsel %vm4008_vm12, %v12999_v3, %v13004_v25  ;;  %v5698_v33 = vsel %vm4008_vm12, %v12998_v48, %v13003_v61  ;;  %v13022_v18 = vpop.permute.xlu1 %13021  ;;  %v5658_v0 = vsel %vm5627_vm14, %v5617_v47, %v12998_v48  ;;  %v5659_v57 = vsel %vm5627_vm14, %v5618_v11, %v12999_v3 }
 0x72c   : > { %v13007_v7 = vpop.permute.xlu0 %13006  ;;  %v5889_v21 = vpack.c.bf16 %v5659_v57, %v5658_v0  ;;  %v5739_v22 = vsel %vm5708_vm15, %v5698_v33, %v17709_v29  ;;  %v5740_v10 = vsel %vm5708_vm15, %v5699_v58, %v17709_v29  ;;  %v13024_v35 = vunpack.i.h.bf16 %v13022_v18 }
 0x72d   : > { %v13009_v42 = vunpack.i.h.bf16 %v13007_v7  ;;  %v13008_v34 = vunpack.i.l.bf16 %v13007_v7  ;;  %v5890_v4 = vpack.c.bf16 %v5740_v10, %v5739_v22  ;;  %v13023_v6 = vunpack.i.l.bf16 %v13022_v18 }
 0x72e   : > { %6293 = vmatprep.mubr.bf16.mxu0 %v5889_v21  ;;  %v5589_v0 = vsel %vm2431_vm5, %v16844_v39, %v13024_v35 }
 0x72f   : > { %6294 = vmatmul.mubr.bf16.gmra.mxu0 %v5888_v27  ;;  %v13032_v5 = vpop.permute.xlu1 %13031  ;;  %6487 = vmatmul.mubr.bf16.gmra.mxu1 %v5890_v4  ;;  %v5587_v63 = vsel %vm2431_vm5, %v16857_v9, %v13009_v42  ;;  %v5586_v32 = vsel %vm2431_vm5, %v16855_v51, %v13008_v34  ;;  %v5619_v45 = vsel %vm2554_vm8, %v13008_v34, %v13013_v8 }
 0x730   : > { %v13017_v14 = vpop.permute.xlu0 %13016  ;;  %11072 = vmatprep.mubr.msk.bf16.mxu1 %vm20020_vm7, %v17717_v1  ;;  %v5620_v20 = vsel %vm2554_vm8, %v13009_v42, %v13014_v15  ;;  %v13034_v46 = vunpack.i.h.bf16 %v13032_v5  ;;  %v13033_v9 = vunpack.i.l.bf16 %v13032_v5  ;;  %v5891_v23 = vpack.c.bf16 %v5587_v63, %v5586_v32 }
 0x731   : > { %v13019_v50 = vunpack.i.h.bf16 %v13017_v14  ;;  %v13018_v59 = vunpack.i.l.bf16 %v13017_v14  ;;  %v5588_v57 = vsel %vm2431_vm5, %v16842_v38, %v13023_v6 }
 0x732   : > { %v5703_v48 = vsel %vm4008_vm12, %v13034_v46, %v16399_v28  ;;  %v5702_v19 = vsel %vm4008_vm12, %v13033_v9, %v16399_v28  ;;  %v5894_v5 = vpack.c.bf16 %v5589_v0, %v5588_v57 }
 0x733   : > { %v5701_v55 = vsel %vm4008_vm12, %v13019_v50, %v16399_v28  ;;  %v5700_v37 = vsel %vm4008_vm12, %v13018_v59, %v16399_v28  ;;  %v13042_v40 = vpop.permute.xlu1 %13041  ;;  %v5660_v26 = vsel %vm5627_vm14, %v5619_v45, %v13018_v59  ;;  %v5661_v31 = vsel %vm5627_vm14, %v5620_v20, %v13019_v50 }
 0x734   : > { %v13027_v30 = vpop.permute.xlu0 %13026  ;;  %v5892_v54 = vpack.c.bf16 %v5661_v31, %v5660_v26  ;;  %v5741_v51 = vsel %vm5708_vm15, %v5700_v37, %v17709_v29  ;;  %v5742_v49 = vsel %vm5708_vm15, %v5701_v55, %v17709_v29  ;;  %v5743_v21 = vsel %vm5708_vm15, %v5702_v19, %v17709_v29 }
 0x735   : > { %v13029_v13 = vunpack.i.h.bf16 %v13027_v30  ;;  %v13028_v62 = vunpack.i.l.bf16 %v13027_v30  ;;  %v5893_v25 = vpack.c.bf16 %v5742_v49, %v5741_v51  ;;  %v5744_v22 = vsel %vm5708_vm15, %v5703_v48, %v17709_v29 }
 0x736   : > { %6301 = vmatprep.mubr.bf16.mxu0 %v5892_v54  ;;  %v13044_v27 = vunpack.i.h.bf16 %v13042_v40  ;;  %v13043_v10 = vunpack.i.l.bf16 %v13042_v40  ;;  %v5896_v15 = vpack.c.bf16 %v5744_v22, %v5743_v21 }
 0x737   : > { %6302 = vmatmul.mubr.bf16.gmra.mxu0 %v5891_v23  ;;  %v5621_v61 = vsel %vm2554_vm8, %v13023_v6, %v13028_v62  ;;  %v5622_v3 = vsel %vm2554_vm8, %v13024_v35, %v13029_v13  ;;  %6495 = vmatmul.mubr.bf16.gmra.mxu1 %v5893_v25  ;;  %v13052_v33 = vpop.permute.xlu1 %13051 }
 0x738   : > { %v13037_v11 = vpop.permute.xlu0 %13036  ;;  %v5662_v47 = vsel %vm5627_vm14, %v5621_v61, %v13033_v9  ;;  %v5663_v58 = vsel %vm5627_vm14, %v5622_v3, %v13034_v46  ;;  %11073 = vmatprep.mubr.msk.bf16.mxu1 %vm20020_vm7, %v17717_v1  ;;  %v13054_v32 = vunpack.i.h.bf16 %v13052_v33  ;;  %v13053_v45 = vunpack.i.l.bf16 %v13052_v33  ;;  %v17873_v33 = vld [vmem:[%s20332_s17] ss:$0 sm:$0xff]  ;;  %s20333_s17 = sld [smem:[#allocation19_spill]] }
 0x739   : > { %v5895_v18 = vpack.c.bf16 %v5663_v58, %v5662_v47  ;;  %v13039_v17 = vunpack.i.h.bf16 %v13037_v11  ;;  %v13038_v7 = vunpack.i.l.bf16 %v13037_v11  ;;  %v6179_v21 = vadd.f32 %v17873_v33, %v17749_v41 }
 0x73a   : > { %v5593_v25 = vsel %vm2431_vm5, %v17064_v24, %v13054_v32  ;;  %v5592_v61 = vsel %vm2431_vm5, %v17062_v16, %v13053_v45  ;;  %v6176_v16 = vadd.f32 %v17873_v33, %v17738_v36 }
 0x73b   : > { %6309 = vmatprep.mubr.bf16.mxu0 %v5895_v18  ;;  %v5623_v39 = vsel %vm2554_vm8, %v13038_v7, %v13043_v10  ;;  %v5624_v38 = vsel %vm2554_vm8, %v13039_v17, %v13044_v27  ;;  %v13062_v8 = vpop.permute.xlu1 %13061  ;;  %v5591_v37 = vsel %vm2431_vm5, %v17078_v12, %v13039_v17  ;;  %v5590_v40 = vsel %vm2431_vm5, %v17094_v60, %v13038_v7 }
 0x73c   : > { %v13047_v42 = vpop.permute.xlu0 %13046  ;;  %v13064_v26 = vunpack.i.h.bf16 %v13062_v8  ;;  %v13063_v31 = vunpack.i.l.bf16 %v13062_v8  ;;  %v5897_v13 = vpack.c.bf16 %v5591_v37, %v5590_v40  ;;  %v5900_v19 = vpack.c.bf16 %v5593_v25, %v5592_v61 }
 0x73d   : > { %v13049_v34 = vunpack.i.h.bf16 %v13047_v42  ;;  %v13048_v4 = vunpack.i.l.bf16 %v13047_v42  ;;  %v6187_v8 = vadd.f32 %v17873_v33, %v17773_v56 }
 0x73e   : > { %v5707_v23 = vsel %vm4008_vm12, %v13064_v26, %v16399_v28  ;;  %v5706_v49 = vsel %vm4008_vm12, %v13063_v31, %v16399_v28 }
 0x73f   : > { %6310 = vmatmul.mubr.bf16.gmra.mxu0 %v5894_v5  ;;  %v5664_v14 = vsel %vm5627_vm14, %v5623_v39, %v13048_v4  ;;  %v5665_v35 = vsel %vm5627_vm14, %v5624_v38, %v13049_v34  ;;  %v5705_v6 = vsel %vm4008_vm12, %v13049_v34, %v16399_v28  ;;  %v5704_v50 = vsel %vm4008_vm12, %v13048_v4, %v16399_v28 }
 0x740   : > { %6503 = vmatmul.mubr.bf16.gmra.mxu1 %v5896_v15  ;;  %v13057_v59 = vpop.permute.xlu0 %13056  ;;  %v5898_v63 = vpack.c.bf16 %v5665_v35, %v5664_v14  ;;  %v5745_v46 = vsel %vm5708_vm15, %v5704_v50, %v17709_v29  ;;  %v5746_v9 = vsel %vm5708_vm15, %v5705_v6, %v17709_v29  ;;  %v5747_v3 = vsel %vm5708_vm15, %v5706_v49, %v17709_v29 }
 0x741   : > { %v13059_v20 = vunpack.i.h.bf16 %v13057_v59  ;;  %v13058_v55 = vunpack.i.l.bf16 %v13057_v59  ;;  %11074 = vmatprep.mubr.msk.bf16.mxu1 %vm20020_vm7, %v17717_v1  ;;  %v5899_v60 = vpack.c.bf16 %v5746_v9, %v5745_v46  ;;  %v5748_v48 = vsel %vm5708_vm15, %v5707_v23, %v17709_v29 }
 0x742   : > { %6317 = vmatprep.mubr.bf16.mxu0 %v5898_v63  ;;  %v5902_v28 = vpack.c.bf16 %v5748_v48, %v5747_v3  ;;  %v6184_v4 = vadd.f32 %v17873_v33, %v17762_v53  ;;  %vm20019_vm15 = vcmask 490496  }
 0x743   : > { %v5625_v30 = vsel %vm2554_vm8, %v13053_v45, %v13058_v55  ;;  %v5626_v54 = vsel %vm2554_vm8, %v13054_v32, %v13059_v20 }
 0x744   : > { %v5666_v51 = vsel %vm5627_vm14, %v5625_v30, %v13063_v31  ;;  %v5667_v12 = vsel %vm5627_vm14, %v5626_v54, %v13064_v26 }
 0x745   : > { %v5901_v62 = vpack.c.bf16 %v5667_v12, %v5666_v51 }
 0x747   : > { %6318 = vmatmul.mubr.bf16.gmra.mxu0 %v5897_v13 }
 0x748   : > { %6511 = vmatmul.mubr.bf16.gmra.mxu1 %v5899_v60  ;;  %6325 = vmatprep.mubr.bf16.mxu0 %v5901_v62 }
 0x749   : > { %11075 = vmatprep.mubr.msk.bf16.mxu1 %vm20020_vm7, %v17717_v1 }
 0x74f   : > { %6326 = vmatmul.mubr.bf16.gmra.mxu0 %v5900_v19 }
 0x750   : > { %6519 = vmatmul.mubr.bf16.gmra.mxu1 %v5902_v28 }
 0x76b   : > { %v6191_v11 = vpop.f32.mrf.mxu0 }
 0x76c   : > { %v6192_v59 = vadd.f32 %v17873_v33, %v6191_v11 }
 0x76d   : > { %v6193_v47 = vpop.f32.mrf.mxu0 }
 0x76f   : > { %v6194_v58 = vpop.f32.mrf.mxu0 }
 0x770   : > { %v6195_v55 = vadd.f32 %v17873_v33, %v6194_v58 }
 0x771   : > { %v6196_v1 = vpop.f32.mrf.mxu0 }
 0x773   : > { %v6199_v24 = vpop.f32.mrf.mxu0 }
 0x774   : > { %v6200_v26 = vadd.f32 %v17873_v33, %v6199_v24 }
 0x775   : > { %v6201_v18 = vpop.f32.mrf.mxu0 }
 0x777   : > { %v6202_v0 = vpop.f32.mrf.mxu0  ;;  %v6368_v57 = vpop.f32.mrf.mxu1 }
 0x778   : > { %v17877_v17 = vadd.f32 %v6368_v57, %v6176_v16  ;;  %v6203_v30 = vadd.f32 %v17873_v33, %v6202_v0 }
 0x779   : > { %v6204_v29 = vpop.f32.mrf.mxu0  ;;  %v6370_v7 = vpop.f32.mrf.mxu1 }
 0x77b   : > { %v6207_v22 = vpop.f32.mrf.mxu0  ;;  %v6371_v27 = vpop.f32.mrf.mxu1 }
 0x77c   : > { %v17881_v10 = vadd.f32 %v6371_v27, %v6179_v21  ;;  %v6208_v62 = vadd.f32 %v17873_v33, %v6207_v22 }
 0x77d   : > { %v6209_v42 = vpop.f32.mrf.mxu0  ;;  %v6373_v34 = vpop.f32.mrf.mxu1 }
 0x77f   : > { %v6210_v5 = vpop.f32.mrf.mxu0  ;;  %v6376_v36 = vpop.f32.mrf.mxu1 }
 0x780   : > { %v17885_v15 = vadd.f32 %v6376_v36, %v6184_v4  ;;  %v6211_v3 = vadd.f32 %v17873_v33, %v6210_v5 }
 0x781   : > { %v6212_v39 = vpop.f32.mrf.mxu0  ;;  %v6378_v38 = vpop.f32.mrf.mxu1 }
 0x783   : > { %v6215_v14 = vpop.f32.mrf.mxu0  ;;  %v6379_v41 = vpop.f32.mrf.mxu1 }
 0x784   : > { %v17889_v35 = vadd.f32 %v6379_v41, %v6187_v8  ;;  %v6216_v58 = vadd.f32 %v17873_v33, %v6215_v14 }
 0x785   : > { %v6217_v6 = vpop.f32.mrf.mxu0  ;;  %v6381_v50 = vpop.f32.mrf.mxu1 }
 0x787   : > { %v6218_v63 = vpop.f32.mrf.mxu0  ;;  %v6384_v32 = vpop.f32.mrf.mxu1 }
 0x788   : > { %v17892_v53 = vadd.f32 %v6384_v32, %v6192_v59  ;;  %v6219_v57 = vadd.f32 %v17873_v33, %v6218_v63  ;;  %v13651_v63 = vld [vmem:[%s20333_s17 + $0x78] sm:$0xff]  }
 0x789   : > { %v6220_v45 = vpop.f32.mrf.mxu0  ;;  %v6386_v20 = vpop.f32.mrf.mxu1  ;;  %11296 = vmatprep.subr.bf16.mxu0 %v13651_v63 }
 0x78b   : > { %v6387_v37 = vpop.f32.mrf.mxu1 }
 0x78c   : > { %v17895_v40 = vadd.f32 %v6387_v37, %v6195_v55 }
 0x78d   : > { %v6389_v56 = vpop.f32.mrf.mxu1 }
 0x78f   : > { %v6392_v31 = vpop.f32.mrf.mxu1 }
 0x790   : > { %v17898_v46 = vadd.f32 %v6392_v31, %v6200_v26  ;;  %v13652_v26 = vld [vmem:[%s20333_s17 + $0x38] sm:$0xff]  }
 0x791   : > { %v6394_v9 = vpop.f32.mrf.mxu1  ;;  %11297 = vmatpush3.bf16.msra.mxu0 %v13652_v26 }
 0x792   : > { %v6223_v51 = vpop.f32.mrf.mxu0 }
 0x793   : > { %v6395_v54 = vpop.f32.mrf.mxu1  ;;  %v6224_v27 = vadd.f32 %v17873_v33, %v6223_v51 }
 0x794   : > { %v17901_v12 = vadd.f32 %v6395_v54, %v6203_v30  ;;  %v6225_v60 = vpop.f32.mrf.mxu0  ;;  %v13653_v54 = vld [vmem:[%s20333_s17 + $0xb8] sm:$0xff]  }
 0x795   : > { %v6397_v13 = vpop.f32.mrf.mxu1  ;;  %7322 = vmatpush1.bf16.msra.mxu1 %v13653_v54  ;;  %v13658_v54 = vld [vmem:[%s20333_s17 + $0x68] sm:$0xff]  }
 0x796   : > { %v6226_v49 = vpop.f32.mrf.mxu0  ;;  %7323 = vmatprep.subr.bf16.mxu1 %v20133_v2 }
 0x797   : > { %v6400_v23 = vpop.f32.mrf.mxu1  ;;  %v6227_v36 = vadd.f32 %v17873_v33, %v6226_v49 }
 0x798   : > { %v6401_v25 = vadd.f32 %v6400_v23, %v6208_v62  ;;  %v6228_v48 = vpop.f32.mrf.mxu0 }
 0x799   : > { %v6402_v61 = vpop.f32.mrf.mxu1 }
 0x79a   : > { %6583 = vrot.lane.b32.xlu0 %v6401_v25, %s20118_s2 }
 0x79b   : > { %v6403_v19 = vpop.f32.mrf.mxu1  ;;  %v17906_v11 = vpop.f32.mrf.mxu0 }
 0x79c   : > { %v6404_v28 = vadd.f32 %v6403_v19, %v6211_v3 }
 0x79d   : > { %v6405_v47 = vpop.f32.mrf.mxu1  ;;  %v6233_v1 = vpop.f32.mrf.mxu0 }
 0x79e   : > { %6585 = vrot.lane.b32.xlu1 %v6404_v28, %s20118_s2  ;;  %v13654_v47 = vld [vmem:[%s20333_s17 + $0xb0] sm:$0xff]  }
 0x79f   : > { %v6408_v24 = vpop.f32.mrf.mxu1  ;;  %v17910_v16 = vpop.f32.mrf.mxu0  ;;  %v13656_v1 = vld [vmem:[%s20333_s17 + $0x30] sm:$0xff]   ;;  %7324 = vmatpush1.bf16.msra.mxu1 %v13654_v47  ;;  %v6232_v47 = vadd.f32 %v17873_v33, %v17906_v11 }
 0x7a0   : > { %v6409_v18 = vadd.f32 %v6408_v24, %v6216_v58  ;;  %v13655_v58 = vld [vmem:[%s20333_s17 + $0x70] sm:$0xff]   ;;  %7325 = vmatprep.subr.bf16.mxu1 %v20133_v2 }
 0x7a1   : > { %v6410_v0 = vpop.f32.mrf.mxu1  ;;  %v6236_v29 = vpop.f32.mrf.mxu0  ;;  %11298 = vmatprep.subr.bf16.mxu0 %v13655_v58 }
 0x7a2   : > { %6587 = vrot.lane.b32.xlu0 %v6409_v18, %s20118_s2  ;;  %11299 = vmatpush3.bf16.msra.mxu0 %v13656_v1 }
 0x7a3   : > { %v6411_v7 = vpop.f32.mrf.mxu1  ;;  %11300 = vmatprep.subr.bf16.mxu0 %v13658_v54 }
 0x7a4   : > { %v6412_v21 = vadd.f32 %v6411_v7, %v6219_v57 }
 0x7a5   : > { %v6413_v22 = vpop.f32.mrf.mxu1 }
 0x7a6   : > { %6589 = vrot.lane.b32.xlu1 %v6412_v21, %s20118_s2 }
 0x7a7   : > { %v6416_v42 = vpop.f32.mrf.mxu1  ;;  %v6239_v4 = vpop.f32.mrf.mxu0 }
 0x7a8   : > { %v6417_v34 = vadd.f32 %v6416_v42, %v6224_v27  ;;  %v6240_v20 = vadd.f32 %v17873_v33, %v6239_v4 }
 0x7a9   : > { %v6418_v5 = vpop.f32.mrf.mxu1  ;;  %v6241_v39 = vpop.f32.mrf.mxu0 }
 0x7aa   : > { %6591 = vrot.lane.b32.xlu0 %v6417_v34, %s20118_s2 }
 0x7ab   : > { %v6419_v38 = vpop.f32.mrf.mxu1  ;;  %v6242_v14 = vpop.f32.mrf.mxu0 }
 0x7ac   : > { %v6420_v8 = vadd.f32 %v6419_v38, %v6227_v36  ;;  %v6243_v9 = vadd.f32 %v17873_v33, %v6242_v14  ;;  %v13657_v38 = vld [vmem:[%s20333_s17 + $0xa8] sm:$0xff]  }
 0x7ad   : > { %v6421_v41 = vpop.f32.mrf.mxu1  ;;  %v6244_v6 = vpop.f32.mrf.mxu0  ;;  %7326 = vmatpush1.bf16.msra.mxu1 %v13657_v38 }
 0x7ae   : > { %6593 = vrot.lane.b32.xlu1 %v6420_v8, %s20118_s2  ;;  %7327 = vmatprep.subr.bf16.mxu1 %v20133_v2 }
 0x7af   : > { %v17919_v50 = vpop.f32.mrf.mxu1 }
 0x7b1   : > { %v6426_v59 = vpop.f32.mrf.mxu1 }
 0x7b3   : > { %v17922_v32 = vpop.f32.mrf.mxu1 }
 0x7b5   : > { %v6429_v45 = vpop.f32.mrf.mxu1 }
 0x7b6   : > { %v6247_v37 = vpop.f32.mrf.mxu0 }
 0x7b7   : > { %v6432_v55 = vpop.f32.mrf.mxu1  ;;  %v6248_v23 = vadd.f32 %v17873_v33, %v6247_v37 }
 0x7b8   : > { %v6433_v56 = vadd.f32 %v6432_v55, %v6240_v20  ;;  %v6249_v30 = vpop.f32.mrf.mxu0 }
 0x7b9   : > { %v6434_v31 = vpop.f32.mrf.mxu1 }
 0x7ba   : > { %6599 = vrot.lane.b32.xlu0 %v6433_v56, %s20118_s2  ;;  %v6250_v13 = vpop.f32.mrf.mxu0 }
 0x7bb   : > { %v6435_v51 = vpop.f32.mrf.mxu1  ;;  %v6251_v19 = vadd.f32 %v17873_v33, %v6250_v13  ;;  %v13660_v13 = vld [vmem:[%s20333_s17 + $0xa0] sm:$0xff]  }
 0x7bc   : > { %v6436_v62 = vadd.f32 %v6435_v51, %v6243_v9  ;;  %v6252_v49 = vpop.f32.mrf.mxu0  ;;  %v13659_v51 = vld [vmem:[%s20333_s17 + $0x28] sm:$0xff]   ;;  %7328 = vmatpush1.bf16.msra.mxu1 %v13660_v13 }
 0x7bd   : > { %v6437_v60 = vpop.f32.mrf.mxu1  ;;  %11301 = vmatpush3.bf16.msra.mxu0 %v13659_v51  ;;  %7329 = vmatprep.subr.bf16.mxu1 %v20133_v2 }
 0x7be   : > { %6601 = vrot.lane.b32.xlu1 %v6436_v62, %s20118_s2 }
 0x7bf   : > { %v6440_v25 = vpop.f32.mrf.mxu1  ;;  %v6255_v3 = vpop.f32.mrf.mxu0 }
 0x7c0   : > { %v6441_v61 = vadd.f32 %v6440_v25, %v6248_v23  ;;  %v6256_v56 = vadd.f32 %v17873_v33, %v6255_v3 }
 0x7c1   : > { %v6442_v48 = vpop.f32.mrf.mxu1  ;;  %v6257_v28 = vpop.f32.mrf.mxu0 }
 0x7c2   : > { %6603 = vrot.lane.b32.xlu0 %v6441_v61, %s20118_s2 }
 0x7c3   : > { %v6443_v24 = vpop.f32.mrf.mxu1  ;;  %v6258_v0 = vpop.f32.mrf.mxu0 }
 0x7c4   : > { %v6444_v18 = vadd.f32 %v6443_v24, %v6251_v19  ;;  %v6259_v60 = vadd.f32 %v17873_v33, %v6258_v0 }
 0x7c5   : > { %v6445_v57 = vpop.f32.mrf.mxu1  ;;  %v6260_v29 = vpop.f32.mrf.mxu0 }
 0x7c6   : > { %6605 = vrot.lane.b32.xlu1 %v6444_v18, %s20118_s2  ;;  %v6425_v18 = vadd.f32 %v17919_v50, %v6232_v47 }
 0x7c7   : > { %v6448_v7 = vpop.f32.mrf.mxu1 }
 0x7c8   : > { %v6449_v9 = vadd.f32 %v6448_v7, %v6256_v56  ;;  %v6235_v7 = vadd.f32 %v17873_v33, %v17910_v16 }
 0x7c9   : > { %v6450_v21 = vpop.f32.mrf.mxu1 }
 0x7ca   : > { %v17939_v27 = vpop.f32.mrf.mxu0 }
 0x7cb   : > { %v6451_v22 = vpop.f32.mrf.mxu1  ;;  %v6264_v38 = vadd.f32 %v17873_v33, %v17939_v27 }
 0x7cc   : > { %v6265_v34 = vpop.f32.mrf.mxu0  ;;  %v6452_v49 = vadd.f32 %v6451_v22, %v6259_v60 }
 0x7cd   : > { %v6453_v42 = vpop.f32.mrf.mxu1 }
 0x7ce   : > { %v17943_v5 = vpop.f32.mrf.mxu0  ;;  %v6428_v42 = vadd.f32 %v17922_v32, %v6235_v7 }
 0x7cf   : > { %v17941_v4 = vpop.f32.mrf.mxu1  ;;  %v6267_v27 = vadd.f32 %v17873_v33, %v17943_v5  ;;  %v13664_v5 = vld [vmem:[%s20333_s17 + $0x90] sm:$0xff]  }
 0x7d0   : > { %v6268_v39 = vpop.f32.mrf.mxu0  ;;  %v6457_v32 = vadd.f32 %v17941_v4, %v6264_v38 }
 0x7d1   : > { %v6458_v36 = vpop.f32.mrf.mxu1  ;;  %v13661_v39 = vld [vmem:[%s20333_s17 + $0x98] sm:$0xff]  }
 0x7d2   : > { %7330 = vmatpush1.bf16.msra.mxu1 %v13661_v39 }
 0x7d3   : > { %v17946_v8 = vpop.f32.mrf.mxu1  ;;  %v6271_v14 = vpop.f32.mrf.mxu0  ;;  %7331 = vmatprep.subr.bf16.mxu1 %v20133_v2 }
 0x7d4   : > { %v6272_v41 = vadd.f32 %v17873_v33, %v6271_v14 }
 0x7d5   : > { %v6461_v6 = vpop.f32.mrf.mxu1  ;;  %v6273_v59 = vpop.f32.mrf.mxu0 }
 0x7d6   : > { %7332 = vmatpush1.bf16.msra.mxu1 %v13664_v5 }
 0x7d7   : > { %v6464_v63 = vpop.f32.mrf.mxu1  ;;  %v6274_v20 = vpop.f32.mrf.mxu0  ;;  %7333 = vmatprep.subr.bf16.mxu1 %v20133_v2 }
 0x7d8   : > { %v6465_v45 = vadd.f32 %v6464_v63, %v6272_v41  ;;  %v6275_v55 = vadd.f32 %v17873_v33, %v6274_v20 }
 0x7d9   : > { %v6466_v37 = vpop.f32.mrf.mxu1  ;;  %v6276_v26 = vpop.f32.mrf.mxu0 }
 0x7da   : > { %6615 = vrot.lane.b32.xlu0 %v6465_v45, %s20118_s2  ;;  %v6460_v37 = vadd.f32 %v17946_v8, %v6267_v27  ;;  %v13662_v26 = vld [vmem:[%s20333_s17 + $0x60] sm:$0xff]  }
 0x7db   : > { %v6467_v31 = vpop.f32.mrf.mxu1  ;;  %11302 = vmatprep.subr.bf16.mxu0 %v13662_v26  ;;  %v13670_v26 = vld [vmem:[%s20333_s17 + $0x50] sm:$0xff]  }
 0x7dc   : > { %v6468_v30 = vadd.f32 %v6467_v31, %v6275_v55  ;;  %v13663_v31 = vld [vmem:[%s20333_s17 + $0x20] sm:$0xff]  }
 0x7dd   : > { %v6469_v62 = vpop.f32.mrf.mxu1  ;;  %11303 = vmatpush3.bf16.msra.mxu0 %v13663_v31 }
 0x7de   : > { %6617 = vrot.lane.b32.xlu1 %v6468_v30, %s20118_s2  ;;  %6607 = vrot.lane.b32.xlu0 %v6449_v9, %s20118_s2 }
 0x7df   : > { %v6279_v23 = vpop.f32.mrf.mxu0  ;;  %v6472_v61 = vpop.f32.mrf.mxu1 }
 0x7e0   : > { %v6280_v25 = vadd.f32 %v17873_v33, %v6279_v23 }
 0x7e1   : > { %v6281_v3 = vpop.f32.mrf.mxu0  ;;  %v6474_v19 = vpop.f32.mrf.mxu1 }
 0x7e2   : > { %v6473_v48 = vadd.f32 %v6472_v61, %v6280_v25  ;;  %6609 = vrot.lane.b32.xlu1 %v6452_v49, %s20118_s2 }
 0x7e3   : > { %v6282_v28 = vpop.f32.mrf.mxu0  ;;  %v6475_v1 = vpop.f32.mrf.mxu1 }
 0x7e4   : > { %v6283_v58 = vadd.f32 %v17873_v33, %v6282_v28  ;;  %6619 = vrot.lane.b32.xlu0 %v6473_v48, %s20118_s2 }
 0x7e5   : > { %v6284_v24 = vpop.f32.mrf.mxu0  ;;  %v6477_v57 = vpop.f32.mrf.mxu1 }
 0x7e6   : > { %v6476_v0 = vadd.f32 %v6475_v1, %v6283_v58 }
 0x7e7   : > { %v6287_v29 = vpop.f32.mrf.mxu0  ;;  %v6480_v22 = vpop.f32.mrf.mxu1 }
 0x7e8   : > { %v6288_v21 = vadd.f32 %v17873_v33, %v6287_v29  ;;  %6621 = vrot.lane.b32.xlu1 %v6476_v0, %s20118_s2  ;;  %6595 = vrot.lane.b32.xlu0 %v6425_v18, %s20118_s2 }
 0x7e9   : > { %v6289_v11 = vpop.f32.mrf.mxu0  ;;  %v6482_v36 = vpop.f32.mrf.mxu1 }
 0x7ea   : > { %v6481_v34 = vadd.f32 %v6480_v22, %v6288_v21  ;;  %v13666_v21 = vld [vmem:[%s20333_s17 + $0x58] sm:$0xff]   ;;  %v13668_v11 = vld [vmem:[%s20333_s17 + $0x80] sm:$0xff]  }
 0x7eb   : > { %v6290_v50 = vpop.f32.mrf.mxu0  ;;  %v6483_v16 = vpop.f32.mrf.mxu1  ;;  %v13667_v22 = vld [vmem:[%s20333_s17 + $0x18] sm:$0xff]   ;;  %11304 = vmatprep.subr.bf16.mxu0 %v13666_v21 }
 0x7ec   : > { %v6291_v14 = vadd.f32 %v17873_v33, %v6290_v50  ;;  %6597 = vrot.lane.b32.xlu1 %v6428_v42, %s20118_s2  ;;  %6623 = vrot.lane.b32.xlu0 %v6481_v34, %s20118_s2 }
 0x7ed   : > { %v6292_v41 = vpop.f32.mrf.mxu0  ;;  %v6485_v59 = vpop.f32.mrf.mxu1  ;;  %11305 = vmatpush3.bf16.msra.mxu0 %v13667_v22  ;;  %v20337_v22 = vld [vmem:[#allocation46_spill] sm:$0xff] }
 0x7ee   : > { %v6484_v6 = vadd.f32 %v6483_v16, %v6291_v14  ;;  %v18024_v16 = vld [vmem:[%s20334_s6] ss:$0 sm:$0xff]  ;;  %11306 = vmatprep.subr.bf16.mxu0 %v13670_v26  ;;  %s20375_s6 = sld [smem:[#allocation20_spill]] }
 0x7ef   : > { %v6295_v63 = vpop.f32.mrf.mxu0  ;;  %v6488_v20 = vpop.f32.mrf.mxu1 }
 0x7f0   : > { %v6296_v45 = vadd.f32 %v17873_v33, %v6295_v63  ;;  %6625 = vrot.lane.b32.xlu1 %v6484_v6, %s20118_s2  ;;  %6611 = vrot.lane.b32.xlu0 %v6457_v32, %s20118_s2 }
 0x7f1   : > { %v6297_v55 = vpop.f32.mrf.mxu0  ;;  %v6490_v56 = vpop.f32.mrf.mxu1 }
 0x7f2   : > { %v6489_v4 = vadd.f32 %v6488_v20, %v6296_v45  ;;  %v18034_v45 = vld [vmem:[%s20335_s19] ss:$0 sm:$0xff]  ;;  %v13669_v56 = vld [vmem:[%s20333_s17 + $0xe8] sm:$0xff]   ;;  %s20374_s19 = sld [smem:[#allocation21_spill]] }
 0x7f3   : > { %v6298_v9 = vpop.f32.mrf.mxu0  ;;  %v6491_v54 = vpop.f32.mrf.mxu1 }
 0x7f4   : > { %v6299_v30 = vadd.f32 %v17873_v33, %v6298_v9  ;;  %6613 = vrot.lane.b32.xlu1 %v6460_v37, %s20118_s2  ;;  %6627 = vrot.lane.b32.xlu0 %v6489_v4, %s20118_s2 }
 0x7f5   : > { %v6300_v51 = vpop.f32.mrf.mxu0  ;;  %v6493_v62 = vpop.f32.mrf.mxu1 }
 0x7f6   : > { %v6492_v13 = vadd.f32 %v6491_v54, %v6299_v30 }
 0x7f7   : > { %v6303_v8 = vpop.f32.mrf.mxu0  ;;  %v6496_v60 = vpop.f32.mrf.mxu1 }
 0x7f8   : > { %6629 = vrot.lane.b32.xlu1 %v6492_v13, %s20118_s2  ;;  %6567 = vrot.lane.b32.xlu0 %v17877_v17, %s20118_s2  ;;  %v6304_v48 = vadd.f32 %v17873_v33, %v6303_v8 }
 0x7f9   : > { %v6305_v23 = vpop.f32.mrf.mxu0  ;;  %v6498_v49 = vpop.f32.mrf.mxu1 }
 0x7fa   : > { %v6497_v58 = vadd.f32 %v6496_v60, %v6304_v48 }
 0x7fb   : > { %v6306_v25 = vpop.f32.mrf.mxu0  ;;  %v6499_v61 = vpop.f32.mrf.mxu1 }
 0x7fc   : > { %6569 = vrot.lane.b32.xlu1 %v17881_v10, %s20118_s2  ;;  %6571 = vrot.lane.b32.xlu0 %v17885_v15, %s20118_s2  ;;  %v6307_v10 = vadd.f32 %v17873_v33, %v6306_v25  ;;  %v13665_v15 = vld [vmem:[%s20333_s17 + $0x88] sm:$0xff]  }
 0x7fd   : > { %v6308_v3 = vpop.f32.mrf.mxu0  ;;  %v6501_v19 = vpop.f32.mrf.mxu1  ;;  %7334 = vmatpush1.bf16.msra.mxu1 %v13665_v15  ;;  %v13675_v15 = vld [vmem:[%s20333_s17 + $0xd8] sm:$0xff]  }
 0x7fe   : > { %7335 = vmatprep.subr.bf16.mxu1 %v20133_v2  ;;  %v13671_v19 = vld [vmem:[%s20333_s17 + $0x10] sm:$0xff]  }
 0x7ff   : > { %v6311_v28 = vpop.f32.mrf.mxu0  ;;  %11307 = vmatpush3.bf16.msra.mxu0 %v13671_v19 }
 0x800   : > { %v6504_v47 = vpop.f32.mrf.mxu1  ;;  %6573 = vrot.lane.b32.xlu1 %v17889_v35, %s20118_s2  ;;  %6577 = vrot.lane.b32.xlu0 %v17895_v40, %s20118_s2  ;;  %v6500_v40 = vadd.f32 %v6499_v61, %v6307_v10  ;;  %v6312_v57 = vadd.f32 %v17873_v33, %v6311_v28  ;;  %v13672_v28 = vld [vmem:[%s20333_s17 + $0xe0] sm:$0xff]   ;;  %v20336_v10 = vld [vmem:[#allocation49_spill] sm:$0xff] }
 0x801   : > { %v6313_v17 = vpop.f32.mrf.mxu0  ;;  %7336 = vmatpush1.bf16.msra.mxu1 %v13668_v11 }
 0x802   : > { %v6506_v1 = vpop.f32.mrf.mxu1  ;;  %v6505_v39 = vadd.f32 %v6504_v47, %v6312_v57  ;;  %7341 = vmatprep.subr.bf16.mxu1 %v20133_v2  ;;  %v13673_v47 = vld [vmem:[%s20333_s17 + $0x48] sm:$0xff]  }
 0x803   : > { %v6314_v24 = vpop.f32.mrf.mxu0  ;;  %11308 = vmatprep.subr.bf16.mxu0 %v13673_v47 }
 0x804   : > { %v6315_v18 = vadd.f32 %v17873_v33, %v6314_v24  ;;  %v6507_v0 = vpop.f32.mrf.mxu1  ;;  %6575 = vrot.lane.b32.xlu1 %v17892_v53, %s20118_s2  ;;  %6631 = vrot.lane.b32.xlu0 %v6497_v58, %s20118_s2 }
 0x805   : > { %v6316_v35 = vpop.f32.mrf.mxu0  ;;  %7342 = vmatpush2.bf16.msra.mxu1 %v13669_v56 }
 0x806   : > { %v6508_v29 = vadd.f32 %v6507_v0, %v6315_v18  ;;  %v6509_v7 = vpop.f32.mrf.mxu1  ;;  %7343 = vmatprep.subr.bf16.mxu1 %v20133_v2 }
 0x807   : > { %v6319_v42 = vpop.f32.mrf.mxu0 }
 0x808   : > { %v6320_v34 = vadd.f32 %v17873_v33, %v6319_v42  ;;  %v6512_v36 = vpop.f32.mrf.mxu1  ;;  %6633 = vrot.lane.b32.xlu1 %v6500_v40, %s20118_s2  ;;  %6637 = vrot.lane.b32.xlu0 %v6508_v29, %s20118_s2  ;;  %v13676_v42 = vld [vmem:[%s20333_s17 + $0x40] sm:$0xff]  }
 0x809   : > { %v6321_v53 = vpop.f32.mrf.mxu0  ;;  %7344 = vmatpush2.bf16.msra.mxu1 %v13672_v28 }
 0x80a   : > { %v6513_v50 = vadd.f32 %v6512_v36, %v6320_v34  ;;  %v6514_v38 = vpop.f32.mrf.mxu1  ;;  %7345 = vmatprep.subr.bf16.mxu1 %v20133_v2  ;;  %v13677_v34 = vld [vmem:[%s20333_s17] sm:$0xff]  }
 0x80b   : > { %v18021_v14 = vpop.f32.mrf.mxu0  ;;  %v20339_v38 = vmov 0.0  }
 0x80c   : > { %v18026_v41 = vpop.f32.mrf.mxu1  ;;  %v6584_v32 = vpop.permute.xlu0 %6583  ;;  %6635 = vrot.lane.b32.xlu1 %v6505_v39, %s20118_s2  ;;  %6639 = vrot.lane.b32.xlu0 %v6513_v50, %s20118_s2  ;;  %v20338_v39 = vld [vmem:[#allocation64_spill] sm:$0xff]  ;;  %v6323_v56 = vadd.f32 %v17873_v33, %v18021_v14 }
 0x80d   : > { %v6695_v6 = vsel %vm2431_vm5, %v16828_v43, %v6584_v32  ;;  %v6324_v59 = vpop.f32.mrf.mxu0  ;;  %7346 = vmatpush2.bf16.msra.mxu1 %v13675_v15  ;;  %v20346_v15 = vld [vmem:[#allocation63_spill] sm:$0xff] }
 0x80e   : > { %v6742_v63 = vmul.f32 %v18024_v16, %v6695_v6  ;;  %v6517_v27 = vpop.f32.mrf.mxu1  ;;  %7347 = vmatprep.subr.bf16.mxu1 %v20133_v2 }
 0x80f   : > { %v6327_v20 = vpop.f32.mrf.mxu0  ;;  %v20340_v27 = vld [vmem:[#allocation48_spill] sm:$0xff] }
 0x810   : > { %v6328_v55 = vadd.f32 %v17873_v33, %v6327_v20  ;;  %v6520_v37 = vpop.f32.mrf.mxu1  ;;  %v6586_v4 = vpop.permute.xlu1 %6585  ;;  %v6789_v30 = vadd.f32 %v18034_v45, %v6742_v63 }
 0x811   : > { %v6696_v31 = vsel %vm2431_vm5, %v16839_v44, %v6586_v4  ;;  %v6329_v9 = vpop.f32.mrf.mxu0 }
 0x812   : > { %v18042_v43 = vadd.f32 %v6520_v37, %v6328_v55  ;;  %v6743_v54 = vmul.f32 %v18024_v16, %v6696_v31  ;;  %v6522_v5 = vpop.f32.mrf.mxu1  ;;  %v6829_v49 = vmax.f32 %v6789_v30, 0.0  ;;  %v13678_v9 = vld [vmem:[%s20333_s17 + $0xd0] sm:$0xff]   ;;  %v20341_v30 = vld [vmem:[#allocation47_spill] sm:$0xff] }
 0x813   : > { %v6330_v51 = vpop.f32.mrf.mxu0  ;;  %7348 = vmatpush2.bf16.msra.mxu1 %v13678_v9 }
 0x814   : > { %v6790_v13 = vadd.f32 %v18034_v45, %v6743_v54  ;;  %v6331_v44 = vadd.f32 %v17873_v33, %v6330_v51  ;;  %v6523_v62 = vpop.f32.mrf.mxu1  ;;  %v6588_v8 = vpop.permute.xlu0 %6587  ;;  %7349 = vmatprep.subr.bf16.mxu1 %v20133_v2 }
 0x815   : > { %v6697_v60 = vsel %vm2431_vm5, %v16818_v52, %v6588_v8  ;;  %v6332_v23 = vpop.f32.mrf.mxu0  ;;  %v13674_v52 = vld [vmem:[%s20333_s17 + $0x8] sm:$0xff]   ;;  %v13680_v8 = vld [vmem:[%s20333_s17 + $0xc0] sm:$0xff]  }
 0x816   : > { %v6830_v25 = vmax.f32 %v6790_v13, 0.0  ;;  %v18050_v61 = vadd.f32 %v6523_v62, %v6331_v44  ;;  %v6744_v3 = vmul.f32 %v18024_v16, %v6697_v60  ;;  %v6525_v48 = vpop.f32.mrf.mxu1  ;;  %11309 = vmatpush3.bf16.msra.mxu0 %v13674_v52  ;;  %v13679_v13 = vld [vmem:[%s20333_s17 + $0xc8] sm:$0xff]   ;;  %v6516_v44 = vadd.f32 %v18026_v41, %v6323_v56  ;;  %v20349_v56 = vld [vmem:[#allocation55_spill] sm:$0xff]  ;;  %s20377_s17 = sld [smem:[#allocation25_spill]] }
 0x817   : > { %11310 = vmatprep.subr.bf16.mxu0 %v13676_v42  ;;  %7350 = vmatpush2.bf16.msra.mxu1 %v13679_v13  ;;  %v20344_v48 = vld [vmem:[#allocation43_spill] sm:$0xff] }
 0x818   : > { %v13065_v17 = vpack.i.bf16 %v6830_v25, %v6829_v49  ;;  %v6590_v58 = vpop.permute.xlu1 %6589  ;;  %v6791_v24 = vadd.f32 %v18034_v45, %v6744_v3  ;;  %7351 = vmatprep.subr.bf16.mxu1 %v20133_v2  ;;  %v20342_v49 = vld [vmem:[#allocation56_spill] sm:$0xff]  ;;  %v20343_v25 = vld [vmem:[#allocation54_spill] sm:$0xff] }
 0x819   : > { %v6698_v1 = vsel %vm2431_vm5, %v20336_v10, %v6590_v58 }
 0x81a   : > { %v6745_v18 = vmul.f32 %v18024_v16, %v6698_v1  ;;  %13066 = vrot.lane.b32.xlu0 %v13065_v17, %s20136_s3  ;;  %v6831_v35 = vmax.f32 %v6791_v24, 0.0  ;;  %11311 = vmatpush3.bf16.msra.mxu0 %v13677_v34  ;;  %v20345_v1 = vld [vmem:[#allocation62_spill] sm:$0xff] }
 0x81b   : > { %11583 = vmatprep.subr.mxu0 %v20339_v38  ;;  %7352 = vmatpush2.bf16.msra.mxu1 %v13680_v8 }
 0x81c   : > { %v6792_v0 = vadd.f32 %v18034_v45, %v6745_v18  ;;  %v6592_v29 = vpop.permute.xlu0 %6591  ;;  %8264 = vmatprep.subr.bf16.mxu1 %v20133_v2 }
 0x81d   : > { %v6699_v19 = vsel %vm2431_vm5, %v20344_v48, %v6592_v29 }
 0x81e   : > { %v6832_v40 = vmax.f32 %v6792_v0, 0.0  ;;  %v6746_v10 = vmul.f32 %v18024_v16, %v6699_v19 }
 0x820   : > { %v13070_v57 = vpack.i.bf16 %v6832_v40, %v6831_v35  ;;  %v6594_v7 = vpop.permute.xlu1 %6593 }
 0x821   : > { %v6700_v41 = vsel %vm2431_vm5, %v20342_v49, %v6594_v7  ;;  %v6793_v7 = vadd.f32 %v18034_v45, %v6746_v10  ;;  %v20354_v10 = vld [vmem:[#allocation44_spill] sm:$0xff] }
 0x822   : > { %13071 = vrot.lane.b32.xlu1 %v13070_v57, %s20136_s3  ;;  %v6747_v47 = vmul.f32 %v18024_v16, %v6700_v41 }
 0x824   : > { %v6794_v40 = vadd.f32 %v18034_v45, %v6747_v47 }
 0x82c   : > { %v6600_v21 = vpop.permute.xlu0 %6599 }
 0x82d   : > { %v6703_v11 = vsel %vm2431_vm5, %v20337_v22, %v6600_v21  ;;  %v20347_v21 = vld [vmem:[#allocation42_spill] sm:$0xff] }
 0x82e   : > { %v6750_v36 = vmul.f32 %v18024_v16, %v6703_v11 }
 0x830   : > { %v6602_v53 = vpop.permute.xlu1 %6601  ;;  %v6797_v32 = vadd.f32 %v18034_v45, %v6750_v36 }
 0x831   : > { %v6704_v50 = vsel %vm2431_vm5, %v20338_v39, %v6602_v53  ;;  %v20348_v39 = vld [vmem:[#allocation58_spill] sm:$0xff] }
 0x832   : > { %v6751_v6 = vmul.f32 %v18024_v16, %v6704_v50  ;;  %v6837_v55 = vmax.f32 %v6797_v32, 0.0  ;;  %v6834_v32 = vmax.f32 %v6794_v40, 0.0 }
 0x834   : > { %v6798_v59 = vadd.f32 %v18034_v45, %v6751_v6  ;;  %v6604_v63 = vpop.permute.xlu0 %6603 }
 0x835   : > { %v6705_v20 = vsel %vm2431_vm5, %v20340_v27, %v6604_v63  ;;  %v6833_v27 = vmax.f32 %v6793_v7, 0.0  ;;  %v20356_v7 = vld [vmem:[#allocation66_spill] sm:$0xff] }
 0x836   : > { %v6838_v37 = vmax.f32 %v6798_v59, 0.0  ;;  %v6752_v4 = vmul.f32 %v18024_v16, %v6705_v20 }
 0x838   : > { %v13075_v26 = vpack.i.bf16 %v6838_v37, %v6837_v55  ;;  %v6606_v31 = vpop.permute.xlu1 %6605  ;;  %v6799_v5 = vadd.f32 %v18034_v45, %v6752_v4 }
 0x839   : > { %v6706_v54 = vsel %vm2431_vm5, %v20341_v30, %v6606_v31  ;;  %v13090_v31 = vpack.i.bf16 %v6834_v32, %v6833_v27 }
 0x83a   : > { %v6753_v51 = vmul.f32 %v18024_v16, %v6706_v54  ;;  %13076 = vrot.lane.b32.xlu1 %v13075_v26, %s20173_s8  ;;  %v6839_v14 = vmax.f32 %v6799_v5, 0.0 }
 0x83c   : > { %v6800_v33 = vadd.f32 %v18034_v45, %v6753_v51 }
 0x83e   : > { %v6840_v62 = vmax.f32 %v6800_v33, 0.0  ;;  %6641 = vrot.lane.b32.xlu1 %v6516_v44, %s20118_s2  ;;  %v20350_v44 = vld [vmem:[#allocation51_spill] sm:$0xff] }
 0x840   : > { %v13080_v60 = vpack.i.bf16 %v6840_v62, %v6839_v14  ;;  %v20351_v14 = vld [vmem:[#allocation50_spill] sm:$0xff] }
 0x842   : > { %13081 = vrot.lane.b32.xlu0 %v13080_v60, %s20173_s8 }
 0x84c   : > { %v6616_v23 = vpop.permute.xlu0 %6615 }
 0x84d   : > { %v6711_v3 = vsel %vm2431_vm5, %v20343_v25, %v6616_v23  ;;  %v20352_v23 = vld [vmem:[#allocation45_spill] sm:$0xff] }
 0x84e   : > { %v6758_v28 = vmul.f32 %v18024_v16, %v6711_v3 }
 0x850   : > { %v6618_v17 = vpop.permute.xlu1 %6617  ;;  %v6608_v58 = vpop.permute.xlu0 %6607  ;;  %v6805_v18 = vadd.f32 %v18034_v45, %v6758_v28 }
 0x851   : > { %v6712_v52 = vsel %vm2431_vm5, %v20345_v1, %v6618_v17  ;;  %v6707_v24 = vsel %vm2431_vm5, %v20346_v15, %v6608_v58  ;;  %v20353_v17 = vld [vmem:[#allocation52_spill] sm:$0xff] }
 0x852   : > { %v6759_v0 = vmul.f32 %v18024_v16, %v6712_v52  ;;  %v6754_v35 = vmul.f32 %v18024_v16, %v6707_v24  ;;  %v6845_v11 = vmax.f32 %v6805_v18, 0.0 }
 0x854   : > { %v6806_v57 = vadd.f32 %v18034_v45, %v6759_v0  ;;  %v6610_v29 = vpop.permute.xlu1 %6609  ;;  %v6801_v34 = vadd.f32 %v18034_v45, %v6754_v35 }
 0x855   : > { %v6708_v22 = vsel %vm2431_vm5, %v20347_v21, %v6610_v29 }
 0x856   : > { %v6846_v42 = vmax.f32 %v6806_v57, 0.0  ;;  %v6755_v36 = vmul.f32 %v18024_v16, %v6708_v22  ;;  %v6620_v53 = vpop.permute.xlu0 %6619  ;;  %v6841_v20 = vmax.f32 %v6801_v34, 0.0  ;;  %v20355_v57 = vld [vmem:[#allocation60_spill] sm:$0xff] }
 0x857   : > { %v6713_v50 = vsel %vm2431_vm5, %v20348_v39, %v6620_v53 }
 0x858   : > { %v13085_v6 = vpack.i.bf16 %v6846_v42, %v6845_v11  ;;  %v6802_v59 = vadd.f32 %v18034_v45, %v6755_v36  ;;  %v6760_v63 = vmul.f32 %v18024_v16, %v6713_v50 }
 0x85a   : > { %v6842_v55 = vmax.f32 %v6802_v59, 0.0  ;;  %v6622_v37 = vpop.permute.xlu1 %6621  ;;  %v6596_v4 = vpop.permute.xlu0 %6595  ;;  %13086 = vrot.lane.b32.xlu0 %v13085_v6, %s20250_s13  ;;  %v6807_v30 = vadd.f32 %v18034_v45, %v6760_v63  ;;  %v20357_v6 = vld [vmem:[#allocation68_spill] sm:$0xff] }
 0x85b   : > { %v6714_v26 = vsel %vm2431_vm5, %v20349_v56, %v6622_v37  ;;  %v6701_v49 = vsel %vm2431_vm5, %v20352_v23, %v6596_v4 }
 0x85c   : > { %v13095_v9 = vpack.i.bf16 %v6842_v55, %v6841_v20  ;;  %v6761_v54 = vmul.f32 %v18024_v16, %v6714_v26  ;;  %v6847_v8 = vmax.f32 %v6807_v30, 0.0  ;;  %v6748_v28 = vmul.f32 %v18024_v16, %v6701_v49 }
 0x85e   : > { %v6808_v5 = vadd.f32 %v18034_v45, %v6761_v54  ;;  %v6598_v51 = vpop.permute.xlu1 %6597  ;;  %v6624_v13 = vpop.permute.xlu0 %6623  ;;  %13096 = vrot.lane.b32.xlu1 %v13095_v9, %s20173_s8  ;;  %13091 = vrot.lane.b32.xlu0 %v13090_v31, %s20136_s3  ;;  %v6795_v35 = vadd.f32 %v18034_v45, %v6748_v28 }
 0x85f   : > { %v6702_v33 = vsel %vm2431_vm5, %v20350_v44, %v6598_v51  ;;  %v6715_v62 = vsel %vm2431_vm5, %v20351_v14, %v6624_v13  ;;  %v20358_v13 = vld [vmem:[#allocation65_spill] sm:$0xff] }
 0x860   : > { %v6848_v60 = vmax.f32 %v6808_v5, 0.0  ;;  %v6762_v41 = vmul.f32 %v18024_v16, %v6715_v62  ;;  %v6749_v3 = vmul.f32 %v18024_v16, %v6702_v33  ;;  %v6835_v32 = vmax.f32 %v6795_v35, 0.0  ;;  %v20359_v62 = vld [vmem:[#allocation70_spill] sm:$0xff] }
 0x862   : > { %v13100_v25 = vpack.i.bf16 %v6848_v60, %v6847_v8  ;;  %v6626_v48 = vpop.permute.xlu1 %6625  ;;  %v6612_v19 = vpop.permute.xlu0 %6611  ;;  %6579 = vrot.lane.b32.xlu0 %v17898_v46, %s20118_s2  ;;  %v6809_v47 = vadd.f32 %v18034_v45, %v6762_v41  ;;  %v6796_v24 = vadd.f32 %v18034_v45, %v6749_v3 }
 0x863   : > { %v6716_v58 = vsel %vm2431_vm5, %v20353_v17, %v6626_v48  ;;  %v6709_v1 = vsel %vm2431_vm5, %v20354_v10, %v6612_v19  ;;  %v20360_v19 = vld [vmem:[#allocation41_spill] sm:$0xff] }
 0x864   : > { %v6763_v52 = vmul.f32 %v18024_v16, %v6716_v58  ;;  %v6756_v15 = vmul.f32 %v18024_v16, %v6709_v1  ;;  %13101 = vrot.lane.b32.xlu1 %v13100_v25, %s20250_s13  ;;  %v6849_v40 = vmax.f32 %v6809_v47, 0.0  ;;  %v20361_v47 = vld [vmem:[#allocation40_spill] sm:$0xff] }
 0x866   : > { %v6810_v46 = vadd.f32 %v18034_v45, %v6763_v52  ;;  %v6614_v18 = vpop.permute.xlu1 %6613  ;;  %v6628_v0 = vpop.permute.xlu0 %6627  ;;  %6645 = vrot.lane.b32.xlu0 %v18050_v61, %s20118_s2  ;;  %v6803_v11 = vadd.f32 %v18034_v45, %v6756_v15  ;;  %v6836_v61 = vmax.f32 %v6796_v24, 0.0 }
 0x867   : > { %v6710_v29 = vsel %vm2431_vm5, %v20355_v57, %v6614_v18  ;;  %v6717_v21 = vsel %vm2431_vm5, %v20356_v7, %v6628_v0  ;;  %v20362_v0 = vld [vmem:[#allocation78_spill] sm:$0xff] }
 0x868   : > { %v6850_v22 = vmax.f32 %v6810_v46, 0.0  ;;  %v6757_v42 = vmul.f32 %v18024_v16, %v6710_v29  ;;  %v6764_v34 = vmul.f32 %v18024_v16, %v6717_v21  ;;  %6581 = vrot.lane.b32.xlu1 %v17901_v12, %s20118_s2  ;;  %v6843_v63 = vmax.f32 %v6803_v11, 0.0 }
 0x869   : > { %v13105_v12 = vpack.i.bf16 %v6836_v61, %v6835_v32 }
 0x86a   : > { %v13110_v36 = vpack.i.bf16 %v6850_v22, %v6849_v40  ;;  %v6804_v53 = vadd.f32 %v18034_v45, %v6757_v42  ;;  %v6630_v39 = vpop.permute.xlu1 %6629  ;;  %v6568_v50 = vpop.permute.xlu0 %6567  ;;  %v6811_v20 = vadd.f32 %v18034_v45, %v6764_v34  ;;  %v20363_v40 = vld [vmem:[#allocation77_spill] sm:$0xff] }
 0x86b   : > { %v6718_v59 = vsel %vm2431_vm5, %v20357_v6, %v6630_v39  ;;  %v6687_v28 = vsel %vm2431_vm5, %v20360_v19, %v6568_v50 }
 0x86c   : > { %v6844_v27 = vmax.f32 %v6804_v53, 0.0  ;;  %v6765_v55 = vmul.f32 %v18024_v16, %v6718_v59  ;;  %6643 = vrot.lane.b32.xlu1 %v18042_v43, %s20118_s2  ;;  %13111 = vrot.lane.b32.xlu0 %v13110_v36, %s20250_s13  ;;  %v6851_v31 = vmax.f32 %v6811_v20, 0.0  ;;  %v6734_v10 = vmul.f32 %v18024_v16, %v6687_v28 }
 0x86e   : > { %v13115_v37 = vpack.i.bf16 %v6844_v27, %v6843_v63  ;;  %v6812_v4 = vadd.f32 %v18034_v45, %v6765_v55  ;;  %v6570_v56 = vpop.permute.xlu1 %6569  ;;  %v6572_v26 = vpop.permute.xlu0 %6571  ;;  %v6781_v24 = vadd.f32 %v18034_v45, %v6734_v10 }
 0x86f   : > { %v6688_v17 = vsel %vm2431_vm5, %v20361_v47, %v6570_v56  ;;  %v6689_v35 = vsel %vm2431_vm5, %v20362_v0, %v6572_v26 }
 0x870   : > { %v6852_v9 = vmax.f32 %v6812_v4, 0.0  ;;  %13106 = vrot.lane.b32.xlu1 %v13105_v12, %s20136_s3  ;;  %13116 = vrot.lane.b32.xlu0 %v13115_v37, %s20173_s8  ;;  %v6735_v1 = vmul.f32 %v18024_v16, %v6688_v17  ;;  %v6821_v21 = vmax.f32 %v6781_v24, 0.0  ;;  %v6736_v11 = vmul.f32 %v18024_v16, %v6689_v35 }
 0x872   : > { %v13120_v30 = vpack.i.bf16 %v6852_v9, %v6851_v31  ;;  %v6574_v54 = vpop.permute.xlu1 %6573  ;;  %v18177_v5 = vpop.permute.xlu0 %6577  ;;  %v6782_v46 = vadd.f32 %v18034_v45, %v6735_v1  ;;  %v6783_v6 = vadd.f32 %v18034_v45, %v6736_v11 }
 0x873   : > { %v6690_v57 = vsel %vm2431_vm5, %v20363_v40, %v6574_v54 }
 0x874   : > { %13121 = vrot.lane.b32.xlu1 %v13120_v30, %s20250_s13  ;;  %v6822_v22 = vmax.f32 %v6782_v46, 0.0  ;;  %v6737_v42 = vmul.f32 %v18024_v16, %v6690_v57  ;;  %v6823_v12 = vmax.f32 %v6783_v6, 0.0 }
 0x876   : > { %v18180_v43 = vpop.permute.xlu1 %6575  ;;  %v6632_v51 = vpop.permute.xlu0 %6631  ;;  %v6784_v59 = vadd.f32 %v18034_v45, %v6737_v42 }
 0x877   : > { %v6719_v44 = vsel %vm2431_vm5, %v20358_v13, %v6632_v51 }
 0x878   : > { %v6766_v33 = vmul.f32 %v18024_v16, %v6719_v44  ;;  %v6824_v37 = vmax.f32 %v6784_v59, 0.0  ;;  %v20364_v44 = vld [vmem:[#allocation59_spill] sm:$0xff] }
 0x87a   : > { %v6634_v14 = vpop.permute.xlu1 %6633  ;;  %v6813_v60 = vadd.f32 %v18034_v45, %v6766_v33  ;;  %v6638_v48 = vpop.permute.xlu0 %6637 }
 0x87b   : > { %v6720_v8 = vsel %vm2431_vm5, %v20359_v62, %v6634_v14  ;;  %v20365_v14 = vld [vmem:[#allocation67_spill] sm:$0xff] }
 0x87c   : > { %v6767_v23 = vmul.f32 %v18024_v16, %v6720_v8  ;;  %v6853_v41 = vmax.f32 %v6813_v60, 0.0  ;;  %v6722_v62 = vsel %vm2431_vm5, %v20365_v14, %v6638_v48  ;;  %v20366_v8 = vld [vmem:[#allocation61_spill] sm:$0xff]  ;;  %v20371_v14 = vld [vmem:[#allocation74_spill] sm:$0xff] }
 0x87d   : > { %v6692_v60 = vsel %vm2431_vm5, %v20366_v8, %v18177_v5  ;;  %v20368_v5 = vld [vmem:[#allocation73_spill] sm:$0xff] }
 0x87e   : > { %v6814_v49 = vadd.f32 %v18034_v45, %v6767_v23  ;;  %v6640_v58 = vpop.permute.xlu0 %6639  ;;  %v6636_v52 = vpop.permute.xlu1 %6635 }
 0x87f   : > { %v6721_v33 = vsel %vm2431_vm5, %v20364_v44, %v6636_v52 }
 0x880   : > { %v6854_v25 = vmax.f32 %v6814_v49, 0.0  ;;  %v6768_v23 = vmul.f32 %v18024_v16, %v6721_v33  ;;  %v20367_v49 = vld [vmem:[#allocation79_spill] sm:$0xff] }
 0x882   : > { %v7044_v3 = vpack.c.bf16 %v6854_v25, %v6853_v41  ;;  %v6691_v41 = vsel %vm2431_vm5, %v20367_v49, %v18180_v43  ;;  %v6769_v25 = vmul.f32 %v18024_v16, %v6722_v62  ;;  %v6815_v28 = vadd.f32 %v18034_v45, %v6768_v23 }
 0x883   : > { %v6738_v19 = vmul.f32 %v18024_v16, %v6691_v41  ;;  %v20372_v41 = vld [vmem:[#allocation53_spill] sm:$0xff] }
 0x884   : > { %11109 = vmatprep.mubr.msk.bf16.mxu1 %vm2472_vm6, %v7044_v3  ;;  %v6739_v3 = vmul.f32 %v18024_v16, %v6692_v60  ;;  %v6816_v48 = vadd.f32 %v18034_v45, %v6769_v25  ;;  %v6855_v52 = vmax.f32 %v6815_v28, 0.0 }
 0x885   : > { %v6785_v1 = vadd.f32 %v18034_v45, %v6738_v19 }
 0x886   : > { %v6786_v17 = vadd.f32 %v18034_v45, %v6739_v3  ;;  %v6856_v0 = vmax.f32 %v6816_v48, 0.0 }
 0x888   : > { %v6826_v40 = vmax.f32 %v6786_v17, 0.0 }
 0x88c   : > { %v13067_v15 = vpop.permute.xlu0 %13066 }
 0x88d   : > { %v13069_v29 = vunpack.i.h.bf16 %v13067_v15  ;;  %v13068_v7 = vunpack.i.l.bf16 %v13067_v15  ;;  %v20369_v15 = vld [vmem:[#allocation69_spill] sm:$0xff] }
 0x88e   : > { %v6723_v24 = vsel %vm2431_vm5, %v20369_v15, %v6640_v58 }
 0x88f   : > { %v6958_v53 = vsel %vm2472_vm6, %v6822_v22, %v13069_v29  ;;  %v6957_v39 = vsel %vm2472_vm6, %v6821_v21, %v13068_v7  ;;  %v7048_v21 = vpack.c.bf16 %v6856_v0, %v6855_v52  ;;  %v6770_v22 = vmul.f32 %v18024_v16, %v6723_v24 }
 0x890   : > { %v7041_v27 = vpack.c.bf16 %v6958_v53, %v6957_v39 }
 0x894   : > { %v13072_v18 = vpop.permute.xlu1 %13071 }
 0x895   : > { %v13074_v20 = vunpack.i.h.bf16 %v13072_v18  ;;  %v13073_v55 = vunpack.i.l.bf16 %v13072_v18 }
 0x897   : > { %v6960_v31 = vsel %vm2472_vm6, %v6824_v37, %v13074_v20  ;;  %v6959_v9 = vsel %vm2472_vm6, %v6823_v12, %v13073_v55 }
 0x898   : > { %v7045_v13 = vpack.c.bf16 %v6960_v31, %v6959_v9  ;;  %v20370_v31 = vld [vmem:[#allocation57_spill] sm:$0xff] }
 0x8ac   : > { %v13077_v34 = vpop.permute.xlu1 %13076 }
 0x8ad   : > { %v13079_v61 = vunpack.i.h.bf16 %v13077_v34  ;;  %v13078_v36 = vunpack.i.l.bf16 %v13077_v34 }
 0x8af   : > { %v6965_v50 = vsel %vm3926_vm10, %v13068_v7, %v13078_v36  ;;  %v6966_v32 = vsel %vm3926_vm10, %v13069_v29, %v13079_v61  ;;  %v6825_v7 = vmax.f32 %v6785_v1, 0.0 }
 0x8b0   : > { %v7042_v63 = vpack.c.bf16 %v6966_v32, %v6965_v50  ;;  %v6642_v47 = vpop.permute.xlu1 %6641 }
 0x8b1   : > { %v6724_v10 = vsel %vm2431_vm5, %v20368_v5, %v6642_v47  ;;  %v20373_v47 = vld [vmem:[#allocation71_spill] sm:$0xff] }
 0x8b2   : > { %7288 = vmatprep.mubr.bf16.mxu0 %v7042_v63  ;;  %v6771_v35 = vmul.f32 %v18024_v16, %v6724_v10 }
 0x8b3   : > { %7289 = vmatmul.mubr.bf16.vlgmr.msra.gmra.mxu0 %v7041_v27 }
 0x8b4   : > { %v18211_v4 = vpop.permute.xlu0 %13081  ;;  %v6818_v32 = vadd.f32 %v18034_v45, %v6771_v35 }
 0x8b5   : > { %v13084_v56 = vunpack.i.h.bf16 %v18211_v4  ;;  %v13083_v26 = vunpack.i.l.bf16 %v18211_v4 }
 0x8b6   : > { %v6858_v37 = vmax.f32 %v6818_v32, 0.0 }
 0x8b7   : > { %v6967_v30 = vsel %vm3926_vm10, %v13073_v55, %v13083_v26  ;;  %v6968_v54 = vsel %vm3926_vm10, %v13074_v20, %v13084_v56  ;;  %v6817_v55 = vadd.f32 %v18034_v45, %v6770_v22 }
 0x8b8   : > { %v7046_v51 = vpack.c.bf16 %v6968_v54, %v6967_v30 }
 0x8ba   : > { %7296 = vmatprep.mubr.bf16.mxu0 %v7046_v51 }
 0x8bb   : > { %7297 = vmatmul.mubr.bf16.gmra.mxu0 %v7045_v13  ;;  %v6857_v13 = vmax.f32 %v6817_v55, 0.0  ;;  %v7413_v55 = vld [vmem:[%s20374_s19 + $0x18] sm:$0xff] }
 0x8bd   : > { %v7052_v49 = vpack.c.bf16 %v6858_v37, %v6857_v13  ;;  %v7411_v37 = vld [vmem:[%s20374_s19 + $0x8] sm:$0xff] }
 0x8cc   : > { %v13087_v43 = vpop.permute.xlu0 %13086 }
 0x8cd   : > { %v13089_v46 = vunpack.i.h.bf16 %v13087_v43  ;;  %v13088_v18 = vunpack.i.l.bf16 %v13087_v43 }
 0x8cf   : > { %v6974_v57 = vsel %vm4008_vm12, %v13079_v61, %v13089_v46  ;;  %v6973_v29 = vsel %vm4008_vm12, %v13078_v36, %v13088_v18 }
 0x8d0   : > { %v7043_v11 = vpack.c.bf16 %v6974_v57, %v6973_v29  ;;  %v13097_v42 = vpop.permute.xlu1 %13096  ;;  %v13092_v34 = vpop.permute.xlu0 %13091 }
 0x8d1   : > { %v13099_v53 = vunpack.i.h.bf16 %v13097_v42  ;;  %v13098_v39 = vunpack.i.l.bf16 %v13097_v42  ;;  %v13094_v58 = vunpack.i.h.bf16 %v13092_v34  ;;  %v13093_v50 = vunpack.i.l.bf16 %v13092_v34 }
 0x8d2   : > { %7354 = vmatmul.mubr.bf16.vlgmr.msra.gmra.mxu1 %v7043_v11 }
 0x8d3   : > { %v6962_v6 = vsel %vm2472_vm6, %v6826_v40, %v13094_v58  ;;  %v6961_v61 = vsel %vm2472_vm6, %v6825_v7, %v13093_v50  ;;  %11110 = vmatprep.mubr.msk.bf16.mxu1 %vm2472_vm6, %v7048_v21  ;;  %v6969_v36 = vsel %vm3926_vm10, %v13093_v50, %v13098_v39  ;;  %v6970_v59 = vsel %vm3926_vm10, %v13094_v58, %v13099_v53 }
 0x8d4   : > { %v6580_v63 = vpop.permute.xlu0 %6579  ;;  %v7050_v27 = vpack.c.bf16 %v6970_v59, %v6969_v36  ;;  %v7049_v20 = vpack.c.bf16 %v6962_v6, %v6961_v61  ;;  %v7417_v59 = vld [vmem:[%s20374_s19 + $0x38] sm:$0xf] }
 0x8d5   : > { %v6693_v9 = vsel %vm2431_vm5, %v20370_v31, %v6580_v63  ;;  %11584 = vmatpush3.msk.msra.mxu0 %vm2744_vm2, %v7417_v59  ;;  %v7416_v63 = vld [vmem:[%s20374_s19 + $0x30] sm:$0xff]  ;;  %v7410_v31 = vld [vmem:[%s20374_s19] sm:$0xff] }
 0x8d6   : > { %v13102_v12 = vpop.permute.xlu1 %13101  ;;  %7304 = vmatprep.mubr.bf16.mxu0 %v7050_v27  ;;  %v6740_v8 = vmul.f32 %v18024_v16, %v6693_v9  ;;  %11585 = vmatprep.subr.mxu0 %v20339_v38  ;;  %v7415_v27 = vld [vmem:[%s20374_s19 + $0x28] sm:$0xff] }
 0x8d7   : > { %v13104_v30 = vunpack.i.h.bf16 %v13102_v12  ;;  %v13103_v54 = vunpack.i.l.bf16 %v13102_v12  ;;  %7305 = vmatmul.mubr.bf16.gmra.mxu0 %v7049_v20  ;;  %v7414_v20 = vld [vmem:[%s20374_s19 + $0x20] sm:$0xff]  ;;  %v7412_v12 = vld [vmem:[%s20374_s19 + $0x10] sm:$0xff]  ;;  %s20378_s19 = sld [smem:[#allocation22_spill]] }
 0x8d8   : > { %v6646_v51 = vpop.permute.xlu0 %6645  ;;  %v6787_v4 = vadd.f32 %v18034_v45, %v6740_v8  ;;  %11586 = vmatpush3.msra.mxu0 %v7416_v63 }
 0x8d9   : > { %v6975_v44 = vsel %vm4008_vm12, %v13083_v26, %v13103_v54  ;;  %v6976_v33 = vsel %vm4008_vm12, %v13084_v56, %v13104_v30  ;;  %v6726_v62 = vsel %vm2431_vm5, %v20371_v14, %v6646_v51  ;;  %11587 = vmatprep.subr.mxu0 %v20339_v38 }
 0x8da   : > { %v6582_v60 = vpop.permute.xlu1 %6581  ;;  %v7047_v23 = vpack.c.bf16 %v6976_v33, %v6975_v44  ;;  %v6773_v3 = vmul.f32 %v18024_v16, %v6726_v62  ;;  %v6827_v15 = vmax.f32 %v6787_v4, 0.0  ;;  %11588 = vmatpush3.msra.mxu0 %v7415_v27 }
 0x8db   : > { %v6694_v25 = vsel %vm2431_vm5, %v20372_v41, %v6582_v60  ;;  %11589 = vmatprep.subr.mxu0 %v20339_v38 }
 0x8dc   : > { %v6741_v19 = vmul.f32 %v18024_v16, %v6694_v25  ;;  %7362 = vmatmul.mubr.bf16.gmra.mxu1 %v7047_v23  ;;  %v6820_v10 = vadd.f32 %v18034_v45, %v6773_v3  ;;  %11590 = vmatpush3.msra.mxu0 %v7414_v20 }
 0x8dd   : > { %11111 = vmatprep.mubr.msk.bf16.mxu1 %vm2472_vm6, %v7052_v49  ;;  %11591 = vmatprep.subr.mxu0 %v20339_v38 }
 0x8de   : > { %v6788_v56 = vadd.f32 %v18034_v45, %v6741_v19  ;;  %v6644_v26 = vpop.permute.xlu1 %6643  ;;  %v13112_v28 = vpop.permute.xlu0 %13111  ;;  %v6860_v21 = vmax.f32 %v6820_v10, 0.0  ;;  %11592 = vmatpush3.msra.mxu0 %v7413_v55 }
 0x8df   : > { %v6725_v48 = vsel %vm2431_vm5, %v20373_v47, %v6644_v26  ;;  %v13114_v17 = vunpack.i.h.bf16 %v13112_v28  ;;  %v13113_v5 = vunpack.i.l.bf16 %v13112_v28  ;;  %11593 = vmatprep.subr.mxu0 %v20339_v38  ;;  %v11078_v47 = vld [vmem:[%s20375_s6] ss:$0 sm:$0xff]  ;;  %s20376_s6 = sld [smem:[#allocation23_spill]] }
 0x8e0   : > { %v6772_v1 = vmul.f32 %v18024_v16, %v6725_v48  ;;  %v6828_v24 = vmax.f32 %v6788_v56, 0.0  ;;  %11594 = vmatpush3.msra.mxu0 %v7412_v12 }
 0x8e1   : > { %v6978_v52 = vsel %vm4008_vm12, %v13099_v53, %v13114_v17  ;;  %v6977_v43 = vsel %vm4008_vm12, %v13098_v39, %v13113_v5  ;;  %11595 = vmatprep.subr.mxu0 %v20339_v38 }
 0x8e2   : > { %v6819_v46 = vadd.f32 %v18034_v45, %v6772_v1  ;;  %v13107_v18 = vpop.permute.xlu1 %13106  ;;  %v13117_v0 = vpop.permute.xlu0 %13116  ;;  %v7051_v35 = vpack.c.bf16 %v6978_v52, %v6977_v43  ;;  %11596 = vmatpush3.msra.mxu0 %v7411_v37 }
 0x8e3   : > { %v13109_v40 = vunpack.i.h.bf16 %v13107_v18  ;;  %v13108_v57 = vunpack.i.l.bf16 %v13107_v18  ;;  %v13119_v29 = vunpack.i.h.bf16 %v13117_v0  ;;  %v13118_v7 = vunpack.i.l.bf16 %v13117_v0  ;;  %11597 = vmatprep.subr.mxu0 %v20339_v38 }
 0x8e4   : > { %v6859_v22 = vmax.f32 %v6819_v46, 0.0  ;;  %7370 = vmatmul.mubr.bf16.gmra.mxu1 %v7051_v35  ;;  %11598 = vmatpush3.msra.mxu0 %v7410_v31 }
 0x8e5   : > { %v6964_v16 = vsel %vm2472_vm6, %v6828_v24, %v13109_v40  ;;  %v6963_v11 = vsel %vm2472_vm6, %v6827_v15, %v13108_v57  ;;  %v6971_v42 = vsel %vm3926_vm10, %v13108_v57, %v13118_v7  ;;  %v6972_v34 = vsel %vm3926_vm10, %v13109_v40, %v13119_v29  ;;  %11602 = vmatprep.subr.mxu0 %v20339_v38 }
 0x8e6   : > { %v7056_v45 = vpack.c.bf16 %v6860_v21, %v6859_v22  ;;  %v13122_v53 = vpop.permute.xlu1 %13121  ;;  %v7054_v39 = vpack.c.bf16 %v6972_v34, %v6971_v42  ;;  %v7053_v58 = vpack.c.bf16 %v6964_v16, %v6963_v11 }
 0x8e7   : > { %v13124_v50 = vunpack.i.h.bf16 %v13122_v53  ;;  %v13123_v32 = vunpack.i.l.bf16 %v13122_v53 }
 0x8e8   : > { %7312 = vmatprep.mubr.bf16.mxu0 %v7054_v39  ;;  %11112 = vmatprep.mubr.msk.bf16.mxu1 %vm2472_vm6, %v7056_v45 }
 0x8e9   : > { %v6979_v6 = vsel %vm4008_vm12, %v13118_v7, %v13123_v32  ;;  %v6980_v61 = vsel %vm4008_vm12, %v13119_v29, %v13124_v50  ;;  %7313 = vmatmul.mubr.bf16.gmra.mxu0 %v7053_v58 }
 0x8ea   : > { %v7055_v36 = vpack.c.bf16 %v6980_v61, %v6979_v6  ;;  %11599 = vmatprep.mubr.msk.f32.mxu0 %vm20021_vm1, %v20339_v38 }
 0x8ec   : > { %7378 = vmatmul.mubr.bf16.gmra.mxu1 %v7055_v36 }
 0x973   : > { %v11312_v9 = vpop.f32.mrf.mxu0 }
 0x975   : > { %v11313_v30 = vpop.f32.mrf.mxu0 }
 0x976   : > { %v11314_v56 = vadd.f32 %v11313_v30, %v11312_v9 }
 0x977   : > { %v11315_v54 = vpop.f32.mrf.mxu0 }
 0x978   : > { %v7291_v1 = vadd.f32 %v11314_v56, %v11078_v47  ;;  %v7497_v56 = vld [vmem:[%s20376_s6 + $0x10] sm:$0xff] }
 0x979   : > { %v11316_v51 = vpop.f32.mrf.mxu0 }
 0x97a   : > { %v11317_v3 = vadd.f32 %v11316_v51, %v11315_v54 }
 0x97b   : > { %v11318_v13 = vpop.f32.mrf.mxu0 }
 0x97c   : > { %v7294_v17 = vadd.f32 %v11317_v3, %v11078_v47 }
 0x97d   : > { %v11319_v44 = vpop.f32.mrf.mxu0 }
 0x97e   : > { %v11320_v26 = vadd.f32 %v11319_v44, %v11318_v13 }
 0x97f   : > { %v11321_v33 = vpop.f32.mrf.mxu0 }
 0x980   : > { %v7299_v15 = vadd.f32 %v11320_v26, %v11078_v47  ;;  %v7496_v26 = vld [vmem:[%s20376_s6 + $0x8] sm:$0xff] }
 0x981   : > { %v11322_v8 = vpop.f32.mrf.mxu0 }
 0x982   : > { %v11323_v48 = vadd.f32 %v11322_v8, %v11321_v33 }
 0x984   : > { %v7302_v35 = vadd.f32 %v11323_v48, %v11078_v47  ;;  %v7418_v48 = vld [vmem:[%s20378_s19] sm:$0x1]  ;;  %s20382_s19 = sld [smem:[#allocation28_spill]] }
 0x992   : > { %v7355_v14 = vpop.f32.mrf.mxu1 }
 0x993   : > { %v18310_v46 = vadd.f32 %v7355_v14, %v7291_v1 }
 0x994   : > { %v7357_v62 = vpop.f32.mrf.mxu1 }
 0x995   : > { %v7387_v16 = vsel %vm20019_vm15, %v18310_v46, 0.0 }
 0x996   : > { %v7358_v60 = vpop.f32.mrf.mxu1 }
 0x997   : > { %v11324_v23 = vpop.f32.mrf.mxu0  ;;  %v18308_v52 = vadd.f32 %v7358_v60, %v7294_v17 }
 0x998   : > { %v7360_v49 = vpop.f32.mrf.mxu1 }
 0x999   : > { %v11325_v41 = vpop.f32.mrf.mxu0  ;;  %v7388_v57 = vsel %vm20019_vm15, %v18308_v52, 0.0 }
 0x99a   : > { %v11326_v43 = vadd.f32 %v11325_v41, %v11324_v23  ;;  %v7389_v53 = vadd.f32 %v7388_v57, %v7387_v16  ;;  %v13785_v57 = vld [vmem:[%s14191_s12 + $0x28] sm:$0xff] }
 0x99b   : > { %v11327_v4 = vpop.f32.mrf.mxu0 }
 0x99c   : > { %v7363_v25 = vpop.f32.mrf.mxu1  ;;  %v7307_v7 = vadd.f32 %v11326_v43, %v11078_v47 }
 0x99d   : > { %v11328_v10 = vpop.f32.mrf.mxu0  ;;  %v18312_v18 = vadd.f32 %v7363_v25, %v7299_v15 }
 0x99e   : > { %v7365_v19 = vpop.f32.mrf.mxu1  ;;  %v11329_v0 = vadd.f32 %v11328_v10, %v11327_v4  ;;  %v7498_v4 = vld [vmem:[%s20376_s6 + $0x18] sm:$0x3f]  ;;  %v13781_v10 = vld [vmem:[%s14191_s12 + $0x8] sm:$0xff] }
 0x99f   : > { %v7390_v11 = vsel %vm20019_vm15, %v18312_v18, 0.0 }
 0x9a0   : > { %v7366_v28 = vpop.f32.mrf.mxu1  ;;  %v7310_v34 = vadd.f32 %v11329_v0, %v11078_v47  ;;  %v7391_v61 = vadd.f32 %v7390_v11, %v7389_v53  ;;  %v13783_v0 = vld [vmem:[%s14191_s12 + $0x18] sm:$0xff]  ;;  %v13685_v53 = vld [vmem:[%s20379_s21 + $0x20] sm:$0xff]  }
 0x9a1   : > { %v18316_v29 = vadd.f32 %v7366_v28, %v7302_v35  ;;  %v7495_v28 = vld [vmem:[%s20376_s6] sm:$0xff]  ;;  %v13682_v11 = vld [vmem:[%s20379_s21 + $0x38] sm:$0xff]  }
 0x9a2   : > { %v7368_v5 = vpop.f32.mrf.mxu1  ;;  %8265 = vmatpush1.bf16.msra.mxu1 %v13682_v11 }
 0x9a3   : > { %v7392_v58 = vsel %vm20019_vm15, %v18316_v29, 0.0  ;;  %v13780_v5 = vld [vmem:[%s14191_s12] sm:$0xff]  ;;  %8266 = vmatprep.subr.bf16.mxu1 %v20133_v2 }
 0x9a4   : > { %v7371_v24 = vpop.f32.mrf.mxu1  ;;  %v7393_v20 = vadd.f32 %v7392_v58, %v7391_v61  ;;  %v7621_v1 = vpack.c.bf16 %v13781_v10, %v13780_v5  ;;  %v13687_v58 = vld [vmem:[%s20379_s21 + $0x10] sm:$0xff]  }
 0x9a5   : > { %v18322_v42 = vadd.f32 %v7371_v24, %v7307_v7  ;;  %v13782_v24 = vld [vmem:[%s14191_s12 + $0x10] sm:$0xff] }
 0x9a6   : > { %v7373_v40 = vpop.f32.mrf.mxu1  ;;  %v7622_v35 = vpack.c.bf16 %v13783_v0, %v13782_v24 }
 0x9a7   : > { %v7394_v59 = vsel %vm20019_vm15, %v18322_v42, 0.0  ;;  %v13784_v40 = vld [vmem:[%s14191_s12 + $0x20] sm:$0xff] }
 0x9a8   : > { %v7374_v21 = vpop.f32.mrf.mxu1  ;;  %v7395_v30 = vadd.f32 %v7394_v59, %v7393_v20  ;;  %v7623_v7 = vpack.c.bf16 %v13785_v57, %v13784_v40  ;;  %v18391_v20 = vld [vmem:[%s20382_s19] ss:$0 sm:$0xff]  ;;  %s20385_s19 = sld [smem:[#allocation31_spill]] }
 0x9a9   : > { %v11330_v22 = vpop.f32.mrf.mxu0  ;;  %v18326_v50 = vadd.f32 %v7374_v21, %v7310_v34  ;;  %v13786_v21 = vld [vmem:[%s14191_s12 + $0x30] sm:$0xff] }
 0x9aa   : > { %v7376_v45 = vpop.f32.mrf.mxu1  ;;  %v13683_v34 = vld [vmem:[%s20379_s21 + $0x30] sm:$0xff]  }
 0x9ab   : > { %v11331_v39 = vpop.f32.mrf.mxu0  ;;  %v7396_v12 = vsel %vm20019_vm15, %v18326_v50, 0.0  ;;  %8267 = vmatpush1.bf16.msra.mxu1 %v13683_v34  ;;  %v13684_v45 = vld [vmem:[%s20379_s21 + $0x28] sm:$0xff]  }
 0x9ac   : > { %v11332_v32 = vadd.f32 %v11331_v39, %v11330_v22  ;;  %v7379_v6 = vpop.f32.mrf.mxu1  ;;  %v7397_v44 = vadd.f32 %v7396_v12, %v7395_v30  ;;  %v13787_v22 = vld [vmem:[%s14191_s12 + $0x38] sm:$0xff]  ;;  %8268 = vmatprep.subr.bf16.mxu1 %v20133_v2  ;;  %s20381_s12 = sld [smem:[#allocation27_spill]]  ;;  %v7761_v30 = vrot.slane %v20339_v38, 7 }
 0x9ad   : > { %v11333_v36 = vpop.f32.mrf.mxu0  ;;  %v7624_v16 = vpack.c.bf16 %v13787_v22, %v13786_v21  ;;  %v13686_v39 = vld [vmem:[%s20379_s21 + $0x18] sm:$0xff]  }
 0x9ae   : > { %v7315_v63 = vadd.f32 %v11332_v32, %v11078_v47  ;;  %v7381_v27 = vpop.f32.mrf.mxu1  ;;  %v13688_v32 = vld [vmem:[%s20379_s21 + $0x8] sm:$0xff]  }
 0x9af   : > { %v11334_v55 = vpop.f32.mrf.mxu0  ;;  %8269 = vmatpush1.bf16.msra.mxu1 %v13684_v45 }
 0x9b0   : > { %v18332_v37 = vadd.f32 %v7379_v6, %v7315_v63  ;;  %v11335_v31 = vadd.f32 %v11334_v55, %v11333_v36  ;;  %v7382_v9 = vpop.f32.mrf.mxu1  ;;  %8270 = vmatprep.subr.bf16.mxu1 %v20133_v2 }
 0x9b2   : > { %v7398_v54 = vsel %vm20019_vm15, %v18332_v37, 0.0  ;;  %v7318_v51 = vadd.f32 %v11335_v31, %v11078_v47  ;;  %v7384_v13 = vpop.f32.mrf.mxu1  ;;  %v13681_v47 = vld [vmem:[%s20377_s17] sm:$0xff]   ;;  %s20380_s17 = sld [smem:[#allocation26_spill]] }
 0x9b3   : > { %v7399_v14 = vadd.f32 %v7398_v54, %v7397_v44  ;;  %8271 = vmatpush1.bf16.msra.mxu1 %v13685_v53  ;;  %v18385_v63 = vld [vmem:[%s20381_s12] ss:$0 sm:$0xff]  ;;  %s20384_s12 = sld [smem:[#allocation33_spill]] }
 0x9b4   : > { %v18336_v33 = vadd.f32 %v7382_v9, %v7318_v51  ;;  %8272 = vmatprep.subr.bf16.mxu1 %v20133_v2 }
 0x9b6   : > { %v7400_v62 = vsel %vm20019_vm15, %v18336_v33, 0.0 }
 0x9b7   : > { %v7401_v8 = vadd.f32 %v7400_v62, %v7399_v14  ;;  %8273 = vmatpush1.bf16.msra.mxu1 %v13686_v39 }
 0x9b8   : > { %8274 = vmatprep.subr.bf16.mxu1 %v20133_v2  ;;  %v18382_v36 = vld [vmem:[%s20380_s17] ss:$0 sm:$0xff]  ;;  %s13908_s17 = smov 40  }
 0x9b9   : > { %v7402_v60 = vrot.slane %v7401_v8, 4 }
 0x9bb   : > { %v7403_v23 = vadd.f32 %v7402_v60, %v7401_v8  ;;  %8275 = vmatpush1.bf16.msra.mxu1 %v13687_v58 }
 0x9bc   : > { %8276 = vmatprep.subr.bf16.mxu1 %v20133_v2 }
 0x9bd   : > { %v7404_v49 = vrot.slane %v7403_v23, 2 }
 0x9bf   : > { %v7405_v41 = vadd.f32 %v7404_v49, %v7403_v23  ;;  %8277 = vmatpush1.bf16.msra.mxu1 %v13688_v32 }
 0x9c0   : > { %8278 = vmatprep.subr.bf16.mxu1 %v20133_v2 }
 0x9c1   : > { %v7406_v25 = vrot.slane %v7405_v41, 1 }
 0x9c3   : > { %v7407_v3 = vadd.f32 %v7406_v25, %v7405_v41 }
 0x9c5   : > { %v7409_v19 = vmul.f32 0.015625, %v7407_v3 }
 0x9c7   : > { %11600 = vmatmul.mubr.msk.f32.vlgmr.msra.gmra.mxu0 %vm20019_vm15, %v7409_v19  ;;  %vm7500_vm15 = vcmask 244736   ;;  %v13689_v19 = vld [vmem:[%s20379_s21] sm:$0xff]  }
 0x9c8   : > { %11603 = vmatpush3.msk.msra.mxu0 %vm7504_vm13, %v7498_v4  ;;  %11610 = vmatprep.mubr.msk.f32.mxu0 %vm20021_vm1, %v20339_v38  ;;  %vm8754_vm1 = vcmask 1014784  }
 0x9c9   : > { %11604 = vmatprep.subr.mxu0 %v20339_v38  ;;  %8279 = vmatpush1.bf16.msra.mxu1 %v13689_v19 }
 0x9ca   : > { %11605 = vmatpush3.msra.mxu0 %v7497_v56  ;;  %8284 = vmatprep.subr.bf16.mxu1 %v20133_v2 }
 0x9cb   : > { %11606 = vmatprep.subr.mxu0 %v20339_v38 }
 0x9cc   : > { %11607 = vmatpush3.msra.mxu0 %v7496_v26 }
 0x9cd   : > { %11608 = vmatprep.subr.mxu0 %v20339_v38 }
 0x9ce   : > { %11609 = vmatpush3.msra.mxu0 %v7495_v28 }
 0x9cf   : > { %11613 = vmatprep.subr.bf16.mxu0 %v13681_v47 }
 0xa87   : > { %v7491_v17 = vpop.f32.mrf.mxu0 }
 0xa88   : > { %v7492_v43 = vadd.f32 %v7491_v17, %v7418_v48 }
 0xa89   : > { %v11601_v15 = vpop.f32.mrf.mxu0 }
 0xa8a   : > { %11611 = vmatmul.mubr.msk.f32.vlgmr.msra.gmra.mxu0 %vm7500_vm15, %v7492_v43  ;;  %vm7779_vm15 = vcmask 1040384  }
 0xa8b   : > { %11614 = vmatpush3.bf16.msra.mxu0 %v13681_v47  ;;  %11615 = vmatprep.mubr.msk.bf16.mxu0 %vm2554_vm8, %v7621_v1  ;;  %v18412_v23 = vsel %vm7779_vm15, 0.0, %v7761_v30  ;;  %v7789_v3 = vsel %vm7779_vm15, %v7761_v30, 0.0 }
 0xa8c   : > { %v7862_v47 = vrot.slane %v18412_v23, 2  ;;  %v7863_v48 = vrot.slane %v7789_v3, 2  ;;  %v7814_v24 = vrot.slane %v18412_v23, 1  ;;  %v7815_v0 = vrot.slane %v7789_v3, 1 }
 0xa8e   : > { %11616 = vmatmul.mubr.msk.bf16.vlgmr.msra.gmra.mxu0 %vm2554_vm8, %v7622_v35  ;;  %v18441_v45 = vsel %vm7504_vm13, %v7862_v47, %v7863_v48  ;;  %v18451_v32 = vsel %vm1408_vm0, %v7814_v24, %v7815_v0 }
 0xa8f   : > { %11619 = vmatprep.mubr.msk.bf16.mxu0 %vm2554_vm8, %v7623_v7 }
 0xa96   : > { %11620 = vmatmul.mubr.msk.bf16.gmra.mxu0 %vm2554_vm8, %v7624_v16 }
 0xb4a   : > { %v18379_v6 = vpop.f32.mrf.mxu0 }
 0xb4c   : > { %v11612_v61 = vpop.f32.mrf.mxu0 }
 0xb4e   : > { %v11617_v59 = vpop.f32.mrf.mxu0 }
 0xb4f   : > { %v18388_v27 = vadd.f32 %v11617_v59, %v18382_v36 }
 0xb50   : > { %v7684_v55 = vpop.f32.mrf.mxu0 }
 0xb51   : > { %v7724_v12 = vmul.f32 %v18385_v63, %v18388_v27  ;;  %v18396_v31 = vadd.f32 %v18382_v36, %v7684_v55 }
 0xb52   : > { %v11618_v9 = vpop.f32.mrf.mxu0 }
 0xb53   : > { %v7739_v54 = vadd.f32 %v18391_v20, %v7724_v12  ;;  %v7722_v51 = vmul.f32 %v18385_v63, %v18396_v31  ;;  %v18403_v13 = vadd.f32 %v11618_v9, %v18382_v36 }
 0xb54   : > { %v7687_v44 = vpop.f32.mrf.mxu0 }
 0xb55   : > { %v7737_v14 = vadd.f32 %v18391_v20, %v7722_v51  ;;  %v7725_v62 = vmul.f32 %v18385_v63, %v18403_v13  ;;  %v18409_v8 = vadd.f32 %v18382_v36, %v7687_v44  ;;  %v7747_v60 = vmax.f32 %v7739_v54, 0.0 }
 0xb56   : > { %v11621_v26 = vpop.f32.mrf.mxu0 }
 0xb57   : > { %v7745_v49 = vmax.f32 %v7737_v14, 0.0  ;;  %v7740_v41 = vadd.f32 %v18391_v20, %v7725_v62  ;;  %v7723_v25 = vmul.f32 %v18385_v63, %v18409_v8  ;;  %v7764_v28 = vrot.slane %v7747_v60, 7 }
 0xb58   : > { %v7700_v21 = vpop.f32.mrf.mxu0 }
 0xb59   : > { %v7762_v4 = vrot.slane %v7745_v49, 7  ;;  %v7748_v56 = vmax.f32 %v7740_v41, 0.0  ;;  %v7738_v1 = vadd.f32 %v18391_v20, %v7723_v25  ;;  %v18433_v22 = vsel %vm7779_vm15, 0.0, %v7764_v28 }
 0xb5a   : > { %v18436_v11 = vadd.f32 %v18382_v36, %v7700_v21  ;;  %v11622_v55 = vpop.f32.mrf.mxu0  ;;  %v7792_v12 = vsel %vm7779_vm15, %v7764_v28, 0.0  ;;  %v7823_v49 = vrot.slane %v18433_v22, 1  ;;  %v7871_v25 = vrot.slane %v18433_v22, 2 }
 0xb5b   : > { %v18421_v17 = vsel %vm7779_vm15, 0.0, %v7762_v4  ;;  %v7790_v5 = vsel %vm7779_vm15, %v7762_v4, 0.0  ;;  %v7765_v10 = vrot.slane %v7748_v56, 7  ;;  %v7746_v7 = vmax.f32 %v7738_v1, 0.0 }
 0xb5c   : > { %v7865_v43 = vrot.slane %v18421_v17, 2  ;;  %v7866_v15 = vrot.slane %v7790_v5, 2  ;;  %v7817_v35 = vrot.slane %v18421_v17, 1  ;;  %v7818_v40 = vrot.slane %v7790_v5, 1 }
 0xb5d   : > { %v18430_v57 = vsel %vm7779_vm15, 0.0, %v7765_v10  ;;  %v7763_v16 = vrot.slane %v7746_v7, 7  ;;  %v7793_v59 = vsel %vm7779_vm15, %v7765_v10, 0.0  ;;  %v18462_v30 = vadd.f32 %v11622_v55, %v18382_v36 }
 0xb5e   : > { %v13125_v34 = vpack.i.bf16 %v18430_v57, %v18433_v22  ;;  %v18444_v53 = vsel %vm7504_vm13, %v7865_v43, %v7866_v15  ;;  %v18454_v61 = vsel %vm1408_vm0, %v7817_v35, %v7818_v40  ;;  %v7726_v44 = vmul.f32 %v18385_v63, %v18436_v11 }
 0xb5f   : > { %v18447_v39 = vsel %vm7779_vm15, 0.0, %v7763_v16  ;;  %v7791_v58 = vsel %vm7779_vm15, %v7763_v16, 0.0  ;;  %v13135_v9 = vpack.i.bf16 %v18444_v53, %v18441_v45  ;;  %v13130_v14 = vpack.i.bf16 %v18454_v61, %v18451_v32 }
 0xb60   : > { %13126 = vrot.lane.b32.xlu0 %v13125_v34, %s20118_s2  ;;  %v7820_v54 = vrot.slane %v18447_v39, 1  ;;  %v7821_v51 = vrot.slane %v7791_v58, 1  ;;  %v7874_v62 = vrot.slane %v18430_v57, 2  ;;  %v7875_v60 = vrot.slane %v7793_v59, 2 }
 0xb61   : > { %13136 = vrot.lane.b32.xlu1 %v13135_v9, %s20116_s23  ;;  %v7824_v41 = vrot.slane %v7792_v12, 1  ;;  %v7872_v3 = vrot.slane %v7792_v12, 2  ;;  %v7868_v19 = vrot.slane %v18447_v39, 2  ;;  %v7729_v4 = vmul.f32 %v18385_v63, %v18462_v30 }
 0xb62   : > { %v13140_v56 = vpack.i.bf16 %v18433_v22, %v18447_v39  ;;  %v7869_v28 = vrot.slane %v7791_v58, 2  ;;  %v7741_v47 = vadd.f32 %v18391_v20, %v7726_v44  ;;  %v13145_v48 = vpack.i.bf16 %v18447_v39, %v18421_v17  ;;  %v7703_v58 = vpop.f32.mrf.mxu0 }
 0xb63   : > { %v7822_v5 = vsel %vm1408_vm0, %v7820_v54, %v7821_v51  ;;  %v7826_v10 = vrot.slane %v18430_v57, 1  ;;  %v7827_v1 = vrot.slane %v7793_v59, 1  ;;  %v18485_v43 = vadd.f32 %v11621_v26, %v18382_v36 }
 0xb64   : > { %13131 = vrot.lane.b32.xlu0 %v13130_v14, %s20119_s5  ;;  %v18489_v15 = vsel %vm7504_vm13, %v7874_v62, %v7875_v60  ;;  %v7825_v24 = vsel %vm1408_vm0, %v7823_v49, %v7824_v41  ;;  %v7744_v0 = vadd.f32 %v18391_v20, %v7729_v4  ;;  %v7873_v40 = vsel %vm7504_vm13, %v7871_v25, %v7872_v3  ;;  %v13690_v60 = vld [vmem:[%s20379_s21 + $0x68] ss:$0 sps:$4 sm:$0xff]  }
 0xb65   : > { %13141 = vrot.lane.b32.xlu1 %v13140_v56, %s20135_s18  ;;  %v13165_v35 = vpack.i.bf16 %v7825_v24, %v7822_v5  ;;  %v7749_v7 = vmax.f32 %v7741_v47, 0.0  ;;  %v13150_v21 = vpack.i.bf16 %v18489_v15, %v7873_v40  ;;  %v7870_v26 = vsel %vm7504_vm13, %v7868_v19, %v7869_v28  ;;  %v13691_v47 = vld [vmem:[%s20379_s21 + $0x60] sm:$0xff]  }
 0xb66   : > { %v7728_v16 = vmul.f32 %v18385_v63, %v18485_v43  ;;  %v7828_v34 = vsel %vm1408_vm0, %v7826_v10, %v7827_v1  ;;  %v7752_v59 = vmax.f32 %v7744_v0, 0.0  ;;  %v13175_v55 = vpack.i.bf16 %v7873_v40, %v7870_v26 }
 0xb67   : > { %v7766_v12 = vrot.slane %v7749_v7, 7  ;;  %v13155_v9 = vpack.i.bf16 %v7828_v34, %v7825_v24  ;;  %v18504_v51 = vadd.f32 %v18382_v36, %v7703_v58  ;;  %v13160_v62 = vpack.i.bf16 %v7870_v26, %v18444_v53  ;;  %v13692_v24 = vld [vmem:[%s20379_s21 + $0x58] sm:$0xff]   ;;  %v13693_v26 = vld [vmem:[%s20379_s21 + $0x50] sm:$0xff]  }
 0xb68   : > { %13146 = vrot.lane.b32.xlu0 %v13145_v48, %s20118_s2  ;;  %v7743_v54 = vadd.f32 %v18391_v20, %v7728_v16  ;;  %v7769_v44 = vrot.slane %v7752_v59, 7  ;;  %v13170_v4 = vpack.i.bf16 %v7822_v5, %v18454_v61  ;;  %v8262_v56 = vsel %vm2744_vm2, %v13690_v60, 0 }
 0xb69   : > { %13166 = vrot.lane.b32.xlu1 %v13165_v35, %s13908_s17  ;;  %v18509_v14 = vsel %vm7779_vm15, 0.0, %v7766_v12  ;;  %v7794_v41 = vsel %vm7779_vm15, %v7766_v12, 0.0  ;;  %v7727_v25 = vmul.f32 %v18385_v63, %v18504_v51  ;;  %8285 = vmatpush2.bf16.msra.mxu1 %v8262_v56  ;;  %vm8967_vm2 = vcmask 1041408  }
 0xb6a   : > { %v7751_v49 = vmax.f32 %v7743_v54, 0.0  ;;  %v18519_v36 = vsel %vm7779_vm15, 0.0, %v7769_v44  ;;  %v13190_v3 = vpack.i.bf16 %v18509_v14, %v18430_v57  ;;  %v7829_v53 = vrot.slane %v18509_v14, 1  ;;  %8286 = vmatprep.subr.bf16.mxu1 %v20133_v2  ;;  %v13694_v54 = vld [vmem:[%s20379_s21 + $0x48] sm:$0xff]  }
 0xb6b   : > { %v7830_v19 = vrot.slane %v7794_v41, 1  ;;  %v7742_v63 = vadd.f32 %v18391_v20, %v7727_v25  ;;  %v13195_v48 = vpack.i.bf16 %v18412_v23, %v18519_v36  ;;  %v7877_v10 = vrot.slane %v18509_v14, 2 }
 0xb6c   : > { %13151 = vrot.lane.b32.xlu0 %v13150_v21, %s20120_s28  ;;  %v7768_v28 = vrot.slane %v7751_v49, 7  ;;  %v7878_v61 = vrot.slane %v7794_v41, 2  ;;  %v7797_v58 = vsel %vm7779_vm15, %v7769_v44, 0.0 }
 0xb6d   : > { %13176 = vrot.lane.b32.xlu1 %v13175_v55, %s20173_s8  ;;  %v18535_v5 = vsel %vm1408_vm0, %v7829_v53, %v7830_v19  ;;  %v7750_v1 = vmax.f32 %v7742_v63, 0.0  ;;  %8287 = vmatpush2.bf16.msra.mxu1 %v13691_v47  ;;  %v7964_v12 = vrot.slane %v7797_v58, 2  ;;  %v13695_v53 = vld [vmem:[%s20379_s21 + $0x40] sm:$0xff]  }
 0xb6e   : > { %v18538_v20 = vsel %vm7779_vm15, 0.0, %v7768_v28  ;;  %8288 = vmatprep.subr.bf16.mxu1 %v20133_v2  ;;  %v13205_v0 = vpack.i.bf16 %v18535_v5, %v7828_v34  ;;  %v7879_v7 = vsel %vm7504_vm13, %v7877_v10, %v7878_v61  ;;  %v7796_v16 = vsel %vm7779_vm15, %v7768_v28, 0.0 }
 0xb6f   : > { %v13200_v40 = vpack.i.bf16 %v18519_v36, %v18538_v20  ;;  %v7767_v21 = vrot.slane %v7750_v1, 7  ;;  %v7883_v34 = vrot.slane %v18538_v20, 2  ;;  %v7884_v59 = vrot.slane %v7796_v16, 2 }
 0xb70   : > { %13156 = vrot.lane.b32.xlu0 %v13155_v9, %s20136_s3  ;;  %v7836_v19 = vrot.slane %v7796_v16, 1 }
 0xb71   : > { %13186 = vrot.lane.b32.xlu1 %v13175_v55, %s20116_s23  ;;  %8289 = vmatpush2.bf16.msra.mxu1 %v13692_v24  ;;  %v7963_v55 = vrot.slane %v18519_v36, 2  ;;  %v18558_v9 = vsel %vm7779_vm15, 0.0, %v7767_v21  ;;  %v7795_v44 = vsel %vm7779_vm15, %v7767_v21, 0.0  ;;  %v7885_v25 = vsel %vm7504_vm13, %v7883_v34, %v7884_v59 }
 0xb72   : > { %8290 = vmatprep.subr.bf16.mxu1 %v20133_v2  ;;  %v13230_v60 = vpack.i.bf16 %v18558_v9, %v18509_v14  ;;  %v7880_v49 = vrot.slane %v18558_v9, 2  ;;  %v7881_v41 = vrot.slane %v7795_v44, 2  ;;  %v7832_v56 = vrot.slane %v18558_v9, 1 }
 0xb73   : > { %v7833_v28 = vrot.slane %v7795_v44, 1 }
 0xb74   : > { %13161 = vrot.lane.b32.xlu0 %v13160_v62, %s20120_s28  ;;  %v7937_v62 = vrot.slane %v7797_v58, 1 }
 0xb75   : > { %13191 = vrot.lane.b32.xlu1 %v13190_v3, %s20135_s18  ;;  %8291 = vmatpush2.bf16.msra.mxu1 %v13693_v26  ;;  %v7965_v3 = vsel %vm7504_vm13, %v7963_v55, %v7964_v12  ;;  %v7834_v1 = vsel %vm1408_vm0, %v7832_v56, %v7833_v28 }
 0xb76   : > { %8292 = vmatprep.subr.bf16.mxu1 %v20133_v2  ;;  %v13235_v63 = vpack.i.bf16 %v7965_v3, %v7885_v25  ;;  %v13280_v26 = vpack.i.bf16 %v18441_v45, %v7965_v3 }
 0xb78   : > { %13171 = vrot.lane.b32.xlu0 %v13170_v4, %s20136_s3  ;;  %v13225_v4 = vpack.i.bf16 %v18538_v20, %v18558_v9 }
 0xb79   : > { %13196 = vrot.lane.b32.xlu1 %v13195_v48, %s20135_s18  ;;  %8293 = vmatpush2.bf16.msra.mxu1 %v13694_v54  ;;  %v7882_v48 = vsel %vm7504_vm13, %v7880_v49, %v7881_v41 }
 0xb7a   : > { %8294 = vmatprep.subr.bf16.mxu1 %v20133_v2  ;;  %v13245_v61 = vpack.i.bf16 %v7882_v48, %v7879_v7  ;;  %v13260_v21 = vpack.i.bf16 %v7885_v25, %v7882_v48 }
 0xb7c   : > { %13181 = vrot.lane.b32.xlu0 %v13165_v35, %s20119_s5  ;;  %v13210_v35 = vpack.i.bf16 %v7879_v7, %v18489_v15  ;;  %v7936_v15 = vrot.slane %v18519_v36, 1  ;;  %v7835_v36 = vrot.slane %v18538_v20, 1 }
 0xb7d   : > { %13206 = vrot.lane.b32.xlu1 %v13205_v0, %s13908_s17  ;;  %8295 = vmatpush2.bf16.msra.mxu1 %v13695_v53 }
 0xb7e   : > { %v7938_v47 = vsel %vm1408_vm0, %v7936_v15, %v7937_v62  ;;  %v7837_v24 = vsel %vm1408_vm0, %v7835_v36, %v7836_v19 }
 0xb7f   : > { %v13240_v10 = vpack.i.bf16 %v18451_v32, %v7938_v47  ;;  %v13270_v7 = vpack.i.bf16 %v7938_v47, %v7837_v24 }
 0xb80   : > { %13201 = vrot.lane.b32.xlu0 %v13200_v40, %s20118_s2  ;;  %v13255_v40 = vpack.i.bf16 %v7834_v1, %v18535_v5 }
 0xb81   : > { %13211 = vrot.lane.b32.xlu1 %v13210_v35, %s20173_s8 }
 0xb84   : > { %13216 = vrot.lane.b32.xlu0 %v13205_v0, %s20119_s5  ;;  %v13250_v0 = vpack.i.bf16 %v7837_v24, %v7834_v1 }
 0xb85   : > { %13221 = vrot.lane.b32.xlu1 %v13210_v35, %s20116_s23 }
 0xb88   : > { %13231 = vrot.lane.b32.xlu0 %v13230_v60, %s20118_s2 }
 0xb89   : > { %13226 = vrot.lane.b32.xlu1 %v13225_v4, %s20135_s18 }
 0xb8c   : > { %13236 = vrot.lane.b32.xlu0 %v13235_v63, %s20120_s28 }
 0xb8d   : > { %13241 = vrot.lane.b32.xlu1 %v13240_v10, %s13908_s17 }
 0xb90   : > { %13246 = vrot.lane.b32.xlu0 %v13245_v61, %s20120_s28  ;;  %s20383_s28 = sld [smem:[#allocation30_spill]] }
 0xb91   : > { %13251 = vrot.lane.b32.xlu1 %v13250_v0, %s13908_s17  ;;  %s20386_s17 = sld [smem:[#allocation32_spill]] }
 0xb94   : > { %13256 = vrot.lane.b32.xlu0 %v13255_v40, %s20136_s3 }
 0xb95   : > { %13261 = vrot.lane.b32.xlu1 %v13260_v21, %s20173_s8 }
 0xb98   : > { %13266 = vrot.lane.b32.xlu0 %v13250_v0, %s20119_s5 }
 0xb99   : > { %13276 = vrot.lane.b32.xlu1 %v13260_v21, %s20116_s23 }
 0xb9c   : > { %13271 = vrot.lane.b32.xlu0 %v13270_v7, %s20136_s3 }
 0xb9d   : > { %13281 = vrot.lane.b32.xlu1 %v13280_v26, %s20173_s8 }
 0xbd2   : > { %v18597_v16 = vpop.permute.xlu0 %13126 }
 0xbd3   : > { %v13137_v5 = vpop.permute.xlu1 %13136 }
 0xbd4   : > { %v13139_v60 = vunpack.i.h.bf16 %v13137_v5  ;;  %v13138_v49 = vunpack.i.l.bf16 %v13137_v5 }
 0xbd6   : > { %v13132_v58 = vpop.permute.xlu0 %13131 }
 0xbd7   : > { %v13142_v35 = vpop.permute.xlu1 %13141  ;;  %v13134_v54 = vunpack.i.h.bf16 %v13132_v58  ;;  %v13133_v44 = vunpack.i.l.bf16 %v13132_v58 }
 0xbd8   : > { %v13144_v53 = vunpack.i.h.bf16 %v13142_v35  ;;  %v13143_v36 = vunpack.i.l.bf16 %v13142_v35 }
 0xbd9   : > { %v8063_v41 = vsel %vm2371_vm3, %v18421_v17, %v13134_v54  ;;  %v8062_v25 = vsel %vm2371_vm3, %v18412_v23, %v13133_v44 }
 0xbda   : > { %v13147_v34 = vpop.permute.xlu0 %13146  ;;  %v8070_v17 = vsel %vm2397_vm4, %v8062_v25, %v13138_v49  ;;  %v8071_v0 = vsel %vm2397_vm4, %v8063_v41, %v13139_v60 }
 0xbdb   : > { %v13167_v59 = vpop.permute.xlu1 %13166  ;;  %v13149_v56 = vunpack.i.h.bf16 %v13147_v34  ;;  %v13148_v28 = vunpack.i.l.bf16 %v13147_v34 }
 0xbdc   : > { %v13169_v63 = vunpack.i.h.bf16 %v13167_v59  ;;  %v13168_v47 = vunpack.i.l.bf16 %v13167_v59 }
 0xbdd   : > { %v8078_v34 = vsel %vm2431_vm5, %v8070_v17, %v13148_v28  ;;  %v8079_v59 = vsel %vm2431_vm5, %v8071_v0, %v13149_v56  ;;  %v13129_v28 = vunpack.i.h.bf16 %v18597_v16  ;;  %v13128_v56 = vunpack.i.l.bf16 %v18597_v16 }
 0xbde   : > { %v18599_v55 = vpop.permute.xlu0 %13151 }
 0xbdf   : > { %v13177_v12 = vpop.permute.xlu1 %13176 }
 0xbe0   : > { %v13179_v48 = vunpack.i.h.bf16 %v13177_v12  ;;  %v13178_v10 = vunpack.i.l.bf16 %v13177_v12 }
 0xbe2   : > { %v18601_v15 = vpop.permute.xlu0 %13156 }
 0xbe3   : > { %v13187_v62 = vpop.permute.xlu1 %13186 }
 0xbe6   : > { %v13162_v3 = vpop.permute.xlu0 %13161 }
 0xbe7   : > { %v13164_v19 = vunpack.i.h.bf16 %v13162_v3  ;;  %v13163_v4 = vunpack.i.l.bf16 %v13162_v3  ;;  %v13192_v24 = vpop.permute.xlu1 %13191 }
 0xbe8   : > { %v13193_v17 = vunpack.i.l.bf16 %v13192_v24 }
 0xbe9   : > { %v8103_v61 = vsel %vm2554_vm8, %v13164_v19, %v13144_v53  ;;  %v8102_v1 = vsel %vm2554_vm8, %v13163_v4, %v13143_v36 }
 0xbea   : > { %v8111_v40 = vsel %vm2704_vm9, %v8103_v61, %v13169_v63  ;;  %v8110_v21 = vsel %vm2704_vm9, %v8102_v1, %v13168_v47  ;;  %v13172_v7 = vpop.permute.xlu0 %13171  ;;  %v13189_v63 = vunpack.i.h.bf16 %v13187_v62  ;;  %v13188_v47 = vunpack.i.l.bf16 %v13187_v62 }
 0xbeb   : > { %v13174_v26 = vunpack.i.h.bf16 %v13172_v7  ;;  %v13173_v5 = vunpack.i.l.bf16 %v13172_v7  ;;  %v8118_v58 = vsel %vm3926_vm10, %v8110_v21, %v13178_v10  ;;  %v8119_v35 = vsel %vm3926_vm10, %v8111_v40, %v13179_v48  ;;  %v18619_v60 = vpop.permute.xlu1 %13196 }
 0xbec   : > { %v8154_v12 = vpack.c.bf16 %v8119_v35, %v8118_v58  ;;  %v13159_v48 = vunpack.i.h.bf16 %v18601_v15  ;;  %v13158_v10 = vunpack.i.l.bf16 %v18601_v15  ;;  %v13194_v1 = vunpack.i.h.bf16 %v13192_v24 }
 0xbed   : > { %v8086_v54 = vsel %vm2472_vm6, %v8078_v34, %v13173_v5  ;;  %v8087_v44 = vsel %vm2472_vm6, %v8079_v59, %v13174_v26 }
 0xbee   : > { %v8094_v49 = vsel %vm20020_vm7, %v8086_v54, %v13163_v4  ;;  %v8095_v41 = vsel %vm20020_vm7, %v8087_v44, %v13164_v19  ;;  %v13182_v25 = vpop.permute.xlu0 %13181  ;;  %11141 = vmatprep.mubr.msk.bf16.mxu1 %vm5627_vm14, %v8154_v12 }
 0xbef   : > { %v8153_v3 = vpack.c.bf16 %v8095_v41, %v8094_v49  ;;  %v13184_v53 = vunpack.i.h.bf16 %v13182_v25  ;;  %v13183_v36 = vunpack.i.l.bf16 %v13182_v25  ;;  %v13207_v61 = vpop.permute.xlu1 %13206 }
 0xbf0   : > { %v13209_v21 = vunpack.i.h.bf16 %v13207_v61  ;;  %v13208_v7 = vunpack.i.l.bf16 %v13207_v61 }
 0xbf1   : > { %v8065_v4 = vsel %vm2371_vm3, %v18433_v22, %v13184_v53  ;;  %v8064_v19 = vsel %vm2371_vm3, %v18447_v39, %v13183_v36  ;;  %8297 = vmatmul.mubr.bf16.vlgmr.msra.gmra.mxu1 %v8153_v3  ;;  %v13154_v22 = vunpack.i.h.bf16 %v18599_v55  ;;  %v13153_v39 = vunpack.i.l.bf16 %v18599_v55 }
 0xbf2   : > { %v8073_v0 = vsel %vm2397_vm4, %v8065_v4, %v13189_v63  ;;  %v8072_v16 = vsel %vm2397_vm4, %v8064_v19, %v13188_v47  ;;  %v18634_v40 = vpop.permute.xlu0 %13201 }
 0xbf3   : > { %v8081_v62 = vsel %vm2431_vm5, %v8073_v0, %v13129_v28  ;;  %v8080_v15 = vsel %vm2431_vm5, %v8072_v16, %v13128_v56  ;;  %v13212_v5 = vpop.permute.xlu1 %13211  ;;  %v8104_v58 = vsel %vm2554_vm8, %v13153_v39, %v13193_v17  ;;  %v8105_v35 = vsel %vm2554_vm8, %v13154_v22, %v13194_v1 }
 0xbf4   : > { %v8088_v26 = vsel %vm2472_vm6, %v8080_v15, %v13158_v10  ;;  %v8089_v24 = vsel %vm2472_vm6, %v8081_v62, %v13159_v48  ;;  %v13214_v34 = vunpack.i.h.bf16 %v13212_v5  ;;  %v13213_v59 = vunpack.i.l.bf16 %v13212_v5 }
 0xbf5   : > { %v8112_v54 = vsel %vm2704_vm9, %v8104_v58, %v13208_v7  ;;  %v8113_v44 = vsel %vm2704_vm9, %v8105_v35, %v13209_v21  ;;  %v8096_v49 = vsel %vm20020_vm7, %v8088_v26, %v13153_v39  ;;  %v8097_v55 = vsel %vm20020_vm7, %v8089_v24, %v13154_v22 }
 0xbf6   : > { %v13217_v12 = vpop.permute.xlu0 %13216  ;;  %v8120_v41 = vsel %vm3926_vm10, %v8112_v54, %v13213_v59  ;;  %v8121_v25 = vsel %vm3926_vm10, %v8113_v44, %v13214_v34  ;;  %v8155_v28 = vpack.c.bf16 %v8097_v55, %v8096_v49  ;;  %v13199_v54 = vunpack.i.h.bf16 %v18619_v60 }
 0xbf7   : > { %v13222_v3 = vpop.permute.xlu1 %13221  ;;  %v8156_v53 = vpack.c.bf16 %v8121_v25, %v8120_v41  ;;  %v13219_v47 = vunpack.i.h.bf16 %v13217_v12  ;;  %v13218_v48 = vunpack.i.l.bf16 %v13217_v12 }
 0xbf8   : > { %v13224_v4 = vunpack.i.h.bf16 %v13222_v3  ;;  %v13223_v19 = vunpack.i.l.bf16 %v13222_v3 }
 0xbf9   : > { %11142 = vmatprep.mubr.msk.bf16.mxu1 %vm5627_vm14, %v8156_v53  ;;  %v8067_v1 = vsel %vm2371_vm3, %v18509_v14, %v13219_v47  ;;  %v8066_v17 = vsel %vm2371_vm3, %v18430_v57, %v13218_v48 }
 0xbfa   : > { %v13232_v36 = vpop.permute.xlu0 %13231  ;;  %8305 = vmatmul.mubr.bf16.gmra.mxu1 %v8155_v28  ;;  %v8074_v7 = vsel %vm2397_vm4, %v8066_v17, %v13223_v19  ;;  %v8075_v22 = vsel %vm2397_vm4, %v8067_v1, %v13224_v4 }
 0xbfb   : > { %v13227_v56 = vpop.permute.xlu1 %13226  ;;  %v13234_v0 = vunpack.i.h.bf16 %v13232_v36  ;;  %v13233_v16 = vunpack.i.l.bf16 %v13232_v36 }
 0xbfc   : > { %v13229_v39 = vunpack.i.h.bf16 %v13227_v56  ;;  %v13228_v26 = vunpack.i.l.bf16 %v13227_v56 }
 0xbfd   : > { %v8082_v14 = vsel %vm2431_vm5, %v8074_v7, %v13233_v16  ;;  %v8083_v57 = vsel %vm2431_vm5, %v8075_v22, %v13234_v0  ;;  %v13198_v0 = vunpack.i.l.bf16 %v18619_v60  ;;  %v13204_v7 = vunpack.i.h.bf16 %v18634_v40 }
 0xbfe   : > { %v18651_v63 = vpop.permute.xlu0 %13236  ;;  %v13203_v22 = vunpack.i.l.bf16 %v18634_v40 }
 0xbff   : > { %v18653_v10 = vpop.permute.xlu1 %13241  ;;  %v13239_v44 = vunpack.i.h.bf16 %v18651_v63  ;;  %v13238_v19 = vunpack.i.l.bf16 %v18651_v63 }
 0xc02   : > { %v13247_v61 = vpop.permute.xlu0 %13246 }
 0xc03   : > { %v13249_v62 = vunpack.i.h.bf16 %v13247_v61  ;;  %v13248_v15 = vunpack.i.l.bf16 %v13247_v61  ;;  %v13252_v21 = vpop.permute.xlu1 %13251 }
 0xc04   : > { %v13254_v5 = vunpack.i.h.bf16 %v13252_v21  ;;  %v13253_v58 = vunpack.i.l.bf16 %v13252_v21 }
 0xc05   : > { %v8107_v59 = vsel %vm2554_vm8, %v13249_v62, %v13229_v39  ;;  %v8106_v12 = vsel %vm2554_vm8, %v13248_v15, %v13228_v26 }
 0xc06   : > { %v13257_v24 = vpop.permute.xlu0 %13256  ;;  %v8114_v56 = vsel %vm2704_vm9, %v8106_v12, %v13253_v58  ;;  %v8115_v47 = vsel %vm2704_vm9, %v8107_v59, %v13254_v5  ;;  %v13243_v5 = vunpack.i.l.bf16 %v18653_v10  ;;  %v8109_v58 = vsel %vm2554_vm8, %v13239_v44, %v13199_v54 }
 0xc07   : > { %v13259_v35 = vunpack.i.h.bf16 %v13257_v24  ;;  %v13258_v34 = vunpack.i.l.bf16 %v13257_v24  ;;  %v13262_v41 = vpop.permute.xlu1 %13261  ;;  %v13244_v24 = vunpack.i.h.bf16 %v18653_v10 }
 0xc08   : > { %v13264_v25 = vunpack.i.h.bf16 %v13262_v41  ;;  %v13263_v3 = vunpack.i.l.bf16 %v13262_v41 }
 0xc09   : > { %v8090_v49 = vsel %vm2472_vm6, %v8082_v14, %v13258_v34  ;;  %v8091_v55 = vsel %vm2472_vm6, %v8083_v57, %v13259_v35 }
 0xc0a   : > { %v13267_v53 = vpop.permute.xlu0 %13266  ;;  %v8098_v36 = vsel %vm20020_vm7, %v8090_v49, %v13248_v15  ;;  %v8099_v28 = vsel %vm20020_vm7, %v8091_v55, %v13249_v62  ;;  %v8122_v61 = vsel %vm3926_vm10, %v8114_v56, %v13263_v3  ;;  %v8123_v1 = vsel %vm3926_vm10, %v8115_v47, %v13264_v25  ;;  %v11126_v56 = vld [vmem:[%s20383_s28] ss:$0 sm:$0xff]  ;;  %s13910_s28 = smov 108  }
 0xc0b   : > { %v13269_v48 = vunpack.i.h.bf16 %v13267_v53  ;;  %v13268_v4 = vunpack.i.l.bf16 %v13267_v53  ;;  %v8157_v17 = vpack.c.bf16 %v8099_v28, %v8098_v36  ;;  %v13277_v15 = vpop.permute.xlu1 %13276  ;;  %v8158_v21 = vpack.c.bf16 %v8123_v1, %v8122_v61 }
 0xc0c   : > { %v13279_v63 = vunpack.i.h.bf16 %v13277_v15  ;;  %v13278_v39 = vunpack.i.l.bf16 %v13277_v15  ;;  %v8117_v55 = vsel %vm2704_vm9, %v8109_v58, %v13244_v24 }
 0xc0d   : > { %v8069_v16 = vsel %vm2371_vm3, %v18538_v20, %v13269_v48  ;;  %v8068_v62 = vsel %vm2371_vm3, %v18558_v9, %v13268_v4  ;;  %11143 = vmatprep.mubr.msk.bf16.mxu1 %vm5627_vm14, %v8158_v21  ;;  %v8108_v9 = vsel %vm2554_vm8, %v13238_v19, %v13198_v0 }
 0xc0e   : > { %v13272_v26 = vpop.permute.xlu0 %13271  ;;  %v8076_v35 = vsel %vm2397_vm4, %v8068_v62, %v13278_v39  ;;  %v8077_v34 = vsel %vm2397_vm4, %v8069_v16, %v13279_v63  ;;  %8313 = vmatmul.mubr.bf16.gmra.mxu1 %v8157_v17  ;;  %v8116_v54 = vsel %vm2704_vm9, %v8108_v9, %v13243_v5  ;;  %vm8720_vm9 = vcmask 883712  }
 0xc0f   : > { %v13274_v60 = vunpack.i.h.bf16 %v13272_v26  ;;  %v13273_v20 = vunpack.i.l.bf16 %v13272_v26  ;;  %v8084_v40 = vsel %vm2431_vm5, %v8076_v35, %v13203_v22  ;;  %v8085_v14 = vsel %vm2431_vm5, %v8077_v34, %v13204_v7  ;;  %v13282_v57 = vpop.permute.xlu1 %13281  ;;  %v13696_v35 = vld [vmem:[%s20384_s12 + $0x78] sm:$0xff]  }
 0xc10   : > { %v13284_v12 = vunpack.i.h.bf16 %v13282_v57  ;;  %v13283_v49 = vunpack.i.l.bf16 %v13282_v57  ;;  %v13697_v34 = vld [vmem:[%s20384_s12 + $0x38] sm:$0xff]   ;;  %11355 = vmatprep.subr.bf16.mxu0 %v13696_v35  ;;  %v13700_v57 = vld [vmem:[%s20384_s12 + $0x68] sm:$0xff]  }
 0xc11   : > { %v8092_v10 = vsel %vm2472_vm6, %v8084_v40, %v13273_v20  ;;  %v8093_v59 = vsel %vm2472_vm6, %v8085_v14, %v13274_v60  ;;  %v13698_v40 = vld [vmem:[%s20384_s12 + $0x70] sm:$0xff]   ;;  %11356 = vmatpush3.bf16.msra.mxu0 %v13697_v34 }
 0xc12   : > { %v8100_v41 = vsel %vm20020_vm7, %v8092_v10, %v13238_v19  ;;  %v8101_v25 = vsel %vm20020_vm7, %v8093_v59, %v13239_v44  ;;  %v8124_v3 = vsel %vm3926_vm10, %v8116_v54, %v13283_v49  ;;  %v8125_v53 = vsel %vm3926_vm10, %v8117_v55, %v13284_v12  ;;  %v13699_v14 = vld [vmem:[%s20384_s12 + $0x30] sm:$0xff]   ;;  %11357 = vmatprep.subr.bf16.mxu0 %v13698_v40  ;;  %v13701_v10 = vld [vmem:[%s20384_s12 + $0x28] sm:$0xff]   ;;  %v13702_v59 = vld [vmem:[%s20384_s12 + $0x60] sm:$0xff]  }
 0xc13   : > { %v8159_v36 = vpack.c.bf16 %v8101_v25, %v8100_v41  ;;  %v8160_v28 = vpack.c.bf16 %v8125_v53, %v8124_v3  ;;  %v18718_v12 = vld [vmem:[%s20385_s19] ss:$0 sm:$0xff]  ;;  %s13911_s19 = smov 52   ;;  %vm8737_vm7 = vcmask 424960  }
 0xc14   : > { %v18721_v54 = vld [vmem:[%s20386_s17] ss:$0 sm:$0xff]  ;;  %s20387_s17 = smov 124  }
 0xc15   : > { %11144 = vmatprep.mubr.msk.bf16.mxu1 %vm5627_vm14, %v8160_v28  ;;  %11358 = vmatpush3.bf16.msra.mxu0 %v13699_v14  ;;  %v13704_v28 = vld [vmem:[%s20384_s12 + $0x58] sm:$0xff]  }
 0xc16   : > { %8321 = vmatmul.mubr.bf16.gmra.mxu1 %v8159_v36  ;;  %11359 = vmatprep.subr.bf16.mxu0 %v13700_v57  ;;  %v13703_v36 = vld [vmem:[%s20384_s12 + $0x20] sm:$0xff]  }
 0xc19   : > { %11360 = vmatpush3.bf16.msra.mxu0 %v13701_v10 }
 0xc1a   : > { %11361 = vmatprep.subr.bf16.mxu0 %v13702_v59  ;;  %v13709_v59 = vld [vmem:[%s20384_s12 + $0x8] sm:$0xff]  }
 0xc1d   : > { %11362 = vmatpush3.bf16.msra.mxu0 %v13703_v36 }
 0xc1e   : > { %11363 = vmatprep.subr.bf16.mxu0 %v13704_v28 }
 0xcb1   : > { %v8298_v47 = vpop.f32.mrf.mxu1 }
 0xcb2   : > { %v8299_v48 = vadd.f32 %v11126_v56, %v8298_v47 }
 0xcb3   : > { %v8300_v4 = vpop.f32.mrf.mxu1 }
 0xcb4   : > { %8337 = vrot.lane.b32.xlu0 %v8299_v48, %s20119_s5 }
 0xcb5   : > { %v8301_v61 = vpop.f32.mrf.mxu1 }
 0xcb6   : > { %v8302_v1 = vadd.f32 %v11126_v56, %v8301_v61 }
 0xcb7   : > { %v8303_v19 = vpop.f32.mrf.mxu1 }
 0xcb8   : > { %8339 = vrot.lane.b32.xlu1 %v8302_v1, %s20119_s5 }
 0xcba   : > { %v8306_v44 = vpop.f32.mrf.mxu1 }
 0xcbb   : > { %v8307_v17 = vadd.f32 %v11126_v56, %v8306_v44 }
 0xcbc   : > { %v8308_v0 = vpop.f32.mrf.mxu1 }
 0xcbd   : > { %8341 = vrot.lane.b32.xlu0 %v8307_v17, %s20119_s5 }
 0xcbe   : > { %v8309_v16 = vpop.f32.mrf.mxu1 }
 0xcbf   : > { %v8310_v62 = vadd.f32 %v11126_v56, %v8309_v16  ;;  %v13705_v16 = vld [vmem:[%s20384_s12 + $0x18] sm:$0xff]  }
 0xcc0   : > { %v8311_v15 = vpop.f32.mrf.mxu1  ;;  %11364 = vmatpush3.bf16.msra.mxu0 %v13705_v16 }
 0xcc1   : > { %8343 = vrot.lane.b32.xlu1 %v8310_v62, %s20119_s5  ;;  %v13706_v62 = vld [vmem:[%s20384_s12 + $0x50] sm:$0xff]  }
 0xcc2   : > { %11365 = vmatprep.subr.bf16.mxu0 %v13706_v62 }
 0xcce   : > { %v8314_v21 = vpop.f32.mrf.mxu1 }
 0xccf   : > { %v8315_v7 = vadd.f32 %v11126_v56, %v8314_v21 }
 0xcd0   : > { %v8316_v22 = vpop.f32.mrf.mxu1 }
 0xcd1   : > { %8345 = vrot.lane.b32.xlu0 %v8315_v7, %s20119_s5 }
 0xcd2   : > { %v8317_v63 = vpop.f32.mrf.mxu1 }
 0xcd3   : > { %v8318_v39 = vadd.f32 %v11126_v56, %v8317_v63  ;;  %v13707_v63 = vld [vmem:[%s20384_s12 + $0x10] sm:$0xff]  }
 0xcd4   : > { %v8319_v26 = vpop.f32.mrf.mxu1  ;;  %11366 = vmatpush3.bf16.msra.mxu0 %v13707_v63 }
 0xcd5   : > { %8347 = vrot.lane.b32.xlu1 %v8318_v39, %s20119_s5 }
 0xcd6   : > { %v8322_v24 = vpop.f32.mrf.mxu1 }
 0xcd7   : > { %v8323_v5 = vadd.f32 %v11126_v56, %v8322_v24 }
 0xcd8   : > { %v8324_v60 = vpop.f32.mrf.mxu1 }
 0xcd9   : > { %8349 = vrot.lane.b32.xlu0 %v8323_v5, %s20119_s5 }
 0xcda   : > { %v8325_v20 = vpop.f32.mrf.mxu1 }
 0xcdb   : > { %v8326_v58 = vadd.f32 %v11126_v56, %v8325_v20 }
 0xcdc   : > { %v8327_v9 = vpop.f32.mrf.mxu1 }
 0xcdd   : > { %8351 = vrot.lane.b32.xlu1 %v8326_v58, %s20119_s5  ;;  %s13909_s5 = smov 36  }
 0xd26   : > { %v8338_v49 = vpop.permute.xlu0 %8337 }
 0xd27   : > { %v18725_v55 = vsel %vm2371_vm3, %v18396_v31, %v8338_v49 }
 0xd28   : > { %v8376_v41 = vmul.f32 %v18718_v12, %v18725_v55 }
 0xd2a   : > { %v8391_v25 = vadd.f32 %v18721_v54, %v8376_v41  ;;  %v8340_v3 = vpop.permute.xlu1 %8339 }
 0xd2b   : > { %v18732_v53 = vsel %vm2371_vm3, %v18409_v8, %v8340_v3 }
 0xd2c   : > { %v8399_v56 = vmax.f32 %v8391_v25, 0.0  ;;  %v8377_v47 = vmul.f32 %v18718_v12, %v18732_v53  ;;  %v13710_v25 = vld [vmem:[%s20384_s12 + $0x40] sm:$0xff]  }
 0xd2e   : > { %v8415_v31 = vrot.slane %v8399_v56, 7  ;;  %v8392_v48 = vadd.f32 %v18721_v54, %v8377_v47  ;;  %v13711_v47 = vld [vmem:[%s20384_s12] sm:$0xff]  }
 0xd2f   : > { %v8342_v0 = vpop.permute.xlu0 %8341 }
 0xd30   : > { %v18740_v4 = vsel %vm7779_vm15, 0.0, %v8415_v31  ;;  %v8439_v8 = vsel %vm7779_vm15, %v8415_v31, 0.0  ;;  %v8400_v61 = vmax.f32 %v8392_v48, 0.0  ;;  %v18749_v21 = vsel %vm2371_vm3, %v18388_v27, %v8342_v0  ;;  %v13708_v27 = vld [vmem:[%s20384_s12 + $0x48] sm:$0xff]  }
 0xd31   : > { %v8461_v1 = vrot.slane %v18740_v4, 1  ;;  %v8462_v19 = vrot.slane %v8439_v8, 1  ;;  %v8506_v44 = vrot.slane %v18740_v4, 2  ;;  %v8507_v17 = vrot.slane %v8439_v8, 2  ;;  %11367 = vmatprep.subr.bf16.mxu0 %v13708_v27 }
 0xd32   : > { %v8416_v15 = vrot.slane %v8400_v61, 7  ;;  %v8378_v7 = vmul.f32 %v18718_v12, %v18749_v21  ;;  %11368 = vmatpush3.bf16.msra.mxu0 %v13709_v59 }
 0xd33   : > { %v8463_v22 = vsel %vm1408_vm0, %v8461_v1, %v8462_v19  ;;  %v8508_v5 = vsel %vm7504_vm13, %v8506_v44, %v8507_v17  ;;  %v8344_v35 = vpop.permute.xlu1 %8343  ;;  %11369 = vmatprep.subr.bf16.mxu0 %v13710_v25 }
 0xd34   : > { %v18756_v39 = vsel %vm7779_vm15, 0.0, %v8416_v15  ;;  %v8440_v26 = vsel %vm7779_vm15, %v8416_v15, 0.0  ;;  %v13285_v24 = vpack.i.bf16 %v8463_v22, %v18451_v32  ;;  %v8393_v34 = vadd.f32 %v18721_v54, %v8378_v7 }
 0xd35   : > { %v8464_v60 = vrot.slane %v18756_v39, 1  ;;  %v8465_v20 = vrot.slane %v8440_v26, 1  ;;  %v8509_v58 = vrot.slane %v18756_v39, 2  ;;  %v8510_v9 = vrot.slane %v8440_v26, 2 }
 0xd36   : > { %v18767_v40 = vsel %vm2371_vm3, %v18403_v13, %v8344_v35  ;;  %13286 = vrot.lane.b32.xlu1 %v13285_v24, %s13909_s5  ;;  %v13295_v14 = vpack.i.bf16 %v18756_v39, %v18740_v4  ;;  %v8401_v49 = vmax.f32 %v8393_v34, 0.0  ;;  %v13290_v13 = vpack.i.bf16 %v8508_v5, %v18441_v45  ;;  %11370 = vmatpush3.bf16.msra.mxu0 %v13711_v47 }
 0xd37   : > { %v8379_v57 = vmul.f32 %v18718_v12, %v18767_v40  ;;  %v8511_v10 = vsel %vm7504_vm13, %v8509_v58, %v8510_v9  ;;  %v8466_v36 = vsel %vm1408_vm0, %v8464_v60, %v8465_v20 }
 0xd38   : > { %13296 = vrot.lane.b32.xlu0 %v13295_v14, %s13910_s28  ;;  %v13305_v41 = vpack.i.bf16 %v8511_v10, %v8508_v5  ;;  %v8417_v28 = vrot.slane %v8401_v49, 7  ;;  %v13300_v8 = vpack.i.bf16 %v8466_v36, %v8463_v22 }
 0xd39   : > { %v8394_v3 = vadd.f32 %v18721_v54, %v8379_v57 }
 0xd3a   : > { %13291 = vrot.lane.b32.xlu1 %v13290_v13, %s20118_s2  ;;  %v18784_v31 = vsel %vm7779_vm15, 0.0, %v8417_v28  ;;  %v8441_v48 = vsel %vm7779_vm15, %v8417_v28, 0.0 }
 0xd3b   : > { %v8402_v56 = vmax.f32 %v8394_v3, 0.0  ;;  %v8467_v61 = vrot.slane %v18784_v31, 1  ;;  %v8468_v1 = vrot.slane %v8441_v48, 1  ;;  %v13310_v44 = vpack.i.bf16 %v18784_v31, %v18756_v39 }
 0xd3c   : > { %13306 = vrot.lane.b32.xlu0 %v13305_v41, %s13911_s19  ;;  %v8512_v62 = vrot.slane %v18784_v31, 2  ;;  %v8513_v15 = vrot.slane %v8441_v48, 2 }
 0xd3d   : > { %v8418_v19 = vrot.slane %v8402_v56, 7  ;;  %v8469_v17 = vsel %vm1408_vm0, %v8467_v61, %v8468_v1 }
 0xd3e   : > { %13301 = vrot.lane.b32.xlu1 %v13300_v8, %s20135_s18  ;;  %v13315_v26 = vpack.i.bf16 %v8469_v17, %v8466_v36  ;;  %v8514_v27 = vsel %vm7504_vm13, %v8512_v62, %v8513_v15 }
 0xd3f   : > { %v18794_v0 = vsel %vm7779_vm15, 0.0, %v8418_v19  ;;  %v8442_v16 = vsel %vm7779_vm15, %v8418_v19, 0.0 }
 0xd40   : > { %13311 = vrot.lane.b32.xlu0 %v13310_v44, %s20293_s14  ;;  %v8515_v7 = vrot.slane %v18794_v0, 2  ;;  %v8516_v22 = vrot.slane %v8442_v16, 2  ;;  %v13330_v63 = vpack.i.bf16 %v18794_v0, %v18784_v31  ;;  %v8470_v58 = vrot.slane %v18794_v0, 1 }
 0xd41   : > { %v8471_v9 = vrot.slane %v8442_v16, 1 }
 0xd42   : > { %v18803_v24 = vsel %vm7504_vm13, %v8515_v7, %v8516_v22  ;;  %13331 = vrot.lane.b32.xlu1 %v13330_v63, %s13910_s28 }
 0xd43   : > { %v8346_v5 = vpop.permute.xlu0 %8345  ;;  %v13340_v20 = vpack.i.bf16 %v18803_v24, %v8514_v27  ;;  %v8472_v13 = vsel %vm1408_vm0, %v8470_v58, %v8471_v9 }
 0xd44   : > { %13316 = vrot.lane.b32.xlu0 %v13315_v26, %s20387_s17  ;;  %v18810_v60 = vsel %vm2371_vm3, %v18436_v11, %v8346_v5  ;;  %v18823_v11 = vpack.i.bf16 %v8514_v27, %v8511_v10 }
 0xd45   : > { %v8380_v35 = vmul.f32 %v18718_v12, %v18810_v60 }
 0xd46   : > { %13341 = vrot.lane.b32.xlu1 %v13340_v20, %s13911_s19 }
 0xd47   : > { %v8395_v34 = vadd.f32 %v18721_v54, %v8380_v35  ;;  %v8348_v14 = vpop.permute.xlu1 %8347 }
 0xd48   : > { %13321 = vrot.lane.b32.xlu0 %v13315_v26, %s13909_s5  ;;  %v18821_v57 = vsel %vm2371_vm3, %v18504_v51, %v8348_v14  ;;  %v13335_v51 = vpack.i.bf16 %v8472_v13, %v8469_v17 }
 0xd49   : > { %v8403_v59 = vmax.f32 %v8395_v34, 0.0  ;;  %v8381_v49 = vmul.f32 %v18718_v12, %v18821_v57 }
 0xd4b   : > { %v8419_v41 = vrot.slane %v8403_v59, 7  ;;  %v8396_v25 = vadd.f32 %v18721_v54, %v8381_v49  ;;  %v8350_v3 = vpop.permute.xlu0 %8349 }
 0xd4c   : > { %13326 = vrot.lane.b32.xlu0 %v18823_v11, %s20118_s2  ;;  %v18833_v36 = vsel %vm2371_vm3, %v18485_v43, %v8350_v3 }
 0xd4d   : > { %v18836_v10 = vsel %vm7779_vm15, 0.0, %v8419_v41  ;;  %v8443_v28 = vsel %vm7779_vm15, %v8419_v41, 0.0  ;;  %v8404_v56 = vmax.f32 %v8396_v25, 0.0  ;;  %v8382_v47 = vmul.f32 %v18718_v12, %v18833_v36 }
 0xd4e   : > { %v8473_v48 = vrot.slane %v18836_v10, 1  ;;  %v8474_v8 = vrot.slane %v8443_v28, 1  ;;  %v13345_v19 = vpack.i.bf16 %v18836_v10, %v18794_v0  ;;  %v8518_v44 = vrot.slane %v18836_v10, 2 }
 0xd4f   : > { %v8420_v61 = vrot.slane %v8404_v56, 7  ;;  %v8397_v1 = vadd.f32 %v18721_v54, %v8382_v47  ;;  %v8352_v43 = vpop.permute.xlu1 %8351  ;;  %v8519_v17 = vrot.slane %v8443_v28, 2 }
 0xd50   : > { %13336 = vrot.lane.b32.xlu0 %v13335_v51, %s20135_s18  ;;  %v18849_v16 = vsel %vm2371_vm3, %v18462_v30, %v8352_v43  ;;  %v8475_v62 = vsel %vm1408_vm0, %v8473_v48, %v8474_v8  ;;  %13346 = vrot.lane.b32.xlu1 %v13345_v19, %s20293_s14  ;;  %vm8703_vm3 = vcmask 293888  }
 0xd51   : > { %v18853_v15 = vsel %vm7779_vm15, 0.0, %v8420_v61  ;;  %v8444_v7 = vsel %vm7779_vm15, %v8420_v61, 0.0  ;;  %v8405_v22 = vmax.f32 %v8397_v1, 0.0  ;;  %v8383_v63 = vmul.f32 %v18718_v12, %v18849_v16 }
 0xd52   : > { %v8521_v26 = vrot.slane %v18853_v15, 2  ;;  %v8522_v5 = vrot.slane %v8444_v7, 2  ;;  %v13365_v20 = vpack.i.bf16 %v18853_v15, %v18836_v10  ;;  %v13350_v58 = vpack.i.bf16 %v8475_v62, %v8472_v13 }
 0xd53   : > { %v8421_v27 = vrot.slane %v8405_v22, 7  ;;  %v8398_v30 = vadd.f32 %v18721_v54, %v8383_v63  ;;  %v8520_v9 = vsel %vm7504_vm13, %v8518_v44, %v8519_v17  ;;  %v18872_v54 = vld [vmem:[%s20384_s12 + $0xa0] ss:$0 sps:$4 sm:$0x33]   ;;  %v8476_v49 = vrot.slane %v18853_v15, 1 }
 0xd54   : > { %v8523_v35 = vsel %vm7504_vm13, %v8521_v26, %v8522_v5  ;;  %13366 = vrot.lane.b32.xlu0 %v13365_v20, %s13910_s28  ;;  %13351 = vrot.lane.b32.xlu1 %v13350_v58, %s20387_s17  ;;  %v8477_v13 = vrot.slane %v8444_v7, 1  ;;  %v13360_v51 = vpack.i.bf16 %v8520_v9, %v18803_v24 }
 0xd55   : > { %v18866_v34 = vsel %vm7779_vm15, 0.0, %v8421_v27  ;;  %v8445_v12 = vsel %vm7779_vm15, %v8421_v27, 0.0  ;;  %v8406_v14 = vmax.f32 %v8398_v30, 0.0  ;;  %v13375_v59 = vpack.i.bf16 %v8523_v35, %v8520_v9  ;;  %11694 = vmatprep.subr.msk.bf16.mxu0 %vm8967_vm2, %v18872_v54 }
 0xd56   : > { %v8479_v41 = vrot.slane %v18866_v34, 1  ;;  %v8480_v25 = vrot.slane %v8445_v12, 1  ;;  %v13380_v28 = vpack.i.bf16 %v18866_v34, %v18853_v15  ;;  %v8478_v56 = vsel %vm1408_vm0, %v8476_v49, %v8477_v13 }
 0xd57   : > { %v8422_v3 = vrot.slane %v8406_v14, 7  ;;  %v13370_v61 = vpack.i.bf16 %v8478_v56, %v8475_v62  ;;  %v8524_v24 = vrot.slane %v18866_v34, 2  ;;  %v8525_v17 = vrot.slane %v8445_v12, 2 }
 0xd58   : > { %13376 = vrot.lane.b32.xlu0 %v13375_v59, %s13911_s19  ;;  %13356 = vrot.lane.b32.xlu1 %v13350_v58, %s13909_s5  ;;  %v8481_v47 = vsel %vm1408_vm0, %v8479_v41, %v8480_v25 }
 0xd59   : > { %v8438_v48 = vsel %vm7779_vm15, 0.0, %v8422_v3  ;;  %v8446_v8 = vsel %vm7779_vm15, %v8422_v3, 0.0  ;;  %v13385_v1 = vpack.i.bf16 %v8481_v47, %v8478_v56  ;;  %v8526_v5 = vsel %vm7504_vm13, %v8524_v24, %v8525_v17 }
 0xd5a   : > { %v8577_v43 = vrot.slane %v8438_v48, 1  ;;  %v8578_v19 = vrot.slane %v8446_v8, 1  ;;  %v13395_v44 = vpack.i.bf16 %v8438_v48, %v18866_v34  ;;  %v8604_v7 = vrot.slane %v8438_v48, 2 }
 0xd5b   : > { %v8605_v22 = vrot.slane %v8446_v8, 2  ;;  %v13400_v62 = vpack.i.bf16 %v18412_v23, %v8438_v48  ;;  %v13410_v20 = vpack.i.bf16 %v8526_v5, %v8523_v35 }
 0xd5c   : > { %13361 = vrot.lane.b32.xlu1 %v13360_v51, %s20118_s2  ;;  %13381 = vrot.lane.b32.xlu0 %v13380_v28, %s20293_s14  ;;  %v8579_v63 = vsel %vm1408_vm0, %v8577_v43, %v8578_v19 }
 0xd5d   : > { %v13405_v26 = vpack.i.bf16 %v8579_v63, %v8481_v47  ;;  %v8606_v27 = vsel %vm7504_vm13, %v8604_v7, %v8605_v22  ;;  %v13420_v58 = vpack.i.bf16 %v18451_v32, %v8579_v63 }
 0xd5e   : > { %v13415_v30 = vpack.i.bf16 %v8606_v27, %v8526_v5  ;;  %v13440_v9 = vpack.i.bf16 %v18441_v45, %v8606_v27 }
 0xd60   : > { %13371 = vrot.lane.b32.xlu1 %v13370_v61, %s20135_s18  ;;  %13386 = vrot.lane.b32.xlu0 %v13385_v1, %s20387_s17 }
 0xd64   : > { %13396 = vrot.lane.b32.xlu1 %v13395_v44, %s13910_s28  ;;  %13391 = vrot.lane.b32.xlu0 %v13385_v1, %s13909_s5  ;;  %s20390_s28 = sld [smem:[#allocation35_spill]] }
 0xd68   : > { %13401 = vrot.lane.b32.xlu1 %v13400_v62, %s20293_s14  ;;  %13406 = vrot.lane.b32.xlu0 %v13405_v26, %s20135_s18  ;;  %s20388_s14 = sld [smem:[#allocation34_spill]] }
 0xd6c   : > { %13416 = vrot.lane.b32.xlu1 %v13415_v30, %s13911_s19  ;;  %13411 = vrot.lane.b32.xlu0 %v13410_v20, %s20118_s2  ;;  %s20389_s2 = sld [smem:[#allocation37_spill]] }
 0xd6d   : > { %s20391_s19 = sld [smem:[#allocation36_spill]] }
 0xd70   : > { %13421 = vrot.lane.b32.xlu1 %v13420_v58, %s20387_s17  ;;  %13426 = vrot.lane.b32.xlu0 %v18823_v11, %s20250_s13  ;;  %s13916_s17 = smov 14  }
 0xd74   : > { %13431 = vrot.lane.b32.xlu1 %v13360_v51, %s20250_s13  ;;  %13436 = vrot.lane.b32.xlu0 %v13410_v20, %s20250_s13 }
 0xd78   : > { %13441 = vrot.lane.b32.xlu1 %v13440_v9, %s20250_s13 }
 0xda8   : > { %v13287_v35 = vpop.permute.xlu1 %13286 }
 0xda9   : > { %v13289_v49 = vunpack.i.h.bf16 %v13287_v35  ;;  %v13288_v13 = vunpack.i.l.bf16 %v13287_v35 }
 0xdaa   : > { %v13297_v12 = vpop.permute.xlu0 %13296 }
 0xdab   : > { %v13299_v41 = vunpack.i.h.bf16 %v13297_v12  ;;  %v13298_v25 = vunpack.i.l.bf16 %v13297_v12  ;;  %v8705_v43 = vsel %vm8703_vm3, %v18740_v4, %v13289_v49  ;;  %v8704_v19 = vsel %vm8703_vm3, %v18412_v23, %v13288_v13  ;;  %v13713_v13 = vld [vmem:[%s20384_s12 + $0x98] sm:$0xff]  }
 0xdac   : > { %v13292_v14 = vpop.permute.xlu1 %13291  ;;  %v8969_v49 = vsel %vm8967_vm2, %v18872_v54, 0  ;;  %v13715_v54 = vld [vmem:[%s20384_s12 + $0x88] sm:$0xff]  }
 0xdad   : > { %v13294_v28 = vunpack.i.h.bf16 %v13292_v14  ;;  %v13293_v11 = vunpack.i.l.bf16 %v13292_v14 }
 0xdae   : > { %v13307_v59 = vpop.permute.xlu0 %13306 }
 0xdaf   : > { %v13309_v48 = vunpack.i.h.bf16 %v13307_v59  ;;  %v13308_v8 = vunpack.i.l.bf16 %v13307_v59  ;;  %v8712_v17 = vsel %vm2431_vm5, %v8704_v19, %v13293_v11  ;;  %v8713_v7 = vsel %vm2431_vm5, %v8705_v43, %v13294_v28 }
 0xdb0   : > { %v13302_v3 = vpop.permute.xlu1 %13301  ;;  %v8721_v5 = vsel %vm8720_vm9, %v8712_v17, %v13298_v25  ;;  %v8722_v27 = vsel %vm8720_vm9, %v8713_v7, %v13299_v41 }
 0xdb1   : > { %v13304_v56 = vunpack.i.h.bf16 %v13302_v3  ;;  %v13303_v51 = vunpack.i.l.bf16 %v13302_v3  ;;  %v8812_v14 = vpack.c.bf16 %v8722_v27, %v8721_v5  ;;  %v13716_v27 = vld [vmem:[%s20384_s12 + $0x80] sm:$0xff]  }
 0xdb2   : > { %v13312_v47 = vpop.permute.xlu0 %13311 }
 0xdb3   : > { %v8729_v61 = vsel %vm2554_vm8, %v13298_v25, %v13303_v51  ;;  %v8730_v1 = vsel %vm2554_vm8, %v13299_v41, %v13304_v56  ;;  %v13314_v24 = vunpack.i.h.bf16 %v13312_v47  ;;  %v13313_v44 = vunpack.i.l.bf16 %v13312_v47  ;;  %v13714_v25 = vld [vmem:[%s20384_s12 + $0x90] sm:$0xff]  }
 0xdb4   : > { %v8738_v22 = vsel %vm8737_vm7, %v8729_v61, %v13308_v8  ;;  %v8739_v63 = vsel %vm8737_vm7, %v8730_v1, %v13309_v48  ;;  %v13332_v59 = vpop.permute.xlu1 %13331 }
 0xdb5   : > { %v8746_v30 = vsel %vm5627_vm14, %v8738_v22, %v13313_v44  ;;  %v8747_v20 = vsel %vm5627_vm14, %v8739_v63, %v13314_v24  ;;  %v13334_v28 = vunpack.i.h.bf16 %v13332_v59  ;;  %v13333_v11 = vunpack.i.l.bf16 %v13332_v59 }
 0xdb6   : > { %v18921_v62 = vpop.permute.xlu0 %13316 }
 0xdb7   : > { %v13319_v26 = vunpack.i.h.bf16 %v18921_v62  ;;  %v13318_v4 = vunpack.i.l.bf16 %v18921_v62 }
 0xdb8   : > { %v13342_v3 = vpop.permute.xlu1 %13341 }
 0xdb9   : > { %v8755_v58 = vsel %vm8754_vm1, %v8746_v30, %v13318_v4  ;;  %v8756_v9 = vsel %vm8754_vm1, %v8747_v20, %v13319_v26  ;;  %v13344_v44 = vunpack.i.h.bf16 %v13342_v3  ;;  %v13343_v17 = vunpack.i.l.bf16 %v13342_v3 }
 0xdba   : > { %v13322_v35 = vpop.permute.xlu0 %13321  ;;  %v8813_v12 = vpack.c.bf16 %v8756_v9, %v8755_v58 }
 0xdbb   : > { %v13324_v51 = vunpack.i.h.bf16 %v13322_v35  ;;  %v13323_v47 = vunpack.i.l.bf16 %v13322_v35 }
 0xdbc   : > { %9003 = vmatprep.mubr.bf16.mxu0 %v8813_v12 }
 0xdbd   : > { %9004 = vmatmul.mubr.bf16.vlgmr.msra.gmra.mxu0 %v8812_v14  ;;  %v8707_v7 = vsel %vm8703_vm3, %v18784_v31, %v13324_v51  ;;  %v8706_v22 = vsel %vm8703_vm3, %v18756_v39, %v13323_v47 }
 0xdbe   : > { %v13327_v41 = vpop.permute.xlu0 %13326  ;;  %11624 = vmatpush3.bf16.msra.mxu0 %v8969_v49 }
 0xdbf   : > { %11625 = vmatprep.subr.bf16.mxu0 %v13713_v13  ;;  %v13329_v61 = vunpack.i.h.bf16 %v13327_v41  ;;  %v13328_v1 = vunpack.i.l.bf16 %v13327_v41 }
 0xdc1   : > { %v8714_v30 = vsel %vm2431_vm5, %v8706_v22, %v13328_v1  ;;  %v8715_v20 = vsel %vm2431_vm5, %v8707_v7, %v13329_v61 }
 0xdc2   : > { %v13337_v56 = vpop.permute.xlu0 %13336  ;;  %11626 = vmatpush3.bf16.msra.mxu0 %v13713_v13  ;;  %v13347_v24 = vpop.permute.xlu1 %13346  ;;  %v8723_v49 = vsel %vm8720_vm9, %v8714_v30, %v13333_v11  ;;  %v8724_v13 = vsel %vm8720_vm9, %v8715_v20, %v13334_v28 }
 0xdc3   : > { %v13339_v48 = vunpack.i.h.bf16 %v13337_v56  ;;  %v13338_v8 = vunpack.i.l.bf16 %v13337_v56  ;;  %11627 = vmatprep.subr.bf16.mxu0 %v13714_v25  ;;  %v13349_v63 = vunpack.i.h.bf16 %v13347_v24  ;;  %v13348_v5 = vunpack.i.l.bf16 %v13347_v24 }
 0xdc4   : > { %v8815_v47 = vpack.c.bf16 %v8724_v13, %v8723_v49 }
 0xdc5   : > { %v8732_v43 = vsel %vm2554_vm8, %v13334_v28, %v13339_v48  ;;  %v8731_v19 = vsel %vm2554_vm8, %v13333_v11, %v13338_v8 }
 0xdc6   : > { %11628 = vmatpush3.bf16.msra.mxu0 %v13714_v25  ;;  %v8740_v58 = vsel %vm8737_vm7, %v8731_v19, %v13343_v17  ;;  %v8741_v9 = vsel %vm8737_vm7, %v8732_v43, %v13344_v44  ;;  %v18951_v35 = vpop.permute.xlu1 %13351  ;;  %v13367_v12 = vpop.permute.xlu0 %13366 }
 0xdc7   : > { %11629 = vmatprep.subr.bf16.mxu0 %v13715_v54  ;;  %v13354_v31 = vunpack.i.h.bf16 %v18951_v35  ;;  %v13353_v14 = vunpack.i.l.bf16 %v18951_v35  ;;  %v8748_v39 = vsel %vm5627_vm14, %v8740_v58, %v13348_v5  ;;  %v8749_v59 = vsel %vm5627_vm14, %v8741_v9, %v13349_v63 }
 0xdc8   : > { %v13369_v19 = vunpack.i.h.bf16 %v13367_v12  ;;  %v13368_v24 = vunpack.i.l.bf16 %v13367_v12 }
 0xdc9   : > { %v8757_v41 = vsel %vm8754_vm1, %v8748_v39, %v13353_v14  ;;  %v8758_v25 = vsel %vm8754_vm1, %v8749_v59, %v13354_v31 }
 0xdca   : > { %11630 = vmatpush3.bf16.msra.mxu0 %v13715_v54  ;;  %v13357_v3 = vpop.permute.xlu1 %13356  ;;  %v13377_v56 = vpop.permute.xlu0 %13376  ;;  %v8816_v51 = vpack.c.bf16 %v8758_v25, %v8757_v41 }
 0xdcb   : > { %11631 = vmatprep.subr.bf16.mxu0 %v13716_v27  ;;  %v13359_v48 = vunpack.i.h.bf16 %v13357_v3  ;;  %v13358_v8 = vunpack.i.l.bf16 %v13357_v3  ;;  %v13379_v63 = vunpack.i.h.bf16 %v13377_v56  ;;  %v13378_v5 = vunpack.i.l.bf16 %v13377_v56 }
 0xdcc   : > { %9011 = vmatprep.mubr.bf16.mxu0 %v8816_v51 }
 0xdcd   : > { %9012 = vmatmul.mubr.bf16.gmra.mxu0 %v8815_v47  ;;  %v8709_v7 = vsel %vm8703_vm3, %v18836_v10, %v13359_v48  ;;  %v8708_v22 = vsel %vm8703_vm3, %v18794_v0, %v13358_v8 }
 0xdce   : > { %11632 = vmatpush3.bf16.msra.mxu0 %v13716_v27  ;;  %v13362_v11 = vpop.permute.xlu1 %13361  ;;  %v13382_v28 = vpop.permute.xlu0 %13381 }
 0xdcf   : > { %9831 = vmatprep.subr.bf16.mxu0 %v20133_v2  ;;  %v13364_v54 = vunpack.i.h.bf16 %v13362_v11  ;;  %v13363_v61 = vunpack.i.l.bf16 %v13362_v11  ;;  %v13384_v9 = vunpack.i.h.bf16 %v13382_v28  ;;  %v13383_v12 = vunpack.i.l.bf16 %v13382_v28 }
 0xdd1   : > { %v8716_v27 = vsel %vm2431_vm5, %v8708_v22, %v13363_v61  ;;  %v8717_v30 = vsel %vm2431_vm5, %v8709_v7, %v13364_v54 }
 0xdd2   : > { %v13372_v1 = vpop.permute.xlu1 %13371  ;;  %v18966_v43 = vpop.permute.xlu0 %13386  ;;  %v8725_v3 = vsel %vm8720_vm9, %v8716_v27, %v13368_v24  ;;  %v8726_v56 = vsel %vm8720_vm9, %v8717_v30, %v13369_v19 }
 0xdd3   : > { %v13374_v44 = vunpack.i.h.bf16 %v13372_v1  ;;  %v13373_v17 = vunpack.i.l.bf16 %v13372_v1  ;;  %v13389_v0 = vunpack.i.h.bf16 %v18966_v43  ;;  %v13388_v13 = vunpack.i.l.bf16 %v18966_v43 }
 0xdd4   : > { %v8818_v8 = vpack.c.bf16 %v8726_v56, %v8725_v3 }
 0xdd5   : > { %v8733_v20 = vsel %vm2554_vm8, %v13368_v24, %v13373_v17  ;;  %v8734_v58 = vsel %vm2554_vm8, %v13369_v19, %v13374_v44 }
 0xdd6   : > { %v13397_v39 = vpop.permute.xlu1 %13396  ;;  %v13392_v59 = vpop.permute.xlu0 %13391  ;;  %v8742_v49 = vsel %vm8737_vm7, %v8733_v20, %v13378_v5  ;;  %v8743_v10 = vsel %vm8737_vm7, %v8734_v58, %v13379_v63 }
 0xdd7   : > { %v8750_v41 = vsel %vm5627_vm14, %v8742_v49, %v13383_v12  ;;  %v8751_v25 = vsel %vm5627_vm14, %v8743_v10, %v13384_v9  ;;  %v13394_v54 = vunpack.i.h.bf16 %v13392_v59  ;;  %v13393_v61 = vunpack.i.l.bf16 %v13392_v59 }
 0xdd8   : > { %v8759_v51 = vsel %vm8754_vm1, %v8750_v41, %v13388_v13  ;;  %v8760_v47 = vsel %vm8754_vm1, %v8751_v25, %v13389_v0  ;;  %v13399_v24 = vunpack.i.h.bf16 %v13397_v39  ;;  %v13398_v19 = vunpack.i.l.bf16 %v13397_v39 }
 0xdd9   : > { %v8819_v48 = vpack.c.bf16 %v8760_v47, %v8759_v51  ;;  %v8711_v30 = vsel %vm8703_vm3, %v18866_v34, %v13394_v54  ;;  %v8710_v20 = vsel %vm8703_vm3, %v18853_v15, %v13393_v61 }
 0xdda   : > { %v13402_v11 = vpop.permute.xlu1 %13401  ;;  %v13407_v28 = vpop.permute.xlu0 %13406 }
 0xddb   : > { %v13409_v1 = vunpack.i.h.bf16 %v13407_v28  ;;  %v13408_v44 = vunpack.i.l.bf16 %v13407_v28  ;;  %9019 = vmatprep.mubr.bf16.mxu0 %v8819_v48  ;;  %v13404_v10 = vunpack.i.h.bf16 %v13402_v11  ;;  %v13403_v41 = vunpack.i.l.bf16 %v13402_v11 }
 0xddc   : > { %9020 = vmatmul.mubr.bf16.gmra.mxu0 %v8818_v8 }
 0xddd   : > { %v8736_v58 = vsel %vm2554_vm8, %v13399_v24, %v13409_v1  ;;  %v8735_v9 = vsel %vm2554_vm8, %v13398_v19, %v13408_v44 }
 0xdde   : > { %v13417_v17 = vpop.permute.xlu1 %13416  ;;  %v13412_v7 = vpop.permute.xlu0 %13411 }
 0xddf   : > { %v13419_v22 = vunpack.i.h.bf16 %v13417_v17  ;;  %v13418_v63 = vunpack.i.l.bf16 %v13417_v17  ;;  %v13414_v5 = vunpack.i.h.bf16 %v13412_v7  ;;  %v13413_v27 = vunpack.i.l.bf16 %v13412_v7 }
 0xde1   : > { %v8744_v12 = vsel %vm8737_vm7, %v8735_v9, %v13418_v63  ;;  %v8745_v39 = vsel %vm8737_vm7, %v8736_v58, %v13419_v22  ;;  %v8718_v59 = vsel %vm2431_vm5, %v8710_v20, %v13413_v27  ;;  %v8719_v49 = vsel %vm2431_vm5, %v8711_v30, %v13414_v5 }
 0xde2   : > { %v13422_v25 = vpop.permute.xlu1 %13421  ;;  %v13427_v3 = vpop.permute.xlu0 %13426  ;;  %v8752_v47 = vsel %vm5627_vm14, %v8744_v12, %v13403_v41  ;;  %v8753_v28 = vsel %vm5627_vm14, %v8745_v39, %v13404_v10  ;;  %v8727_v48 = vsel %vm8720_vm9, %v8718_v59, %v13398_v19  ;;  %v8728_v8 = vsel %vm8720_vm9, %v8719_v49, %v13399_v24 }
 0xde3   : > { %v13424_v34 = vunpack.i.h.bf16 %v13422_v25  ;;  %v13423_v56 = vunpack.i.l.bf16 %v13422_v25  ;;  %v13429_v51 = vunpack.i.h.bf16 %v13427_v3  ;;  %v13428_v15 = vunpack.i.l.bf16 %v13427_v3 }
 0xde4   : > { %v8821_v22 = vpack.c.bf16 %v8728_v8, %v8727_v48  ;;  %vm8954_vm5 = vcmask 556032   ;;  %vm20392_vm7 = vcmask 654336  }
 0xde5   : > { %v8763_v54 = vsel %vm4008_vm12, %v13318_v4, %v13428_v15  ;;  %v8764_v11 = vsel %vm4008_vm12, %v13319_v26, %v13429_v51  ;;  %v8761_v61 = vsel %vm8754_vm1, %v8752_v47, %v13423_v56  ;;  %v8762_v1 = vsel %vm8754_vm1, %v8753_v28, %v13424_v34  ;;  %vm20393_vm14 = vmmov %vm20392_vm7 }
 0xde6   : > { %v13432_v44 = vpop.permute.xlu1 %13431  ;;  %v13437_v17 = vpop.permute.xlu0 %13436  ;;  %v8822_v7 = vpack.c.bf16 %v8762_v1, %v8761_v61  ;;  %v8814_v24 = vpack.c.bf16 %v8764_v11, %v8763_v54  ;;  %v11147_v54 = vld [vmem:[%s20388_s14] ss:$0 sm:$0xff]  ;;  %vm20398_vm1 = vmmov %vm20392_vm7  ;;  %s13918_s14 = smov 10  }
 0xde7   : > { %v13434_v19 = vunpack.i.h.bf16 %v13432_v44  ;;  %v13433_v63 = vunpack.i.l.bf16 %v13432_v44  ;;  %v13439_v5 = vunpack.i.h.bf16 %v13437_v17  ;;  %v13438_v27 = vunpack.i.l.bf16 %v13437_v17  ;;  %vm20401_vm9 = vmmov %vm20398_vm1 }
 0xde8   : > { %9027 = vmatprep.mubr.bf16.mxu0 %v8822_v7 }
 0xde9   : > { %9028 = vmatmul.mubr.bf16.gmra.mxu0 %v8821_v22  ;;  %v8766_v62 = vsel %vm4008_vm12, %v13354_v31, %v13434_v19  ;;  %v8765_v26 = vsel %vm4008_vm12, %v13353_v14, %v13433_v63  ;;  %v8767_v4 = vsel %vm4008_vm12, %v13388_v13, %v13438_v27  ;;  %v8768_v30 = vsel %vm4008_vm12, %v13389_v0, %v13439_v5 }
 0xdea   : > { %11633 = vmatprep.mubr.msk.bf16.mxu0 %vm8954_vm5, %v8814_v24  ;;  %v13442_v20 = vpop.permute.xlu1 %13441  ;;  %v8817_v58 = vpack.c.bf16 %v8766_v62, %v8765_v26  ;;  %v8820_v39 = vpack.c.bf16 %v8768_v30, %v8767_v4 }
 0xdeb   : > { %v13444_v9 = vunpack.i.h.bf16 %v13442_v20  ;;  %v13443_v12 = vunpack.i.l.bf16 %v13442_v20 }
 0xded   : > { %v8769_v35 = vsel %vm4008_vm12, %v13423_v56, %v13443_v12  ;;  %v8770_v31 = vsel %vm4008_vm12, %v13424_v34, %v13444_v9 }
 0xdee   : > { %v8823_v14 = vpack.c.bf16 %v8770_v31, %v8769_v35 }
 0xdf1   : > { %11634 = vmatmul.mubr.msk.bf16.vlgmr.msra.gmra.mxu0 %vm8954_vm5, %v8817_v58 }
 0xdf2   : > { %11637 = vmatprep.mubr.msk.bf16.mxu0 %vm8954_vm5, %v8820_v39 }
 0xdf9   : > { %11638 = vmatmul.mubr.msk.bf16.gmra.mxu0 %vm8954_vm5, %v8823_v14  ;;  %vm20402_vm5 = vmmov %vm20398_vm1 }
 0xe7d   : > { %v11371_v13 = vpop.f32.mrf.mxu0 }
 0xe7f   : > { %v11372_v43 = vpop.f32.mrf.mxu0 }
 0xe80   : > { %v11373_v34 = vadd.f32 %v11372_v43, %v11371_v13 }
 0xe81   : > { %v11374_v0 = vpop.f32.mrf.mxu0 }
 0xe82   : > { %v9006_v44 = vadd.f32 %v11373_v34, %v11147_v54  ;;  %v19052_v34 = vld [vmem:[%s20390_s28] ss:$0 sm:$0xff]  ;;  %s13919_s28 = smov 8  }
 0xe83   : > { %v11375_v59 = vpop.f32.mrf.mxu0 }
 0xe84   : > { %v11376_v61 = vadd.f32 %v11375_v59, %v11374_v0 }
 0xe86   : > { %v9009_v5 = vadd.f32 %v11376_v61, %v11147_v54 }
 0xe8d   : > { %v11377_v49 = vpop.f32.mrf.mxu0 }
 0xe8f   : > { %v11378_v10 = vpop.f32.mrf.mxu0 }
 0xe90   : > { %v11379_v1 = vadd.f32 %v11378_v10, %v11377_v49 }
 0xe91   : > { %v11380_v41 = vpop.f32.mrf.mxu0 }
 0xe92   : > { %v9014_v24 = vadd.f32 %v11379_v1, %v11147_v54 }
 0xe93   : > { %v11381_v25 = vpop.f32.mrf.mxu0 }
 0xe94   : > { %v11382_v22 = vadd.f32 %v11381_v25, %v11380_v41  ;;  %v13717_v25 = vld [vmem:[%s20389_s2 + $0xb8] sm:$0xff]  }
 0xe95   : > { %9832 = vmatpush1.bf16.msra.mxu0 %v13717_v25 }
 0xe96   : > { %v9017_v4 = vadd.f32 %v11382_v22, %v11147_v54  ;;  %9833 = vmatprep.subr.bf16.mxu0 %v20133_v2 }
 0xe9c   : > { %v11383_v3 = vpop.f32.mrf.mxu0 }
 0xe9e   : > { %v11384_v51 = vpop.f32.mrf.mxu0 }
 0xe9f   : > { %v11385_v63 = vadd.f32 %v11384_v51, %v11383_v3  ;;  %v13720_v3 = vld [vmem:[%s20389_s2 + $0x78] sm:$0xff]  }
 0xea0   : > { %v11386_v15 = vpop.f32.mrf.mxu0  ;;  %v13721_v51 = vld [vmem:[%s20389_s2 + $0x38] sm:$0xff]   ;;  %11404 = vmatprep.subr.bf16.mxu1 %v13720_v3 }
 0xea1   : > { %v9022_v9 = vadd.f32 %v11385_v63, %v11147_v54  ;;  %11405 = vmatpush3.bf16.msra.mxu1 %v13721_v51 }
 0xea2   : > { %v11387_v47 = vpop.f32.mrf.mxu0 }
 0xea3   : > { %v11388_v20 = vadd.f32 %v11387_v47, %v11386_v15  ;;  %v13718_v15 = vld [vmem:[%s20389_s2 + $0xb0] sm:$0xff]  }
 0xea4   : > { %v13723_v47 = vld [vmem:[%s20389_s2 + $0x70] sm:$0xff]   ;;  %9834 = vmatpush1.bf16.msra.mxu0 %v13718_v15 }
 0xea5   : > { %v9025_v43 = vadd.f32 %v11388_v20, %v11147_v54  ;;  %11406 = vmatprep.subr.bf16.mxu1 %v13723_v47  ;;  %9835 = vmatprep.subr.bf16.mxu0 %v20133_v2  ;;  %v13727_v20 = vld [vmem:[%s20389_s2 + $0x28] sm:$0xff]  }
 0xea9   : > { %v11389_v28 = vpop.f32.mrf.mxu0 }
 0xeab   : > { %v11390_v56 = vpop.f32.mrf.mxu0 }
 0xeac   : > { %v11391_v58 = vadd.f32 %v11390_v56, %v11389_v28  ;;  %v13724_v28 = vld [vmem:[%s20389_s2 + $0x30] sm:$0xff]   ;;  %v13719_v56 = vld [vmem:[%s20389_s2 + $0xa8] sm:$0xff]  }
 0xead   : > { %v11392_v48 = vpop.f32.mrf.mxu0  ;;  %11407 = vmatpush3.bf16.msra.mxu1 %v13724_v28  ;;  %9836 = vmatpush1.bf16.msra.mxu0 %v13719_v56  ;;  %v13730_v28 = vld [vmem:[%s20389_s2 + $0x20] sm:$0xff]  }
 0xeae   : > { %v9030_v13 = vadd.f32 %v11391_v58, %v11147_v54  ;;  %9837 = vmatprep.subr.bf16.mxu0 %v20133_v2 }
 0xeaf   : > { %v11393_v8 = vpop.f32.mrf.mxu0 }
 0xeb0   : > { %v11394_v14 = vadd.f32 %v11393_v8, %v11392_v48  ;;  %v13722_v48 = vld [vmem:[%s20389_s2 + $0xa0] sm:$0xff]  }
 0xeb1   : > { %v11635_v11 = vpop.f32.mrf.mxu0  ;;  %9838 = vmatpush1.bf16.msra.mxu0 %v13722_v48 }
 0xeb2   : > { %v9079_v62 = vadd.f32 %v11635_v11, %v9014_v24  ;;  %v9033_v10 = vadd.f32 %v11394_v14, %v11147_v54  ;;  %9839 = vmatprep.subr.bf16.mxu0 %v20133_v2  ;;  %v19055_v54 = vld [vmem:[%s20391_s19] ss:$0 sm:$0xff]  ;;  %s20422_s19 = sld [smem:[#allocation39_spill]] }
 0xeb3   : > { %v9070_v17 = vpop.f32.mrf.mxu0 }
 0xeb4   : > { %v9071_v7 = vadd.f32 %v9070_v17, %v9006_v44 }
 0xeb5   : > { %v11636_v19 = vpop.f32.mrf.mxu0 }
 0xeb6   : > { %9109 = vrot.lane.b32.xlu0 %v9071_v7, %s13909_s5  ;;  %v9082_v39 = vadd.f32 %v11636_v19, %v9017_v4  ;;  %v13725_v4 = vld [vmem:[%s20389_s2 + $0x98] sm:$0xff]  }
 0xeb7   : > { %v9073_v27 = vpop.f32.mrf.mxu0  ;;  %9840 = vmatpush1.bf16.msra.mxu0 %v13725_v4 }
 0xeb8   : > { %v9074_v26 = vadd.f32 %v9073_v27, %v9009_v5  ;;  %9841 = vmatprep.subr.bf16.mxu0 %v20133_v2 }
 0xeb9   : > { %v11639_v30 = vpop.f32.mrf.mxu0 }
 0xeba   : > { %9111 = vrot.lane.b32.xlu1 %v9074_v26, %s13909_s5  ;;  %9113 = vrot.lane.b32.xlu0 %v9079_v62, %s13909_s5  ;;  %v9095_v59 = vadd.f32 %v11639_v30, %v9030_v13  ;;  %v13726_v30 = vld [vmem:[%s20389_s2 + $0x68] sm:$0xff]  }
 0xebb   : > { %v9086_v12 = vpop.f32.mrf.mxu0  ;;  %11408 = vmatprep.subr.bf16.mxu1 %v13726_v30 }
 0xebc   : > { %v9087_v35 = vadd.f32 %v9086_v12, %v9022_v9  ;;  %11409 = vmatpush3.bf16.msra.mxu1 %v13727_v20 }
 0xebd   : > { %v11640_v31 = vpop.f32.mrf.mxu0 }
 0xebe   : > { %9115 = vrot.lane.b32.xlu1 %v9082_v39, %s13909_s5  ;;  %9117 = vrot.lane.b32.xlu0 %v9087_v35, %s13909_s5  ;;  %v9098_v41 = vadd.f32 %v11640_v31, %v9033_v10  ;;  %v13728_v31 = vld [vmem:[%s20389_s2 + $0x90] sm:$0xff]  }
 0xebf   : > { %v9089_v0 = vpop.f32.mrf.mxu0  ;;  %9842 = vmatpush1.bf16.msra.mxu0 %v13728_v31  ;;  %v13733_v31 = vld [vmem:[%s20389_s2 + $0x18] sm:$0xff]  }
 0xec0   : > { %v9090_v49 = vadd.f32 %v9089_v0, %v9025_v43  ;;  %9843 = vmatprep.subr.bf16.mxu0 %v20133_v2 }
 0xec2   : > { %9119 = vrot.lane.b32.xlu1 %v9090_v49, %s13909_s5  ;;  %9121 = vrot.lane.b32.xlu0 %v9095_v59, %s13909_s5 }
 0xec6   : > { %9123 = vrot.lane.b32.xlu1 %v9098_v41, %s13909_s5  ;;  %s13912_s5 = smov 80  }
 0xf28   : > { %v9110_v8 = vpop.permute.xlu0 %9109 }
 0xf29   : > { %v19059_v11 = vsel %vm8703_vm3, %v18725_v55, %v9110_v8  ;;  %v13731_v8 = vld [vmem:[%s20389_s2 + $0x88] sm:$0xff]  }
 0xf2a   : > { %v9148_v61 = vmul.f32 %v19052_v34, %v19059_v11  ;;  %9844 = vmatpush1.bf16.msra.mxu0 %v13731_v8  ;;  %v13737_v8 = vld [vmem:[%s20389_s2 + $0xd0] sm:$0xff]  }
 0xf2b   : > { %9845 = vmatprep.subr.bf16.mxu0 %v20133_v2 }
 0xf2c   : > { %v9163_v1 = vadd.f32 %v19055_v54, %v9148_v61  ;;  %v9112_v44 = vpop.permute.xlu1 %9111  ;;  %v9114_v17 = vpop.permute.xlu0 %9113 }
 0xf2d   : > { %v19066_v7 = vsel %vm8703_vm3, %v18732_v53, %v9112_v44  ;;  %v19070_v22 = vsel %vm8703_vm3, %v18749_v21, %v9114_v17 }
 0xf2e   : > { %v9171_v55 = vmax.f32 %v9163_v1, 0.0  ;;  %v9149_v19 = vmul.f32 %v19052_v34, %v19066_v7  ;;  %v9150_v63 = vmul.f32 %v19052_v34, %v19070_v22 }
 0xf30   : > { %v9187_v24 = vrot.slane %v9171_v55, 7  ;;  %v9164_v5 = vadd.f32 %v19055_v54, %v9149_v19  ;;  %v9165_v27 = vadd.f32 %v19055_v54, %v9150_v63  ;;  %v9116_v62 = vpop.permute.xlu1 %9115  ;;  %v9118_v53 = vpop.permute.xlu0 %9117 }
 0xf31   : > { %v19080_v26 = vsel %vm8703_vm3, %v18767_v40, %v9116_v62  ;;  %v19084_v21 = vsel %vm8703_vm3, %v18810_v60, %v9118_v53 }
 0xf32   : > { %v19090_v58 = vsel %vm7779_vm15, 0.0, %v9187_v24  ;;  %v19093_v9 = vsel %vm7779_vm15, %v9187_v24, 0.0  ;;  %v9172_v12 = vmax.f32 %v9164_v5, 0.0  ;;  %v9173_v39 = vmax.f32 %v9165_v27, 0.0 }
 0xf33   : > { %v9233_v35 = vrot.slane %v19090_v58, 1  ;;  %v9234_v40 = vrot.slane %v19093_v9, 1  ;;  %v9151_v0 = vmul.f32 %v19052_v34, %v19080_v26  ;;  %v9152_v59 = vmul.f32 %v19052_v34, %v19084_v21 }
 0xf34   : > { %v9188_v60 = vrot.slane %v9172_v12, 7  ;;  %v9189_v14 = vrot.slane %v9173_v39, 7  ;;  %v9120_v13 = vpop.permute.xlu1 %9119  ;;  %v9122_v43 = vpop.permute.xlu0 %9121  ;;  %v9278_v62 = vrot.slane %v19090_v58, 2  ;;  %v9279_v53 = vrot.slane %v19093_v9, 2 }
 0xf35   : > { %v19105_v49 = vsel %vm8703_vm3, %v18821_v57, %v9120_v13  ;;  %v19109_v10 = vsel %vm8703_vm3, %v18833_v36, %v9122_v43  ;;  %v19126_v47 = vsel %vm1408_vm0, %v9233_v35, %v9234_v40  ;;  %v13729_v36 = vld [vmem:[%s20389_s2 + $0x60] sm:$0xff]   ;;  %v9166_v61 = vadd.f32 %v19055_v54, %v9151_v0  ;;  %v13732_v40 = vld [vmem:[%s20389_s2 + $0x58] sm:$0xff]   ;;  %v13735_v13 = vld [vmem:[%s20389_s2 + $0x50] sm:$0xff]  }
 0xf36   : > { %v19112_v41 = vsel %vm7779_vm15, 0.0, %v9188_v60  ;;  %v19115_v25 = vsel %vm7779_vm15, %v9188_v60, 0.0  ;;  %v19118_v3 = vsel %vm7779_vm15, 0.0, %v9189_v14  ;;  %v19121_v51 = vsel %vm7779_vm15, %v9189_v14, 0.0  ;;  %11410 = vmatprep.subr.bf16.mxu1 %v13729_v36  ;;  %v13734_v60 = vld [vmem:[%s20389_s2 + $0x80] sm:$0xff]  }
 0xf37   : > { %v9281_v15 = vrot.slane %v19112_v41, 2  ;;  %v9282_v57 = vrot.slane %v19115_v25, 2  ;;  %v9284_v56 = vrot.slane %v19118_v3, 2  ;;  %v9285_v48 = vrot.slane %v19121_v51, 2  ;;  %11411 = vmatpush3.bf16.msra.mxu1 %v13730_v28  ;;  %9846 = vmatpush1.bf16.msra.mxu0 %v13734_v60 }
 0xf38   : > { %v9167_v1 = vadd.f32 %v19055_v54, %v9152_v59  ;;  %v9153_v44 = vmul.f32 %v19052_v34, %v19105_v49  ;;  %v9154_v17 = vmul.f32 %v19052_v34, %v19109_v10  ;;  %v13455_v55 = vpack.i.bf16 %v19126_v47, %v18451_v32  ;;  %11412 = vmatprep.subr.bf16.mxu1 %v13732_v40 }
 0xf39   : > { %v9174_v19 = vmax.f32 %v9166_v61, 0.0  ;;  %v19145_v5 = vsel %vm7504_vm13, %v9281_v15, %v9282_v57  ;;  %v19149_v27 = vsel %vm7504_vm13, %v9284_v56, %v9285_v48  ;;  %v13460_v39 = vpack.i.bf16 %v19112_v41, %v19090_v58  ;;  %v13736_v48 = vld [vmem:[%s20389_s2 + $0x10] sm:$0xff]   ;;  %9857 = vmatprep.subr.bf16.mxu0 %v20133_v2 }
 0xf3a   : > { %v9168_v63 = vadd.f32 %v19055_v54, %v9153_v44  ;;  %v9169_v24 = vadd.f32 %v19055_v54, %v9154_v17  ;;  %13456 = vrot.lane.b32.xlu1 %v13455_v55, %s20116_s23  ;;  %v9175_v30 = vmax.f32 %v9167_v1, 0.0  ;;  %v9572_v35 = vpack.c.bf16 %v19149_v27, %v19145_v5  ;;  %v13738_v44 = vld [vmem:[%s20389_s2 + $0x48] sm:$0xff]  }
 0xf3b   : > { %v9190_v4 = vrot.slane %v9174_v19, 7  ;;  %v19170_v15 = vsel %vm7504_vm13, %v9278_v62, %v9279_v53  ;;  %v13465_v56 = vpack.i.bf16 %v19118_v3, %v19112_v41  ;;  %11413 = vmatpush3.bf16.msra.mxu1 %v13733_v31  ;;  %v9239_v17 = vrot.slane %v19118_v3, 1  ;;  %v9124_v62 = vpop.permute.xlu1 %9123  ;;  %9858 = vmatpush2.bf16.msra.mxu0 %v13737_v8  ;;  %v13741_v8 = vld [vmem:[%s20389_s2 + $0x40] sm:$0xff]  }
 0xf3c   : > { %v9176_v20 = vmax.f32 %v9168_v63, 0.0  ;;  %v9177_v12 = vmax.f32 %v9169_v24, 0.0  ;;  %11203 = vmatprep.mubr.msk.bf16.mxu0 %vm2397_vm4, %v9572_v35  ;;  %v9191_v59 = vrot.slane %v9175_v30, 7  ;;  %11414 = vmatprep.subr.bf16.mxu1 %v13735_v13  ;;  %v9240_v55 = vrot.slane %v19121_v51, 1 }
 0xf3d   : > { %v19162_v14 = vsel %vm7779_vm15, 0.0, %v9190_v4  ;;  %v9214_v9 = vsel %vm7779_vm15, %v9190_v4, 0.0  ;;  %v13450_v53 = vpack.i.bf16 %v19170_v15, %v18441_v45  ;;  %v13740_v4 = vld [vmem:[%s20389_s2 + $0xc8] sm:$0xff]   ;;  %9859 = vmatprep.subr.bf16.mxu0 %v20133_v2  ;;  %v9236_v35 = vrot.slane %v19112_v41, 1 }
 0xf3e   : > { %v9287_v43 = vrot.slane %v19162_v14, 2  ;;  %v9288_v0 = vrot.slane %v9214_v9, 2  ;;  %13461 = vrot.lane.b32.xlu1 %v13460_v39, %s20135_s18  ;;  %v9192_v57 = vrot.slane %v9176_v20, 7  ;;  %v9193_v36 = vrot.slane %v9177_v12, 7  ;;  %v13739_v39 = vld [vmem:[%s20389_s2 + $0x8] sm:$0xff]  }
 0xf3f   : > { %v13445_v28 = vpack.i.bf16 %v19162_v14, %v19118_v3  ;;  %v9242_v61 = vrot.slane %v19162_v14, 1  ;;  %v9243_v1 = vrot.slane %v9214_v9, 1  ;;  %v19189_v63 = vsel %vm7779_vm15, 0.0, %v9191_v59  ;;  %11415 = vmatpush3.bf16.msra.mxu1 %v13736_v48  ;;  %9860 = vmatpush2.bf16.msra.mxu0 %v13740_v4 }
 0xf40   : > { %v19186_v19 = vsel %vm7504_vm13, %v9287_v43, %v9288_v0  ;;  %v9215_v24 = vsel %vm7779_vm15, %v9191_v59, 0.0  ;;  %v19196_v51 = vsel %vm7779_vm15, 0.0, %v9192_v57  ;;  %v19199_v30 = vsel %vm7779_vm15, %v9192_v57, 0.0  ;;  %11416 = vmatprep.subr.bf16.mxu1 %v13738_v44  ;;  %9861 = vmatprep.subr.bf16.mxu0 %v20133_v2 }
 0xf41   : > { %13446 = vrot.lane.b32.xlu0 %v13445_v28, %s20135_s18  ;;  %v19202_v20 = vsel %vm7779_vm15, 0.0, %v9193_v36  ;;  %v19205_v12 = vsel %vm7779_vm15, %v9193_v36, 0.0  ;;  %v9237_v40 = vrot.slane %v19115_v25, 1  ;;  %v13475_v31 = vpack.i.bf16 %v19186_v19, %v19149_v27 }
 0xf42   : > { %13466 = vrot.lane.b32.xlu1 %v13465_v56, %s20250_s13  ;;  %v9244_v60 = vsel %vm1408_vm0, %v9242_v61, %v9243_v1  ;;  %v9290_v9 = vrot.slane %v19189_v63, 2  ;;  %v9291_v13 = vrot.slane %v9215_v24, 2  ;;  %v19217_v43 = vsel %vm8703_vm3, %v18849_v16, %v9124_v62  ;;  %v13742_v61 = vld [vmem:[%s20389_s2] sm:$0xff]   ;;  %vm20399_vm3 = vmmov %vm20398_vm1 }
 0xf43   : > { %v9241_v0 = vsel %vm1408_vm0, %v9239_v17, %v9240_v55  ;;  %v9293_v25 = vrot.slane %v19196_v51, 2  ;;  %v9294_v59 = vrot.slane %v19199_v30, 2  ;;  %v9296_v57 = vrot.slane %v19202_v20, 2  ;;  %11417 = vmatpush3.bf16.msra.mxu1 %v13739_v39  ;;  %v13743_v17 = vld [vmem:[%s20389_s2 + $0xc0] sm:$0xff]  }
 0xf44   : > { %v9297_v36 = vrot.slane %v19205_v12, 2  ;;  %v13470_v28 = vpack.i.bf16 %v9244_v60, %v9241_v0  ;;  %v9155_v16 = vmul.f32 %v19052_v34, %v19217_v43  ;;  %v13490_v56 = vpack.i.bf16 %v19149_v27, %v19145_v5  ;;  %11418 = vmatprep.subr.bf16.mxu1 %v13741_v8  ;;  %9862 = vmatpush2.bf16.msra.mxu0 %v13743_v17 }
 0xf45   : > { %13451 = vrot.lane.b32.xlu0 %v13450_v53, %s20136_s3  ;;  %v9238_v48 = vsel %vm1408_vm0, %v9236_v35, %v9237_v40  ;;  %v9245_v1 = vrot.slane %v19189_v63, 1  ;;  %v9246_v44 = vrot.slane %v9215_v24, 1  ;;  %v19239_v2 = vsel %vm7504_vm13, %v9290_v9, %v9291_v13  ;;  %11659 = vmatprep.subr.mxu0 %v20339_v38 }
 0xf46   : > { %13476 = vrot.lane.b32.xlu1 %v13475_v31, %s20174_s9  ;;  %v19242_v34 = vsel %vm7504_vm13, %v9293_v25, %v9294_v59  ;;  %v19245_v27 = vsel %vm7504_vm13, %v9296_v57, %v9297_v36  ;;  %v13480_v55 = vpack.i.bf16 %v9238_v48, %v19126_v47  ;;  %v9170_v62 = vadd.f32 %v19055_v54, %v9155_v16 }
 0xf47   : > { %v13495_v24 = vpack.i.bf16 %v9241_v0, %v9238_v48  ;;  %11419 = vmatpush3.bf16.msra.mxu1 %v13742_v61  ;;  %v9247_v53 = vsel %vm1408_vm0, %v9245_v1, %v9246_v44  ;;  %v13485_v54 = vpack.i.bf16 %v19145_v5, %v19170_v15  ;;  %v13530_v31 = vpack.i.bf16 %v19196_v51, %v19189_v63 }
 0xf48   : > { %v9178_v47 = vmax.f32 %v9170_v62, 0.0  ;;  %v13525_v35 = vpack.i.bf16 %v9247_v53, %v9244_v60  ;;  %v9248_v9 = vrot.slane %v19196_v51, 1  ;;  %v9249_v13 = vrot.slane %v19199_v30, 1 }
 0xf49   : > { %13471 = vrot.lane.b32.xlu0 %v13470_v28, %s20173_s8  ;;  %v13505_v5 = vpack.i.bf16 %v19189_v63, %v19162_v14  ;;  %v13535_v60 = vpack.i.bf16 %v19202_v20, %v19196_v51  ;;  %v9251_v59 = vrot.slane %v19202_v20, 1  ;;  %v9252_v57 = vrot.slane %v19205_v12, 1 }
 0xf4a   : > { %13491 = vrot.lane.b32.xlu1 %v13490_v56, %s20136_s3  ;;  %v9194_v40 = vrot.slane %v9178_v47, 7  ;;  %v9250_v0 = vsel %vm1408_vm0, %v9248_v9, %v9249_v13  ;;  %v13515_v28 = vpack.i.bf16 %v19239_v2, %v19186_v19  ;;  %v13555_v16 = vpack.i.bf16 %v19245_v27, %v19242_v34 }
 0xf4b   : > { %v13540_v25 = vpack.i.bf16 %v9250_v0, %v9247_v53  ;;  %v9253_v8 = vsel %vm1408_vm0, %v9251_v59, %v9252_v57  ;;  %v13545_v17 = vpack.i.bf16 %v19242_v34, %v19239_v2 }
 0xf4c   : > { %v9210_v15 = vsel %vm7779_vm15, 0.0, %v9194_v40  ;;  %v9218_v36 = vsel %vm7779_vm15, %v9194_v40, 0.0  ;;  %v13560_v1 = vpack.i.bf16 %v9253_v8, %v9250_v0 }
 0xf4d   : > { %13481 = vrot.lane.b32.xlu0 %v13480_v55, %s20173_s8  ;;  %v13510_v30 = vpack.i.bf16 %v9210_v15, %v19202_v20  ;;  %v9376_v56 = vrot.slane %v9210_v15, 2  ;;  %v9377_v48 = vrot.slane %v9218_v36, 2  ;;  %v9349_v12 = vrot.slane %v9210_v15, 1 }
 0xf4e   : > { %13496 = vrot.lane.b32.xlu1 %v13495_v24, %s13912_s5  ;;  %v9350_v61 = vrot.slane %v9218_v36, 1 }
 0xf4f   : > { %v19290_v44 = vsel %vm7504_vm13, %v9376_v56, %v9377_v48 }
 0xf50   : > { %v13570_v55 = vpack.i.bf16 %v19290_v44, %v19245_v27  ;;  %v9351_v62 = vsel %vm1408_vm0, %v9349_v12, %v9350_v61 }
 0xf51   : > { %13486 = vrot.lane.b32.xlu0 %v13485_v54, %s20174_s9  ;;  %v13580_v53 = vpack.i.bf16 %v18451_v32, %v9351_v62  ;;  %v13575_v54 = vpack.i.bf16 %v18412_v23, %v9210_v15 }
 0xf52   : > { %13526 = vrot.lane.b32.xlu1 %v13525_v35, %s20116_s23 }
 0xf55   : > { %13501 = vrot.lane.b32.xlu0 %v13495_v24, %s20116_s23  ;;  %v13550_v24 = vpack.i.bf16 %v9351_v62, %v9253_v8 }
 0xf56   : > { %13531 = vrot.lane.b32.xlu1 %v13530_v31, %s20135_s18 }
 0xf59   : > { %13506 = vrot.lane.b32.xlu0 %v13505_v5, %s20250_s13 }
 0xf5a   : > { %13536 = vrot.lane.b32.xlu1 %v13535_v60, %s20250_s13 }
 0xf5d   : > { %13511 = vrot.lane.b32.xlu0 %v13510_v30, %s20135_s18 }
 0xf5e   : > { %13541 = vrot.lane.b32.xlu1 %v13540_v25, %s20173_s8 }
 0xf61   : > { %13516 = vrot.lane.b32.xlu0 %v13515_v28, %s20136_s3 }
 0xf62   : > { %13556 = vrot.lane.b32.xlu1 %v13555_v16, %s20136_s3  ;;  %s13913_s3 = smov 2  }
 0xf65   : > { %13521 = vrot.lane.b32.xlu0 %v13525_v35, %s13912_s5 }
 0xf66   : > { %13561 = vrot.lane.b32.xlu1 %v13560_v1, %s13912_s5 }
 0xf69   : > { %13546 = vrot.lane.b32.xlu0 %v13545_v17, %s20174_s9 }
 0xf6a   : > { %13571 = vrot.lane.b32.xlu1 %v13570_v55, %s20174_s9  ;;  %s20403_s9 = sld [smem:[#allocation38_spill]] }
 0xf6d   : > { %13551 = vrot.lane.b32.xlu0 %v13550_v24, %s20173_s8  ;;  %s13915_s8 = smov 12  }
 0xf6e   : > { %13581 = vrot.lane.b32.xlu1 %v13580_v53, %s13912_s5  ;;  %s13920_s5 = smov 60  }
 0xf71   : > { %13566 = vrot.lane.b32.xlu0 %v13560_v1, %s20116_s23 }
 0xf72   : > { %10077 = vrot.lane.b32.xlu1 %v18451_v32, %s13913_s3 }
 0xf75   : > { %13576 = vrot.lane.b32.xlu0 %v13575_v54, %s20250_s13  ;;  %s13914_s13 = smov 4  }
 0xf76   : > { %10122 = vrot.lane.b32.xlu1 %v18441_v45, %s13914_s13 }
 0xf7a   : > { %10240 = vrot.lane.b32.xlu1 %v18412_v23, %s13915_s8 }
 0xf7e   : > { %10264 = vrot.lane.b32.xlu1 %v18451_v32, %s13916_s17 }
 0xfac   : > { %v13457_v47 = vpop.permute.xlu1 %13456 }
 0xfad   : > { %v13459_v5 = vunpack.i.h.bf16 %v13457_v47  ;;  %v13458_v60 = vunpack.i.l.bf16 %v13457_v47 }
 0xfaf   : > { %v9460_v15 = vsel %vm2397_vm4, %v19090_v58, %v13459_v5  ;;  %v9459_v57 = vsel %vm2397_vm4, %v18412_v23, %v13458_v60 }
 0xfb0   : > { %v13462_v35 = vpop.permute.xlu1 %13461 }
 0xfb1   : > { %v13464_v8 = vunpack.i.h.bf16 %v13462_v35  ;;  %v13463_v12 = vunpack.i.l.bf16 %v13462_v35 }
 0xfb3   : > { %v13447_v40 = vpop.permute.xlu0 %13446 }
 0xfb4   : > { %v13467_v31 = vpop.permute.xlu1 %13466  ;;  %v13449_v36 = vunpack.i.h.bf16 %v13447_v40  ;;  %v13448_v28 = vunpack.i.l.bf16 %v13447_v40 }
 0xfb5   : > { %v13469_v61 = vunpack.i.h.bf16 %v13467_v31  ;;  %v13468_v1 = vunpack.i.l.bf16 %v13467_v31 }
 0xfb7   : > { %v13452_v9 = vpop.permute.xlu0 %13451 }
 0xfb8   : > { %v19308_v13 = vpop.permute.xlu1 %13476  ;;  %v13454_v16 = vunpack.i.h.bf16 %v13452_v9  ;;  %v13453_v56 = vunpack.i.l.bf16 %v13452_v9 }
 0xfb9   : > { %v13478_v54 = vunpack.i.l.bf16 %v19308_v13 }
 0xfba   : > { %v9468_v9 = vsel %vm2472_vm6, %v9460_v15, %v13454_v16  ;;  %v9476_v35 = vsel %vm2554_vm8, %v13454_v16, %v13464_v8  ;;  %v9467_v31 = vsel %vm2472_vm6, %v9459_v57, %v13453_v56  ;;  %v9475_v5 = vsel %vm2554_vm8, %v13453_v56, %v13463_v12 }
 0xfbb   : > { %v13472_v0 = vpop.permute.xlu0 %13471 }
 0xfbc   : > { %v19310_v30 = vpop.permute.xlu1 %13491  ;;  %v13474_v47 = vunpack.i.h.bf16 %v13472_v0  ;;  %v13473_v40 = vunpack.i.l.bf16 %v13472_v0 }
 0xfbd   : > { %v20022_v25 = vunpack.i.h.bf16 %v19310_v30  ;;  %v13493_v59 = vunpack.i.l.bf16 %v19310_v30 }
 0xfbf   : > { %v13482_v48 = vpop.permute.xlu0 %13481  ;;  %v9477_v55 = vsel %vm2554_vm8, %v13493_v59, %v13448_v28  ;;  %v9478_v62 = vsel %vm2554_vm8, %v20022_v25, %v13449_v36 }
 0xfc0   : > { %v13497_v17 = vpop.permute.xlu1 %13496  ;;  %v13484_v58 = vunpack.i.h.bf16 %v13482_v48  ;;  %v13483_v24 = vunpack.i.l.bf16 %v13482_v48  ;;  %v9485_v48 = vsel %vm3926_vm10, %v9477_v55, %v13473_v40  ;;  %v9486_v25 = vsel %vm3926_vm10, %v9478_v62, %v13474_v47 }
 0xfc1   : > { %v13499_v4 = vunpack.i.h.bf16 %v13497_v17  ;;  %v13498_v53 = vunpack.i.l.bf16 %v13497_v17  ;;  %v9493_v17 = vsel %vm3967_vm11, %v9485_v48, %v13478_v54  ;;  %v20394_v62 = vunpack.i.h.bf16 %v19308_v13 }
 0xfc2   : > { %v9483_v0 = vsel %vm3926_vm10, %v9475_v5, %v13483_v24  ;;  %v9484_v15 = vsel %vm3926_vm10, %v9476_v35, %v13484_v58  ;;  %v9569_v35 = vpack.c.bf16 %v9468_v9, %v9467_v31  ;;  %v20396_v31 = vunpack.i.h.bf16 %v19310_v30 }
 0xfc3   : > { %v13487_v60 = vpop.permute.xlu0 %13486  ;;  %v9494_v58 = vsel %vm3967_vm11, %v9486_v25, %v20394_v62  ;;  %v20395_v25 = vpack.c.bf16 %v19239_v2, %v19186_v19 }
 0xfc4   : > { %v13489_v28 = vunpack.i.h.bf16 %v13487_v60  ;;  %v13488_v39 = vunpack.i.l.bf16 %v13487_v60  ;;  %v13527_v36 = vpop.permute.xlu1 %13526 }
 0xfc6   : > { %v9500_v16 = vsel %vm4008_vm12, %v13489_v28, %v13469_v61  ;;  %v9499_v57 = vsel %vm4008_vm12, %v13488_v39, %v13468_v1  ;;  %v9491_v56 = vsel %vm3967_vm11, %v9483_v0, %v13488_v39  ;;  %v9492_v8 = vsel %vm3967_vm11, %v9484_v15, %v13489_v28 }
 0xfc7   : > { %v9508_v12 = vsel %vm20392_vm7, %v9500_v16, %v13499_v4  ;;  %v9507_v55 = vsel %vm20393_vm14, %v9499_v57, %v13498_v53  ;;  %v13502_v40 = vpop.permute.xlu0 %13501  ;;  %v9570_v47 = vpack.c.bf16 %v9492_v8, %v9491_v56  ;;  %v9574_v4 = vpack.c.bf16 %v9494_v58, %v9493_v17 }
 0xfc8   : > { %v9571_v61 = vpack.c.bf16 %v9508_v12, %v9507_v55  ;;  %v13504_v24 = vunpack.i.h.bf16 %v13502_v40  ;;  %v13503_v1 = vunpack.i.l.bf16 %v13502_v40  ;;  %v13532_v39 = vpop.permute.xlu1 %13531  ;;  %v13529_v16 = vunpack.i.h.bf16 %v13527_v36 }
 0xfc9   : > { %9798 = vmatprep.mubr.bf16.mxu1 %v9570_v47  ;;  %v13534_v55 = vunpack.i.h.bf16 %v13532_v39  ;;  %v13533_v17 = vunpack.i.l.bf16 %v13532_v39  ;;  %vm20406_vm7 = vmmov 0  }
 0xfca   : > { %9864 = vmatmul.mubr.bf16.vlgmr.msra.gmra.mxu0 %v9571_v61  ;;  %v9462_v53 = vsel %vm2397_vm4, %v19118_v3, %v13504_v24  ;;  %v9461_v5 = vsel %vm2397_vm4, %v19112_v41, %v13503_v1  ;;  %9799 = vmatmul.mubr.bf16.vlgmr.msra.gmra.mxu1 %v9569_v35  ;;  %v13528_v41 = vunpack.i.l.bf16 %v13527_v36  ;;  %v20397_v24 = vunpack.i.h.bf16 %v19308_v13 }
 0xfcb   : > { %v13507_v60 = vpop.permute.xlu0 %13506  ;;  %11204 = vmatprep.mubr.msk.bf16.mxu0 %vm2397_vm4, %v20395_v25  ;;  %9806 = vmatprep.mubr.bf16.mxu1 %v9574_v4  ;;  %v9469_v9 = vsel %vm2472_vm6, %v9461_v5, %v13493_v59  ;;  %v9470_v48 = vsel %vm2472_vm6, %v9462_v53, %v20396_v31  ;;  %v9464_v59 = vsel %vm2397_vm4, %v19189_v63, %v13529_v16 }
 0xfcc   : > { %v13537_v28 = vpop.permute.xlu1 %13536  ;;  %v9573_v15 = vpack.c.bf16 %v9470_v48, %v9469_v9  ;;  %v13509_v19 = vunpack.i.h.bf16 %v13507_v60  ;;  %v13508_v2 = vunpack.i.l.bf16 %v13507_v60  ;;  %v9463_v30 = vsel %vm2397_vm4, %v19162_v14, %v13528_v41 }
 0xfcd   : > { %v13539_v62 = vunpack.i.h.bf16 %v13537_v28  ;;  %v13538_v35 = vunpack.i.l.bf16 %v13537_v28 }
 0xfce   : > { %v9502_v1 = vsel %vm4008_vm12, %v20397_v24, %v13509_v19  ;;  %v9501_v47 = vsel %vm4008_vm12, %v13478_v54, %v13508_v2  ;;  %v20400_v2 = vpack.c.bf16 %v19245_v27, %v19242_v34 }
 0xfcf   : > { %v13512_v0 = vpop.permute.xlu0 %13511 }
 0xfd0   : > { %v13542_v3 = vpop.permute.xlu1 %13541 }
 0xfd1   : > { %v13544_v63 = vunpack.i.h.bf16 %v13542_v3  ;;  %v13543_v5 = vunpack.i.l.bf16 %v13542_v3 }
 0xfd2   : > { %9807 = vmatmul.mubr.bf16.gmra.mxu1 %v9573_v15 }
 0xfd3   : > { %v13517_v57 = vpop.permute.xlu0 %13516 }
 0xfd4   : > { %v19356_v56 = vpop.permute.xlu1 %13556  ;;  %v13519_v8 = vunpack.i.h.bf16 %v13517_v57  ;;  %v13518_v12 = vunpack.i.l.bf16 %v13517_v57 }
 0xfd5   : > { %v13559_v60 = vunpack.i.h.bf16 %v19356_v56  ;;  %v13558_v25 = vunpack.i.l.bf16 %v19356_v56 }
 0xfd6   : > { %v9480_v4 = vsel %vm2554_vm8, %v13519_v8, %v13534_v55  ;;  %v9479_v14 = vsel %vm2554_vm8, %v13518_v12, %v13533_v17  ;;  %v9472_v13 = vsel %vm2472_vm6, %v9464_v59, %v13519_v8  ;;  %v9471_v54 = vsel %vm2472_vm6, %v9463_v30, %v13518_v12 }
 0xfd7   : > { %v13522_v40 = vpop.permute.xlu0 %13521  ;;  %v9487_v41 = vsel %vm3926_vm10, %v9479_v14, %v13543_v5  ;;  %v9488_v57 = vsel %vm3926_vm10, %v9480_v4, %v13544_v63  ;;  %v13514_v59 = vunpack.i.h.bf16 %v13512_v0  ;;  %v13513_v30 = vunpack.i.l.bf16 %v13512_v0 }
 0xfd8   : > { %v13524_v58 = vunpack.i.h.bf16 %v13522_v40  ;;  %v13523_v36 = vunpack.i.l.bf16 %v13522_v40  ;;  %v13562_v61 = vpop.permute.xlu1 %13561  ;;  %v9577_v17 = vpack.c.bf16 %v9472_v13, %v9471_v54 }
 0xfd9   : > { %v13564_v15 = vunpack.i.h.bf16 %v13562_v61  ;;  %v13563_v16 = vunpack.i.l.bf16 %v13562_v61  ;;  %v9481_v24 = vsel %vm2554_vm8, %v13558_v25, %v13513_v30  ;;  %v9482_v34 = vsel %vm2554_vm8, %v13559_v60, %v13514_v59 }
 0xfda   : > { %v9509_v39 = vsel %vm20398_vm1, %v9501_v47, %v13523_v36  ;;  %v9510_v53 = vsel %vm20399_vm3, %v9502_v1, %v13524_v58 }
 0xfdb   : > { %v13547_v9 = vpop.permute.xlu0 %13546  ;;  %v9575_v31 = vpack.c.bf16 %v9510_v53, %v9509_v39 }
 0xfdc   : > { %v13549_v28 = vunpack.i.h.bf16 %v13547_v9  ;;  %v13548_v48 = vunpack.i.l.bf16 %v13547_v9  ;;  %v13572_v56 = vpop.permute.xlu1 %13571  ;;  %v9584_v9 = vpack.c.bf16 %v18441_v45, %v19290_v44 }
 0xfdd   : > { %9872 = vmatmul.mubr.bf16.gmra.mxu0 %v9575_v31  ;;  %v13574_v27 = vunpack.i.h.bf16 %v13572_v56  ;;  %v13573_v1 = vunpack.i.l.bf16 %v13572_v56 }
 0xfde   : > { %v9504_v3 = vsel %vm4008_vm12, %v13549_v28, %v13539_v62  ;;  %v9503_v19 = vsel %vm4008_vm12, %v13548_v48, %v13538_v35  ;;  %11205 = vmatprep.mubr.msk.bf16.mxu0 %vm2397_vm4, %v20400_v2  ;;  %v9495_v8 = vsel %vm3967_vm11, %v9487_v41, %v13548_v48  ;;  %v9496_v12 = vsel %vm3967_vm11, %v9488_v57, %v13549_v28 }
 0xfdf   : > { %v13552_v55 = vpop.permute.xlu0 %13551  ;;  %v9578_v40 = vpack.c.bf16 %v9496_v12, %v9495_v8  ;;  %v9511_v62 = vsel %vm20401_vm9, %v9503_v19, %v13563_v16  ;;  %v9512_v61 = vsel %vm20402_vm5, %v9504_v3, %v13564_v15  ;;  %v11175_v12 = vld [vmem:[%s20403_s9] ss:$0 sm:$0xff]  ;;  %s11226_s9 = sshll.u32 %s14156_s0, 4 }
 0xfe0   : > { %v13554_v58 = vunpack.i.h.bf16 %v13552_v55  ;;  %v13553_v36 = vunpack.i.l.bf16 %v13552_v55  ;;  %v9579_v63 = vpack.c.bf16 %v9512_v61, %v9511_v62  ;;  %v13582_v31 = vpop.permute.xlu1 %13581 }
 0xfe1   : > { %9814 = vmatprep.mubr.bf16.mxu1 %v9578_v40  ;;  %v13584_v44 = vunpack.i.h.bf16 %v13582_v31  ;;  %v13583_v3 = vunpack.i.l.bf16 %v13582_v31 }
 0xfe2   : > { %9815 = vmatmul.mubr.bf16.gmra.mxu1 %v9577_v17  ;;  %v9489_v47 = vsel %vm3926_vm10, %v9481_v24, %v13553_v36  ;;  %v9490_v0 = vsel %vm3926_vm10, %v9482_v34, %v13554_v58  ;;  %vm20404_vm10 = vmmov %vm20398_vm1 }
 0xfe3   : > { %v13567_v35 = vpop.permute.xlu0 %13566  ;;  %v9497_v4 = vsel %vm3967_vm11, %v9489_v47, %v13573_v1  ;;  %v9498_v14 = vsel %vm3967_vm11, %v9490_v0, %v13574_v27  ;;  %vm20405_vm11 = vmmov %vm20398_vm1 }
 0xfe4   : > { %v13569_v39 = vunpack.i.h.bf16 %v13567_v35  ;;  %v13568_v53 = vunpack.i.l.bf16 %v13567_v35  ;;  %v9582_v5 = vpack.c.bf16 %v9498_v14, %v9497_v4 }
 0xfe5   : > { %9880 = vmatmul.mubr.bf16.gmra.mxu0 %v9579_v63 }
 0xfe6   : > { %v9466_v13 = vsel %vm2397_vm4, %v19202_v20, %v13569_v39  ;;  %v9465_v54 = vsel %vm2397_vm4, %v19196_v51, %v13568_v53  ;;  %9822 = vmatprep.mubr.bf16.mxu1 %v9582_v5  ;;  %11206 = vmatprep.mubr.msk.bf16.mxu0 %vm2397_vm4, %v9584_v9 }
 0xfe7   : > { %v13577_v28 = vpop.permute.xlu0 %13576  ;;  %v9473_v48 = vsel %vm2472_vm6, %v9465_v54, %v13558_v25  ;;  %v9474_v15 = vsel %vm2472_vm6, %v9466_v13, %v13559_v60  ;;  %vm20407_vm6 = vcmask 490496  }
 0xfe8   : > { %v13579_v16 = vunpack.i.h.bf16 %v13577_v28  ;;  %v13578_v41 = vunpack.i.l.bf16 %v13577_v28  ;;  %v9581_v57 = vpack.c.bf16 %v9474_v15, %v9473_v48  ;;  %vm20409_vm14 = vmmov %vm20407_vm6 }
 0xfe9   : > { %vm20410_vm1 = vmmov %vm20407_vm6 }
 0xfea   : > { %v9506_v19 = vsel %vm4008_vm12, %v13574_v27, %v13579_v16  ;;  %v9505_v20 = vsel %vm4008_vm12, %v13573_v1, %v13578_v41  ;;  %9823 = vmatmul.mubr.bf16.gmra.mxu1 %v9581_v57  ;;  %vm20408_vm12 = vmmov %vm20407_vm6 }
 0xfeb   : > { %v9513_v51 = vsel %vm20404_vm10, %v9505_v20, %v13583_v3  ;;  %v9514_v56 = vsel %vm20405_vm11, %v9506_v19, %v13584_v44  ;;  %vm20411_vm3 = vmmov %vm20410_vm1 }
 0xfec   : > { %v9583_v2 = vpack.c.bf16 %v9514_v56, %v9513_v51  ;;  %vm20412_vm9 = vmmov %vm20410_vm1 }
 0xfed   : > { %vm20413_vm5 = vmmov %vm20410_vm1 }
 0xfee   : > { %9888 = vmatmul.mubr.bf16.gmra.mxu0 %v9583_v2  ;;  %vm20414_vm10 = vmmov %vm20410_vm1 }
 0xfef   : > { %11689 = vmatprep.mubr.msk.f32.mxu0 %vm20406_vm7, %v20339_v38  ;;  %vm20415_vm11 = vmmov %vm20410_vm1 }
 0xff0   : > { %vm20416_vm7 = vmmov %vm20410_vm1 }
0x108a   : > { %v9865_v60 = vpop.f32.mrf.mxu0  ;;  %v11420_v25 = vpop.f32.mrf.mxu1 }
0x108c   : > { %v9867_v8 = vpop.f32.mrf.mxu0  ;;  %v11421_v59 = vpop.f32.mrf.mxu1 }
0x108d   : > { %v11422_v30 = vadd.f32 %v11421_v59, %v11420_v25 }
0x108e   : > { %v9868_v55 = vpop.f32.mrf.mxu0  ;;  %v11423_v40 = vpop.f32.mrf.mxu1 }
0x108f   : > { %v9801_v17 = vadd.f32 %v11422_v30, %v11175_v12 }
0x1090   : > { %v9870_v58 = vpop.f32.mrf.mxu0  ;;  %v11424_v36 = vpop.f32.mrf.mxu1 }
0x1091   : > { %v9866_v62 = vadd.f32 %v9865_v60, %v9801_v17  ;;  %v11425_v61 = vadd.f32 %v11424_v36, %v11423_v40 }
0x1092   : > { %v11426_v24 = vpop.f32.mrf.mxu1 }
0x1093   : > { %v9804_v34 = vadd.f32 %v11425_v61, %v11175_v12  ;;  %9904 = vrot.lane.b32.xlu0 %v9866_v62, %s20116_s23 }
0x1094   : > { %v11427_v27 = vpop.f32.mrf.mxu1 }
0x1095   : > { %v9869_v1 = vadd.f32 %v9868_v55, %v9804_v34  ;;  %v11428_v47 = vadd.f32 %v11427_v27, %v11426_v24  ;;  %v19424_v34 = vpop.permute.xlu1 %10077 }
0x1096   : > { %v11429_v32 = vpop.f32.mrf.mxu1 }
0x1097   : > { %9906 = vrot.lane.b32.xlu1 %v9869_v1, %s20116_s23  ;;  %v9809_v63 = vadd.f32 %v11428_v47, %v11175_v12 }
0x1098   : > { %v11430_v0 = vpop.f32.mrf.mxu1 }
0x1099   : > { %v11431_v35 = vadd.f32 %v11430_v0, %v11429_v32  ;;  %v19426_v27 = vpop.permute.xlu1 %10122 }
0x109b   : > { %v9812_v53 = vadd.f32 %v11431_v35, %v11175_v12 }
0x109d   : > { %v9873_v4 = vpop.f32.mrf.mxu0  ;;  %v19428_v1 = vpop.permute.xlu1 %10240 }
0x109e   : > { %v9874_v14 = vadd.f32 %v9873_v4, %v9809_v63 }
0x109f   : > { %v9875_v39 = vpop.f32.mrf.mxu0 }
0x10a0   : > { %9908 = vrot.lane.b32.xlu0 %v9874_v14, %s20116_s23 }
0x10a1   : > { %v9876_v5 = vpop.f32.mrf.mxu0  ;;  %v19430_v32 = vpop.permute.xlu1 %10264 }
0x10a2   : > { %v9877_v9 = vadd.f32 %v9876_v5, %v9812_v53  ;;  %v11432_v31 = vpop.f32.mrf.mxu1 }
0x10a3   : > { %v9878_v13 = vpop.f32.mrf.mxu0 }
0x10a4   : > { %v11433_v54 = vpop.f32.mrf.mxu1  ;;  %9910 = vrot.lane.b32.xlu1 %v9877_v9, %s20116_s23 }
0x10a5   : > { %v11434_v28 = vadd.f32 %v11433_v54, %v11432_v31  ;;  %v9881_v48 = vpop.f32.mrf.mxu0 }
0x10a6   : > { %v11435_v15 = vpop.f32.mrf.mxu1 }
0x10a7   : > { %v9817_v16 = vadd.f32 %v11434_v28, %v11175_v12  ;;  %v9883_v41 = vpop.f32.mrf.mxu0 }
0x10a8   : > { %v11436_v57 = vpop.f32.mrf.mxu1 }
0x10a9   : > { %v9882_v44 = vadd.f32 %v9881_v48, %v9817_v16  ;;  %v11437_v3 = vadd.f32 %v11436_v57, %v11435_v15  ;;  %v9884_v19 = vpop.f32.mrf.mxu0 }
0x10aa   : > { %v11438_v20 = vpop.f32.mrf.mxu1 }
0x10ab   : > { %v9820_v51 = vadd.f32 %v11437_v3, %v11175_v12  ;;  %v9886_v56 = vpop.f32.mrf.mxu0  ;;  %9912 = vrot.lane.b32.xlu0 %v9882_v44, %s20116_s23 }
0x10ac   : > { %v11439_v2 = vpop.f32.mrf.mxu1 }
0x10ad   : > { %v9885_v60 = vadd.f32 %v9884_v19, %v9820_v51  ;;  %v11440_v25 = vadd.f32 %v11439_v2, %v11438_v20 }
0x10ae   : > { %v11441_v8 = vpop.f32.mrf.mxu1  ;;  %v9889_v59 = vpop.f32.mrf.mxu0 }
0x10af   : > { %v9825_v30 = vadd.f32 %v11440_v25, %v11175_v12  ;;  %9914 = vrot.lane.b32.xlu1 %v9885_v60, %s20116_s23 }
0x10b0   : > { %v11442_v55 = vpop.f32.mrf.mxu1  ;;  %v9891_v40 = vpop.f32.mrf.mxu0 }
0x10b1   : > { %v9890_v17 = vadd.f32 %v9889_v59, %v9825_v30  ;;  %v11443_v58 = vadd.f32 %v11442_v55, %v11441_v8 }
0x10b2   : > { %v9892_v36 = vpop.f32.mrf.mxu0 }
0x10b3   : > { %v9828_v62 = vadd.f32 %v11443_v58, %v11175_v12  ;;  %9916 = vrot.lane.b32.xlu0 %v9890_v17, %s20116_s23 }
0x10b4   : > { %v9894_v61 = vpop.f32.mrf.mxu0 }
0x10b5   : > { %v9893_v24 = vadd.f32 %v9892_v36, %v9828_v62 }
0x10b7   : > { %9918 = vrot.lane.b32.xlu1 %v9893_v24, %s20116_s23  ;;  %s13917_s23 = smov 6  }
0x1105   : > { %v9905_v47 = vpop.permute.xlu0 %9904 }
0x1106   : > { %v19434_v0 = vsel %vm2397_vm4, %v19059_v11, %v9905_v47 }
0x1107   : > { %v9936_v12 = vsel %vm20407_vm6, %v19434_v0, -inf  ;;  %v9960_v35 = vsel %vm20408_vm12, %v19434_v0, 0.0  ;;  %vm20417_vm6 = vmmov %vm20410_vm1 }
0x1108   : > { %9937 = vmax.xlane.f32.xlu1 %v9936_v12  ;;  %9961 = vadd.xlane.f32.xlu0 %v9960_v35  ;;  %vm20418_vm12 = vmmov %vm20410_vm1 }
0x1109   : > { %v9907_v63 = vpop.permute.xlu1 %9906 }
0x110a   : > { %v19442_v4 = vsel %vm2397_vm4, %v19066_v7, %v9907_v63 }
0x110b   : > { %v9939_v14 = vsel %vm20409_vm14, %v19442_v4, -inf  ;;  %v9963_v11 = vsel %vm20410_vm1, %v19442_v4, 0.0  ;;  %vm20419_vm14 = vmmov %vm20410_vm1 }
0x110c   : > { %9940 = vmax.xlane.f32.xlu1 %v9939_v14  ;;  %9964 = vadd.xlane.f32.xlu0 %v9963_v11 }
0x1112   : > { %v9909_v39 = vpop.permute.xlu0 %9908 }
0x1113   : > { %v19450_v53 = vsel %vm2397_vm4, %v19070_v22, %v9909_v39 }
0x1114   : > { %v9966_v5 = vsel %vm20411_vm3, %v19450_v53, 0.0  ;;  %v9942_v13 = vsel %vm20413_vm5, %v19450_v53, -inf  ;;  %vm20420_vm3 = vmmov %vm20410_vm1  ;;  %vm9993_vm5 = vcmask 7168  }
0x1115   : > { %9967 = vadd.xlane.f32.xlu0 %v9966_v5 }
0x1116   : > { %v9911_v9 = vpop.permute.xlu1 %9910 }
0x1117   : > { %v19456_v7 = vsel %vm2397_vm4, %v19080_v26, %v9911_v9 }
0x1118   : > { %v9969_v31 = vsel %vm20412_vm9, %v19456_v7, 0.0  ;;  %v9945_v22 = vsel %vm20414_vm10, %v19456_v7, -inf  ;;  %vm20421_vm9 = vmmov %vm20410_vm1  ;;  %vm10343_vm10 = vcmask 97280  }
0x1119   : > { %9970 = vadd.xlane.f32.xlu1 %v9969_v31  ;;  %9943 = vmax.xlane.f32.xlu0 %v9942_v13 }
0x111d   : > { %9946 = vmax.xlane.f32.xlu1 %v9945_v22  ;;  %v9913_v54 = vpop.permute.xlu0 %9912 }
0x111e   : > { %v19466_v28 = vsel %vm2397_vm4, %v19084_v21, %v9913_v54 }
0x111f   : > { %v9972_v26 = vsel %vm20415_vm11, %v19466_v28, 0.0  ;;  %v9948_v41 = vsel %vm20417_vm6, %v19466_v28, -inf  ;;  %vm10352_vm11 = vcmask 113664   ;;  %vm20424_vm6 = vmmov %vm20410_vm1 }
0x1120   : > { %9973 = vadd.xlane.f32.xlu0 %v9972_v26 }
0x1121   : > { %v9915_v48 = vpop.permute.xlu1 %9914 }
0x1122   : > { %v19472_v15 = vsel %vm2397_vm4, %v19105_v49, %v9915_v48 }
0x1123   : > { %v9975_v16 = vsel %vm20416_vm7, %v19472_v15, 0.0  ;;  %v9951_v44 = vsel %vm20418_vm12, %v19472_v15, -inf  ;;  %vm10379_vm7 = vcmask 146432   ;;  %vm20425_vm12 = vmmov %vm20410_vm1 }
0x1124   : > { %9976 = vadd.xlane.f32.xlu1 %v9975_v16  ;;  %9949 = vmax.xlane.f32.xlu0 %v9948_v41 }
0x1125   : > { %v9917_v57 = vpop.permute.xlu0 %9916 }
0x1126   : > { %v19480_v21 = vsel %vm2397_vm4, %v19109_v10, %v9917_v57 }
0x1127   : > { %v9978_v49 = vsel %vm20419_vm14, %v19480_v21, 0.0  ;;  %v9954_v10 = vsel %vm20420_vm3, %v19480_v21, -inf  ;;  %vm20426_vm14 = vmmov %vm20410_vm1 }
0x1128   : > { %9952 = vmax.xlane.f32.xlu1 %v9951_v44  ;;  %9979 = vadd.xlane.f32.xlu0 %v9978_v49  ;;  %vm20427_vm3 = vmmov %vm20410_vm1 }
0x1129   : > { %v9919_v3 = vpop.permute.xlu1 %9918 }
0x112a   : > { %v19488_v19 = vsel %vm2397_vm4, %v19217_v43, %v9919_v3  ;;  %v10371_v3 = vld [vmem:[%s20422_s19 + $0x10] sm:$0x3]  ;;  %vm10298_vm4 = vcmask 15360  }
0x112b   : > { %v9981_v20 = vsel %vm20410_vm1, %v19488_v19, 0.0  ;;  %v9957_v51 = vsel %vm20421_vm9, %v19488_v19, -inf  ;;  %11641 = vmatprep.subr.msk.mxu1 %vm8967_vm2, %v10371_v3  ;;  %vm20429_vm9 = vmmov %vm20410_vm1 }
0x112c   : > { %9982 = vadd.xlane.f32.xlu1 %v9981_v20  ;;  %9955 = vmax.xlane.f32.xlu0 %v9954_v10 }
0x112d   : > { %11642 = vmatpush3.msk.msra.mxu1 %vm8967_vm2, %v10371_v3  ;;  %vm10334_vm2 = vcmask 80896  }
0x1130   : > { %9958 = vmax.xlane.f32.xlu0 %v9957_v51 }
0x1191   : > { %v9938_v56 = vpop.xlane.xlu1 %9937  ;;  %v9962_v2 = vpop.xlane.xlu0 %9961 }
0x1192   : > { %v9985_v60 = vmul.f32 0.016666668, %v9962_v2 }
0x1194   : > { %v9994_v25 = vsel %vm9993_vm5, %v9938_v56, %v9985_v60 }
0x1195   : > { %v10010_v43 = vrot.slane %v9994_v25, 7  ;;  %v9965_v8 = vpop.xlane.xlu0 %9964  ;;  %v9941_v55 = vpop.xlane.xlu1 %9940  ;;  %v10370_v25 = vld [vmem:[%s20422_s19 + $0x8] sm:$0xff] }
0x1196   : > { %v9986_v59 = vmul.f32 0.016666668, %v9965_v8  ;;  %11643 = vmatprep.subr.mxu1 %v10370_v25 }
0x1197   : > { %v10034_v30 = vsel %vm7779_vm15, %v10010_v43, 0.0  ;;  %v19499_v40 = vsel %vm7779_vm15, 0.0, %v10010_v43  ;;  %v10369_v43 = vld [vmem:[%s20422_s19] sm:$0xff]  ;;  %11644 = vmatpush3.msra.mxu1 %v10370_v25 }
0x1198   : > { %v9995_v17 = vsel %vm9993_vm5, %v9941_v55, %v9986_v59  ;;  %10147 = vrot.lane.b32.xlu0 %v19499_v40, %s13917_s23  ;;  %v10056_v58 = vrot.slane %v19499_v40, 1  ;;  %v10101_v36 = vrot.slane %v19499_v40, 2  ;;  %v10102_v62 = vrot.slane %v10034_v30, 2  ;;  %11645 = vmatprep.subr.mxu1 %v10369_v43 }
0x1199   : > { %v10011_v61 = vrot.slane %v9995_v17, 7  ;;  %v10057_v24 = vrot.slane %v10034_v30, 1  ;;  %11646 = vmatpush3.msra.mxu1 %v10369_v43 }
0x119a   : > { %v10103_v47 = vsel %vm7504_vm13, %v10101_v36, %v10102_v62 }
0x119b   : > { %10124 = vrot.lane.b32.xlu1 %v10103_v47, %s13914_s13  ;;  %v10058_v12 = vsel %vm1408_vm0, %v10056_v58, %v10057_v24  ;;  %v10035_v35 = vsel %vm7779_vm15, %v10011_v61, 0.0  ;;  %v19512_v63 = vsel %vm7779_vm15, 0.0, %v10011_v61 }
0x119c   : > { %10079 = vrot.lane.b32.xlu0 %v10058_v12, %s13913_s3  ;;  %v10059_v11 = vrot.slane %v19512_v63, 1  ;;  %v10060_v39 = vrot.slane %v10035_v35, 1  ;;  %v10104_v22 = vrot.slane %v19512_v63, 2  ;;  %v10105_v54 = vrot.slane %v10035_v35, 2 }
0x119e   : > { %v9968_v14 = vpop.xlane.xlu0 %9967  ;;  %v10061_v13 = vsel %vm1408_vm0, %v10059_v11, %v10060_v39  ;;  %v10106_v48 = vsel %vm7504_vm13, %v10104_v22, %v10105_v54 }
0x119f   : > { %10202 = vrot.lane.b32.xlu1 %v10103_v47, %s13918_s14  ;;  %v9987_v5 = vmul.f32 0.016666668, %v9968_v14 }
0x11a0   : > { %10175 = vrot.lane.b32.xlu0 %v10058_v12, %s13919_s28 }
0x11a2   : > { %v9944_v9 = vpop.xlane.xlu0 %9943  ;;  %v9971_v49 = vpop.xlane.xlu1 %9970 }
0x11a3   : > { %v9996_v31 = vsel %vm9993_vm5, %v9944_v9, %v9987_v5  ;;  %10149 = vrot.lane.b32.xlu1 %v19512_v63, %s13917_s23  ;;  %v9988_v2 = vmul.f32 0.016666668, %v9971_v49 }
0x11a4   : > { %v10012_v26 = vrot.slane %v9996_v31, 7  ;;  %10177 = vrot.lane.b32.xlu0 %v10061_v13, %s13919_s28 }
0x11a6   : > { %v19527_v16 = vsel %vm7779_vm15, 0.0, %v10012_v26  ;;  %v10036_v41 = vsel %vm7779_vm15, %v10012_v26, 0.0  ;;  %v9947_v56 = vpop.xlane.xlu1 %9946 }
0x11a7   : > { %10226 = vrot.lane.b32.xlu1 %v19512_v63, %s13915_s8  ;;  %v10063_v57 = vrot.slane %v10036_v41, 1  ;;  %v10062_v44 = vrot.slane %v19527_v16, 1  ;;  %v10108_v20 = vrot.slane %v10036_v41, 2  ;;  %v10107_v51 = vrot.slane %v19527_v16, 2 }
0x11a8   : > { %10204 = vrot.lane.b32.xlu0 %v10106_v48, %s13918_s14  ;;  %v9997_v8 = vsel %vm9993_vm5, %v9947_v56, %v9988_v2 }
0x11a9   : > { %v10064_v10 = vsel %vm1408_vm0, %v10062_v44, %v10063_v57  ;;  %v10109_v60 = vsel %vm7504_vm13, %v10107_v51, %v10108_v20  ;;  %v10013_v59 = vrot.slane %v9997_v8, 7  ;;  %v9974_v30 = vpop.xlane.xlu0 %9973 }
0x11aa   : > { %v9989_v62 = vmul.f32 0.016666668, %v9974_v30 }
0x11ab   : > { %10081 = vrot.lane.b32.xlu1 %v10061_v13, %s13913_s3  ;;  %v19553_v55 = vsel %vm7779_vm15, 0.0, %v10013_v59  ;;  %v10037_v17 = vsel %vm7779_vm15, %v10013_v59, 0.0 }
0x11ac   : > { %10228 = vrot.lane.b32.xlu0 %v19527_v16, %s13915_s8  ;;  %v10066_v36 = vrot.slane %v10037_v17, 1  ;;  %v10065_v61 = vrot.slane %v19553_v55, 1  ;;  %v10111_v47 = vrot.slane %v10037_v17, 2  ;;  %v10110_v35 = vrot.slane %v19553_v55, 2 }
0x11ad   : > { %v9950_v58 = vpop.xlane.xlu0 %9949 }
0x11ae   : > { %v9998_v24 = vsel %vm9993_vm5, %v9950_v58, %v9989_v62  ;;  %v10067_v12 = vsel %vm1408_vm0, %v10065_v61, %v10066_v36  ;;  %v10112_v11 = vsel %vm7504_vm13, %v10110_v35, %v10111_v47 }
0x11af   : > { %10126 = vrot.lane.b32.xlu1 %v10106_v48, %s13914_s13  ;;  %v10014_v14 = vrot.slane %v9998_v24, 7 }
0x11b0   : > { %10083 = vrot.lane.b32.xlu0 %v10064_v10, %s13913_s3 }
0x11b1   : > { %v19570_v39 = vsel %vm7779_vm15, 0.0, %v10014_v14  ;;  %v10038_v5 = vsel %vm7779_vm15, %v10014_v14, 0.0  ;;  %v9980_v3 = vpop.xlane.xlu0 %9979 }
0x11b2   : > { %v10069_v9 = vrot.slane %v10038_v5, 1  ;;  %v10068_v31 = vrot.slane %v19570_v39, 1  ;;  %v10114_v22 = vrot.slane %v10038_v5, 2  ;;  %v10113_v26 = vrot.slane %v19570_v39, 2 }
0x11b3   : > { %10250 = vrot.lane.b32.xlu1 %v10061_v13, %s13916_s17  ;;  %v9977_v13 = vpop.xlane.xlu1 %9976  ;;  %v9991_v2 = vmul.f32 0.016666668, %v9980_v3 }
0x11b4   : > { %10128 = vrot.lane.b32.xlu0 %v10109_v60, %s13914_s13  ;;  %v10070_v54 = vsel %vm1408_vm0, %v10068_v31, %v10069_v9  ;;  %v9990_v41 = vmul.f32 0.016666668, %v9977_v13  ;;  %v10115_v57 = vsel %vm7504_vm13, %v10113_v26, %v10114_v22 }
0x11b5   : > { %v9956_v51 = vpop.xlane.xlu0 %9955 }
0x11b6   : > { %v10000_v25 = vsel %vm9993_vm5, %v9956_v51, %v9991_v2 }
0x11b7   : > { %10274 = vrot.lane.b32.xlu1 %v10106_v48, %s20135_s18  ;;  %v9953_v48 = vpop.xlane.xlu1 %9952  ;;  %v10016_v30 = vrot.slane %v10000_v25, 7 }
0x11b8   : > { %10252 = vrot.lane.b32.xlu0 %v10064_v10, %s13916_s17  ;;  %v9999_v44 = vsel %vm9993_vm5, %v9953_v48, %v9990_v41 }
0x11b9   : > { %v10015_v49 = vrot.slane %v9999_v44, 7  ;;  %v19608_v58 = vsel %vm7779_vm15, 0.0, %v10016_v30  ;;  %v10040_v36 = vsel %vm7779_vm15, %v10016_v30, 0.0  ;;  %v10299_v30 = vsel %vm10298_vm4, %v18412_v23, %v19424_v34 }
0x11ba   : > { %v10075_v62 = vrot.slane %v10040_v36, 1  ;;  %v10074_v61 = vrot.slane %v19608_v58, 1  ;;  %v10120_v24 = vrot.slane %v10040_v36, 2 }
0x11bb   : > { %10151 = vrot.lane.b32.xlu1 %v19527_v16, %s13917_s23  ;;  %v19591_v20 = vsel %vm7779_vm15, 0.0, %v10015_v49  ;;  %v9983_v35 = vpop.xlane.xlu1 %9982 }
0x11bc   : > { %10206 = vrot.lane.b32.xlu0 %v10109_v60, %s13918_s14  ;;  %v10116_v59 = vrot.slane %v19591_v20, 2  ;;  %v10076_v47 = vsel %vm1408_vm0, %v10074_v61, %v10075_v62  ;;  %v9992_v5 = vmul.f32 0.016666668, %v9983_v35 }
0x11bf   : > { %10179 = vrot.lane.b32.xlu1 %v10064_v10, %s13919_s28  ;;  %v10039_v10 = vsel %vm7779_vm15, %v10015_v49, 0.0 }
0x11c0   : > { %10153 = vrot.lane.b32.xlu0 %v19553_v55, %s13917_s23  ;;  %v10072_v56 = vrot.slane %v10039_v10, 1  ;;  %v10117_v43 = vrot.slane %v10039_v10, 2 }
0x11c2   : > { %v10118_v17 = vsel %vm7504_vm13, %v10116_v59, %v10117_v43 }
0x11c3   : > { %10276 = vrot.lane.b32.xlu1 %v10109_v60, %s20135_s18  ;;  %v10071_v60 = vrot.slane %v19591_v20, 1 }
0x11c4   : > { %10085 = vrot.lane.b32.xlu0 %v10067_v12, %s13913_s3 }
0x11c5   : > { %v10073_v8 = vsel %vm1408_vm0, %v10071_v60, %v10072_v56 }
0x11c7   : > { %10230 = vrot.lane.b32.xlu1 %v19553_v55, %s13915_s8 }
0x11c8   : > { %10208 = vrot.lane.b32.xlu0 %v10112_v11, %s13918_s14 }
0x11cb   : > { %10181 = vrot.lane.b32.xlu1 %v10067_v12, %s13919_s28 }
0x11cc   : > { %10232 = vrot.lane.b32.xlu0 %v19570_v39, %s13915_s8 }
0x11cf   : > { %10130 = vrot.lane.b32.xlu1 %v10112_v11, %s13914_s13 }
0x11d0   : > { %10087 = vrot.lane.b32.xlu0 %v10070_v54, %s13913_s3 }
0x11d3   : > { %10254 = vrot.lane.b32.xlu1 %v10067_v12, %s13916_s17  ;;  %v10119_v12 = vrot.slane %v19608_v58, 2 }
0x11d4   : > { %10132 = vrot.lane.b32.xlu0 %v10115_v57, %s13914_s13 }
0x11d5   : > { %v10121_v14 = vsel %vm7504_vm13, %v10119_v12, %v10120_v24 }
0x11d7   : > { %10278 = vrot.lane.b32.xlu1 %v10112_v11, %s20135_s18  ;;  %v9959_v11 = vpop.xlane.xlu0 %9958 }
0x11d8   : > { %10256 = vrot.lane.b32.xlu0 %v10070_v54, %s13916_s17  ;;  %v10001_v9 = vsel %vm9993_vm5, %v9959_v11, %v9992_v5  ;;  %vm20430_vm5 = vmmov %vm20410_vm1 }
0x11d9   : > { %v10017_v31 = vrot.slane %v10001_v9, 7 }
0x11db   : > { %10155 = vrot.lane.b32.xlu1 %v19570_v39, %s13917_s23  ;;  %v10041_v13 = vsel %vm7779_vm15, %v10017_v31, 0.0  ;;  %v10033_v22 = vsel %vm7779_vm15, 0.0, %v10017_v31  ;;  %vm10325_vm15 = vcmask 64512  }
0x11dc   : > { %10210 = vrot.lane.b32.xlu0 %v10115_v57, %s13918_s14  ;;  %v10199_v26 = vrot.slane %v10033_v22, 2  ;;  %v10173_v48 = vrot.slane %v10041_v13, 1  ;;  %v10172_v41 = vrot.slane %v10033_v22, 1 }
0x11de   : > { %v10174_v44 = vsel %vm1408_vm0, %v10172_v41, %v10173_v48  ;;  %vm10307_vm0 = vcmask 31744  }
0x11df   : > { %10183 = vrot.lane.b32.xlu1 %v10070_v54, %s13919_s28  ;;  %v10200_v54 = vrot.slane %v10041_v13, 2 }
0x11e0   : > { %10157 = vrot.lane.b32.xlu0 %v19591_v20, %s13917_s23 }
0x11e3   : > { %10280 = vrot.lane.b32.xlu1 %v10115_v57, %s20135_s18  ;;  %v10201_v57 = vsel %vm7504_vm13, %v10199_v26, %v10200_v54  ;;  %vm10316_vm13 = vcmask 48128  }
0x11e4   : > { %10089 = vrot.lane.b32.xlu0 %v10073_v8, %s13913_s3 }
0x11e7   : > { %10234 = vrot.lane.b32.xlu1 %v19591_v20, %s13915_s8 }
0x11e8   : > { %10212 = vrot.lane.b32.xlu0 %v10118_v17, %s13918_s14 }
0x11eb   : > { %10185 = vrot.lane.b32.xlu1 %v10073_v8, %s13919_s28 }
0x11ec   : > { %10236 = vrot.lane.b32.xlu0 %v19608_v58, %s13915_s8 }
0x11ef   : > { %10134 = vrot.lane.b32.xlu1 %v10118_v17, %s13914_s13 }
0x11f0   : > { %10091 = vrot.lane.b32.xlu0 %v10076_v47, %s13913_s3  ;;  %s1231_s3 = sand.u32 1, %s13840_s10  }
0x11f3   : > { %10258 = vrot.lane.b32.xlu1 %v10073_v8, %s13916_s17 }
0x11f4   : > { %10136 = vrot.lane.b32.xlu0 %v10121_v14, %s13914_s13  ;;  %s1232_s13 = scalar_lea.vmem [#allocation3], %s1231_s3 }
0x11f7   : > { %10282 = vrot.lane.b32.xlu1 %v10118_v17, %s20135_s18  ;;  %v10308_v17 = vsel %vm10307_vm0, %v10299_v30, %v19426_v27 }
0x11f8   : > { %10260 = vrot.lane.b32.xlu0 %v10076_v47, %s13916_s17 }
0x11fb   : > { %10159 = vrot.lane.b32.xlu1 %v19608_v58, %s13917_s23 }
0x11fc   : > { %10284 = vrot.lane.b32.xlu0 %v10121_v14, %s20135_s18 }
0x11ff   : > { %10187 = vrot.lane.b32.xlu1 %v10076_v47, %s13919_s28 }
0x1200   : > { %10161 = vrot.lane.b32.xlu0 %v10033_v22, %s13917_s23  ;;  %s10727_s23 = scalar_lea.sflag [#allocation4], %s1231_s3 }
0x1203   : > { %10214 = vrot.lane.b32.xlu1 %v10121_v14, %s13918_s14 }
0x1204   : > { %10238 = vrot.lane.b32.xlu0 %v10033_v22, %s13915_s8  ;;  %s10739_s8 = sshll.u32 %s1232_s13, 4  ;;  %s10740_s8 = int_to_ptr.vmem [resolvable:$true] %s10739_s8 }
0x1207   : > { %10216 = vrot.lane.b32.xlu1 %v10201_v57, %s13918_s14  ;;  %s13788_s14 = scalar_lea.vmem %s10740_s8, 16 }
0x1208   : > { %10189 = vrot.lane.b32.xlu0 %v10174_v44, %s13919_s28  ;;  %p13789_p11 = scmp.ne.s32.totalorder %s10740_s8, %s13788_s14  ;;  %s13921_s28 = smov [#allocation3]  }
0x120a   : > { %v10148_v49 = vpop.permute.xlu0 %10147  ;;  %p13790_p12 = pnand %p13789_p11, %p14173_p5 }
0x120b   : > { %10288 = vrot.lane.b32.xlu1 %v18441_v45, %s20135_s18  ;;  %v10317_v62 = vsel %vm10316_vm13, %v10308_v17, %v10148_v49 }
0x120c   : > { %10262 = vrot.lane.b32.xlu0 %v10174_v44, %s13916_s17  ;;  %s19796_s17 = scalar_lea.hbm %s14133_s4, %s11226_s9  ;;  %p13791_p13 = pneg %p13790_p12 }
0x120d   : > { %v10125_v3 = vpop.permute.xlu1 %10124 }
0x120e   : > { %v10080_v10 = vpop.permute.xlu0 %10079 }
0x120f   : > { %v10300_v11 = vsel %vm10298_vm4, %v19499_v40, %v10080_v10 }
0x1210   : > { %10286 = vrot.lane.b32.xlu0 %v10201_v57, %s20135_s18  ;;  %v10309_v9 = vsel %vm10307_vm0, %v10300_v11, %v10125_v3  ;;  %s20428_s18 = sld [smem:[#allocation24_spill]] }
0x1211   : > { %v10203_v51 = vpop.permute.xlu1 %10202 }
0x1212   : > { %v10176_v56 = vpop.permute.xlu0 %10175 }
0x1213   : > { %v10326_v61 = vsel %vm10325_vm15, %v10317_v62, %v10176_v56 }
0x1214   : > { %v10335_v12 = vsel %vm10334_vm2, %v10326_v61, %v10203_v51 }
0x1215   : > { %v10150_v2 = vpop.permute.xlu1 %10149 }
0x1216   : > { %v10178_v60 = vpop.permute.xlu0 %10177  ;;  %v10318_v13 = vsel %vm10316_vm13, %v10309_v9, %v10150_v2 }
0x1217   : > { %v10327_v54 = vsel %vm10325_vm15, %v10318_v13, %v10178_v60 }
0x1219   : > { %v10227_v25 = vpop.permute.xlu1 %10226 }
0x121a   : > { %v10205_v43 = vpop.permute.xlu0 %10204  ;;  %v10344_v23 = vsel %vm10343_vm10, %v10335_v12, %v10227_v25 }
0x121b   : > { %v10336_v48 = vsel %vm10334_vm2, %v10327_v54, %v10205_v43 }
0x121d   : > { %v10082_v8 = vpop.permute.xlu1 %10081 }
0x121e   : > { %v10229_v59 = vpop.permute.xlu0 %10228  ;;  %v10301_v2 = vsel %vm10298_vm4, %v19512_v63, %v10082_v8 }
0x121f   : > { %v10345_v41 = vsel %vm10343_vm10, %v10336_v48, %v10229_v59 }
0x1221   : > { %v10127_v45 = vpop.permute.xlu1 %10126 }
0x1222   : > { %v10084_v36 = vpop.permute.xlu0 %10083  ;;  %v10310_v25 = vsel %vm10307_vm0, %v10301_v2, %v10127_v45 }
0x1223   : > { %v10302_v8 = vsel %vm10298_vm4, %v19527_v16, %v10084_v36 }
0x1225   : > { %v10251_v24 = vpop.permute.xlu1 %10250 }
0x1226   : > { %v10129_v47 = vpop.permute.xlu0 %10128  ;;  %v10353_v34 = vsel %vm10352_vm11, %v10344_v23, %v10251_v24 }
0x1227   : > { %v10311_v45 = vsel %vm10307_vm0, %v10302_v8, %v10129_v47 }
0x1229   : > { %v10275_v35 = vpop.permute.xlu1 %10274 }
0x122a   : > { %v10361_v27 = vsel %vm2554_vm8, %v10353_v34, %v10275_v35  ;;  %v10253_v14 = vpop.permute.xlu0 %10252 }
0x122b   : > { %11647 = vmatprep.mubr.msk.f32.mxu1 %vm10379_vm7, %v10361_v27  ;;  %v10354_v57 = vsel %vm10352_vm11, %v10345_v41, %v10253_v14 }
0x122d   : > { %v10152_v5 = vpop.permute.xlu1 %10151 }
0x122e   : > { %v10207_v31 = vpop.permute.xlu0 %10206  ;;  %v10319_v59 = vsel %vm10316_vm13, %v10310_v25, %v10152_v5 }
0x1231   : > { %v10180_v22 = vpop.permute.xlu1 %10179 }
0x1232   : > { %v10154_v26 = vpop.permute.xlu0 %10153  ;;  %v10328_v30 = vsel %vm10325_vm15, %v10319_v59, %v10180_v22 }
0x1233   : > { %v10337_v61 = vsel %vm10334_vm2, %v10328_v30, %v10207_v31  ;;  %v10320_v35 = vsel %vm10316_vm13, %v10311_v45, %v10154_v26 }
0x1235   : > { %v10277_v44 = vpop.permute.xlu1 %10276 }
0x1236   : > { %v10362_v40 = vsel %vm2554_vm8, %v10354_v57, %v10277_v44  ;;  %v10086_v49 = vpop.permute.xlu0 %10085 }
0x1237   : > { %11648 = vmatmul.mubr.msk.f32.vlgmr.msra.gmra.mxu1 %vm10379_vm7, %v10362_v40  ;;  %v10303_v57 = vsel %vm10298_vm4, %v19553_v55, %v10086_v49 }
0x1239   : > { %v10231_v3 = vpop.permute.xlu1 %10230 }
0x123a   : > { %v10209_v10 = vpop.permute.xlu0 %10208  ;;  %v10346_v24 = vsel %vm10343_vm10, %v10337_v61, %v10231_v3 }
0x123d   : > { %v10182_v51 = vpop.permute.xlu1 %10181 }
0x123e   : > { %v10233_v56 = vpop.permute.xlu0 %10232  ;;  %v10329_v14 = vsel %vm10325_vm15, %v10320_v35, %v10182_v51 }
0x123f   : > { %v10338_v5 = vsel %vm10334_vm2, %v10329_v14, %v10209_v10 }
0x1240   : > { %v10347_v13 = vsel %vm10343_vm10, %v10338_v5, %v10233_v56 }
0x1241   : > { %v10131_v60 = vpop.permute.xlu1 %10130 }
0x1242   : > { %v10088_v43 = vpop.permute.xlu0 %10087  ;;  %v10312_v40 = vsel %vm10307_vm0, %v10303_v57, %v10131_v60 }
0x1243   : > { %v10304_v51 = vsel %vm10298_vm4, %v19570_v39, %v10088_v43 }
0x1245   : > { %v10255_v17 = vpop.permute.xlu1 %10254 }
0x1246   : > { %v10133_v62 = vpop.permute.xlu0 %10132  ;;  %v10355_v12 = vsel %vm10352_vm11, %v10346_v24, %v10255_v17 }
0x1247   : > { %v10313_v2 = vsel %vm10307_vm0, %v10304_v51, %v10133_v62  ;;  %v11207_v51 = vld [vmem:[#allocation2] ss:$0 sm:$0xff] }
0x1249   : > { %v10279_v23 = vpop.permute.xlu1 %10278 }
0x124a   : > { %v10363_v34 = vsel %vm2554_vm8, %v10355_v12, %v10279_v23  ;;  %v10257_v63 = vpop.permute.xlu0 %10256 }
0x124b   : > { %11650 = vmatprep.mubr.msk.f32.mxu1 %vm10379_vm7, %v10363_v34  ;;  %v10356_v22 = vsel %vm10352_vm11, %v10347_v13, %v10257_v63 }
0x124d   : > { %v10156_v27 = vpop.permute.xlu1 %10155 }
0x124e   : > { %v10211_v11 = vpop.permute.xlu0 %10210  ;;  %v10321_v10 = vsel %vm10316_vm13, %v10312_v40, %v10156_v27 }
0x1251   : > { %v10184_v9 = vpop.permute.xlu1 %10183 }
0x1252   : > { %v10158_v31 = vpop.permute.xlu0 %10157  ;;  %v10330_v56 = vsel %vm10325_vm15, %v10321_v10, %v10184_v9 }
0x1253   : > { %v10322_v59 = vsel %vm10316_vm13, %v10313_v2, %v10158_v31  ;;  %v10339_v17 = vsel %vm10334_vm2, %v10330_v56, %v10211_v11 }
0x1255   : > { %v10281_v54 = vpop.permute.xlu1 %10280 }
0x1256   : > { %v10364_v16 = vsel %vm2554_vm8, %v10356_v22, %v10281_v54  ;;  %v10090_v36 = vpop.permute.xlu0 %10089 }
0x1257   : > { %11651 = vmatmul.mubr.msk.f32.gmra.mxu1 %vm10379_vm7, %v10364_v16  ;;  %v10305_v5 = vsel %vm10298_vm4, %v19591_v20, %v10090_v36 }
0x1259   : > { %v10235_v47 = vpop.permute.xlu1 %10234 }
0x125a   : > { %v10213_v26 = vpop.permute.xlu0 %10212  ;;  %v10348_v49 = vsel %vm10343_vm10, %v10339_v17, %v10235_v47 }
0x125d   : > { %v10186_v48 = vpop.permute.xlu1 %10185 }
0x125e   : > { %v10237_v41 = vpop.permute.xlu0 %10236  ;;  %v10331_v55 = vsel %vm10325_vm15, %v10322_v59, %v10186_v48 }
0x125f   : > { %v10340_v24 = vsel %vm10334_vm2, %v10331_v55, %v10213_v26 }
0x1260   : > { %v10349_v62 = vsel %vm10343_vm10, %v10340_v24, %v10237_v41 }
0x1261   : > { %v10135_v44 = vpop.permute.xlu1 %10134 }
0x1262   : > { %v10092_v3 = vpop.permute.xlu0 %10091  ;;  %v10314_v13 = vsel %vm10307_vm0, %v10305_v5, %v10135_v44 }
0x1263   : > { %v10306_v14 = vsel %vm10298_vm4, %v19608_v58, %v10092_v3  ;;  %vm20431_vm4 = vmmov %vm20410_vm1 }
0x1265   : > { %v10259_v25 = vpop.permute.xlu1 %10258 }
0x1266   : > { %v10137_v30 = vpop.permute.xlu0 %10136  ;;  %v10357_v60 = vsel %vm10352_vm11, %v10348_v49, %v10259_v25 }
0x1267   : > { %v10315_v11 = vsel %vm10307_vm0, %v10306_v14, %v10137_v30  ;;  %vm20432_vm0 = vmmov %vm20410_vm1 }
0x1269   : > { %v10283_v61 = vpop.permute.xlu1 %10282 }
0x126a   : > { %v10365_v39 = vsel %vm2554_vm8, %v10357_v60, %v10283_v61  ;;  %v10261_v43 = vpop.permute.xlu0 %10260 }
0x126b   : > { %11653 = vmatprep.mubr.msk.f32.mxu1 %vm10379_vm7, %v10365_v39  ;;  %v10358_v23 = vsel %vm10352_vm11, %v10349_v62, %v10261_v43 }
0x126d   : > { %v10160_v12 = vpop.permute.xlu1 %10159 }
0x126e   : > { %v10285_v34 = vpop.permute.xlu0 %10284  ;;  %v10323_v16 = vsel %vm10316_vm13, %v10314_v13, %v10160_v12 }
0x126f   : > { %v10366_v63 = vsel %vm2554_vm8, %v10358_v23, %v10285_v34 }
0x1270   : > { %11654 = vmatmul.mubr.msk.f32.gmra.mxu1 %vm10379_vm7, %v10366_v63 }
0x1271   : > { %v10188_v8 = vpop.permute.xlu1 %10187 }
0x1272   : > { %v10162_v45 = vpop.permute.xlu0 %10161  ;;  %v10332_v26 = vsel %vm10325_vm15, %v10323_v16, %v10188_v8 }
0x1273   : > { %v10324_v9 = vsel %vm10316_vm13, %v10315_v11, %v10162_v45  ;;  %vm20433_vm13 = vmmov %vm20432_vm0 }
0x1275   : > { %v10215_v35 = vpop.permute.xlu1 %10214 }
0x1276   : > { %v10239_v27 = vpop.permute.xlu0 %10238  ;;  %v10341_v58 = vsel %vm10334_vm2, %v10332_v26, %v10215_v35 }
0x1277   : > { %v10350_v36 = vsel %vm10343_vm10, %v10341_v58, %v10239_v27 }
0x1279   : > { %v10217_v22 = vpop.permute.xlu1 %10216 }
0x127a   : > { %v10190_v31 = vpop.permute.xlu0 %10189 }
0x127b   : > { %v10333_v54 = vsel %vm10325_vm15, %v10324_v9, %v10190_v31  ;;  %vm20434_vm15 = vmmov %vm20432_vm0 }
0x127c   : > { %v10342_v47 = vsel %vm10334_vm2, %v10333_v54, %v10217_v22  ;;  %vm20435_vm2 = vmmov %vm20432_vm0 }
0x127d   : > { %v10351_v48 = vsel %vm10343_vm10, %v10342_v47, %v19428_v1  ;;  %v10289_v41 = vpop.permute.xlu1 %10288  ;;  %vm20436_vm10 = vmmov %vm20432_vm0 }
0x127e   : > { %v10263_v20 = vpop.permute.xlu0 %10262  ;;  %v10360_v57 = vsel %vm10352_vm11, %v10351_v48, %v19430_v32 }
0x127f   : > { %v10359_v44 = vsel %vm10352_vm11, %v10350_v36, %v10263_v20  ;;  %v10368_v10 = vsel %vm2554_vm8, %v10360_v57, %v10289_v41  ;;  %vm20437_vm11 = vmmov %vm20432_vm0 }
0x1282   : > { %v10287_v40 = vpop.permute.xlu0 %10286 }
0x1283   : > { %v10367_v3 = vsel %vm2554_vm8, %v10359_v44, %v10287_v40  ;;  %vm20423_vm8 = vmmov %vm20410_vm1 }
0x1284   : > { %11656 = vmatprep.mubr.msk.f32.mxu1 %vm10379_vm7, %v10367_v3 }
0x1285   : > { %11657 = vmatmul.mubr.msk.f32.gmra.mxu1 %vm10379_vm7, %v10368_v10  ;;  %vm20438_vm7 = vmmov %vm20432_vm0 }
0x12f7   : > { %v11649_v1 = vpop.f32.mrf.mxu1 }
0x12f8   : > { %v10479_v56 = vadd.f32 %v11649_v1, %v11207_v51 }
0x12f9   : > { %v10473_v2 = vpop.f32.mrf.mxu1 }
0x12fa   : > { %v11218_v25 = vmul.f32 -1.442695, %v10479_v56  ;;  %v10474_v59 = vadd.f32 %v11207_v51, %v10473_v2  ;;  %v10649_v2 = vld [vmem:[%s14123_s20 + $0x70] sm:$0xff] }
0x12fb   : > { %11660 = vmatpush3.msra.mxu0 %v10649_v2  ;;  %v7499_v2 = vld [vmem:[%s20428_s18] sm:$0x1]  ;;  %s13792_s18 = sshll.u32 %s13921_s28, 4  ;;  %s13793_s18 = int_to_ptr.vmem [resolvable:$false] %s13792_s18 }
0x12fc   : > { %13744 = vpow2.f32 %v11218_v25  ;;  %v11217_v30 = vmul.f32 -1.442695, %v10474_v59  ;;  %v10648_v25 = vld [vmem:[%s14123_s20 + $0x68] sm:$0xff]  ;;  %11661 = vmatprep.subr.mxu0 %v20339_v38  ;;  %v10647_v59 = vld [vmem:[%s14123_s20 + $0x60] sm:$0xff]  ;;  %s13794_s0 = scalar_lea.vmem %s13793_s18, 32  ;;  %p13795_p0 = scmp.lt.s32.totalorder %s10740_s8, %s13793_s18 }
0x12fd   : > { %11662 = vmatpush3.msra.mxu0 %v10648_v25  ;;  %p13796_p1 = scmp.lt.s32.totalorder %s13794_s0, %s13788_s14 }
0x12fe   : > { %13746 = vpow2.f32 %v11217_v30  ;;  %11663 = vmatprep.subr.mxu0 %v20339_v38  ;;  %v10646_v30 = vld [vmem:[%s14123_s20 + $0x58] sm:$0xff] }
0x12ff   : > { %11664 = vmatpush3.msra.mxu0 %v10647_v59  ;;  %p13797_p2 = por %p13796_p1, %p13795_p0 }
0x1300   : > { %11665 = vmatprep.subr.mxu0 %v20339_v38 }
0x1301   : > { %11666 = vmatpush3.msra.mxu0 %v10646_v30  ;;  %p13798_p3 = pnand %p13797_p2, %p13791_p13 }
0x1302   : > { %11667 = vmatprep.subr.mxu0 %v20339_v38 }
0x1309   : > { %v13745_v32 = vpop.eup %13744 }
0x130a   : > { %v10537_v17 = vadd.f32 1.0, %v13745_v32  ;;  %v10645_v32 = vld [vmem:[%s14123_s20 + $0x50] sm:$0xff] }
0x130b   : > { %v13747_v55 = vpop.eup %13746  ;;  %11668 = vmatpush3.msra.mxu0 %v10645_v32  ;;  %v7585_v32 = vlaneseq }
0x130c   : > { %13748 = vrcp.f32 %v10537_v17  ;;  %v10536_v49 = vadd.f32 1.0, %v13747_v55  ;;  %v10644_v17 = vld [vmem:[%s14123_s20 + $0x48] sm:$0xff]  ;;  %11669 = vmatprep.subr.mxu0 %v20339_v38  ;;  %v10643_v55 = vld [vmem:[%s14123_s20 + $0x40] sm:$0xff] }
0x130d   : > { %11670 = vmatpush3.msra.mxu0 %v10644_v17  ;;  %v7586_v17 = vshrl.u32 %v7585_v32, 7 }
0x130e   : > { %13750 = vrcp.f32 %v10536_v49  ;;  %11671 = vmatprep.subr.mxu0 %v20339_v38  ;;  %v10642_v49 = vld [vmem:[%s14123_s20 + $0x38] sm:$0xff] }
0x130f   : > { %11672 = vmatpush3.msra.mxu0 %v10643_v55  ;;  %v7587_v55 = vsub.s32 0, %v7586_v17 }
0x1310   : > { %11673 = vmatprep.subr.mxu0 %v20339_v38 }
0x1311   : > { %11674 = vmatpush3.msra.mxu0 %v10642_v49 }
0x1312   : > { %11675 = vmatprep.subr.mxu0 %v20339_v38 }
0x1317   : > { %v11652_v60 = vpop.f32.mrf.mxu1 }
0x1318   : > { %v10489_v61 = vadd.f32 %v11652_v60, %v11207_v51  ;;  %v10641_v60 = vld [vmem:[%s14123_s20 + $0x30] sm:$0xff] }
0x1319   : > { %v13749_v24 = vpop.eup %13748  ;;  %v10483_v39 = vpop.f32.mrf.mxu1  ;;  %11676 = vmatpush3.msra.mxu0 %v10641_v60 }
0x131a   : > { %v11220_v43 = vmul.f32 -1.442695, %v10489_v61  ;;  %v10484_v62 = vadd.f32 %v11207_v51, %v10483_v39  ;;  %10567 = vperm.xlu1 %13585, %v13749_v24   ;;  %v10640_v61 = vld [vmem:[%s14123_s20 + $0x28] sm:$0xff]  ;;  %11677 = vmatprep.subr.mxu0 %v20339_v38  ;;  %v10639_v24 = vld [vmem:[%s14123_s20 + $0x20] sm:$0xff]  ;;  %v10638_v39 = vld [vmem:[%s14123_s20 + $0x18] sm:$0xff] }
0x131b   : > { %v13751_v12 = vpop.eup %13750  ;;  %11678 = vmatpush3.msra.mxu0 %v10640_v61 }
0x131c   : > { %13752 = vpow2.f32 %v11220_v43  ;;  %v11219_v23 = vmul.f32 -1.442695, %v10484_v62  ;;  %10562 = vperm.xlu0 %13586, %v13751_v12   ;;  %11679 = vmatprep.subr.mxu0 %v20339_v38  ;;  %v10637_v43 = vld [vmem:[%s14123_s20 + $0x10] sm:$0xff]  ;;  %v10636_v62 = vld [vmem:[%s14123_s20 + $0x8] sm:$0xff]  ;;  %v10635_v12 = vld [vmem:[%s14123_s20] sm:$0xff] }
0x131d   : > { %11680 = vmatpush3.msra.mxu0 %v10639_v24 }
0x131e   : > { %13754 = vpow2.f32 %v11219_v23  ;;  %11681 = vmatprep.subr.mxu0 %v20339_v38 }
0x131f   : > { %11682 = vmatpush3.msra.mxu0 %v10638_v39 }
0x1320   : > { %11683 = vmatprep.subr.mxu0 %v20339_v38 }
0x1321   : > { %11684 = vmatpush3.msra.mxu0 %v10637_v43 }
0x1322   : > { %11685 = vmatprep.subr.mxu0 %v20339_v38 }
0x1323   : > { %11686 = vmatpush3.msra.mxu0 %v10636_v62 }
0x1324   : > { %11687 = vmatprep.subr.mxu0 %v20339_v38 }
0x1325   : > { %11688 = vmatpush3.msra.mxu0 %v10635_v12 }
0x1329   : > { %v13753_v34 = vpop.eup %13752 }
0x132a   : > { %v10539_v63 = vadd.f32 1.0, %v13753_v34 }
0x132b   : > { %v13755_v8 = vpop.eup %13754 }
0x132c   : > { %13756 = vrcp.f32 %v10539_v63  ;;  %v10538_v45 = vadd.f32 1.0, %v13755_v8 }
0x132e   : > { %13758 = vrcp.f32 %v10538_v45 }
0x1330   : > { %v11655_v35 = vpop.f32.mrf.mxu1 }
0x1331   : > { %v10499_v27 = vadd.f32 %v11655_v35, %v11207_v51 }
0x1332   : > { %v10493_v14 = vpop.f32.mrf.mxu1 }
0x1333   : > { %v11222_v11 = vmul.f32 -1.442695, %v10499_v27  ;;  %v10494_v5 = vadd.f32 %v11207_v51, %v10493_v14 }
0x1335   : > { %13760 = vpow2.f32 %v11222_v11  ;;  %v11221_v9 = vmul.f32 -1.442695, %v10494_v5 }
0x1337   : > { %13762 = vpow2.f32 %v11221_v9 }
0x1339   : > { %v13757_v31 = vpop.eup %13756 }
0x133a   : > { %10577 = vperm.xlu0 %13586, %v13757_v31  }
0x133b   : > { %v13759_v13 = vpop.eup %13758 }
0x133c   : > { %10572 = vperm.xlu1 %13585, %v13759_v13  }
0x1342   : > { %v13761_v22 = vpop.eup %13760 }
0x1343   : > { %v10541_v54 = vadd.f32 1.0, %v13761_v22 }
0x1344   : > { %v13763_v16 = vpop.eup %13762 }
0x1345   : > { %13764 = vrcp.f32 %v10541_v54  ;;  %v10540_v47 = vadd.f32 1.0, %v13763_v16  ;;  %v11658_v26 = vpop.f32.mrf.mxu1 }
0x1346   : > { %v10509_v58 = vadd.f32 %v11658_v26, %v11207_v51 }
0x1347   : > { %13766 = vrcp.f32 %v10540_v47  ;;  %v10503_v48 = vpop.f32.mrf.mxu1 }
0x1348   : > { %v11224_v20 = vmul.f32 -1.442695, %v10509_v58  ;;  %v10504_v36 = vadd.f32 %v11207_v51, %v10503_v48 }
0x134a   : > { %13768 = vpow2.f32 %v11224_v20  ;;  %v11223_v41 = vmul.f32 -1.442695, %v10504_v36 }
0x134c   : > { %13770 = vpow2.f32 %v11223_v41 }
0x1352   : > { %v13765_v57 = vpop.eup %13764 }
0x1353   : > { %10587 = vperm.xlu0 %13586, %v13765_v57  }
0x1354   : > { %v13767_v44 = vpop.eup %13766 }
0x1355   : > { %10582 = vperm.xlu1 %13585, %v13767_v44  }
0x1357   : > { %v13769_v40 = vpop.eup %13768 }
0x1358   : > { %v10543_v3 = vadd.f32 1.0, %v13769_v40 }
0x1359   : > { %v13771_v10 = vpop.eup %13770 }
0x135a   : > { %13772 = vrcp.f32 %v10543_v3  ;;  %v10542_v1 = vadd.f32 1.0, %v13771_v10 }
0x135c   : > { %13774 = vrcp.f32 %v10542_v1 }
0x1367   : > { %v13773_v56 = vpop.eup %13772 }
0x1368   : > { %10597 = vperm.xlu0 %13586, %v13773_v56  }
0x1369   : > { %v13775_v51 = vpop.eup %13774 }
0x136a   : > { %10592 = vperm.xlu1 %13585, %v13775_v51  }
0x1395   : > { %v10568_v23 = vpop.permute.xlu1 %10567 }
0x1396   : > { %v10601_v45 = vmul.f32 %v10568_v23, %v19442_v4 }
0x1397   : > { %v10563_v34 = vpop.permute.xlu0 %10562 }
0x1398   : > { %v10600_v8 = vmul.f32 %v10563_v34, %v19434_v0  ;;  %v10609_v5 = vsel %vm20424_vm6, %v10601_v45, 0.0  ;;  %vm20440_vm6 = vcmask 982016  }
0x139a   : > { %v10608_v27 = vsel %vm20423_vm8, %v10600_v8, 0.0  ;;  %vm20439_vm8 = vmmov %vm20432_vm0 }
0x139b   : > { %v10610_v31 = vadd.f32 %v10609_v5, %v10608_v27 }
0x13b5   : > { %v10578_v14 = vpop.permute.xlu0 %10577 }
0x13b6   : > { %v10603_v38 = vmul.f32 %v10578_v14, %v19456_v7 }
0x13b7   : > { %v10573_v63 = vpop.permute.xlu1 %10572 }
0x13b8   : > { %v10602_v35 = vmul.f32 %v10573_v63, %v19450_v53  ;;  %v10613_v0 = vsel %vm20426_vm14, %v10603_v38, 0.0 }
0x13ba   : > { %v10611_v9 = vsel %vm20425_vm12, %v10602_v35, 0.0  ;;  %vm10724_vm12 = vcmask 65536  }
0x13bb   : > { %v10612_v22 = vadd.f32 %v10611_v9, %v10610_v31 }
0x13bd   : > { %v10614_v53 = vadd.f32 %v10613_v0, %v10612_v22 }
0x13ce   : > { %v10588_v54 = vpop.permute.xlu0 %10587 }
0x13cf   : > { %v10605_v16 = vmul.f32 %v10588_v54, %v19472_v15 }
0x13d0   : > { %v10583_v11 = vpop.permute.xlu1 %10582 }
0x13d1   : > { %v10604_v13 = vmul.f32 %v10583_v11, %v19466_v28  ;;  %v10617_v48 = vsel %vm20427_vm3, %v10605_v16, 0.0 }
0x13d3   : > { %v10615_v4 = vsel %vm20410_vm1, %v10604_v13, 0.0 }
0x13d4   : > { %v10616_v47 = vadd.f32 %v10615_v4, %v10614_v53 }
0x13d6   : > { %v10618_v28 = vadd.f32 %v10617_v48, %v10616_v47 }
0x13e3   : > { %v10598_v26 = vpop.permute.xlu0 %10597 }
0x13e4   : > { %v10607_v20 = vmul.f32 %v10598_v26, %v19488_v19  ;;  %v7575_v19 = vadd.f32 %v18379_v6, %v7499_v2 }
0x13e5   : > { %v10593_v58 = vpop.permute.xlu1 %10592 }
0x13e6   : > { %v10606_v7 = vmul.f32 %v10593_v58, %v19480_v21  ;;  %v10621_v57 = vsel %vm20430_vm5, %v10607_v20, 0.0  ;;  %v11117_v21 = vmul.f32 -2.0, %v7575_v19 }
0x13e8   : > { %v10619_v36 = vsel %vm20429_vm9, %v10606_v7, 0.0  ;;  %v7580_v25 = vmul.f32 1.442695, %v11117_v21 }
0x13e9   : > { %v10620_v41 = vadd.f32 %v10619_v36, %v10618_v28 }
0x13ea   : > { %13776 = vpow2.f32 %v7580_v25 }
0x13eb   : > { %v10622_v44 = vadd.f32 %v10621_v57, %v10620_v41 }
0x13ed   : > { %v10623_v40 = vrot.slane %v10622_v44, 4 }
0x13ef   : > { %v10624_v3 = vadd.f32 %v10623_v40, %v10622_v44 }
0x13f1   : > { %v10625_v15 = vrot.slane %v10624_v3, 2 }
0x13f3   : > { %v10626_v10 = vadd.f32 %v10625_v15, %v10624_v3 }
0x13f5   : > { %v10627_v1 = vrot.slane %v10626_v10, 1 }
0x13f7   : > { %v10628_v56 = vadd.f32 %v10627_v1, %v10626_v10  ;;  %v13777_v59 = vpop.eup %13776 }
0x13f8   : > { %v7582_v30 = vadd.f32 1.0, %v13777_v59 }
0x13f9   : > { %v10629_v51 = vmul.f32 0.015625, %v10628_v56 }
0x13fa   : > { %13778 = vrcp.f32 %v7582_v30 }
0x13fb   : > { %10631 = vrot.lane.b32.xlu1 %v10629_v51, %s13920_s5 }
0x1407   : > { %v13779_v49 = vpop.eup %13778 }
0x1408   : > { %v7588_v60 = vrot.slane %v13779_v49, %v7587_v55 }
0x140a   : > { %v7589_v61 = vmul.f32 %v7588_v60, %v18310_v46  ;;  %v7590_v24 = vmul.f32 %v7588_v60, %v18308_v52  ;;  %v7591_v6 = vmul.f32 %v7588_v60, %v18312_v18  ;;  %v7592_v12 = vmul.f32 %v7588_v60, %v18316_v29 }
0x140b   : > { %v7593_v63 = vmul.f32 %v7588_v60, %v18322_v42  ;;  %v7594_v46 = vmul.f32 %v7588_v60, %v18326_v50  ;;  %v7595_v27 = vmul.f32 %v7588_v60, %v18332_v37  ;;  %v7596_v29 = vmul.f32 %v7588_v60, %v18336_v33  ;;  %v10650_v33 = vld [vmem:[%s14128_s27] sm:$0x1] }
0x140c   : > { %v7597_v39 = vsel %vm20431_vm4, %v7589_v61, 0.0  ;;  %v7598_v43 = vsel %vm20432_vm0, %v7590_v24, 0.0  ;;  %v7600_v23 = vsel %vm20433_vm13, %v7591_v6, 0.0  ;;  %v7602_v8 = vsel %vm20434_vm15, %v7592_v12, 0.0 }
0x140d   : > { %v7599_v62 = vadd.f32 %v7598_v43, %v7597_v39  ;;  %v7604_v52 = vsel %vm20435_vm2, %v7593_v63, 0.0  ;;  %v7606_v18 = vsel %vm20436_vm10, %v7594_v46, 0.0  ;;  %v7608_v11 = vsel %vm20437_vm11, %v7595_v27, 0.0 }
0x140e   : > { %v7610_v5 = vsel %vm20438_vm7, %v7596_v29, 0.0 }
0x140f   : > { %v7601_v34 = vadd.f32 %v7600_v23, %v7599_v62 }
0x1411   : > { %v7603_v45 = vadd.f32 %v7602_v8, %v7601_v34 }
0x1413   : > { %v7605_v35 = vadd.f32 %v7604_v52, %v7603_v45 }
0x1415   : > { %v7607_v14 = vadd.f32 %v7606_v18, %v7605_v35 }
0x1417   : > { %v7609_v42 = vadd.f32 %v7608_v11, %v7607_v14 }
0x1419   : > { %v7611_v9 = vadd.f32 %v7610_v5, %v7609_v42 }
0x141b   : > { %v7612_v50 = vrot.slane %v7611_v9, 4 }
0x141d   : > { %v7613_v31 = vadd.f32 %v7612_v50, %v7611_v9 }
0x141f   : > { %v7614_v38 = vrot.slane %v7613_v31, 2 }
0x1421   : > { %v7615_v13 = vadd.f32 %v7614_v38, %v7613_v31 }
0x1423   : > { %v7616_v37 = vrot.slane %v7615_v13, 1 }
0x1425   : > { %v7617_v22 = vadd.f32 %v7616_v37, %v7615_v13 }
0x1427   : > { %v7618_v54 = vmul.f32 0.015625, %v7617_v22 }
0x146d   : > { %v10632_v0 = vpop.permute.xlu1 %10631 }
0x146e   : > { %v10634_v4 = vsel %vm20439_vm8, %v7618_v54, %v10632_v0 }
0x146f   : > { %11690 = vmatmul.mubr.msk.f32.vlgmr.msra.gmra.mxu0 %vm20440_vm6, %v10634_v4 }
0x152f   : > { %v10720_v53 = vpop.f32.mrf.mxu0 }
0x1530   : > { %v10721_v16 = vadd.f32 %v10720_v53, %v10650_v33 }
0x1531   : > { %v11691_v47 = vpop.f32.mrf.mxu0 }
0x1532   : > { %10725 = vst.msk [vmem:[%s1232_s13] sm:$0x1] %vm10724_vm12, %v10721_v16 }
0x1533   : > { %13801 = shalt.err (!%p13798_p3)
}
0x1534   : > { %s13802_s5 = scalar_lea.hbm %s19796_s17, 16  ;;  %s13806_s3 = scalar_lea.hbm %s14133_s4, 32 }
0x1535   : > { %p13803_p4 = scmp.ne.s32.totalorder %s19796_s17, %s13802_s5  ;;  %p13807_p9 = scmp.lt.s32.totalorder %s19796_s17, %s14133_s4 }
0x1536   : > { %p13808_p10 = scmp.lt.s32.totalorder %s13806_s3, %s13802_s5 }
0x1537   : > { %p13804_p7 = pnand %p13803_p4, %p14173_p5 }
0x1538   : > { %p13809_p11 = por %p13808_p10, %p13807_p9 }
0x1539   : > { %p13805_p8 = pneg %p13804_p7 }
0x153b   : > { %p13810_p12 = pnand %p13809_p11, %p13805_p8 }
0x153d   : > { %13813 = shalt.err (!%p13810_p12)
}
0x153e   : > { %11695 = dma.vmem_to_hbm [thread:$0]  (%p14173_p5), %s10740_s8, 16, %s19796_s17, %s10727_s23  }
0x153f PF: > { %p11701_p13 = scmp.ge.s32.totalorder %s13848_s16, 2  ;;  %s10751_s9 = sand.u32 1, %s13836_s7  }
0x1540   : > { %s10752_s13 = scalar_lea.sflag [#allocation4], %s10751_s9 }
0x1541   : > { %p11698_p0 = pnand %p11701_p13, %p14177_p6 }
0x1543   : > { %p11699_p1 = pneg %p11698_p0 }
0x1545   : > { %13831 = dma.done.wait (%p11699_p1), %s10752_s13, 16  }
0x1546   : > { %13833 = vsyncadd (%p11699_p1), %s10752_s13, 4294967280  ;;  %p95_p2 = scmp.ge.s32.totalorder %s14160_s15, 4   ;;  %s20441_s7 = smov %s13840_s10 }
0x1547   : > { %s20442_s10 = smov %s13844_s11  ;;  %s20443_s11 = smov %s14171_s22 }
0x1548   : > { %s20444_s16 = smov %s14160_s15  ;;  %97 = sbr.rel (!%p95_p2) target bundleno = 95 (0x5f), region = 260 }
0x154d   :  { %10756 = vsyncpa [#allocation4], 1 }
0x154e   :  { %10758 = vsyncpa [#allocation4 + $0x1], 1 }

</bundles_post_ra>
